<compile_context>
chip_gen: v5e
topology: v5e:2x2
jax: 0.10.0
libtpu: 0.0.40
codegen_flags: <defaults>
</compile_context>

<pallas_src>
import functools

import jax
import jax.numpy as jnp
from jax.experimental import pallas as pl
from jax.experimental.pallas import tpu as pltpu


def _leaky_relu(x, slope=0.2):
    return jnp.where(x >= 0, x, slope * x)


def _disc_kernel(x_ref,
                 w1_ref,
                 w2_ref, b2_ref,
                 w3_ref, b3_ref,
                 w4_ref, b4_ref,
                 w5_ref,
                 o_ref):
    # x_ref: (tm, nc) bf16 tile of pixels; weights bf16; accumulate in f32.
    x = x_ref[...]

    # conv1 (1x1, no bias) + LeakyReLU(0.2)
    h = jnp.dot(x, w1_ref[...], preferred_element_type=jnp.float32)
    h = _leaky_relu(h)

    # conv2 (BN scale folded into weight) + BN shift + LeakyReLU
    h = jnp.dot(h.astype(jnp.bfloat16), w2_ref[...],
                preferred_element_type=jnp.float32)
    h = _leaky_relu(h + b2_ref[...])

    # conv3 + BN shift + LeakyReLU
    h = jnp.dot(h.astype(jnp.bfloat16), w3_ref[...],
                preferred_element_type=jnp.float32)
    h = _leaky_relu(h + b3_ref[...])

    # conv4 + BN shift + LeakyReLU
    h = jnp.dot(h.astype(jnp.bfloat16), w4_ref[...],
                preferred_element_type=jnp.float32)
    h = _leaky_relu(h + b4_ref[...])

    # conv5 (-> 1 channel, zero-padded to 128 lanes) + Sigmoid
    h = jnp.dot(h.astype(jnp.bfloat16), w5_ref[...],
                preferred_element_type=jnp.float32)
    o_ref[...] = jax.nn.sigmoid(h).astype(o_ref.dtype)


def discriminator_forward(x_nchw, params, *, tm=256):
    """x_nchw: (N, nc, H, W) float32.  Returns (N, 1, H, W) float32."""
    N, C, H, W = x_nchw.shape
    M = N * H * W
    Mp = ((M + tm - 1) // tm) * tm   # pad pixel count up to a multiple of tm

    # NCHW -> (M, C) pixels-by-channels, pad rows, cast to bf16 for the MXU.
    x2d = jnp.transpose(x_nchw, (0, 2, 3, 1)).reshape(M, C)
    if Mp != M:
        x2d = jnp.pad(x2d, ((0, Mp - M), (0, 0)))
    x2d = x2d.astype(jnp.bfloat16)

    (w1, w2, b2, w3, b3, w4, b4, w5) = params
    c1 = w1.shape[1]   # ndf*8
    c2 = w2.shape[1]   # ndf*4
    c3 = w3.shape[1]   # ndf*2
    c4 = w4.shape[1]   # ndf

    # Zero-pad the final (c4, 1) weight to (c4, 128) so the output block is
    # lane-dense (unmasked stores); column 0 is the real logit.
    w5p = jnp.zeros((c4, 128), jnp.float32).at[:, 0:1].set(w5)

    # Weights in bf16, BN shifts stay f32.
    w1b = w1.astype(jnp.bfloat16)
    w2b = w2.astype(jnp.bfloat16)
    w3b = w3.astype(jnp.bfloat16)
    w4b = w4.astype(jnp.bfloat16)
    w5b = w5p.astype(jnp.bfloat16)

    full = lambda r, c: pl.BlockSpec((r, c), lambda i: (0, 0))

    out2d = pl.pallas_call(
        _disc_kernel,
        out_shape=jax.ShapeDtypeStruct((Mp, 128), jnp.float32),
        grid_spec=pltpu.PrefetchScalarGridSpec(
            num_scalar_prefetch=0,
            grid=(Mp // tm,),
            in_specs=[
                pl.BlockSpec((tm, C), lambda i: (i, 0)),   # x tile
                full(C, c1),                               # w1
                full(c1, c2), full(1, c2),                 # w2 (scale-folded), shift2
                full(c2, c3), full(1, c3),                 # w3, shift3
                full(c3, c4), full(1, c4),                 # w4, shift4
                full(c4, 128),                             # w5 (lane-padded)
            ],
            out_specs=pl.BlockSpec((tm, 128), lambda i: (i, 0)),
        ),
        compiler_params=pltpu.CompilerParams(
            dimension_semantics=("parallel",),
            vmem_limit_bytes=32 * 1024 * 1024),
    )(x2d, w1b, w2b, b2, w3b, b3, w4b, b4, w5b)

    # take real pixels, real output column, reshape back to (N, 1, H, W)
    out = out2d[:M, 0:1]
    return jnp.transpose(out.reshape(N, H, W, 1), (0, 3, 1, 2))


def make_params(key, nc=512, ndf=64):
    """Deterministic synthetic parameters.
    Matmul weights are conv weights transposed: PyTorch Conv2d weight
    (out, in, 1, 1) -> (in, out) here.  BatchNorm scale is folded into the
    preceding conv weight; only the shift is kept as an explicit bias."""
    dims = [nc, ndf * 8, ndf * 4, ndf * 2, ndf, 1]
    keys = jax.random.split(key, 24)
    k = iter(keys)

    def conv_w(cin, cout):
        # small-scale init so sigmoid/leaky stay in a numerically nice range
        return (jax.random.normal(next(k), (cin, cout), jnp.float32)
                * (0.05 / jnp.sqrt(cin)))

    def bn(cout):
        gamma = 1.0 + 0.1 * jax.random.normal(next(k), (1, cout), jnp.float32)
        beta = 0.1 * jax.random.normal(next(k), (1, cout), jnp.float32)
        mean = 0.1 * jax.random.normal(next(k), (1, cout), jnp.float32)
        var = jnp.abs(jax.random.normal(next(k), (1, cout), jnp.float32)) + 0.5
        eps = 1e-5
        scale = gamma / jnp.sqrt(var + eps)
        shift = beta - mean * scale
        return scale, shift

    w1 = conv_w(dims[0], dims[1])
    w2 = conv_w(dims[1], dims[2]); s2, b2 = bn(dims[2])
    w3 = conv_w(dims[2], dims[3]); s3, b3 = bn(dims[3])
    w4 = conv_w(dims[3], dims[4]); s4, b4 = bn(dims[4])
    w5 = conv_w(dims[4], dims[5])

    # fold BN per-output-channel scale into the preceding conv weight
    w2 = w2 * s2
    w3 = w3 * s3
    w4 = w4 * s4
    return (w1, w2, b2, w3, b3, w4, b4, w5)


def reference_forward(x_nchw, params):
    """Pure-JAX f32 reference with identical (scale-folded) math."""
    (w1, w2, b2, w3, b3, w4, b4, w5) = params
    N, C, H, W = x_nchw.shape
    h = jnp.transpose(x_nchw, (0, 2, 3, 1)).reshape(N * H * W, C)
    h = _leaky_relu(h @ w1)
    h = _leaky_relu(h @ w2 + b2)
    h = _leaky_relu(h @ w3 + b3)
    h = _leaky_relu(h @ w4 + b4)
    h = jax.nn.sigmoid(h @ w5)
    return jnp.transpose(h.reshape(N, H, W, 1), (0, 3, 1, 2))


if __name__ == "__main__":
    key = jax.random.PRNGKey(0)
    kx, kp = jax.random.split(key)

    # Module defaults: nc=512, ndf=64.  Spatial 16x16, batch 2 ->
    # M = 2*16*16 = 512 pixels -> 2 parallel tiles of tm=256.
    N, nc, H, W = 2, 512, 16, 16
    x = jax.random.normal(kx, (N, nc, H, W), jnp.float32)
    params = make_params(kp, nc=nc, ndf=64)

    fwd = jax.jit(functools.partial(discriminator_forward, tm=256))
    out = fwd(x, params)
    out = jax.block_until_ready(out)

    ref = reference_forward(x, params)
    assert out.shape == (N, 1, H, W), out.shape
    # bf16 matmuls vs f32 reference -> loosened tolerance
    assert jnp.allclose(out, ref, rtol=2e-2, atol=2e-2), "mismatch vs reference"

    print("KERNEL_OK")
</pallas_src>

<mosaic_0001>
module attributes {stable_mosaic.version = 11 : i64} {
  func.func @_disc_kernel(%arg0: i32, %arg1: memref<256x512xbf16, #tpu.memory_space<vmem>>, %arg2: memref<512x512xbf16, #tpu.memory_space<vmem>>, %arg3: memref<512x256xbf16, #tpu.memory_space<vmem>>, %arg4: memref<1x256xf32, #tpu.memory_space<vmem>>, %arg5: memref<256x128xbf16, #tpu.memory_space<vmem>>, %arg6: memref<1x128xf32, #tpu.memory_space<vmem>>, %arg7: memref<128x64xbf16, #tpu.memory_space<vmem>>, %arg8: memref<1x64xf32, #tpu.memory_space<vmem>>, %arg9: memref<64x128xbf16, #tpu.memory_space<vmem>>, %arg10: memref<256x128xf32, #tpu.memory_space<vmem>>) attributes {dimension_semantics = [#tpu.dimension_semantics<parallel>], iteration_bounds = array<i64: 2>, scalar_prefetch = 0 : i64, scratch_operands = 0 : i64, tpu.core_type = #tpu.core_type<tc>, window_params = [{transform_indices = @transform_0, window_bounds = array<i64: 256, 512>}, {pipeline_mode = #tpu.pipeline_mode<synchronous>, transform_indices = @transform_1, window_bounds = array<i64: 512, 512>}, {pipeline_mode = #tpu.pipeline_mode<synchronous>, transform_indices = @transform_2, window_bounds = array<i64: 512, 256>}, {pipeline_mode = #tpu.pipeline_mode<synchronous>, transform_indices = @transform_3, window_bounds = array<i64: 1, 256>}, {pipeline_mode = #tpu.pipeline_mode<synchronous>, transform_indices = @transform_4, window_bounds = array<i64: 256, 128>}, {pipeline_mode = #tpu.pipeline_mode<synchronous>, transform_indices = @transform_5, window_bounds = array<i64: 1, 128>}, {pipeline_mode = #tpu.pipeline_mode<synchronous>, transform_indices = @transform_6, window_bounds = array<i64: 128, 64>}, {pipeline_mode = #tpu.pipeline_mode<synchronous>, transform_indices = @transform_7, window_bounds = array<i64: 1, 64>}, {pipeline_mode = #tpu.pipeline_mode<synchronous>, transform_indices = @transform_8, window_bounds = array<i64: 64, 128>}, {transform_indices = @transform_9, window_bounds = array<i64: 256, 128>}]} {
    %c0 = arith.constant 0 : index
    %c0_0 = arith.constant 0 : index
    %0 = vector.load %arg1[%c0, %c0_0] : memref<256x512xbf16, #tpu.memory_space<vmem>>, vector<256x512xbf16>
    %c0_1 = arith.constant 0 : index
    %c0_2 = arith.constant 0 : index
    %1 = vector.load %arg2[%c0_1, %c0_2] : memref<512x512xbf16, #tpu.memory_space<vmem>>, vector<512x512xbf16>
    %cst = arith.constant dense<0.000000e+00> : vector<256x512xf32>
    %2 = tpu.matmul %0, %1, %cst {dimension_numbers = #tpu.dot_dimension_numbers<[1], [0], [0], [1], [0, 0, 1, 1], [], []>} : vector<256x512xbf16>, vector<512x512xbf16>, vector<256x512xf32> -> vector<256x512xf32>
    %cst_3 = arith.constant 0.000000e+00 : f32
    %3 = vector.broadcast %cst_3 : f32 to vector<256x512xf32>
    %4 = arith.cmpf oge, %2, %3 : vector<256x512xf32>
    %cst_4 = arith.constant 2.000000e-01 : f32
    %5 = vector.broadcast %cst_4 : f32 to vector<256x512xf32>
    %6 = arith.mulf %5, %2 : vector<256x512xf32>
    %7 = arith.select %4, %2, %6 : vector<256x512xi1>, vector<256x512xf32>
    %8 = arith.truncf %7 : vector<256x512xf32> to vector<256x512xbf16>
    %c0_5 = arith.constant 0 : index
    %c0_6 = arith.constant 0 : index
    %9 = vector.load %arg3[%c0_5, %c0_6] : memref<512x256xbf16, #tpu.memory_space<vmem>>, vector<512x256xbf16>
    %cst_7 = arith.constant dense<0.000000e+00> : vector<256x256xf32>
    %10 = tpu.matmul %8, %9, %cst_7 {dimension_numbers = #tpu.dot_dimension_numbers<[1], [0], [0], [1], [0, 0, 1, 1], [], []>} : vector<256x512xbf16>, vector<512x256xbf16>, vector<256x256xf32> -> vector<256x256xf32>
    %c0_8 = arith.constant 0 : index
    %c0_9 = arith.constant 0 : index
    %11 = vector.load %arg4[%c0_8, %c0_9] : memref<1x256xf32, #tpu.memory_space<vmem>>, vector<1x256xf32>
    %12 = vector.broadcast %11 : vector<1x256xf32> to vector<256x256xf32>
    %13 = arith.addf %10, %12 : vector<256x256xf32>
    %cst_10 = arith.constant 0.000000e+00 : f32
    %14 = vector.broadcast %cst_10 : f32 to vector<256x256xf32>
    %15 = arith.cmpf oge, %13, %14 : vector<256x256xf32>
    %cst_11 = arith.constant 2.000000e-01 : f32
    %16 = vector.broadcast %cst_11 : f32 to vector<256x256xf32>
    %17 = arith.mulf %16, %13 : vector<256x256xf32>
    %18 = arith.select %15, %13, %17 : vector<256x256xi1>, vector<256x256xf32>
    %19 = arith.truncf %18 : vector<256x256xf32> to vector<256x256xbf16>
    %c0_12 = arith.constant 0 : index
    %c0_13 = arith.constant 0 : index
    %20 = vector.load %arg5[%c0_12, %c0_13] : memref<256x128xbf16, #tpu.memory_space<vmem>>, vector<256x128xbf16>
    %cst_14 = arith.constant dense<0.000000e+00> : vector<256x128xf32>
    %21 = tpu.matmul %19, %20, %cst_14 {dimension_numbers = #tpu.dot_dimension_numbers<[1], [0], [0], [1], [0, 0, 1, 1], [], []>} : vector<256x256xbf16>, vector<256x128xbf16>, vector<256x128xf32> -> vector<256x128xf32>
    %c0_15 = arith.constant 0 : index
    %c0_16 = arith.constant 0 : index
    %22 = vector.load %arg6[%c0_15, %c0_16] : memref<1x128xf32, #tpu.memory_space<vmem>>, vector<1x128xf32>
    %23 = vector.broadcast %22 : vector<1x128xf32> to vector<256x128xf32>
    %24 = arith.addf %21, %23 : vector<256x128xf32>
    %cst_17 = arith.constant 0.000000e+00 : f32
    %25 = vector.broadcast %cst_17 : f32 to vector<256x128xf32>
    %26 = arith.cmpf oge, %24, %25 : vector<256x128xf32>
    %cst_18 = arith.constant 2.000000e-01 : f32
    %27 = vector.broadcast %cst_18 : f32 to vector<256x128xf32>
    %28 = arith.mulf %27, %24 : vector<256x128xf32>
    %29 = arith.select %26, %24, %28 : vector<256x128xi1>, vector<256x128xf32>
    %30 = arith.truncf %29 : vector<256x128xf32> to vector<256x128xbf16>
    %c0_19 = arith.constant 0 : index
    %c0_20 = arith.constant 0 : index
    %31 = vector.load %arg7[%c0_19, %c0_20] : memref<128x64xbf16, #tpu.memory_space<vmem>>, vector<128x64xbf16>
    %cst_21 = arith.constant dense<0.000000e+00> : vector<256x64xf32>
    %32 = tpu.matmul %30, %31, %cst_21 {dimension_numbers = #tpu.dot_dimension_numbers<[1], [0], [0], [1], [0, 0, 1, 1], [], []>} : vector<256x128xbf16>, vector<128x64xbf16>, vector<256x64xf32> -> vector<256x64xf32>
    %c0_22 = arith.constant 0 : index
    %c0_23 = arith.constant 0 : index
    %33 = vector.load %arg8[%c0_22, %c0_23] : memref<1x64xf32, #tpu.memory_space<vmem>>, vector<1x64xf32>
    %34 = vector.broadcast %33 : vector<1x64xf32> to vector<256x64xf32>
    %35 = arith.addf %32, %34 : vector<256x64xf32>
    %cst_24 = arith.constant 0.000000e+00 : f32
    %36 = vector.broadcast %cst_24 : f32 to vector<256x64xf32>
    %37 = arith.cmpf oge, %35, %36 : vector<256x64xf32>
    %cst_25 = arith.constant 2.000000e-01 : f32
    %38 = vector.broadcast %cst_25 : f32 to vector<256x64xf32>
    %39 = arith.mulf %38, %35 : vector<256x64xf32>
    %40 = arith.select %37, %35, %39 : vector<256x64xi1>, vector<256x64xf32>
    %41 = arith.truncf %40 : vector<256x64xf32> to vector<256x64xbf16>
    %c0_26 = arith.constant 0 : index
    %c0_27 = arith.constant 0 : index
    %42 = vector.load %arg9[%c0_26, %c0_27] : memref<64x128xbf16, #tpu.memory_space<vmem>>, vector<64x128xbf16>
    %cst_28 = arith.constant dense<0.000000e+00> : vector<256x128xf32>
    %43 = tpu.matmul %41, %42, %cst_28 {dimension_numbers = #tpu.dot_dimension_numbers<[1], [0], [0], [1], [0, 0, 1, 1], [], []>} : vector<256x64xbf16>, vector<64x128xbf16>, vector<256x128xf32> -> vector<256x128xf32>
    %44 = arith.negf %43 : vector<256x128xf32>
    %45 = math.exp %44 : vector<256x128xf32>
    %cst_29 = arith.constant 1.000000e+00 : f32
    %46 = vector.broadcast %cst_29 : f32 to vector<256x128xf32>
    %47 = arith.addf %46, %45 : vector<256x128xf32>
    %48 = arith.divf %46, %47 : vector<256x128xf32>
    %c0_30 = arith.constant 0 : index
    %c0_31 = arith.constant 0 : index
    %49 = vector.load %arg10[%c0_30, %c0_31] : memref<256x128xf32, #tpu.memory_space<vmem>>, vector<256x128xf32>
    tpu.vector_store %arg10[%c0_30, %c0_31], %48 {strides = array<i32>} : memref<256x128xf32, #tpu.memory_space<vmem>>, vector<256x128xf32>,
    return
  }
  func.func @transform_0(%arg0: i32) -> (i32, i32) {
    %c0_i32 = arith.constant 0 : i32
    %c0_i32_0 = arith.constant 0 : i32
    return %arg0, %c0_i32 : i32, i32
  }
  func.func @transform_1(%arg0: i32) -> (i32, i32) {
    %c0_i32 = arith.constant 0 : i32
    %c0_i32_0 = arith.constant 0 : i32
    %c0_i32_1 = arith.constant 0 : i32
    return %c0_i32, %c0_i32_0 : i32, i32
  }
  func.func @transform_2(%arg0: i32) -> (i32, i32) {
    %c0_i32 = arith.constant 0 : i32
    %c0_i32_0 = arith.constant 0 : i32
    %c0_i32_1 = arith.constant 0 : i32
    return %c0_i32, %c0_i32_0 : i32, i32
  }
  func.func @transform_3(%arg0: i32) -> (i32, i32) {
    %c0_i32 = arith.constant 0 : i32
    %c0_i32_0 = arith.constant 0 : i32
    %c0_i32_1 = arith.constant 0 : i32
    return %c0_i32, %c0_i32_0 : i32, i32
  }
  func.func @transform_4(%arg0: i32) -> (i32, i32) {
    %c0_i32 = arith.constant 0 : i32
    %c0_i32_0 = arith.constant 0 : i32
    %c0_i32_1 = arith.constant 0 : i32
    return %c0_i32, %c0_i32_0 : i32, i32
  }
  func.func @transform_5(%arg0: i32) -> (i32, i32) {
    %c0_i32 = arith.constant 0 : i32
    %c0_i32_0 = arith.constant 0 : i32
    %c0_i32_1 = arith.constant 0 : i32
    return %c0_i32, %c0_i32_0 : i32, i32
  }
  func.func @transform_6(%arg0: i32) -> (i32, i32) {
    %c0_i32 = arith.constant 0 : i32
    %c0_i32_0 = arith.constant 0 : i32
    %c0_i32_1 = arith.constant 0 : i32
    return %c0_i32, %c0_i32_0 : i32, i32
  }
  func.func @transform_7(%arg0: i32) -> (i32, i32) {
    %c0_i32 = arith.constant 0 : i32
    %c0_i32_0 = arith.constant 0 : i32
    %c0_i32_1 = arith.constant 0 : i32
    return %c0_i32, %c0_i32_0 : i32, i32
  }
  func.func @transform_8(%arg0: i32) -> (i32, i32) {
    %c0_i32 = arith.constant 0 : i32
    %c0_i32_0 = arith.constant 0 : i32
    %c0_i32_1 = arith.constant 0 : i32
    return %c0_i32, %c0_i32_0 : i32, i32
  }
  func.func @transform_9(%arg0: i32) -> (i32, i32) {
    %c0_i32 = arith.constant 0 : i32
    %c0_i32_0 = arith.constant 0 : i32
    return %arg0, %c0_i32 : i32, i32
  }
}

</mosaic_0001>

<bundles_post_ra>
// kernel: discriminator_forward.1
= control target key start
LH: loop header
LB: loop body
LE: loop exit
PB: predicated region body
PF: predicated region fallthrough
CT: control target
= control target key end

     0   :  { %s7926_s30 = smov 0   ;;  %s10450_s0 = inlined_call_operand.vmem [shape: bf16[512,512], index: 0, kind: input, shape index: {}]   ;;  %s10451_s1 = inlined_call_operand.vmem [shape: bf16[512,512], index: 1, kind: input, shape index: {}]   ;;  %s10452_s2 = inlined_call_operand.vmem [shape: bf16[512,256], index: 2, kind: input, shape index: {}]   ;;  %s10453_s3 = inlined_call_operand.vmem [shape: f32[1,256], index: 3, kind: input, shape index: {}]   ;;  %s10454_s4 = inlined_call_operand.vmem [shape: bf16[256,128], index: 4, kind: input, shape index: {}]   ;;  %s10455_s5 = inlined_call_operand.vmem [shape: f32[1,128], index: 5, kind: input, shape index: {}]   ;;  %s10456_s6 = inlined_call_operand.vmem [shape: bf16[128,64], index: 6, kind: input, shape index: {}]   ;;  %s10457_s7 = inlined_call_operand.vmem [shape: f32[1,64], index: 7, kind: input, shape index: {}]   ;;  %s10458_s8 = inlined_call_operand.vmem [shape: bf16[64,128], index: 8, kind: input, shape index: {}]   ;;  %s10459_s9 = inlined_call_operand.vmem [shape: f32[512,128], index: 9, kind: output, shape index: {}]  }
   0x1 LB: > { %s6247_s10 = sadd.s32 4294967295, %s7874_s30   ;;  %p6251_p0 = scmp.ge.s32.totalorder %s7874_s30, 1  ;;  %s7874_s30 = sphi %s7926_s30, %s19_s30  }
   0x2   : > { %p289_p1 = scmp.lt.s32.totalorder %s7874_s30, 3 }
   0x4   : > { %p290_p2 = pnand %p6251_p0, %p289_p1 }
   0x6   : > { %293 = sbr.rel (%p290_p2) target bundleno = 2282 (0x8ea), region = 56 }
   0xb   : > { %v6627_v0 = vld [vmem:[%s10451_s1 + $0xe0] sm:$0xf]  ;;  %v7538_v1 = vld [vmem:[%s10451_s1 + $0xec] sm:$0xf0]  ;;  %s6252_s28 = sshll.u32 %s6247_s10, 5 }
   0xc   : > { %v6755_v2 = vld [vmem:[%s10451_s1 + $0x1e0] sm:$0xf]  ;;  %v6628_v3 = vor.u32 %v7538_v1, %v6627_v0  ;;  %v7570_v4 = vld [vmem:[%s10451_s1 + $0x1ec] sm:$0xf0]  ;;  %p327_p3 = scmp.lt.s32.totalorder %s6252_s28, 63 }
   0xd   : > { %v6883_v5 = vld [vmem:[%s10451_s1 + $0x2e0] sm:$0xf]  ;;  %v7602_v6 = vld [vmem:[%s10451_s1 + $0x2ec] sm:$0xf0]  ;;  %v6756_v7 = vor.u32 %v7570_v4, %v6755_v2 }
   0xe   : > { %v6884_v8 = vor.u32 %v7602_v6, %v6883_v5  ;;  %v7011_v9 = vld [vmem:[%s10451_s1 + $0x3e0] sm:$0xf]  ;;  %v7634_v10 = vld [vmem:[%s10451_s1 + $0x3ec] sm:$0xf0]  ;;  %1492 = vmatpush.bf16.msra.mxu0 %v6628_v3  ;;  %s10847_s28 = smov (!%p327_p3, %s6252_s28), 63 }
   0xf   : > { %v6611_v11 = vld [vmem:[%s10451_s1 + $0xc0] sm:$0xf]  ;;  %v7012_v12 = vor.u32 %v7634_v10, %v7011_v9  ;;  %v7534_v13 = vld [vmem:[%s10451_s1 + $0xcc] sm:$0xf0]  ;;  %1581 = vmatpush.bf16.msra.mxu1 %v6756_v7  ;;  %s7443_s25 = sshll.u32 %s10847_s28, 4  ;;  %s6256_s18 = sshll.u32 %s10847_s28, 3 }
  0x10   : > { %v6739_v14 = vld [vmem:[%s10451_s1 + $0x1c0] sm:$0xf]  ;;  %v7566_v15 = vld [vmem:[%s10451_s1 + $0x1cc] sm:$0xf0]  ;;  %1670 = vmatpush.bf16.msra.mxu2 %v6884_v8  ;;  %v6612_v16 = vor.u32 %v7534_v13, %v6611_v11  ;;  %s8140_s14 = scalar_lea.vmem %s10450_s0, %s7443_s25  ;;  %s10393_s20 = scalar_lea.vmem %s10459_s9, %s6256_s18 }
  0x11   : > { %v6740_v17 = vor.u32 %v7566_v15, %v6739_v14  ;;  %v6867_v18 = vld [vmem:[%s10451_s1 + $0x2c0] sm:$0xf]  ;;  %v7598_v19 = vld [vmem:[%s10451_s1 + $0x2cc] sm:$0xf0]  ;;  %1759 = vmatpush.bf16.msra.mxu3 %v7012_v12 }
  0x12   : > { %v6995_v20 = vld [vmem:[%s10451_s1 + $0x3c0] sm:$0xf]  ;;  %v6868_v21 = vor.u32 %v7598_v19, %v6867_v18  ;;  %v7630_v22 = vld [vmem:[%s10451_s1 + $0x3cc] sm:$0xf0]  ;;  %1493 = vmatpush.bf16.msra.mxu0 %v6612_v16 }
  0x13   : > { %v6595_v23 = vld [vmem:[%s10451_s1 + $0xa0] sm:$0xf]  ;;  %v7530_v24 = vld [vmem:[%s10451_s1 + $0xac] sm:$0xf0]  ;;  %v6996_v25 = vor.u32 %v7630_v22, %v6995_v20  ;;  %1582 = vmatpush.bf16.msra.mxu1 %v6740_v17 }
  0x14   : > { %v6723_v26 = vld [vmem:[%s10451_s1 + $0x1a0] sm:$0xf]  ;;  %v7562_v27 = vld [vmem:[%s10451_s1 + $0x1ac] sm:$0xf0]  ;;  %v6596_v29 = vor.u32 %v7530_v24, %v6595_v23  ;;  %1671 = vmatpush.bf16.msra.mxu2 %v6868_v21 }
  0x15   : > { %v6851_v28 = vld [vmem:[%s10451_s1 + $0x2a0] sm:$0xf]  ;;  %v7594_v30 = vld [vmem:[%s10451_s1 + $0x2ac] sm:$0xf0]  ;;  %v6724_v33 = vor.u32 %v7562_v27, %v6723_v26  ;;  %1760 = vmatpush.bf16.msra.mxu3 %v6996_v25 }
  0x16   : > { %v6979_v31 = vld [vmem:[%s10451_s1 + $0x3a0] sm:$0xf]  ;;  %v7626_v32 = vld [vmem:[%s10451_s1 + $0x3ac] sm:$0xf0]  ;;  %v6852_v34 = vor.u32 %v7594_v30, %v6851_v28  ;;  %1494 = vmatpush.bf16.msra.mxu0 %v6596_v29  ;;  %v7536_v28 = vld [vmem:[%s10451_s1 + $0xe4] sm:$0xf] }
  0x17   : > { %v6579_v35 = vld [vmem:[%s10451_s1 + $0x80] sm:$0xf]  ;;  %v7526_v36 = vld [vmem:[%s10451_s1 + $0x8c] sm:$0xf0]  ;;  %v6980_v38 = vor.u32 %v7626_v32, %v6979_v31  ;;  %1583 = vmatpush.bf16.msra.mxu1 %v6724_v33  ;;  %v6629_v29 = vld [vmem:[%s10451_s1 + $0xf0] sm:$0xf0] }
  0x18   : > { %v6707_v37 = vld [vmem:[%s10451_s1 + $0x180] sm:$0xf]  ;;  %v7558_v39 = vld [vmem:[%s10451_s1 + $0x18c] sm:$0xf0]  ;;  %v6580_v44 = vor.u32 %v7526_v36, %v6579_v35  ;;  %1672 = vmatpush.bf16.msra.mxu2 %v6852_v34  ;;  %v7568_v31 = vld [vmem:[%s10451_s1 + $0x1e4] sm:$0xf] }
  0x19   : > { %v6835_v40 = vld [vmem:[%s10451_s1 + $0x280] sm:$0xf]  ;;  %v7590_v41 = vld [vmem:[%s10451_s1 + $0x28c] sm:$0xf0]  ;;  %v6708_v45 = vor.u32 %v7558_v39, %v6707_v37  ;;  %1761 = vmatpush.bf16.msra.mxu3 %v6980_v38  ;;  %v6757_v32 = vld [vmem:[%s10451_s1 + $0x1f0] sm:$0xf0] }
  0x1a   : > { %v6963_v42 = vld [vmem:[%s10451_s1 + $0x380] sm:$0xf]  ;;  %v7622_v43 = vld [vmem:[%s10451_s1 + $0x38c] sm:$0xf0]  ;;  %v6836_v46 = vor.u32 %v7590_v41, %v6835_v40  ;;  %1495 = vmatpush.bf16.msra.mxu0 %v6580_v44  ;;  %v7444_v37 = vld [vmem:[%s8140_s14 + $0x4] sm:$0xf] }
  0x1b   : > { %v6563_v47 = vld [vmem:[%s10451_s1 + $0x60] sm:$0xf]  ;;  %v7522_v48 = vld [vmem:[%s10451_s1 + $0x6c] sm:$0xf0]  ;;  %v6964_v50 = vor.u32 %v7622_v43, %v6963_v42  ;;  %1584 = vmatpush.bf16.msra.mxu1 %v6708_v45  ;;  %v6261_v39 = vld [vmem:[%s8140_s14 + $0x10] sm:$0xf0]  ;;  %v6632_v42 = vor.u32 %v7536_v28, %v6629_v29 }
  0x1c   : > { %v6691_v49 = vld [vmem:[%s10451_s1 + $0x160] sm:$0xf]  ;;  %v7554_v51 = vld [vmem:[%s10451_s1 + $0x16c] sm:$0xf0]  ;;  %v6564_v56 = vor.u32 %v7522_v48, %v6563_v47  ;;  %1673 = vmatpush.bf16.msra.mxu2 %v6836_v46  ;;  %v6267_v40 = vld [vmem:[%s8140_s14 + $0x8] sm:$0xf]  ;;  %v6760_v46 = vor.u32 %v7568_v31, %v6757_v32  ;;  %v8158_v47 = vor.u32 %v7444_v37, %v6261_v39 }
  0x1d   : > { %v6819_v52 = vld [vmem:[%s10451_s1 + $0x260] sm:$0xf]  ;;  %v7586_v53 = vld [vmem:[%s10451_s1 + $0x26c] sm:$0xf0]  ;;  %v6692_v57 = vor.u32 %v7554_v51, %v6691_v49  ;;  %1762 = vmatpush.bf16.msra.mxu3 %v6964_v50  ;;  %v7447_v41 = vld [vmem:[%s8140_s14 + $0x14] sm:$0xf0] }
  0x1e   : > { %v6947_v54 = vld [vmem:[%s10451_s1 + $0x360] sm:$0xf]  ;;  %v7618_v55 = vld [vmem:[%s10451_s1 + $0x36c] sm:$0xf0]  ;;  %v6820_v58 = vor.u32 %v7586_v53, %v6819_v52  ;;  %1496 = vmatpush.bf16.msra.mxu0 %v6564_v56  ;;  %v7445_v44 = vld [vmem:[%s8140_s14 + $0xc] sm:$0xf]  ;;  %v8160_v48 = vor.u32 %v7447_v41, %v6267_v40 }
  0x1f   : > { %v6547_v59 = vld [vmem:[%s10451_s1 + $0x40] sm:$0xf]  ;;  %v7518_v60 = vld [vmem:[%s10451_s1 + $0x4c] sm:$0xf0]  ;;  %v6948_v62 = vor.u32 %v7618_v55, %v6947_v54  ;;  %1585 = vmatpush.bf16.msra.mxu1 %v6692_v57  ;;  %v6269_v45 = vld [vmem:[%s8140_s14 + $0x18] sm:$0xf0] }
  0x20   : > { %v6675_v61 = vld [vmem:[%s10451_s1 + $0x140] sm:$0xf]  ;;  %v7550_v63 = vld [vmem:[%s10451_s1 + $0x14c] sm:$0xf0]  ;;  %v6548_v4 = vor.u32 %v7518_v60, %v6547_v59  ;;  %1674 = vmatpush.bf16.msra.mxu2 %v6820_v58  ;;  %10589 = vst [vmem:[#allocation3_spill] sm:$0xff] %v8158_v47  ;;  %v8162_v49 = vor.u32 %v7445_v44, %v6269_v45 }
  0x21   : > { %v6803_v0 = vld [vmem:[%s10451_s1 + $0x240] sm:$0xf]  ;;  %v7582_v1 = vld [vmem:[%s10451_s1 + $0x24c] sm:$0xf0]  ;;  %v6676_v8 = vor.u32 %v7550_v63, %v6675_v61  ;;  %1763 = vmatpush.bf16.msra.mxu3 %v6948_v62  ;;  %10590 = vst [vmem:[#allocation4_spill] sm:$0xff] %v8160_v48 }
  0x22   : > { %v6931_v2 = vld [vmem:[%s10451_s1 + $0x340] sm:$0xf]  ;;  %v7614_v3 = vld [vmem:[%s10451_s1 + $0x34c] sm:$0xf0]  ;;  %v6804_v9 = vor.u32 %v7582_v1, %v6803_v0  ;;  %1497 = vmatpush.bf16.msra.mxu0 %v6548_v4  ;;  %10591 = vst [vmem:[#allocation5_spill] sm:$0xff] %v8162_v49 }
  0x23   : > { %v6531_v5 = vld [vmem:[%s10451_s1 + $0x20] sm:$0xf]  ;;  %v7514_v6 = vld [vmem:[%s10451_s1 + $0x2c] sm:$0xf0]  ;;  %v6932_v13 = vor.u32 %v7614_v3, %v6931_v2  ;;  %1586 = vmatpush.bf16.msra.mxu1 %v6676_v8  ;;  %v7532_v50 = vld [vmem:[%s10451_s1 + $0xc4] sm:$0xf] }
  0x24   : > { %v6659_v7 = vld [vmem:[%s10451_s1 + $0x120] sm:$0xf]  ;;  %v7546_v10 = vld [vmem:[%s10451_s1 + $0x12c] sm:$0xf0]  ;;  %v6532_v18 = vor.u32 %v7514_v6, %v6531_v5  ;;  %1675 = vmatpush.bf16.msra.mxu2 %v6804_v9  ;;  %v6613_v51 = vld [vmem:[%s10451_s1 + $0xd0] sm:$0xf0] }
  0x25   : > { %v6787_v11 = vld [vmem:[%s10451_s1 + $0x220] sm:$0xf]  ;;  %v7578_v12 = vld [vmem:[%s10451_s1 + $0x22c] sm:$0xf0]  ;;  %v6660_v20 = vor.u32 %v7546_v10, %v6659_v7  ;;  %1764 = vmatpush.bf16.msra.mxu3 %v6932_v13  ;;  %v7564_v52 = vld [vmem:[%s10451_s1 + $0x1c4] sm:$0xf]  ;;  %v6616_v53 = vor.u32 %v7532_v50, %v6613_v51 }
  0x26   : > { %v6915_v14 = vld [vmem:[%s10451_s1 + $0x320] sm:$0xf]  ;;  %v7610_v15 = vld [vmem:[%s10451_s1 + $0x32c] sm:$0xf0]  ;;  %v6788_v21 = vor.u32 %v7578_v12, %v6787_v11  ;;  %1498 = vmatpush.bf16.msra.mxu0 %v6532_v18  ;;  %v6741_v54 = vld [vmem:[%s10451_s1 + $0x1d0] sm:$0xf0] }
  0x27   : > { %v6515_v16 = vld [vmem:[%s10451_s1] sm:$0xf]  ;;  %v7510_v17 = vld [vmem:[%s10451_s1 + $0xc] sm:$0xf0]  ;;  %v6916_v24 = vor.u32 %v7610_v15, %v6915_v14  ;;  %1587 = vmatpush.bf16.msra.mxu1 %v6660_v20  ;;  %v6744_v55 = vor.u32 %v7564_v52, %v6741_v54  ;;  %v7448_v58 = vld [vmem:[%s8140_s14 + $0x24] sm:$0xf] }
  0x28   : > { %v6643_v19 = vld [vmem:[%s10451_s1 + $0x100] sm:$0xf]  ;;  %v7542_v22 = vld [vmem:[%s10451_s1 + $0x10c] sm:$0xf0]  ;;  %v6516_v30 = vor.u32 %v7510_v17, %v6515_v16  ;;  %1676 = vmatpush.bf16.msra.mxu2 %v6788_v21  ;;  %v6277_v59 = vld [vmem:[%s8140_s14 + $0x30] sm:$0xf0] }
  0x29   : > { %v6771_v23 = vld [vmem:[%s10451_s1 + $0x200] sm:$0xf]  ;;  %v7574_v25 = vld [vmem:[%s10451_s1 + $0x20c] sm:$0xf0]  ;;  %v6644_v33 = vor.u32 %v7542_v22, %v6643_v19  ;;  %1765 = vmatpush.bf16.msra.mxu3 %v6916_v24  ;;  %v6283_v60 = vld [vmem:[%s8140_s14 + $0x28] sm:$0xf]  ;;  %v8190_v1 = vor.u32 %v7448_v58, %v6277_v59 }
  0x2a   : > { %v6899_v26 = vld [vmem:[%s10451_s1 + $0x300] sm:$0xf]  ;;  %v7606_v27 = vld [vmem:[%s10451_s1 + $0x30c] sm:$0xf0]  ;;  %v6772_v34 = vor.u32 %v7574_v25, %v6771_v23  ;;  %1499 = vmatpush.bf16.msra.mxu0 %v6516_v30  ;;  %v7451_v61 = vld [vmem:[%s8140_s14 + $0x34] sm:$0xf0] }
  0x2b   : > { %v6259_v35 = vld [vmem:[%s8140_s14] sm:$0xf]  ;;  %v7446_v36 = vld [vmem:[%s8140_s14 + $0xc] sm:$0xf0]  ;;  %v6900_v38 = vor.u32 %v7606_v27, %v6899_v26  ;;  %1588 = vmatpush.bf16.msra.mxu1 %v6644_v33  ;;  %v7449_v62 = vld [vmem:[%s8140_s14 + $0x2c] sm:$0xf]  ;;  %v8192_v2 = vor.u32 %v7451_v61, %v6283_v60 }
  0x2c   : > { %v8154_v43 = vor.u32 %v7446_v36, %v6259_v35  ;;  %1677 = vmatpush.bf16.msra.mxu2 %v6772_v34  ;;  %v6275_v56 = vld [vmem:[%s8140_s14 + $0x20] sm:$0xf]  ;;  %v7450_v57 = vld [vmem:[%s8140_s14 + $0x2c] sm:$0xf0]  ;;  %v6285_v63 = vld [vmem:[%s8140_s14 + $0x38] sm:$0xf0] }
  0x2d   : > { %1766 = vmatpush.bf16.msra.mxu3 %v6900_v38  ;;  %v8188_v0 = vor.u32 %v7450_v57, %v6275_v56  ;;  %v8194_v3 = vor.u32 %v7449_v62, %v6285_v63  ;;  %v6291_v4 = vld [vmem:[%s8140_s14 + $0x40] sm:$0xf]  ;;  %v7454_v5 = vld [vmem:[%s8140_s14 + $0x4c] sm:$0xf0]  ;;  %v7452_v6 = vld [vmem:[%s8140_s14 + $0x44] sm:$0xf] }
  0x2e   : > { %10588 = vst [vmem:[#allocation2_spill] sm:$0xff] %v8154_v43  ;;  %1848 = vmatpush.bf16.msrb.mxu0 %v6632_v42  ;;  %1589 = vmatmul.bf16.vlgmr.msra.gmra.mxu1 %v8158_v47  ;;  %v6293_v7 = vld [vmem:[%s8140_s14 + $0x50] sm:$0xf0]  ;;  %v6299_v8 = vld [vmem:[%s8140_s14 + $0x48] sm:$0xf]  ;;  %v8208_v12 = vor.u32 %v7454_v5, %v6291_v4 }
  0x2f   : > { %1500 = vmatmul.bf16.vlgmr.msra.gmra.mxu0 %v8154_v43  ;;  %1937 = vmatpush.bf16.msrb.mxu1 %v6760_v46  ;;  %v7455_v9 = vld [vmem:[%s8140_s14 + $0x54] sm:$0xf0]  ;;  %v7453_v10 = vld [vmem:[%s8140_s14 + $0x4c] sm:$0xf]  ;;  %v6301_v11 = vld [vmem:[%s8140_s14 + $0x58] sm:$0xf0]  ;;  %v8210_v13 = vor.u32 %v7452_v6, %v6293_v7 }
  0x30   : > { %1678 = vmatmul.bf16.vlgmr.msra.gmra.mxu2 %v8160_v48  ;;  %1767 = vmatmul.bf16.vlgmr.msra.gmra.mxu3 %v8162_v49  ;;  %v8212_v14 = vor.u32 %v7455_v9, %v6299_v8  ;;  %v8214_v15 = vor.u32 %v7453_v10, %v6301_v11  ;;  %v7528_v16 = vld [vmem:[%s10451_s1 + $0xa4] sm:$0xf]  ;;  %v6597_v17 = vld [vmem:[%s10451_s1 + $0xb0] sm:$0xf0]  ;;  %v6307_v22 = vld [vmem:[%s8140_s14 + $0x60] sm:$0xf] }
  0x31   : > { %v7560_v18 = vld [vmem:[%s10451_s1 + $0x1a4] sm:$0xf]  ;;  %v6600_v19 = vor.u32 %v7528_v16, %v6597_v17  ;;  %v6725_v20 = vld [vmem:[%s10451_s1 + $0x1b0] sm:$0xf0]  ;;  %v7458_v23 = vld [vmem:[%s8140_s14 + $0x6c] sm:$0xf0] }
  0x32   : > { %1849 = vmatpush.bf16.msrb.mxu0 %v6616_v53  ;;  %v6728_v21 = vor.u32 %v7560_v18, %v6725_v20  ;;  %v7456_v24 = vld [vmem:[%s8140_s14 + $0x64] sm:$0xf]  ;;  %v6309_v25 = vld [vmem:[%s8140_s14 + $0x70] sm:$0xf0]  ;;  %v6315_v26 = vld [vmem:[%s8140_s14 + $0x68] sm:$0xf]  ;;  %v8240_v30 = vor.u32 %v7458_v23, %v6307_v22 }
  0x33   : > { %1938 = vmatpush.bf16.msrb.mxu1 %v6744_v55  ;;  %v7459_v27 = vld [vmem:[%s8140_s14 + $0x74] sm:$0xf0]  ;;  %v7457_v28 = vld [vmem:[%s8140_s14 + $0x6c] sm:$0xf]  ;;  %v6317_v29 = vld [vmem:[%s8140_s14 + $0x78] sm:$0xf0]  ;;  %v8242_v31 = vor.u32 %v7456_v24, %v6309_v25 }
  0x34   : > { %v8244_v32 = vor.u32 %v7459_v27, %v6315_v26  ;;  %v8246_v33 = vor.u32 %v7457_v28, %v6317_v29  ;;  %v6323_v34 = vld [vmem:[%s8140_s14 + $0x80] sm:$0xf]  ;;  %v7462_v35 = vld [vmem:[%s8140_s14 + $0x8c] sm:$0xf0]  ;;  %v7460_v36 = vld [vmem:[%s8140_s14 + $0x84] sm:$0xf] }
  0x35   : > { %v6325_v37 = vld [vmem:[%s8140_s14 + $0x90] sm:$0xf0]  ;;  %v6331_v38 = vld [vmem:[%s8140_s14 + $0x88] sm:$0xf]  ;;  %v7463_v39 = vld [vmem:[%s8140_s14 + $0x94] sm:$0xf0]  ;;  %v8260_v42 = vor.u32 %v7462_v35, %v6323_v34 }
  0x36   : > { %1850 = vmatpush.bf16.msrb.mxu0 %v6600_v19  ;;  %v7461_v40 = vld [vmem:[%s8140_s14 + $0x8c] sm:$0xf]  ;;  %v6333_v41 = vld [vmem:[%s8140_s14 + $0x98] sm:$0xf0]  ;;  %v8262_v44 = vor.u32 %v7460_v36, %v6325_v37  ;;  %v8264_v45 = vor.u32 %v7463_v39, %v6331_v38  ;;  %v7524_v50 = vld [vmem:[%s10451_s1 + $0x84] sm:$0xf] }
  0x37   : > { %1939 = vmatpush.bf16.msrb.mxu1 %v6728_v21  ;;  %v8266_v46 = vor.u32 %v7461_v40, %v6333_v41  ;;  %v6581_v51 = vld [vmem:[%s10451_s1 + $0x90] sm:$0xf0]  ;;  %v7556_v52 = vld [vmem:[%s10451_s1 + $0x184] sm:$0xf]  ;;  %v6339_v62 = vld [vmem:[%s8140_s14 + $0xa0] sm:$0xf] }
  0x38   : > { %v6584_v53 = vor.u32 %v7524_v50, %v6581_v51  ;;  %v6709_v54 = vld [vmem:[%s10451_s1 + $0x190] sm:$0xf0]  ;;  %v7600_v55 = vld [vmem:[%s10451_s1 + $0x2e4] sm:$0xf]  ;;  %v7466_v63 = vld [vmem:[%s8140_s14 + $0xac] sm:$0xf0] }
  0x39   : > { %v6885_v56 = vld [vmem:[%s10451_s1 + $0x2f0] sm:$0xf0]  ;;  %v6712_v57 = vor.u32 %v7556_v52, %v6709_v54  ;;  %v7632_v59 = vld [vmem:[%s10451_s1 + $0x3e4] sm:$0xf]  ;;  %v6347_v6 = vld [vmem:[%s8140_s14 + $0xa8] sm:$0xf]  ;;  %v8304_v10 = vor.u32 %v7466_v63, %v6339_v62 }
  0x3a   : > { %v6888_v58 = vor.u32 %v7600_v55, %v6885_v56  ;;  %v7013_v60 = vld [vmem:[%s10451_s1 + $0x3f0] sm:$0xf0]  ;;  %1851 = vmatpush.bf16.msrb.mxu0 %v6584_v53  ;;  %v7464_v4 = vld [vmem:[%s8140_s14 + $0xa4] sm:$0xf]  ;;  %v7467_v7 = vld [vmem:[%s8140_s14 + $0xb4] sm:$0xf0] }
  0x3b   : > { %v7016_v61 = vor.u32 %v7632_v59, %v7013_v60  ;;  %1940 = vmatpush.bf16.msrb.mxu1 %v6712_v57  ;;  %v6341_v5 = vld [vmem:[%s8140_s14 + $0xb0] sm:$0xf0]  ;;  %v7465_v8 = vld [vmem:[%s8140_s14 + $0xac] sm:$0xf]  ;;  %v6349_v9 = vld [vmem:[%s8140_s14 + $0xb8] sm:$0xf0]  ;;  %v8308_v16 = vor.u32 %v7467_v7, %v6347_v6 }
  0x3c   : > { %2026 = vmatpush.bf16.msrb.mxu2 %v6888_v58  ;;  %v8306_v11 = vor.u32 %v7464_v4, %v6341_v5  ;;  %v8310_v17 = vor.u32 %v7465_v8, %v6349_v9  ;;  %v6355_v18 = vld [vmem:[%s8140_s14 + $0xc0] sm:$0xf]  ;;  %v7470_v19 = vld [vmem:[%s8140_s14 + $0xcc] sm:$0xf0]  ;;  %v7468_v20 = vld [vmem:[%s8140_s14 + $0xc4] sm:$0xf] }
  0x3d   : > { %2115 = vmatpush.bf16.msrb.mxu3 %v7016_v61  ;;  %10592 = vst [vmem:[#allocation6_spill] sm:$0xff] %v8308_v16  ;;  %v6357_v21 = vld [vmem:[%s8140_s14 + $0xd0] sm:$0xf0]  ;;  %v6363_v22 = vld [vmem:[%s8140_s14 + $0xc8] sm:$0xf]  ;;  %v8324_v26 = vor.u32 %v7470_v19, %v6355_v18 }
  0x3e   : > { %1594 = vmatmul.bf16.gmra.mxu1 %v8190_v1  ;;  %10593 = vst [vmem:[#allocation7_spill] sm:$0xff] %v8310_v17  ;;  %v7471_v23 = vld [vmem:[%s8140_s14 + $0xd4] sm:$0xf0]  ;;  %v7469_v24 = vld [vmem:[%s8140_s14 + $0xcc] sm:$0xf]  ;;  %v8326_v27 = vor.u32 %v7468_v20, %v6357_v21 }
  0x3f   : > { %1505 = vmatmul.bf16.gmra.mxu0 %v8188_v0  ;;  %v6365_v25 = vld [vmem:[%s8140_s14 + $0xd8] sm:$0xf0]  ;;  %v8328_v28 = vor.u32 %v7471_v23, %v6363_v22  ;;  %v7520_v34 = vld [vmem:[%s10451_s1 + $0x64] sm:$0xf]  ;;  %v6565_v35 = vld [vmem:[%s10451_s1 + $0x70] sm:$0xf0] }
  0x40   : > { %1683 = vmatmul.bf16.gmra.mxu2 %v8192_v2  ;;  %1772 = vmatmul.bf16.gmra.mxu3 %v8194_v3  ;;  %v8330_v29 = vor.u32 %v7469_v24, %v6365_v25  ;;  %v7552_v36 = vld [vmem:[%s10451_s1 + $0x164] sm:$0xf]  ;;  %v6568_v37 = vor.u32 %v7520_v34, %v6565_v35  ;;  %v6693_v38 = vld [vmem:[%s10451_s1 + $0x170] sm:$0xf0]  ;;  %v6371_v40 = vld [vmem:[%s8140_s14 + $0xe0] sm:$0xf] }
  0x41   : > { %v6696_v39 = vor.u32 %v7552_v36, %v6693_v38  ;;  %v7474_v41 = vld [vmem:[%s8140_s14 + $0xec] sm:$0xf0]  ;;  %v7472_v50 = vld [vmem:[%s8140_s14 + $0xe4] sm:$0xf]  ;;  %v6373_v51 = vld [vmem:[%s8140_s14 + $0xf0] sm:$0xf0] }
  0x42   : > { %1852 = vmatpush.bf16.msrb.mxu0 %v6568_v37  ;;  %v6379_v52 = vld [vmem:[%s8140_s14 + $0xe8] sm:$0xf]  ;;  %v7475_v53 = vld [vmem:[%s8140_s14 + $0xf4] sm:$0xf0]  ;;  %v7473_v54 = vld [vmem:[%s8140_s14 + $0xec] sm:$0xf]  ;;  %v8356_v56 = vor.u32 %v7474_v41, %v6371_v40  ;;  %v8358_v57 = vor.u32 %v7472_v50, %v6373_v51 }
  0x43   : > { %1941 = vmatpush.bf16.msrb.mxu1 %v6696_v39  ;;  %v6381_v55 = vld [vmem:[%s8140_s14 + $0xf8] sm:$0xf0]  ;;  %v8360_v58 = vor.u32 %v7475_v53, %v6379_v52  ;;  %v7596_v60 = vld [vmem:[%s10451_s1 + $0x2c4] sm:$0xf]  ;;  %v6869_v61 = vld [vmem:[%s10451_s1 + $0x2d0] sm:$0xf0] }
  0x44   : > { %v8362_v59 = vor.u32 %v7473_v54, %v6381_v55  ;;  %v7628_v62 = vld [vmem:[%s10451_s1 + $0x3c4] sm:$0xf]  ;;  %v6872_v63 = vor.u32 %v7596_v60, %v6869_v61  ;;  %v6997_v4 = vld [vmem:[%s10451_s1 + $0x3d0] sm:$0xf0]  ;;  %v6387_v6 = vld [vmem:[%s8140_s14 + $0x100] sm:$0xf] }
  0x45   : > { %v7000_v5 = vor.u32 %v7628_v62, %v6997_v4  ;;  %v7478_v7 = vld [vmem:[%s8140_s14 + $0x10c] sm:$0xf0]  ;;  %v7476_v8 = vld [vmem:[%s8140_s14 + $0x104] sm:$0xf]  ;;  %v6389_v9 = vld [vmem:[%s8140_s14 + $0x110] sm:$0xf0] }
  0x46   : > { %2027 = vmatpush.bf16.msrb.mxu2 %v6872_v63  ;;  %v6395_v18 = vld [vmem:[%s8140_s14 + $0x108] sm:$0xf]  ;;  %v7479_v19 = vld [vmem:[%s8140_s14 + $0x114] sm:$0xf0]  ;;  %v7477_v20 = vld [vmem:[%s8140_s14 + $0x10c] sm:$0xf]  ;;  %v8388_v22 = vor.u32 %v7478_v7, %v6387_v6  ;;  %v8390_v24 = vor.u32 %v7476_v8, %v6389_v9 }
  0x47   : > { %2116 = vmatpush.bf16.msrb.mxu3 %v7000_v5  ;;  %v6397_v21 = vld [vmem:[%s8140_s14 + $0x118] sm:$0xf0]  ;;  %v8392_v25 = vor.u32 %v7479_v19, %v6395_v18  ;;  %v7516_v37 = vld [vmem:[%s10451_s1 + $0x44] sm:$0xf]  ;;  %v6549_v38 = vld [vmem:[%s10451_s1 + $0x50] sm:$0xf0] }
  0x48   : > { %v8394_v35 = vor.u32 %v7477_v20, %v6397_v21  ;;  %v7548_v39 = vld [vmem:[%s10451_s1 + $0x144] sm:$0xf]  ;;  %v6552_v40 = vor.u32 %v7516_v37, %v6549_v38  ;;  %v6677_v41 = vld [vmem:[%s10451_s1 + $0x150] sm:$0xf0]  ;;  %v6403_v62 = vld [vmem:[%s8140_s14 + $0x120] sm:$0xf] }
  0x49   : > { %v6680_v51 = vor.u32 %v7548_v39, %v6677_v41  ;;  %v7482_v63 = vld [vmem:[%s8140_s14 + $0x12c] sm:$0xf0]  ;;  %v7480_v4 = vld [vmem:[%s8140_s14 + $0x124] sm:$0xf]  ;;  %v6405_v5 = vld [vmem:[%s8140_s14 + $0x130] sm:$0xf0] }
  0x4a   : > { %1853 = vmatpush.bf16.msrb.mxu0 %v6552_v40  ;;  %v6411_v6 = vld [vmem:[%s8140_s14 + $0x128] sm:$0xf]  ;;  %v7483_v7 = vld [vmem:[%s8140_s14 + $0x134] sm:$0xf0]  ;;  %v7481_v8 = vld [vmem:[%s8140_s14 + $0x12c] sm:$0xf]  ;;  %v8420_v19 = vor.u32 %v7482_v63, %v6403_v62 }
  0x4b   : > { %1942 = vmatpush.bf16.msrb.mxu1 %v6680_v51  ;;  %v6413_v9 = vld [vmem:[%s8140_s14 + $0x138] sm:$0xf0]  ;;  %v7592_v51 = vld [vmem:[%s10451_s1 + $0x2a4] sm:$0xf] }
  0x4c   : > { %v8426_v38 = vor.u32 %v7481_v8, %v6413_v9 }
  0x4e   : > { %1599 = vmatmul.bf16.gmra.mxu1 %v8210_v13  ;;  %10595 = vst [vmem:[#allocation9_spill] sm:$0xff] %v8426_v38 }
  0x4f   : > { %1510 = vmatmul.bf16.gmra.mxu0 %v8208_v12 }
  0x50   : > { %1688 = vmatmul.bf16.gmra.mxu2 %v8212_v14  ;;  %1777 = vmatmul.bf16.gmra.mxu3 %v8214_v15 }
  0x5e   : > { %1604 = vmatmul.bf16.gmra.mxu1 %v8242_v31 }
  0x5f   : > { %1515 = vmatmul.bf16.gmra.mxu0 %v8240_v30 }
  0x60   : > { %1693 = vmatmul.bf16.gmra.mxu2 %v8244_v32  ;;  %1782 = vmatmul.bf16.gmra.mxu3 %v8246_v33 }
  0x6e   : > { %1609 = vmatmul.bf16.gmra.mxu1 %v8262_v44 }
  0x6f   : > { %1520 = vmatmul.bf16.gmra.mxu0 %v8260_v42 }
  0x70   : > { %1698 = vmatmul.bf16.gmra.mxu2 %v8264_v45  ;;  %1787 = vmatmul.bf16.gmra.mxu3 %v8266_v46 }
  0x7e   : > { %1614 = vmatmul.bf16.gmra.mxu1 %v8306_v11 }
  0x7f   : > { %1525 = vmatmul.bf16.gmra.mxu0 %v8304_v10 }
  0x80   : > { %1703 = vmatmul.bf16.gmra.mxu2 %v8308_v16  ;;  %1792 = vmatmul.bf16.gmra.mxu3 %v8310_v17 }
  0x8e   : > { %1619 = vmatmul.bf16.gmra.mxu1 %v8326_v27 }
  0x8f   : > { %1530 = vmatmul.bf16.gmra.mxu0 %v8324_v26 }
  0x90   : > { %1708 = vmatmul.bf16.gmra.mxu2 %v8328_v28  ;;  %1797 = vmatmul.bf16.gmra.mxu3 %v8330_v29 }
  0x9e   : > { %1624 = vmatmul.bf16.gmra.mxu1 %v8358_v57 }
  0x9f   : > { %1535 = vmatmul.bf16.gmra.mxu0 %v8356_v56 }
  0xa0   : > { %1713 = vmatmul.bf16.gmra.mxu2 %v8360_v58  ;;  %1802 = vmatmul.bf16.gmra.mxu3 %v8362_v59 }
  0xab   : > { %v1590_v34 = vpop.f32.mrf.mxu1 }
  0xac   : > { %v1501_v23 = vpop.f32.mrf.mxu0 }
  0xad   : > { %v1591_v36 = vadd.f32 %v1590_v34, %v1501_v23  ;;  %v8422_v34 = vor.u32 %v7480_v4, %v6405_v5 }
  0xae   : > { %1629 = vmatmul.bf16.gmra.mxu1 %v8390_v24 }
  0xaf   : > { %1540 = vmatmul.bf16.gmra.mxu0 %v8388_v22 }
  0xb0   : > { %1718 = vmatmul.bf16.gmra.mxu2 %v8392_v25  ;;  %1807 = vmatmul.bf16.gmra.mxu3 %v8394_v35 }
  0xb3   : > { %v1679_v50 = vpop.f32.mrf.mxu2  ;;  %v1768_v53 = vpop.f32.mrf.mxu3 }
  0xb4   : > { %v1680_v52 = vadd.f32 %v1679_v50, %v1591_v36  ;;  %v1503_v54 = vpop.f32.mrf.mxu0  ;;  %v1592_v55 = vpop.f32.mrf.mxu1  ;;  %v8424_v36 = vor.u32 %v7483_v7, %v6411_v6 }
  0xb5   : > { %v1593_v61 = vadd.f32 %v1592_v55, %v1503_v54  ;;  %v6981_v54 = vld [vmem:[%s10451_s1 + $0x3b0] sm:$0xf0] }
  0xb6   : > { %v1769_v60 = vadd.f32 %v1768_v53, %v1680_v52  ;;  %10594 = vst [vmem:[#allocation8_spill] sm:$0xff] %v8424_v36  ;;  %v6853_v52 = vld [vmem:[%s10451_s1 + $0x2b0] sm:$0xf0]  ;;  %v7624_v53 = vld [vmem:[%s10451_s1 + $0x3a4] sm:$0xf] }
  0xb7   : > { %v6856_v62 = vor.u32 %v7592_v51, %v6853_v52  ;;  %v6984_v63 = vor.u32 %v7624_v53, %v6981_v54  ;;  %v6429_v51 = vld [vmem:[%s8140_s14 + $0x158] sm:$0xf0] }
  0xb8   : > { %v3044_v39 = vmul.f32 0.2, %v1769_v60  ;;  %vm2916_vm0 = vcmp.ge.f32.partialorder %v1769_v60, 0.0 }
  0xb9   : > { %2028 = vmatpush.bf16.msrb.mxu2 %v6856_v62  ;;  %2117 = vmatpush.bf16.msrb.mxu3 %v6984_v63 }
  0xba   : > { %v3172_v55 = vsel %vm2916_vm0, %v1769_v60, %v3044_v39  ;;  %v6427_v39 = vld [vmem:[%s8140_s14 + $0x148] sm:$0xf] }
  0xbb   : > { %v1681_v18 = vpop.f32.mrf.mxu2  ;;  %v1770_v21 = vpop.f32.mrf.mxu3 }
  0xbc   : > { %v1682_v20 = vadd.f32 %v1681_v18, %v1593_v61  ;;  %v1506_v23 = vpop.f32.mrf.mxu0  ;;  %v1595_v37 = vpop.f32.mrf.mxu1 }
  0xbd   : > { %v1596_v41 = vadd.f32 %v1595_v37, %v1506_v23  ;;  %v7484_v23 = vld [vmem:[%s8140_s14 + $0x144] sm:$0xf]  ;;  %v6421_v37 = vld [vmem:[%s8140_s14 + $0x150] sm:$0xf0] }
  0xbe   : > { %v1771_v40 = vadd.f32 %v1770_v21, %v1682_v20  ;;  %1634 = vmatmul.bf16.gmra.mxu1 %v8422_v34  ;;  %v6419_v20 = vld [vmem:[%s8140_s14 + $0x140] sm:$0xf]  ;;  %v7486_v21 = vld [vmem:[%s8140_s14 + $0x14c] sm:$0xf0] }
  0xbf   : > { %1545 = vmatmul.bf16.gmra.mxu0 %v8420_v19  ;;  %v8454_v53 = vor.u32 %v7486_v21, %v6419_v20  ;;  %v6533_v20 = vld [vmem:[%s10451_s1 + $0x30] sm:$0xf0] }
  0xc0   : > { %vm2920_vm1 = vcmp.ge.f32.partialorder %v1771_v40, 0.0  ;;  %v3048_v50 = vmul.f32 0.2, %v1771_v40  ;;  %1723 = vmatmul.bf16.gmra.mxu2 %v8424_v36  ;;  %1812 = vmatmul.bf16.gmra.mxu3 %v8426_v38 }
  0xc1   : > { %10597 = vst [vmem:[#allocation11_spill] sm:$0xff] %v8454_v53 }
  0xc2   : > { %v3176_v61 = vsel %vm2920_vm1, %v1771_v40, %v3048_v50  ;;  %v7487_v40 = vld [vmem:[%s8140_s14 + $0x154] sm:$0xf0]  ;;  %v7485_v50 = vld [vmem:[%s8140_s14 + $0x14c] sm:$0xf] }
  0xc3   : > { %v8444_v4 = vpack.c.bf16 %v3176_v61, %v3172_v55  ;;  %v1684_v5 = vpop.f32.mrf.mxu2  ;;  %v1773_v7 = vpop.f32.mrf.mxu3  ;;  %v8456_v61 = vor.u32 %v7484_v23, %v6421_v37  ;;  %v8458_v62 = vor.u32 %v7487_v40, %v6427_v39  ;;  %v7544_v23 = vld [vmem:[%s10451_s1 + $0x124] sm:$0xf]  ;;  %v6661_v37 = vld [vmem:[%s10451_s1 + $0x130] sm:$0xf0] }
  0xc4   : > { %v1685_v6 = vadd.f32 %v1684_v5, %v1596_v41  ;;  %v1508_v8 = vpop.f32.mrf.mxu0  ;;  %v1597_v9 = vpop.f32.mrf.mxu1  ;;  %v8460_v5 = vor.u32 %v7485_v50, %v6429_v51  ;;  %v6664_v51 = vor.u32 %v7544_v23, %v6661_v37  ;;  %v6445_v23 = vld [vmem:[%s8140_s14 + $0x178] sm:$0xf0] }
  0xc5   : > { %10596 = vst [vmem:[#allocation10_spill] sm:$0xff] %v8444_v4  ;;  %v1598_v60 = vadd.f32 %v1597_v9, %v1508_v8  ;;  %v6435_v4 = vld [vmem:[%s8140_s14 + $0x160] sm:$0xf] }
  0xc6   : > { %v1774_v18 = vadd.f32 %v1773_v7, %v1685_v6  ;;  %10598 = vst [vmem:[#allocation12_spill] sm:$0xff] %v8456_v61  ;;  %1943 = vmatpush.bf16.msrb.mxu1 %v6664_v51 }
  0xc7   : > { %10599 = vst [vmem:[#allocation13_spill] sm:$0xff] %v8458_v62 }
  0xc8   : > { %10600 = vst [vmem:[#allocation14_spill] sm:$0xff] %v8460_v5  ;;  %v3052_v6 = vmul.f32 0.2, %v1774_v18  ;;  %vm2924_vm2 = vcmp.ge.f32.partialorder %v1774_v18, 0.0 }
  0xca   : > { %v3180_v39 = vsel %vm2924_vm2, %v1774_v18, %v3052_v6  ;;  %v7490_v18 = vld [vmem:[%s8140_s14 + $0x16c] sm:$0xf0]  ;;  %v7488_v6 = vld [vmem:[%s8140_s14 + $0x164] sm:$0xf] }
  0xcb   : > { %v1686_v52 = vpop.f32.mrf.mxu2  ;;  %v1775_v41 = vpop.f32.mrf.mxu3 }
  0xcc   : > { %v1687_v54 = vadd.f32 %v1686_v52, %v1598_v60  ;;  %v1511_v55 = vpop.f32.mrf.mxu0  ;;  %v1600_v63 = vpop.f32.mrf.mxu1  ;;  %v7512_v60 = vld [vmem:[%s10451_s1 + $0x24] sm:$0xf] }
  0xcd   : > { %v1601_v8 = vadd.f32 %v1600_v63, %v1511_v55  ;;  %v6536_v21 = vor.u32 %v7512_v60, %v6533_v20 }
  0xce   : > { %v1776_v7 = vadd.f32 %v1775_v41, %v1687_v54  ;;  %1639 = vmatmul.bf16.gmra.mxu1 %v8456_v61 }
  0xcf   : > { %1550 = vmatmul.bf16.gmra.mxu0 %v8454_v53 }
  0xd0   : > { %vm2928_vm3 = vcmp.ge.f32.partialorder %v1776_v7, 0.0  ;;  %v3056_v9 = vmul.f32 0.2, %v1776_v7  ;;  %1728 = vmatmul.bf16.gmra.mxu2 %v8458_v62  ;;  %1817 = vmatmul.bf16.gmra.mxu3 %v8460_v5  ;;  %v7491_v5 = vld [vmem:[%s8140_s14 + $0x174] sm:$0xf0] }
  0xd1   : > { %1854 = vmatpush.bf16.msrb.mxu0 %v6536_v21  ;;  %v7489_v62 = vld [vmem:[%s8140_s14 + $0x16c] sm:$0xf] }
  0xd2   : > { %v3184_v40 = vsel %vm2928_vm3, %v1776_v7, %v3056_v9  ;;  %v6437_v7 = vld [vmem:[%s8140_s14 + $0x170] sm:$0xf0]  ;;  %v6443_v9 = vld [vmem:[%s8140_s14 + $0x168] sm:$0xf] }
  0xd3   : > { %v1689_v50 = vpop.f32.mrf.mxu2  ;;  %v8478_v52 = vpack.c.bf16 %v3184_v40, %v3180_v39  ;;  %v1778_v41 = vpop.f32.mrf.mxu3  ;;  %v8488_v39 = vor.u32 %v7490_v18, %v6435_v4  ;;  %v8492_v21 = vor.u32 %v7491_v5, %v6443_v9  ;;  %v7588_v4 = vld [vmem:[%s10451_s1 + $0x284] sm:$0xf] }
  0xd4   : > { %v1690_v54 = vadd.f32 %v1689_v50, %v1601_v8  ;;  %v1513_v55 = vpop.f32.mrf.mxu0  ;;  %v1602_v63 = vpop.f32.mrf.mxu1  ;;  %v7620_v5 = vld [vmem:[%s10451_s1 + $0x384] sm:$0xf] }
  0xd5   : > { %10601 = vst [vmem:[#allocation15_spill] sm:$0xff] %v8478_v52  ;;  %v1603_v20 = vadd.f32 %v1602_v63, %v1513_v55  ;;  %v8490_v52 = vor.u32 %v7488_v6, %v6437_v7 }
  0xd6   : > { %v1779_v60 = vadd.f32 %v1778_v41, %v1690_v54  ;;  %10602 = vst [vmem:[#allocation16_spill] sm:$0xff] %v8488_v39  ;;  %v8494_v54 = vor.u32 %v7489_v62, %v6445_v23  ;;  %v6837_v62 = vld [vmem:[%s10451_s1 + $0x290] sm:$0xf0] }
  0xd7   : > { %10603 = vst [vmem:[#allocation17_spill] sm:$0xff] %v8490_v52  ;;  %v6840_v18 = vor.u32 %v7588_v4, %v6837_v62  ;;  %v6451_v62 = vld [vmem:[%s8140_s14 + $0x180] sm:$0xf] }
  0xd8   : > { %10604 = vst [vmem:[#allocation18_spill] sm:$0xff] %v8492_v21  ;;  %v3060_v41 = vmul.f32 0.2, %v1779_v60  ;;  %vm2932_vm4 = vcmp.ge.f32.partialorder %v1779_v60, 0.0 }
  0xd9   : > { %10605 = vst [vmem:[#allocation19_spill] sm:$0xff] %v8494_v54  ;;  %2029 = vmatpush.bf16.msrb.mxu2 %v6840_v18 }
  0xda   : > { %v3188_v7 = vsel %vm2932_vm4, %v1779_v60, %v3060_v41  ;;  %v6453_v60 = vld [vmem:[%s8140_s14 + $0x190] sm:$0xf0]  ;;  %v6459_v41 = vld [vmem:[%s8140_s14 + $0x188] sm:$0xf] }
  0xdb   : > { %v1691_v37 = vpop.f32.mrf.mxu2  ;;  %v1780_v8 = vpop.f32.mrf.mxu3 }
  0xdc   : > { %v1692_v40 = vadd.f32 %v1691_v37, %v1603_v20  ;;  %v1516_v50 = vpop.f32.mrf.mxu0  ;;  %v1605_v51 = vpop.f32.mrf.mxu1  ;;  %v6965_v20 = vld [vmem:[%s10451_s1 + $0x390] sm:$0xf0] }
  0xdd   : > { %v1606_v63 = vadd.f32 %v1605_v51, %v1516_v50  ;;  %v6968_v6 = vor.u32 %v7620_v5, %v6965_v20  ;;  %v7494_v5 = vld [vmem:[%s8140_s14 + $0x18c] sm:$0xf0]  ;;  %v7492_v20 = vld [vmem:[%s8140_s14 + $0x184] sm:$0xf] }
  0xde   : > { %v1781_v55 = vadd.f32 %v1780_v8, %v1692_v40  ;;  %1644 = vmatmul.bf16.gmra.mxu1 %v8490_v52 }
  0xdf   : > { %1555 = vmatmul.bf16.gmra.mxu0 %v8488_v39  ;;  %2118 = vmatpush.bf16.msrb.mxu3 %v6968_v6 }
  0xe0   : > { %vm2936_vm5 = vcmp.ge.f32.partialorder %v1781_v55, 0.0  ;;  %v3064_v61 = vmul.f32 0.2, %v1781_v55  ;;  %1733 = vmatmul.bf16.gmra.mxu2 %v8492_v21  ;;  %1822 = vmatmul.bf16.gmra.mxu3 %v8494_v54  ;;  %v6461_v21 = vld [vmem:[%s8140_s14 + $0x198] sm:$0xf0] }
  0xe2   : > { %v3192_v9 = vsel %vm2936_vm5, %v1781_v55, %v3064_v61  ;;  %v7495_v61 = vld [vmem:[%s8140_s14 + $0x194] sm:$0xf0]  ;;  %v7493_v55 = vld [vmem:[%s8140_s14 + $0x18c] sm:$0xf] }
  0xe3   : > { %v1694_v23 = vpop.f32.mrf.mxu2  ;;  %v8512_v37 = vpack.c.bf16 %v3192_v9, %v3188_v7  ;;  %v1783_v8 = vpop.f32.mrf.mxu3  ;;  %v8522_v7 = vor.u32 %v7494_v5, %v6451_v62  ;;  %v8526_v18 = vor.u32 %v7495_v61, %v6459_v41  ;;  %v7540_v62 = vld [vmem:[%s10451_s1 + $0x104] sm:$0xf]  ;;  %v6645_v5 = vld [vmem:[%s10451_s1 + $0x110] sm:$0xf0] }
  0xe4   : > { %v1695_v40 = vadd.f32 %v1694_v23, %v1606_v63  ;;  %v1518_v50 = vpop.f32.mrf.mxu0  ;;  %v1607_v51 = vpop.f32.mrf.mxu1  ;;  %v6648_v61 = vor.u32 %v7540_v62, %v6645_v5  ;;  %v6477_v62 = vld [vmem:[%s8140_s14 + $0x1b8] sm:$0xf0] }
  0xe5   : > { %10606 = vst [vmem:[#allocation20_spill] sm:$0xff] %v8512_v37  ;;  %v1608_v4 = vadd.f32 %v1607_v51, %v1518_v50  ;;  %v8524_v37 = vor.u32 %v7492_v20, %v6453_v60 }
  0xe6   : > { %v1784_v54 = vadd.f32 %v1783_v8, %v1695_v40  ;;  %10607 = vst [vmem:[#allocation21_spill] sm:$0xff] %v8522_v7  ;;  %v8528_v40 = vor.u32 %v7493_v55, %v6461_v21  ;;  %v6517_v21 = vld [vmem:[%s10451_s1 + $0x10] sm:$0xf0]  ;;  %1944 = vmatpush.bf16.msrb.mxu1 %v6648_v61 }
  0xe7   : > { %10608 = vst [vmem:[#allocation22_spill] sm:$0xff] %v8524_v37 }
  0xe8   : > { %10609 = vst [vmem:[#allocation23_spill] sm:$0xff] %v8526_v18  ;;  %v3068_v8 = vmul.f32 0.2, %v1784_v54  ;;  %vm2940_vm6 = vcmp.ge.f32.partialorder %v1784_v54, 0.0 }
  0xe9   : > { %10610 = vst [vmem:[#allocation24_spill] sm:$0xff] %v8528_v40 }
  0xea   : > { %v3196_v20 = vsel %vm2940_vm6, %v1784_v54, %v3068_v8  ;;  %v7498_v54 = vld [vmem:[%s8140_s14 + $0x1ac] sm:$0xf0]  ;;  %v7496_v8 = vld [vmem:[%s8140_s14 + $0x1a4] sm:$0xf] }
  0xeb   : > { %v1696_v52 = vpop.f32.mrf.mxu2  ;;  %v1785_v63 = vpop.f32.mrf.mxu3 }
  0xec   : > { %v1697_v9 = vadd.f32 %v1696_v52, %v1608_v4  ;;  %v1521_v23 = vpop.f32.mrf.mxu0  ;;  %v1610_v6 = vpop.f32.mrf.mxu1  ;;  %v7508_v52 = vld [vmem:[%s10451_s1 + $0x4] sm:$0xf] }
  0xed   : > { %v1611_v51 = vadd.f32 %v1610_v6, %v1521_v23  ;;  %v6520_v4 = vor.u32 %v7508_v52, %v6517_v21 }
  0xee   : > { %v1786_v50 = vadd.f32 %v1785_v63, %v1697_v9  ;;  %1649 = vmatmul.bf16.gmra.mxu1 %v8524_v37  ;;  %v7497_v37 = vld [vmem:[%s8140_s14 + $0x1ac] sm:$0xf] }
  0xef   : > { %1560 = vmatmul.bf16.gmra.mxu0 %v8522_v7 }
  0xf0   : > { %vm2944_vm7 = vcmp.ge.f32.partialorder %v1786_v50, 0.0  ;;  %v3072_v39 = vmul.f32 0.2, %v1786_v50  ;;  %1738 = vmatmul.bf16.gmra.mxu2 %v8526_v18  ;;  %1827 = vmatmul.bf16.gmra.mxu3 %v8528_v40  ;;  %v6467_v40 = vld [vmem:[%s8140_s14 + $0x1a0] sm:$0xf] }
  0xf1   : > { %1855 = vmatpush.bf16.msrb.mxu0 %v6520_v4  ;;  %v7499_v18 = vld [vmem:[%s8140_s14 + $0x1b4] sm:$0xf0] }
  0xf2   : > { %v3200_v60 = vsel %vm2944_vm7, %v1786_v50, %v3072_v39  ;;  %v6469_v39 = vld [vmem:[%s8140_s14 + $0x1b0] sm:$0xf0]  ;;  %v6475_v50 = vld [vmem:[%s8140_s14 + $0x1a8] sm:$0xf] }
  0xf3   : > { %v1699_v41 = vpop.f32.mrf.mxu2  ;;  %v8546_v55 = vpack.c.bf16 %v3200_v60, %v3196_v20  ;;  %v1788_v63 = vpop.f32.mrf.mxu3  ;;  %v8556_v20 = vor.u32 %v7498_v54, %v6467_v40  ;;  %v8560_v4 = vor.u32 %v7499_v18, %v6475_v50  ;;  %v7584_v40 = vld [vmem:[%s10451_s1 + $0x264] sm:$0xf] }
  0xf4   : > { %v1700_v9 = vadd.f32 %v1699_v41, %v1611_v51  ;;  %v1523_v23 = vpop.f32.mrf.mxu0  ;;  %v1612_v6 = vpop.f32.mrf.mxu1  ;;  %v7616_v18 = vld [vmem:[%s10451_s1 + $0x364] sm:$0xf] }
  0xf5   : > { %10611 = vst [vmem:[#allocation25_spill] sm:$0xff] %v8546_v55  ;;  %v1613_v21 = vadd.f32 %v1612_v6, %v1523_v23  ;;  %v8558_v55 = vor.u32 %v7496_v8, %v6469_v39  ;;  %v6949_v8 = vld [vmem:[%s10451_s1 + $0x370] sm:$0xf0] }
  0xf6   : > { %v1789_v52 = vadd.f32 %v1788_v63, %v1700_v9  ;;  %10612 = vst [vmem:[#allocation26_spill] sm:$0xff] %v8556_v20  ;;  %v8562_v9 = vor.u32 %v7497_v37, %v6477_v62  ;;  %v6952_v39 = vor.u32 %v7616_v18, %v6949_v8 }
  0xf7   : > { %10613 = vst [vmem:[#allocation27_spill] sm:$0xff] %v8558_v55 }
  0xf8   : > { %10614 = vst [vmem:[#allocation28_spill] sm:$0xff] %v8560_v4  ;;  %vm2948_vm8 = vcmp.ge.f32.partialorder %v1789_v52, 0.0  ;;  %v3076_v63 = vmul.f32 0.2, %v1789_v52  ;;  %2119 = vmatpush.bf16.msrb.mxu3 %v6952_v39  ;;  %v6483_v39 = vld [vmem:[%s8140_s14 + $0x1c0] sm:$0xf] }
  0xf9   : > { %10615 = vst [vmem:[#allocation29_spill] sm:$0xff] %v8562_v9 }
  0xfa   : > { %v3204_v50 = vsel %vm2948_vm8, %v1789_v52, %v3076_v63 }
  0xfb   : > { %v1701_v5 = vpop.f32.mrf.mxu2  ;;  %v1790_v51 = vpop.f32.mrf.mxu3 }
  0xfc   : > { %v1702_v60 = vadd.f32 %v1701_v5, %v1613_v21  ;;  %v1526_v41 = vpop.f32.mrf.mxu0  ;;  %v1615_v61 = vpop.f32.mrf.mxu1  ;;  %v6821_v21 = vld [vmem:[%s10451_s1 + $0x270] sm:$0xf0] }
  0xfd   : > { %v1616_v6 = vadd.f32 %v1615_v61, %v1526_v41  ;;  %v6824_v54 = vor.u32 %v7584_v40, %v6821_v21  ;;  %v7612_v41 = vld [vmem:[%s10451_s1 + $0x344] sm:$0xf]  ;;  %v6933_v21 = vld [vmem:[%s10451_s1 + $0x350] sm:$0xf0] }
  0xfe   : > { %v1791_v23 = vadd.f32 %v1790_v51, %v1702_v60  ;;  %1654 = vmatmul.bf16.gmra.mxu1 %v8558_v55  ;;  %v7580_v60 = vld [vmem:[%s10451_s1 + $0x244] sm:$0xf]  ;;  %v6805_v51 = vld [vmem:[%s10451_s1 + $0x250] sm:$0xf0] }
  0xff   : > { %1565 = vmatmul.bf16.gmra.mxu0 %v8556_v20  ;;  %2030 = vmatpush.bf16.msrb.mxu2 %v6824_v54  ;;  %v6808_v40 = vor.u32 %v7580_v60, %v6805_v51  ;;  %v7500_v60 = vld [vmem:[%s8140_s14 + $0x1c4] sm:$0xf] }
 0x100   : > { %vm2952_vm9 = vcmp.ge.f32.partialorder %v1791_v23, 0.0  ;;  %v3080_v37 = vmul.f32 0.2, %v1791_v23  ;;  %1743 = vmatmul.bf16.gmra.mxu2 %v8560_v4  ;;  %1832 = vmatmul.bf16.gmra.mxu3 %v8562_v9  ;;  %v7572_v9 = vld [vmem:[%s10451_s1 + $0x204] sm:$0xf] }
 0x102   : > { %v3208_v62 = vsel %vm2952_vm9, %v1791_v23, %v3080_v37  ;;  %v6936_v37 = vor.u32 %v7612_v41, %v6933_v21  ;;  %v6917_v41 = vld [vmem:[%s10451_s1 + $0x330] sm:$0xf0]  ;;  %v7501_v21 = vld [vmem:[%s8140_s14 + $0x1cc] sm:$0xf] }
 0x103   : > { %v1704_v5 = vpop.f32.mrf.mxu2  ;;  %v8590_v61 = vpack.c.bf16 %v3208_v62, %v3204_v50  ;;  %v1793_v63 = vpop.f32.mrf.mxu3  ;;  %2031 = vmatpush.bf16.msrb.mxu2 %v6808_v40  ;;  %v6789_v50 = vld [vmem:[%s10451_s1 + $0x230] sm:$0xf0]  ;;  %v7608_v62 = vld [vmem:[%s10451_s1 + $0x324] sm:$0xf] }
 0x104   : > { %v1705_v52 = vadd.f32 %v1704_v5, %v1616_v6  ;;  %v1528_v23 = vpop.f32.mrf.mxu0  ;;  %v1617_v18 = vpop.f32.mrf.mxu1  ;;  %2120 = vmatpush.bf16.msrb.mxu3 %v6936_v37  ;;  %v7576_v6 = vld [vmem:[%s10451_s1 + $0x224] sm:$0xf]  ;;  %v7502_v5 = vld [vmem:[%s8140_s14 + $0x1cc] sm:$0xf0]  ;;  %v6920_v40 = vor.u32 %v7608_v62, %v6917_v41 }
 0x105   : > { %10616 = vst [vmem:[#allocation30_spill] sm:$0xff] %v8590_v61  ;;  %v1618_v8 = vadd.f32 %v1617_v18, %v1528_v23  ;;  %v6792_v51 = vor.u32 %v7576_v6, %v6789_v50  ;;  %v7503_v23 = vld [vmem:[%s8140_s14 + $0x1d4] sm:$0xf0]  ;;  %v6493_v18 = vld [vmem:[%s8140_s14 + $0x1d8] sm:$0xf0]  ;;  %v8615_v61 = vor.u32 %v7502_v5, %v6483_v39 }
 0x106   : > { %v1794_v54 = vadd.f32 %v1793_v63, %v1705_v52  ;;  %v6485_v52 = vld [vmem:[%s8140_s14 + $0x1d0] sm:$0xf0]  ;;  %v6491_v63 = vld [vmem:[%s8140_s14 + $0x1c8] sm:$0xf]  ;;  %v7604_v50 = vld [vmem:[%s10451_s1 + $0x304] sm:$0xf]  ;;  %v8633_v20 = vor.u32 %v7501_v21, %v6493_v18 }
 0x107   : > { %2032 = vmatpush.bf16.msrb.mxu2 %v6792_v51  ;;  %10617 = vst [vmem:[#allocation31_spill] sm:$0xff] %v8615_v61  ;;  %v6773_v6 = vld [vmem:[%s10451_s1 + $0x210] sm:$0xf0]  ;;  %v8626_v51 = vor.u32 %v7500_v60, %v6485_v52  ;;  %v8628_v39 = vor.u32 %v7503_v23, %v6491_v63  ;;  %v7571_v60 = vld [vmem:[%s10451_s1 + $0x1f4] sm:$0xf0] }
 0x108   : > { %2121 = vmatpush.bf16.msrb.mxu3 %v6920_v40  ;;  %v6776_v5 = vor.u32 %v7572_v9, %v6773_v6  ;;  %v6901_v40 = vld [vmem:[%s10451_s1 + $0x310] sm:$0xf0]  ;;  %10620 = vst [vmem:[#allocation34_spill] sm:$0xff] %v8633_v20  ;;  %v3084_v53 = vmul.f32 0.2, %v1794_v54  ;;  %vm2956_vm10 = vcmp.ge.f32.partialorder %v1794_v54, 0.0 }
 0x109   : > { %10618 = vst [vmem:[#allocation32_spill] sm:$0xff] %v8626_v51  ;;  %v6904_v7 = vor.u32 %v7604_v50, %v6901_v40  ;;  %v6635_v9 = vld [vmem:[%s10451_s1 + $0xe8] sm:$0xf]  ;;  %v6499_v40 = vld [vmem:[%s8140_s14 + $0x1e0] sm:$0xf] }
 0x10a   : > { %10619 = vst [vmem:[#allocation33_spill] sm:$0xff] %v8628_v39  ;;  %v3212_v52 = vsel %vm2956_vm10, %v1794_v54, %v3084_v53  ;;  %v7506_v53 = vld [vmem:[%s8140_s14 + $0x1ec] sm:$0xf0]  ;;  %v7504_v54 = vld [vmem:[%s8140_s14 + $0x1e4] sm:$0xf] }
 0x10b   : > { %v1706_v37 = vpop.f32.mrf.mxu2  ;;  %v1795_v41 = vpop.f32.mrf.mxu3  ;;  %2033 = vmatpush.bf16.msrb.mxu2 %v6776_v5 }
 0x10c   : > { %v1707_v62 = vadd.f32 %v1706_v37, %v1618_v8  ;;  %v1531_v4 = vpop.f32.mrf.mxu0  ;;  %v1620_v55 = vpop.f32.mrf.mxu1  ;;  %2122 = vmatpush.bf16.msrb.mxu3 %v6904_v7  ;;  %v6763_v7 = vld [vmem:[%s10451_s1 + $0x1e8] sm:$0xf] }
 0x10d   : > { %v1621_v36 = vadd.f32 %v1620_v55, %v1531_v4  ;;  %v7539_v55 = vld [vmem:[%s10451_s1 + $0xf4] sm:$0xf0]  ;;  %v6764_v21 = vor.u32 %v7571_v60, %v6763_v7  ;;  %v6509_v7 = vld [vmem:[%s8140_s14 + $0x1f8] sm:$0xf0] }
 0x10e   : > { %v1796_v38 = vadd.f32 %v1795_v41, %v1707_v62  ;;  %1659 = vmatmul.bf16.gmra.mxu1 %v8626_v51  ;;  %v6636_v4 = vor.u32 %v7539_v55, %v6635_v9  ;;  %v7507_v9 = vld [vmem:[%s8140_s14 + $0x1f4] sm:$0xf0]  ;;  %v7505_v55 = vld [vmem:[%s8140_s14 + $0x1ec] sm:$0xf] }
 0x10f   : > { %1570 = vmatmul.bf16.gmra.mxu0 %v8615_v61  ;;  %2293 = vmatpush.bf16.msra.mxu1 %v6764_v21 }
 0x110   : > { %vm2960_vm11 = vcmp.ge.f32.partialorder %v1796_v38, 0.0  ;;  %v3088_v8 = vmul.f32 0.2, %v1796_v38  ;;  %1748 = vmatmul.bf16.gmra.mxu2 %v8628_v39  ;;  %1837 = vmatmul.bf16.gmra.mxu3 %v8633_v20 }
 0x111   : > { %2204 = vmatpush.bf16.msra.mxu0 %v6636_v4 }
 0x112   : > { %v3216_v63 = vsel %vm2960_vm11, %v1796_v38, %v3088_v8  ;;  %v6501_v38 = vld [vmem:[%s8140_s14 + $0x1f0] sm:$0xf0]  ;;  %v6507_v8 = vld [vmem:[%s8140_s14 + $0x1e8] sm:$0xf] }
 0x113   : > { %v1709_v23 = vpop.f32.mrf.mxu2  ;;  %v8651_v18 = vpack.c.bf16 %v3216_v63, %v3212_v52  ;;  %v1798_v6 = vpop.f32.mrf.mxu3  ;;  %v8661_v52 = vor.u32 %v7506_v53, %v6499_v40  ;;  %v8665_v4 = vor.u32 %v7507_v9, %v6507_v8 }
 0x114   : > { %v1710_v37 = vadd.f32 %v1709_v23, %v1621_v36  ;;  %v1533_v50 = vpop.f32.mrf.mxu0  ;;  %v1622_v62 = vpop.f32.mrf.mxu1 }
 0x115   : > { %10621 = vst [vmem:[#allocation35_spill] sm:$0xff] %v8651_v18  ;;  %v1623_v5 = vadd.f32 %v1622_v62, %v1533_v50  ;;  %v8663_v18 = vor.u32 %v7504_v54, %v6501_v38 }
 0x116   : > { %v1799_v41 = vadd.f32 %v1798_v6, %v1710_v37  ;;  %10622 = vst [vmem:[#allocation36_spill] sm:$0xff] %v8661_v52  ;;  %v8667_v37 = vor.u32 %v7505_v55, %v6509_v7 }
 0x117   : > { %10623 = vst [vmem:[#allocation37_spill] sm:$0xff] %v8663_v18 }
 0x118   : > { %10624 = vst [vmem:[#allocation38_spill] sm:$0xff] %v8665_v4  ;;  %v3092_v6 = vmul.f32 0.2, %v1799_v41  ;;  %vm2964_vm12 = vcmp.ge.f32.partialorder %v1799_v41, 0.0 }
 0x119   : > { %10625 = vst [vmem:[#allocation39_spill] sm:$0xff] %v8667_v37 }
 0x11b   : > { %v1711_v60 = vpop.f32.mrf.mxu2  ;;  %v1800_v36 = vpop.f32.mrf.mxu3 }
 0x11c   : > { %v1712_v63 = vadd.f32 %v1711_v60, %v1623_v5  ;;  %v1536_v23 = vpop.f32.mrf.mxu0  ;;  %v1625_v21 = vpop.f32.mrf.mxu1  ;;  %v3220_v5 = vsel %vm2964_vm12, %v1799_v41, %v3092_v6  ;;  %v6619_v41 = vld [vmem:[%s10451_s1 + $0xc8] sm:$0xf]  ;;  %v7535_v6 = vld [vmem:[%s10451_s1 + $0xd4] sm:$0xf0] }
 0x11d   : > { %v1626_v62 = vadd.f32 %v1625_v21, %v1536_v23 }
 0x11e   : > { %v1801_v50 = vadd.f32 %v1800_v36, %v1712_v63  ;;  %1664 = vmatmul.bf16.gmra.mxu1 %v8663_v18 }
 0x11f   : > { %1575 = vmatmul.bf16.gmra.mxu0 %v8661_v52 }
 0x120   : > { %vm2968_vm13 = vcmp.ge.f32.partialorder %v1801_v50, 0.0  ;;  %v3096_v20 = vmul.f32 0.2, %v1801_v50  ;;  %1753 = vmatmul.bf16.gmra.mxu2 %v8665_v4  ;;  %1842 = vmatmul.bf16.gmra.mxu3 %v8667_v37 }
 0x122   : > { %v3224_v40 = vsel %vm2968_vm13, %v1801_v50, %v3096_v20  ;;  %v6620_v50 = vor.u32 %v7535_v6, %v6619_v41 }
 0x123   : > { %v1714_v53 = vpop.f32.mrf.mxu2  ;;  %v8673_v54 = vpack.c.bf16 %v3224_v40, %v3220_v5  ;;  %v1803_v8 = vpop.f32.mrf.mxu3 }
 0x124   : > { %v1715_v38 = vadd.f32 %v1714_v53, %v1626_v62  ;;  %v1538_v9 = vpop.f32.mrf.mxu0  ;;  %v1627_v55 = vpop.f32.mrf.mxu1  ;;  %v7567_v62 = vld [vmem:[%s10451_s1 + $0x1d4] sm:$0xf0]  ;;  %2205 = vmatpush.bf16.msra.mxu0 %v6620_v50 }
 0x125   : > { %10626 = vst [vmem:[#allocation40_spill] sm:$0xff] %v8673_v54  ;;  %v1628_v60 = vadd.f32 %v1627_v55, %v1538_v9 }
 0x126   : > { %v1804_v7 = vadd.f32 %v1803_v8, %v1715_v38 }
 0x128   : > { %v3100_v52 = vmul.f32 0.2, %v1804_v7  ;;  %vm2972_vm14 = vcmp.ge.f32.partialorder %v1804_v7, 0.0 }
 0x12a   : > { %v3228_v5 = vsel %vm2972_vm14, %v1804_v7, %v3100_v52 }
 0x12b   : > { %v1716_v63 = vpop.f32.mrf.mxu2  ;;  %v1805_v23 = vpop.f32.mrf.mxu3 }
 0x12c   : > { %v1717_v36 = vadd.f32 %v1716_v63, %v1628_v60  ;;  %v1541_v21 = vpop.f32.mrf.mxu0  ;;  %v1630_v18 = vpop.f32.mrf.mxu1 }
 0x12d   : > { %v1631_v39 = vadd.f32 %v1630_v18, %v1541_v21  ;;  %v6747_v18 = vld [vmem:[%s10451_s1 + $0x1c8] sm:$0xf] }
 0x12e   : > { %v1806_v4 = vadd.f32 %v1805_v23, %v1717_v36  ;;  %1945 = vmatmul.bf16.vlgmr.msrb.gmra.mxu1 %v8158_v47  ;;  %v6748_v38 = vor.u32 %v7567_v62, %v6747_v18 }
 0x12f   : > { %1856 = vmatmul.bf16.vlgmr.msrb.gmra.mxu0 %v8154_v43 }
 0x130   : > { %vm2976_vm15 = vcmp.ge.f32.partialorder %v1806_v4, 0.0  ;;  %v3104_v20 = vmul.f32 0.2, %v1806_v4  ;;  %2034 = vmatmul.bf16.vlgmr.msrb.gmra.mxu2 %v8160_v48  ;;  %2123 = vmatmul.bf16.vlgmr.msrb.gmra.mxu3 %v8162_v49 }
 0x131   : > { %2294 = vmatpush.bf16.msra.mxu1 %v6748_v38 }
 0x132   : > { %v3232_v40 = vsel %vm2976_vm15, %v1806_v4, %v3104_v20 }
 0x133   : > { %v1719_v53 = vpop.f32.mrf.mxu2  ;;  %v8691_v8 = vpack.c.bf16 %v3232_v40, %v3228_v5  ;;  %v1808_v55 = vpop.f32.mrf.mxu3 }
 0x134   : > { %v1720_v9 = vadd.f32 %v1719_v53, %v1631_v39  ;;  %v1543_v60 = vpop.f32.mrf.mxu0  ;;  %v1632_v63 = vpop.f32.mrf.mxu1 }
 0x135   : > { %10627 = vst [vmem:[#allocation41_spill] sm:$0xff] %v8691_v8  ;;  %v1633_v23 = vadd.f32 %v1632_v63, %v1543_v60 }
 0x136   : > { %v1809_v36 = vadd.f32 %v1808_v55, %v1720_v9 }
 0x138   : > { %v3108_v48 = vmul.f32 0.2, %v1809_v36  ;;  %vm2980_vm0 = vcmp.ge.f32.partialorder %v1809_v36, 0.0 }
 0x13a   : > { %v3236_v7 = vsel %vm2980_vm0, %v1809_v36, %v3108_v48  ;;  %v6603_v36 = vld [vmem:[%s10451_s1 + $0xa8] sm:$0xf] }
 0x13b   : > { %v1721_v21 = vpop.f32.mrf.mxu2  ;;  %v1810_v6 = vpop.f32.mrf.mxu3 }
 0x13c   : > { %v1722_v41 = vadd.f32 %v1721_v21, %v1633_v23  ;;  %v1546_v54 = vpop.f32.mrf.mxu0  ;;  %v1635_v49 = vpop.f32.mrf.mxu1 }
 0x13d   : > { %v1636_v4 = vadd.f32 %v1635_v49, %v1546_v54 }
 0x13e   : > { %v1811_v52 = vadd.f32 %v1810_v6, %v1722_v41  ;;  %1950 = vmatmul.bf16.gmra.mxu1 %v8190_v1  ;;  %v7531_v6 = vld [vmem:[%s10451_s1 + $0xb4] sm:$0xf0] }
 0x13f   : > { %1861 = vmatmul.bf16.gmra.mxu0 %v8188_v0 }
 0x140   : > { %vm2984_vm1 = vcmp.ge.f32.partialorder %v1811_v52, 0.0  ;;  %v3112_v39 = vmul.f32 0.2, %v1811_v52  ;;  %2039 = vmatmul.bf16.gmra.mxu2 %v8192_v2  ;;  %2128 = vmatmul.bf16.gmra.mxu3 %v8194_v3 }
 0x142   : > { %v3240_v20 = vsel %vm2984_vm1, %v1811_v52, %v3112_v39  ;;  %v6731_v52 = vld [vmem:[%s10451_s1 + $0x1a8] sm:$0xf]  ;;  %v7563_v39 = vld [vmem:[%s10451_s1 + $0x1b4] sm:$0xf0] }
 0x143   : > { %v1724_v18 = vpop.f32.mrf.mxu2  ;;  %v8697_v50 = vpack.c.bf16 %v3240_v20, %v3236_v7  ;;  %v1813_v5 = vpop.f32.mrf.mxu3 }
 0x144   : > { %v1725_v62 = vadd.f32 %v1724_v18, %v1636_v4  ;;  %v1548_v40 = vpop.f32.mrf.mxu0  ;;  %v1637_v49 = vpop.f32.mrf.mxu1  ;;  %v6604_v4 = vor.u32 %v7531_v6, %v6603_v36 }
 0x145   : > { %10628 = vst [vmem:[#allocation42_spill] sm:$0xff] %v8697_v50  ;;  %v1638_v53 = vadd.f32 %v1637_v49, %v1548_v40 }
 0x146   : > { %v1814_v54 = vadd.f32 %v1813_v5, %v1725_v62  ;;  %v6732_v62 = vor.u32 %v7563_v39, %v6731_v52  ;;  %2206 = vmatpush.bf16.msra.mxu0 %v6604_v4 }
 0x148   : > { %v3116_v23 = vmul.f32 0.2, %v1814_v54  ;;  %vm2988_vm2 = vcmp.ge.f32.partialorder %v1814_v54, 0.0  ;;  %2295 = vmatpush.bf16.msra.mxu1 %v6732_v62 }
 0x14a   : > { %v3244_v7 = vsel %vm2988_vm2, %v1814_v54, %v3116_v23 }
 0x14b   : > { %v1726_v38 = vpop.f32.mrf.mxu2  ;;  %v1815_v55 = vpop.f32.mrf.mxu3 }
 0x14c   : > { %v1727_v9 = vadd.f32 %v1726_v38, %v1638_v53  ;;  %v1551_v60 = vpop.f32.mrf.mxu0  ;;  %v1640_v63 = vpop.f32.mrf.mxu1 }
 0x14d   : > { %v1641_v41 = vadd.f32 %v1640_v63, %v1551_v60 }
 0x14e   : > { %v1816_v21 = vadd.f32 %v1815_v55, %v1727_v9  ;;  %1955 = vmatmul.bf16.gmra.mxu1 %v8210_v13 }
 0x14f   : > { %1866 = vmatmul.bf16.gmra.mxu0 %v8208_v12 }
 0x150   : > { %vm2992_vm3 = vcmp.ge.f32.partialorder %v1816_v21, 0.0  ;;  %v3120_v48 = vmul.f32 0.2, %v1816_v21  ;;  %2044 = vmatmul.bf16.gmra.mxu2 %v8212_v14  ;;  %2133 = vmatmul.bf16.gmra.mxu3 %v8214_v15 }
 0x152   : > { %v3248_v20 = vsel %vm2992_vm3, %v1816_v21, %v3120_v48 }
 0x153   : > { %v1729_v18 = vpop.f32.mrf.mxu2  ;;  %v8715_v5 = vpack.c.bf16 %v3248_v20, %v3244_v7  ;;  %v1818_v49 = vpop.f32.mrf.mxu3 }
 0x154   : > { %v1730_v40 = vadd.f32 %v1729_v18, %v1641_v41  ;;  %v1553_v53 = vpop.f32.mrf.mxu0  ;;  %v1642_v38 = vpop.f32.mrf.mxu1 }
 0x155   : > { %10629 = vst [vmem:[#allocation43_spill] sm:$0xff] %v8715_v5  ;;  %v1643_v55 = vadd.f32 %v1642_v38, %v1553_v53 }
 0x156   : > { %v1819_v9 = vadd.f32 %v1818_v49, %v1730_v40 }
 0x158   : > { %v3124_v8 = vmul.f32 0.2, %v1819_v9  ;;  %vm2996_vm4 = vcmp.ge.f32.partialorder %v1819_v9, 0.0 }
 0x15a   : > { %v3252_v41 = vsel %vm2996_vm4, %v1819_v9, %v3124_v8  ;;  %v6587_v9 = vld [vmem:[%s10451_s1 + $0x88] sm:$0xf] }
 0x15b   : > { %v1731_v60 = vpop.f32.mrf.mxu2  ;;  %v1820_v36 = vpop.f32.mrf.mxu3 }
 0x15c   : > { %v1732_v63 = vadd.f32 %v1731_v60, %v1643_v55  ;;  %v1556_v6 = vpop.f32.mrf.mxu0  ;;  %v1645_v50 = vpop.f32.mrf.mxu1 }
 0x15d   : > { %v1646_v23 = vadd.f32 %v1645_v50, %v1556_v6  ;;  %v7527_v6 = vld [vmem:[%s10451_s1 + $0x94] sm:$0xf0] }
 0x15e   : > { %v1821_v54 = vadd.f32 %v1820_v36, %v1732_v63  ;;  %1960 = vmatmul.bf16.gmra.mxu1 %v8242_v31 }
 0x15f   : > { %1871 = vmatmul.bf16.gmra.mxu0 %v8240_v30 }
 0x160   : > { %vm3000_vm5 = vcmp.ge.f32.partialorder %v1821_v54, 0.0  ;;  %v3128_v21 = vmul.f32 0.2, %v1821_v54  ;;  %2049 = vmatmul.bf16.gmra.mxu2 %v8244_v32  ;;  %2138 = vmatmul.bf16.gmra.mxu3 %v8246_v33 }
 0x162   : > { %v3256_v48 = vsel %vm3000_vm5, %v1821_v54, %v3128_v21  ;;  %v6715_v54 = vld [vmem:[%s10451_s1 + $0x188] sm:$0xf]  ;;  %v7559_v21 = vld [vmem:[%s10451_s1 + $0x194] sm:$0xf0] }
 0x163   : > { %v1734_v52 = vpop.f32.mrf.mxu2  ;;  %v8721_v4 = vpack.c.bf16 %v3256_v48, %v3252_v41  ;;  %v1823_v7 = vpop.f32.mrf.mxu3 }
 0x164   : > { %v1735_v39 = vadd.f32 %v1734_v52, %v1646_v23  ;;  %v1558_v20 = vpop.f32.mrf.mxu0  ;;  %v1647_v50 = vpop.f32.mrf.mxu1  ;;  %v6588_v23 = vor.u32 %v7527_v6, %v6587_v9 }
 0x165   : > { %10630 = vst [vmem:[#allocation44_spill] sm:$0xff] %v8721_v4  ;;  %v1648_v62 = vadd.f32 %v1647_v50, %v1558_v20 }
 0x166   : > { %v1824_v18 = vadd.f32 %v1823_v7, %v1735_v39  ;;  %v6716_v39 = vor.u32 %v7559_v21, %v6715_v54  ;;  %2207 = vmatpush.bf16.msra.mxu0 %v6588_v23  ;;  %v7635_v54 = vld [vmem:[%s10451_s1 + $0x3f4] sm:$0xf0] }
 0x168   : > { %v3132_v60 = vmul.f32 0.2, %v1824_v18  ;;  %vm3004_vm6 = vcmp.ge.f32.partialorder %v1824_v18, 0.0  ;;  %2296 = vmatpush.bf16.msra.mxu1 %v6716_v39 }
 0x16a   : > { %v3260_v41 = vsel %vm3004_vm6, %v1824_v18, %v3132_v60 }
 0x16b   : > { %v1736_v40 = vpop.f32.mrf.mxu2  ;;  %v1825_v53 = vpop.f32.mrf.mxu3 }
 0x16c   : > { %v1737_v49 = vadd.f32 %v1736_v40, %v1648_v62  ;;  %v1561_v38 = vpop.f32.mrf.mxu0  ;;  %v1650_v55 = vpop.f32.mrf.mxu1 }
 0x16d   : > { %v1651_v36 = vadd.f32 %v1650_v55, %v1561_v38 }
 0x16e   : > { %v1826_v63 = vadd.f32 %v1825_v53, %v1737_v49  ;;  %1965 = vmatmul.bf16.gmra.mxu1 %v8262_v44 }
 0x16f   : > { %1876 = vmatmul.bf16.gmra.mxu0 %v8260_v42 }
 0x170   : > { %vm3008_vm7 = vcmp.ge.f32.partialorder %v1826_v63, 0.0  ;;  %v3136_v8 = vmul.f32 0.2, %v1826_v63  ;;  %2054 = vmatmul.bf16.gmra.mxu2 %v8264_v45  ;;  %2143 = vmatmul.bf16.gmra.mxu3 %v8266_v46 }
 0x172   : > { %v3264_v48 = vsel %vm3008_vm7, %v1826_v63, %v3136_v8  ;;  %v7603_v8 = vld [vmem:[%s10451_s1 + $0x2f4] sm:$0xf0] }
 0x173   : > { %v1739_v52 = vpop.f32.mrf.mxu2  ;;  %v8739_v7 = vpack.c.bf16 %v3264_v48, %v3260_v41  ;;  %v1828_v50 = vpop.f32.mrf.mxu3 }
 0x174   : > { %v1740_v20 = vadd.f32 %v1739_v52, %v1651_v36  ;;  %v1563_v62 = vpop.f32.mrf.mxu0  ;;  %v1652_v40 = vpop.f32.mrf.mxu1  ;;  %v6891_v36 = vld [vmem:[%s10451_s1 + $0x2e8] sm:$0xf] }
 0x175   : > { %10631 = vst [vmem:[#allocation45_spill] sm:$0xff] %v8739_v7  ;;  %v1653_v53 = vadd.f32 %v1652_v40, %v1563_v62  ;;  %v6892_v23 = vor.u32 %v7603_v8, %v6891_v36 }
 0x176   : > { %v1829_v49 = vadd.f32 %v1828_v50, %v1740_v20 }
 0x177   : > { %2382 = vmatpush.bf16.msra.mxu2 %v6892_v23 }
 0x178   : > { %v3140_v5 = vmul.f32 0.2, %v1829_v49  ;;  %vm3012_vm8 = vcmp.ge.f32.partialorder %v1829_v49, 0.0 }
 0x17a   : > { %v3268_v41 = vsel %vm3012_vm8, %v1829_v49, %v3140_v5 }
 0x17b   : > { %v1741_v38 = vpop.f32.mrf.mxu2  ;;  %v1830_v9 = vpop.f32.mrf.mxu3 }
 0x17c   : > { %v1742_v55 = vadd.f32 %v1741_v38, %v1653_v53  ;;  %v1566_v6 = vpop.f32.mrf.mxu0  ;;  %v1655_v4 = vpop.f32.mrf.mxu1 }
 0x17d   : > { %v1656_v60 = vadd.f32 %v1655_v4, %v1566_v6  ;;  %v7019_v4 = vld [vmem:[%s10451_s1 + $0x3e8] sm:$0xf] }
 0x17e   : > { %v1831_v18 = vadd.f32 %v1830_v9, %v1742_v55  ;;  %1970 = vmatmul.bf16.gmra.mxu1 %v8306_v11  ;;  %v7020_v21 = vor.u32 %v7635_v54, %v7019_v4 }
 0x17f   : > { %1881 = vmatmul.bf16.gmra.mxu0 %v8304_v10 }
 0x180   : > { %vm3016_vm9 = vcmp.ge.f32.partialorder %v1831_v18, 0.0  ;;  %v3144_v63 = vmul.f32 0.2, %v1831_v18  ;;  %2059 = vmatmul.bf16.gmra.mxu2 %v8308_v16  ;;  %2148 = vmatmul.bf16.gmra.mxu3 %v8310_v17 }
 0x181   : > { %2471 = vmatpush.bf16.msra.mxu3 %v7020_v21 }
 0x182   : > { %v3272_v48 = vsel %vm3016_vm9, %v1831_v18, %v3144_v63  ;;  %v6571_v18 = vld [vmem:[%s10451_s1 + $0x68] sm:$0xf]  ;;  %v7555_v63 = vld [vmem:[%s10451_s1 + $0x174] sm:$0xf0] }
 0x183   : > { %v1744_v52 = vpop.f32.mrf.mxu2  ;;  %v8757_v39 = vpack.c.bf16 %v3272_v48, %v3268_v41  ;;  %v1833_v50 = vpop.f32.mrf.mxu3 }
 0x184   : > { %v1745_v20 = vadd.f32 %v1744_v52, %v1656_v60  ;;  %v1568_v62 = vpop.f32.mrf.mxu0  ;;  %v1657_v40 = vpop.f32.mrf.mxu1  ;;  %v7523_v60 = vld [vmem:[%s10451_s1 + $0x74] sm:$0xf0] }
 0x185   : > { %10632 = vst [vmem:[#allocation46_spill] sm:$0xff] %v8757_v39  ;;  %v1658_v38 = vadd.f32 %v1657_v40, %v1568_v62 }
 0x186   : > { %v1834_v53 = vadd.f32 %v1833_v50, %v1745_v20 }
 0x188   : > { %v3148_v36 = vmul.f32 0.2, %v1834_v53  ;;  %vm3020_vm10 = vcmp.ge.f32.partialorder %v1834_v53, 0.0 }
 0x18a   : > { %v3276_v4 = vsel %vm3020_vm10, %v1834_v53, %v3148_v36 }
 0x18b   : > { %v1746_v55 = vpop.f32.mrf.mxu2  ;;  %v1835_v6 = vpop.f32.mrf.mxu3 }
 0x18c   : > { %v1747_v9 = vadd.f32 %v1746_v55, %v1658_v38  ;;  %v1571_v7 = vpop.f32.mrf.mxu0  ;;  %v1660_v17 = vpop.f32.mrf.mxu1 }
 0x18d   : > { %v1661_v5 = vadd.f32 %v1660_v17, %v1571_v7  ;;  %v6699_v17 = vld [vmem:[%s10451_s1 + $0x168] sm:$0xf]  ;;  %v6572_v7 = vor.u32 %v7523_v60, %v6571_v18 }
 0x18e   : > { %v1836_v8 = vadd.f32 %v1835_v6, %v1747_v9  ;;  %1975 = vmatmul.bf16.gmra.mxu1 %v8326_v27  ;;  %v6700_v21 = vor.u32 %v7555_v63, %v6699_v17  ;;  %v7599_v63 = vld [vmem:[%s10451_s1 + $0x2d4] sm:$0xf0] }
 0x18f   : > { %1886 = vmatmul.bf16.gmra.mxu0 %v8324_v26 }
 0x190   : > { %vm3024_vm11 = vcmp.ge.f32.partialorder %v1836_v8, 0.0  ;;  %v3152_v49 = vmul.f32 0.2, %v1836_v8  ;;  %2064 = vmatmul.bf16.gmra.mxu2 %v8328_v28  ;;  %2153 = vmatmul.bf16.gmra.mxu3 %v8330_v29 }
 0x191   : > { %2208 = vmatpush.bf16.msra.mxu0 %v6572_v7  ;;  %2297 = vmatpush.bf16.msra.mxu1 %v6700_v21  ;;  %v6875_v7 = vld [vmem:[%s10451_s1 + $0x2c8] sm:$0xf] }
 0x192   : > { %v3280_v54 = vsel %vm3024_vm11, %v1836_v8, %v3152_v49 }
 0x193   : > { %v1749_v23 = vpop.f32.mrf.mxu2  ;;  %v8775_v41 = vpack.c.bf16 %v3280_v54, %v3276_v4  ;;  %v1838_v52 = vpop.f32.mrf.mxu3  ;;  %v7003_v4 = vld [vmem:[%s10451_s1 + $0x3c8] sm:$0xf] }
 0x194   : > { %v1750_v48 = vadd.f32 %v1749_v23, %v1661_v5  ;;  %v1573_v20 = vpop.f32.mrf.mxu0  ;;  %v1662_v50 = vpop.f32.mrf.mxu1 }
 0x195   : > { %10633 = vst [vmem:[#allocation47_spill] sm:$0xff] %v8775_v41  ;;  %v1663_v40 = vadd.f32 %v1662_v50, %v1573_v20  ;;  %v7631_v20 = vld [vmem:[%s10451_s1 + $0x3d4] sm:$0xf0] }
 0x196   : > { %v1839_v62 = vadd.f32 %v1838_v52, %v1750_v48  ;;  %v6876_v52 = vor.u32 %v7599_v63, %v6875_v7  ;;  %v6683_v7 = vld [vmem:[%s10451_s1 + $0x148] sm:$0xf] }
 0x198   : > { %v3156_v60 = vmul.f32 0.2, %v1839_v62  ;;  %vm3028_vm12 = vcmp.ge.f32.partialorder %v1839_v62, 0.0  ;;  %2383 = vmatpush.bf16.msra.mxu2 %v6876_v52 }
 0x19a   : > { %v3284_v5 = vsel %vm3028_vm12, %v1839_v62, %v3156_v60  ;;  %v7004_v62 = vor.u32 %v7631_v20, %v7003_v4  ;;  %v7551_v4 = vld [vmem:[%s10451_s1 + $0x154] sm:$0xf0] }
 0x19b   : > { %v1751_v38 = vpop.f32.mrf.mxu2  ;;  %v1840_v9 = vpop.f32.mrf.mxu3  ;;  %v6684_v52 = vor.u32 %v7551_v4, %v6683_v7  ;;  %v10637_v7 = vld [vmem:[#allocation9_spill] sm:$0xff] }
 0x19c   : > { %v1752_v55 = vadd.f32 %v1751_v38, %v1663_v40  ;;  %v1576_v6 = vpop.f32.mrf.mxu0  ;;  %v1665_v18 = vpop.f32.mrf.mxu1  ;;  %2472 = vmatpush.bf16.msra.mxu3 %v7004_v62  ;;  %v7627_v4 = vld [vmem:[%s10451_s1 + $0x3b4] sm:$0xf0] }
 0x19d   : > { %v1666_v36 = vadd.f32 %v1665_v18, %v1576_v6  ;;  %2298 = vmatpush.bf16.msra.mxu1 %v6684_v52 }
 0x19e   : > { %v1841_v53 = vadd.f32 %v1840_v9, %v1752_v55  ;;  %1980 = vmatmul.bf16.gmra.mxu1 %v8358_v57 }
 0x19f   : > { %1891 = vmatmul.bf16.gmra.mxu0 %v8356_v56 }
 0x1a0   : > { %vm3032_vm13 = vcmp.ge.f32.partialorder %v1841_v53, 0.0  ;;  %v3160_v8 = vmul.f32 0.2, %v1841_v53  ;;  %2069 = vmatmul.bf16.gmra.mxu2 %v8360_v58  ;;  %2158 = vmatmul.bf16.gmra.mxu3 %v8362_v59 }
 0x1a2   : > { %v3288_v49 = vsel %vm3032_vm13, %v1841_v53, %v3160_v8 }
 0x1a3   : > { %v1754_v17 = vpop.f32.mrf.mxu2  ;;  %v8790_v54 = vpack.c.bf16 %v3288_v49, %v3284_v5  ;;  %v1843_v21 = vpop.f32.mrf.mxu3  ;;  %v6555_v49 = vld [vmem:[%s10451_s1 + $0x48] sm:$0xf] }
 0x1a4   : > { %v1755_v23 = vadd.f32 %v1754_v17, %v1666_v36  ;;  %v1578_v48 = vpop.f32.mrf.mxu0  ;;  %v1667_v50 = vpop.f32.mrf.mxu1  ;;  %v7519_v17 = vld [vmem:[%s10451_s1 + $0x54] sm:$0xf0] }
 0x1a5   : > { %10634 = vst [vmem:[#allocation48_spill] sm:$0xff] %v8790_v54  ;;  %v1668_v38 = vadd.f32 %v1667_v50, %v1578_v48  ;;  %v6556_v63 = vor.u32 %v7519_v17, %v6555_v49 }
 0x1a6   : > { %v1844_v40 = vadd.f32 %v1843_v21, %v1755_v23 }
 0x1a7   : > { %2209 = vmatpush.bf16.msra.mxu0 %v6556_v63  ;;  %v7595_v63 = vld [vmem:[%s10451_s1 + $0x2b4] sm:$0xf0] }
 0x1a8   : > { %v3164_v53 = vmul.f32 0.2, %v1844_v40  ;;  %vm3036_vm14 = vcmp.ge.f32.partialorder %v1844_v40, 0.0 }
 0x1aa   : > { %v3292_v23 = vsel %vm3036_vm14, %v1844_v40, %v3164_v53 }
 0x1ab   : > { %v1756_v55 = vpop.f32.mrf.mxu2  ;;  %v1845_v6 = vpop.f32.mrf.mxu3 }
 0x1ac   : > { %v1757_v9 = vadd.f32 %v1756_v55, %v1668_v38  ;;  %v1857_v18 = vpop.f32.mrf.mxu0  ;;  %v1946_v60 = vpop.f32.mrf.mxu1 }
 0x1ad   : > { %v1947_v8 = vadd.f32 %v1946_v60, %v1857_v18 }
 0x1ae   : > { %v1846_v36 = vadd.f32 %v1845_v6, %v1757_v9  ;;  %1985 = vmatmul.bf16.gmra.mxu1 %v8390_v24 }
 0x1af   : > { %1896 = vmatmul.bf16.gmra.mxu0 %v8388_v22 }
 0x1b0   : > { %vm3040_vm15 = vcmp.ge.f32.partialorder %v1846_v36, 0.0  ;;  %v3168_v5 = vmul.f32 0.2, %v1846_v36  ;;  %2074 = vmatmul.bf16.gmra.mxu2 %v8392_v25  ;;  %2163 = vmatmul.bf16.gmra.mxu3 %v8394_v35 }
 0x1b2   : > { %v3296_v21 = vsel %vm3040_vm15, %v1846_v36, %v3168_v5  ;;  %v6859_v5 = vld [vmem:[%s10451_s1 + $0x2a8] sm:$0xf] }
 0x1b3   : > { %v2035_v48 = vpop.f32.mrf.mxu2  ;;  %v8811_v20 = vpack.c.bf16 %v3296_v21, %v3292_v23  ;;  %v2124_v62 = vpop.f32.mrf.mxu3 }
 0x1b4   : > { %v2036_v50 = vadd.f32 %v2035_v48, %v1947_v8  ;;  %v1859_v38 = vpop.f32.mrf.mxu0  ;;  %v1948_v55 = vpop.f32.mrf.mxu1  ;;  %v10636_v8 = vld [vmem:[#allocation8_spill] sm:$0xff]  ;;  %v6860_v48 = vor.u32 %v7595_v63, %v6859_v5  ;;  %v10641_v63 = vld [vmem:[#allocation13_spill] sm:$0xff] }
 0x1b5   : > { %10635 = vst [vmem:[#allocation49_spill] sm:$0xff] %v8811_v20  ;;  %v1949_v6 = vadd.f32 %v1948_v55, %v1859_v38  ;;  %v10640_v5 = vld [vmem:[#allocation12_spill] sm:$0xff] }
 0x1b6   : > { %v2125_v9 = vadd.f32 %v2124_v62, %v2036_v50  ;;  %2384 = vmatpush.bf16.msra.mxu2 %v6860_v48 }
 0x1b8   : > { %v3045_v41 = vmul.f32 0.2, %v2125_v9  ;;  %vm2917_vm0 = vcmp.ge.f32.partialorder %v2125_v9, 0.0 }
 0x1ba   : > { %v3173_v23 = vsel %vm2917_vm0, %v2125_v9, %v3045_v41 }
 0x1bb   : > { %v2037_v18 = vpop.f32.mrf.mxu2  ;;  %v2126_v49 = vpop.f32.mrf.mxu3 }
 0x1bc   : > { %v2038_v60 = vadd.f32 %v2037_v18, %v1949_v6  ;;  %v1862_v17 = vpop.f32.mrf.mxu0  ;;  %v1951_v54 = vpop.f32.mrf.mxu1 }
 0x1bd   : > { %v1952_v53 = vadd.f32 %v1951_v54, %v1862_v17  ;;  %v6987_v54 = vld [vmem:[%s10451_s1 + $0x3a8] sm:$0xf] }
 0x1be   : > { %v2127_v40 = vadd.f32 %v2126_v49, %v2038_v60  ;;  %1990 = vmatmul.bf16.gmra.mxu1 %v8422_v34  ;;  %v6988_v52 = vor.u32 %v7627_v4, %v6987_v54  ;;  %v10642_v54 = vld [vmem:[#allocation14_spill] sm:$0xff]  ;;  %v6539_v4 = vld [vmem:[%s10451_s1 + $0x28] sm:$0xf] }
 0x1bf   : > { %1901 = vmatmul.bf16.gmra.mxu0 %v8420_v19 }
 0x1c0   : > { %vm2921_vm1 = vcmp.ge.f32.partialorder %v2127_v40, 0.0  ;;  %v3049_v36 = vmul.f32 0.2, %v2127_v40  ;;  %2079 = vmatmul.bf16.gmra.mxu2 %v10636_v8  ;;  %2168 = vmatmul.bf16.gmra.mxu3 %v10637_v7 }
 0x1c1   : > { %2473 = vmatpush.bf16.msra.mxu3 %v6988_v52 }
 0x1c2   : > { %v3177_v21 = vsel %vm2921_vm1, %v2127_v40, %v3049_v36  ;;  %v10639_v36 = vld [vmem:[#allocation11_spill] sm:$0xff] }
 0x1c3   : > { %v8829_v50 = vpack.c.bf16 %v3177_v21, %v3173_v23  ;;  %v2040_v62 = vpop.f32.mrf.mxu2  ;;  %v2129_v55 = vpop.f32.mrf.mxu3 }
 0x1c4   : > { %v2041_v38 = vadd.f32 %v2040_v62, %v1952_v53  ;;  %v1864_v6 = vpop.f32.mrf.mxu0  ;;  %v1953_v18 = vpop.f32.mrf.mxu1 }
 0x1c5   : > { %10638 = vst [vmem:[#allocation50_spill] sm:$0xff] %v8829_v50  ;;  %v1954_v49 = vadd.f32 %v1953_v18, %v1864_v6 }
 0x1c6   : > { %v2130_v60 = vadd.f32 %v2129_v55, %v2041_v38 }
 0x1c8   : > { %v3053_v41 = vmul.f32 0.2, %v2130_v60  ;;  %vm2925_vm2 = vcmp.ge.f32.partialorder %v2130_v60, 0.0 }
 0x1ca   : > { %v3181_v23 = vsel %vm2925_vm2, %v2130_v60, %v3053_v41 }
 0x1cb   : > { %v2042_v17 = vpop.f32.mrf.mxu2  ;;  %v2131_v39 = vpop.f32.mrf.mxu3 }
 0x1cc   : > { %v2043_v20 = vadd.f32 %v2042_v17, %v1954_v49  ;;  %v1867_v7 = vpop.f32.mrf.mxu0  ;;  %v1956_v8 = vpop.f32.mrf.mxu1 }
 0x1cd   : > { %v1957_v40 = vadd.f32 %v1956_v8, %v1867_v7  ;;  %v7547_v7 = vld [vmem:[%s10451_s1 + $0x134] sm:$0xf0] }
 0x1ce   : > { %v2132_v9 = vadd.f32 %v2131_v39, %v2043_v20  ;;  %1995 = vmatmul.bf16.gmra.mxu1 %v10640_v5  ;;  %v7515_v39 = vld [vmem:[%s10451_s1 + $0x34] sm:$0xf0]  ;;  %v6667_v20 = vld [vmem:[%s10451_s1 + $0x128] sm:$0xf] }
 0x1cf   : > { %1906 = vmatmul.bf16.gmra.mxu0 %v10639_v36  ;;  %v6540_v8 = vor.u32 %v7515_v39, %v6539_v4  ;;  %v6668_v52 = vor.u32 %v7547_v7, %v6667_v20  ;;  %v10646_v20 = vld [vmem:[#allocation18_spill] sm:$0xff]  ;;  %v7591_v7 = vld [vmem:[%s10451_s1 + $0x294] sm:$0xf0] }
 0x1d0   : > { %vm2929_vm3 = vcmp.ge.f32.partialorder %v2132_v9, 0.0  ;;  %v3057_v53 = vmul.f32 0.2, %v2132_v9  ;;  %2084 = vmatmul.bf16.gmra.mxu2 %v10641_v63  ;;  %2173 = vmatmul.bf16.gmra.mxu3 %v10642_v54 }
 0x1d1   : > { %2210 = vmatpush.bf16.msra.mxu0 %v6540_v8  ;;  %2299 = vmatpush.bf16.msra.mxu1 %v6668_v52  ;;  %v6843_v8 = vld [vmem:[%s10451_s1 + $0x288] sm:$0xf] }
 0x1d2   : > { %v3185_v21 = vsel %vm2929_vm3, %v2132_v9, %v3057_v53  ;;  %v10644_v9 = vld [vmem:[#allocation16_spill] sm:$0xff]  ;;  %v10645_v53 = vld [vmem:[#allocation17_spill] sm:$0xff] }
 0x1d3   : > { %v2045_v48 = vpop.f32.mrf.mxu2  ;;  %v8847_v62 = vpack.c.bf16 %v3185_v21, %v3181_v23  ;;  %v2134_v55 = vpop.f32.mrf.mxu3  ;;  %v6844_v23 = vor.u32 %v7591_v7, %v6843_v8 }
 0x1d4   : > { %v2046_v38 = vadd.f32 %v2045_v48, %v1957_v40  ;;  %v1869_v6 = vpop.f32.mrf.mxu0  ;;  %v1958_v18 = vpop.f32.mrf.mxu1 }
 0x1d5   : > { %10643 = vst [vmem:[#allocation51_spill] sm:$0xff] %v8847_v62  ;;  %v1959_v17 = vadd.f32 %v1958_v18, %v1869_v6  ;;  %2385 = vmatpush.bf16.msra.mxu2 %v6844_v23 }
 0x1d6   : > { %v2135_v49 = vadd.f32 %v2134_v55, %v2046_v38 }
 0x1d8   : > { %v3061_v5 = vmul.f32 0.2, %v2135_v49  ;;  %vm2933_vm4 = vcmp.ge.f32.partialorder %v2135_v49, 0.0 }
 0x1da   : > { %v3189_v48 = vsel %vm2933_vm4, %v2135_v49, %v3061_v5  ;;  %v10649_v49 = vld [vmem:[#allocation21_spill] sm:$0xff] }
 0x1db   : > { %v2047_v50 = vpop.f32.mrf.mxu2  ;;  %v2136_v39 = vpop.f32.mrf.mxu3 }
 0x1dc   : > { %v2048_v4 = vadd.f32 %v2047_v50, %v1959_v17  ;;  %v1872_v54 = vpop.f32.mrf.mxu0  ;;  %v1961_v63 = vpop.f32.mrf.mxu1  ;;  %v10647_v50 = vld [vmem:[#allocation19_spill] sm:$0xff] }
 0x1dd   : > { %v1962_v41 = vadd.f32 %v1961_v63, %v1872_v54  ;;  %v6971_v63 = vld [vmem:[%s10451_s1 + $0x388] sm:$0xf]  ;;  %v7623_v54 = vld [vmem:[%s10451_s1 + $0x394] sm:$0xf0] }
 0x1de   : > { %v2137_v60 = vadd.f32 %v2136_v39, %v2048_v4  ;;  %2000 = vmatmul.bf16.gmra.mxu1 %v10645_v53  ;;  %v6972_v21 = vor.u32 %v7623_v54, %v6971_v63  ;;  %v10652_v63 = vld [vmem:[#allocation24_spill] sm:$0xff] }
 0x1df   : > { %1911 = vmatmul.bf16.gmra.mxu0 %v10644_v9 }
 0x1e0   : > { %vm2937_vm5 = vcmp.ge.f32.partialorder %v2137_v60, 0.0  ;;  %v3065_v40 = vmul.f32 0.2, %v2137_v60  ;;  %2089 = vmatmul.bf16.gmra.mxu2 %v10646_v20  ;;  %2178 = vmatmul.bf16.gmra.mxu3 %v10647_v50 }
 0x1e1   : > { %2474 = vmatpush.bf16.msra.mxu3 %v6972_v21 }
 0x1e2   : > { %v3193_v52 = vsel %vm2937_vm5, %v2137_v60, %v3065_v40  ;;  %v10651_v40 = vld [vmem:[#allocation23_spill] sm:$0xff] }
 0x1e3   : > { %v2050_v38 = vpop.f32.mrf.mxu2  ;;  %v8865_v55 = vpack.c.bf16 %v3193_v52, %v3189_v48  ;;  %v2139_v18 = vpop.f32.mrf.mxu3 }
 0x1e4   : > { %v2051_v6 = vadd.f32 %v2050_v38, %v1962_v41  ;;  %v1874_v17 = vpop.f32.mrf.mxu0  ;;  %v1963_v4 = vpop.f32.mrf.mxu1  ;;  %v10650_v41 = vld [vmem:[#allocation22_spill] sm:$0xff] }
 0x1e5   : > { %10648 = vst [vmem:[#allocation52_spill] sm:$0xff] %v8865_v55  ;;  %v1964_v62 = vadd.f32 %v1963_v4, %v1874_v17 }
 0x1e6   : > { %v2140_v39 = vadd.f32 %v2139_v18, %v2051_v6 }
 0x1e8   : > { %v3069_v8 = vmul.f32 0.2, %v2140_v39  ;;  %vm2941_vm6 = vcmp.ge.f32.partialorder %v2140_v39, 0.0 }
 0x1eb   : > { %v2052_v50 = vpop.f32.mrf.mxu2  ;;  %v2141_v53 = vpop.f32.mrf.mxu3 }
 0x1ec   : > { %v2053_v20 = vadd.f32 %v2052_v50, %v1964_v62  ;;  %v1877_v9 = vpop.f32.mrf.mxu0  ;;  %v1966_v36 = vpop.f32.mrf.mxu1  ;;  %v6523_v62 = vld [vmem:[%s10451_s1 + $0x8] sm:$0xf]  ;;  %v3197_v50 = vsel %vm2941_vm6, %v2140_v39, %v3069_v8 }
 0x1ed   : > { %v1967_v5 = vadd.f32 %v1966_v36, %v1877_v9  ;;  %v6651_v36 = vld [vmem:[%s10451_s1 + $0x108] sm:$0xf] }
 0x1ee   : > { %v2142_v7 = vadd.f32 %v2141_v53, %v2053_v20  ;;  %2005 = vmatmul.bf16.gmra.mxu1 %v10650_v41  ;;  %v7511_v53 = vld [vmem:[%s10451_s1 + $0x14] sm:$0xf0] }
 0x1ef   : > { %1916 = vmatmul.bf16.gmra.mxu0 %v10649_v49  ;;  %v6524_v9 = vor.u32 %v7511_v53, %v6523_v62  ;;  %v7543_v20 = vld [vmem:[%s10451_s1 + $0x114] sm:$0xf0] }
 0x1f0   : > { %vm2945_vm7 = vcmp.ge.f32.partialorder %v2142_v7, 0.0  ;;  %v3073_v60 = vmul.f32 0.2, %v2142_v7  ;;  %2094 = vmatmul.bf16.gmra.mxu2 %v10651_v40  ;;  %2183 = vmatmul.bf16.gmra.mxu3 %v10652_v63  ;;  %v6652_v21 = vor.u32 %v7543_v20, %v6651_v36  ;;  %v7587_v36 = vld [vmem:[%s10451_s1 + $0x274] sm:$0xf0]  ;;  %v10655_v20 = vld [vmem:[#allocation27_spill] sm:$0xff] }
 0x1f1   : > { %2211 = vmatpush.bf16.msra.mxu0 %v6524_v9 }
 0x1f2   : > { %v3201_v54 = vsel %vm2945_vm7, %v2142_v7, %v3073_v60  ;;  %2300 = vmatpush.bf16.msra.mxu1 %v6652_v21  ;;  %v10654_v60 = vld [vmem:[#allocation26_spill] sm:$0xff] }
 0x1f3   : > { %v2055_v23 = vpop.f32.mrf.mxu2  ;;  %v8883_v48 = vpack.c.bf16 %v3201_v54, %v3197_v50  ;;  %v2144_v38 = vpop.f32.mrf.mxu3  ;;  %v10656_v50 = vld [vmem:[#allocation28_spill] sm:$0xff]  ;;  %v10657_v54 = vld [vmem:[#allocation29_spill] sm:$0xff] }
 0x1f4   : > { %v2056_v52 = vadd.f32 %v2055_v23, %v1967_v5  ;;  %v1879_v6 = vpop.f32.mrf.mxu0  ;;  %v1968_v18 = vpop.f32.mrf.mxu1  ;;  %v6827_v5 = vld [vmem:[%s10451_s1 + $0x268] sm:$0xf] }
 0x1f5   : > { %10653 = vst [vmem:[#allocation21_spill] sm:$0xff] %v8883_v48  ;;  %v1969_v4 = vadd.f32 %v1968_v18, %v1879_v6  ;;  %v6811_v6 = vld [vmem:[%s10451_s1 + $0x248] sm:$0xf]  ;;  %v7583_v18 = vld [vmem:[%s10451_s1 + $0x254] sm:$0xf0] }
 0x1f6   : > { %v2145_v17 = vadd.f32 %v2144_v38, %v2056_v52 }
 0x1f8   : > { %vm2949_vm8 = vcmp.ge.f32.partialorder %v2145_v17, 0.0  ;;  %v3077_v39 = vmul.f32 0.2, %v2145_v17 }
 0x1fa   : > { %v3205_v21 = vsel %vm2949_vm8, %v2145_v17, %v3077_v39  ;;  %v6812_v39 = vor.u32 %v7583_v18, %v6811_v6  ;;  %v6779_v18 = vld [vmem:[%s10451_s1 + $0x208] sm:$0xf] }
 0x1fb   : > { %v2057_v55 = vpop.f32.mrf.mxu2  ;;  %v2146_v53 = vpop.f32.mrf.mxu3 }
 0x1fc   : > { %v2058_v62 = vadd.f32 %v2057_v55, %v1969_v4  ;;  %v1882_v63 = vpop.f32.mrf.mxu0  ;;  %v1971_v40 = vpop.f32.mrf.mxu1  ;;  %v6955_v55 = vld [vmem:[%s10451_s1 + $0x368] sm:$0xf] }
 0x1fd   : > { %v1972_v7 = vadd.f32 %v1971_v40, %v1882_v63  ;;  %v6828_v40 = vor.u32 %v7587_v36, %v6827_v5  ;;  %v7619_v63 = vld [vmem:[%s10451_s1 + $0x374] sm:$0xf0]  ;;  %v6939_v4 = vld [vmem:[%s10451_s1 + $0x348] sm:$0xf] }
 0x1fe   : > { %v2147_v8 = vadd.f32 %v2146_v53, %v2058_v62  ;;  %2010 = vmatmul.bf16.gmra.mxu1 %v10655_v20  ;;  %v6956_v23 = vor.u32 %v7619_v63, %v6955_v55  ;;  %v6795_v63 = vld [vmem:[%s10451_s1 + $0x228] sm:$0xf] }
 0x1ff   : > { %1921 = vmatmul.bf16.gmra.mxu0 %v10654_v60  ;;  %2386 = vmatpush.bf16.msra.mxu2 %v6828_v40 }
 0x200   : > { %vm2953_vm9 = vcmp.ge.f32.partialorder %v2147_v8, 0.0  ;;  %v3081_v9 = vmul.f32 0.2, %v2147_v8  ;;  %2099 = vmatmul.bf16.gmra.mxu2 %v10656_v50  ;;  %2188 = vmatmul.bf16.gmra.mxu3 %v10657_v54 }
 0x201   : > { %2475 = vmatpush.bf16.msra.mxu3 %v6956_v23  ;;  %v6923_v23 = vld [vmem:[%s10451_s1 + $0x328] sm:$0xf] }
 0x202   : > { %v3209_v52 = vsel %vm2953_vm9, %v2147_v8, %v3081_v9  ;;  %v7615_v8 = vld [vmem:[%s10451_s1 + $0x354] sm:$0xf0] }
 0x203   : > { %v2060_v38 = vpop.f32.mrf.mxu2  ;;  %v8911_v62 = vpack.c.bf16 %v3209_v52, %v3205_v21  ;;  %v2149_v5 = vpop.f32.mrf.mxu3  ;;  %v6940_v55 = vor.u32 %v7615_v8, %v6939_v4  ;;  %2387 = vmatpush.bf16.msra.mxu2 %v6812_v39  ;;  %v7611_v52 = vld [vmem:[%s10451_s1 + $0x334] sm:$0xf0] }
 0x204   : > { %v2061_v53 = vadd.f32 %v2060_v38, %v1972_v7  ;;  %v1884_v17 = vpop.f32.mrf.mxu0  ;;  %v1973_v36 = vpop.f32.mrf.mxu1  ;;  %v7579_v7 = vld [vmem:[%s10451_s1 + $0x234] sm:$0xf0]  ;;  %v6924_v38 = vor.u32 %v7611_v52, %v6923_v23 }
 0x205   : > { %10658 = vst [vmem:[#allocation22_spill] sm:$0xff] %v8911_v62  ;;  %v1974_v40 = vadd.f32 %v1973_v36, %v1884_v17  ;;  %2476 = vmatpush.bf16.msra.mxu3 %v6940_v55  ;;  %v6796_v21 = vor.u32 %v7579_v7, %v6795_v63  ;;  %v7575_v4 = vld [vmem:[%s10451_s1 + $0x214] sm:$0xf0] }
 0x206   : > { %v2150_v9 = vadd.f32 %v2149_v5, %v2061_v53  ;;  %v6907_v53 = vld [vmem:[%s10451_s1 + $0x308] sm:$0xf]  ;;  %v6780_v8 = vor.u32 %v7575_v4, %v6779_v18  ;;  %v7607_v36 = vld [vmem:[%s10451_s1 + $0x314] sm:$0xf0]  ;;  %v6637_v18 = vld [vmem:[%s10451_s1 + $0xf8] sm:$0xf0] }
 0x207   : > { %2388 = vmatpush.bf16.msra.mxu2 %v6796_v21  ;;  %v6908_v63 = vor.u32 %v7607_v36, %v6907_v53  ;;  %v7569_v4 = vld [vmem:[%s10451_s1 + $0x1ec] sm:$0xf] }
 0x208   : > { %v3085_v7 = vmul.f32 0.2, %v2150_v9  ;;  %vm2957_vm10 = vcmp.ge.f32.partialorder %v2150_v9, 0.0 }
 0x209   : > { %2477 = vmatpush.bf16.msra.mxu3 %v6924_v38  ;;  %v10660_v38 = vld [vmem:[#allocation34_spill] sm:$0xff] }
 0x20b   : > { %v2062_v6 = vpop.f32.mrf.mxu2  ;;  %v2151_v17 = vpop.f32.mrf.mxu3  ;;  %2389 = vmatpush.bf16.msra.mxu2 %v6780_v8 }
 0x20c   : > { %v2063_v5 = vadd.f32 %v2062_v6, %v1974_v40  ;;  %v1887_v39 = vpop.f32.mrf.mxu0  ;;  %v1976_v55 = vpop.f32.mrf.mxu1  ;;  %v10659_v40 = vld [vmem:[#allocation33_spill] sm:$0xff]  ;;  %v7537_v6 = vld [vmem:[%s10451_s1 + $0xec] sm:$0xf] }
 0x20d   : > { %v1977_v21 = vadd.f32 %v1976_v55, %v1887_v39  ;;  %2478 = vmatpush.bf16.msra.mxu3 %v6908_v63  ;;  %v6640_v53 = vor.u32 %v7537_v6, %v6637_v18 }
 0x20e   : > { %v2152_v23 = vadd.f32 %v2151_v17, %v2063_v5  ;;  %2015 = vmatmul.bf16.gmra.mxu1 %v8626_v51  ;;  %v6765_v5 = vld [vmem:[%s10451_s1 + $0x1f8] sm:$0xf0]  ;;  %v3213_v17 = vsel %vm2957_vm10, %v2150_v9, %v3085_v7 }
 0x20f   : > { %1926 = vmatmul.bf16.gmra.mxu0 %v8615_v61  ;;  %v6768_v36 = vor.u32 %v7569_v4, %v6765_v5  ;;  %v10664_v4 = vld [vmem:[#allocation38_spill] sm:$0xff] }
 0x210   : > { %vm2961_vm11 = vcmp.ge.f32.partialorder %v2152_v23, 0.0  ;;  %v3089_v52 = vmul.f32 0.2, %v2152_v23  ;;  %2104 = vmatmul.bf16.gmra.mxu2 %v10659_v40  ;;  %2193 = vmatmul.bf16.gmra.mxu3 %v10660_v38 }
 0x211   : > { %2560 = vmatpush.bf16.msrb.mxu0 %v6640_v53  ;;  %2649 = vmatpush.bf16.msrb.mxu1 %v6768_v36 }
 0x212   : > { %v3217_v39 = vsel %vm2961_vm11, %v2152_v23, %v3089_v52  ;;  %v10662_v23 = vld [vmem:[#allocation36_spill] sm:$0xff]  ;;  %v10663_v52 = vld [vmem:[#allocation37_spill] sm:$0xff] }
 0x213   : > { %v2065_v8 = vpop.f32.mrf.mxu2  ;;  %v8956_v55 = vpack.c.bf16 %v3217_v39, %v3213_v17  ;;  %v2154_v62 = vpop.f32.mrf.mxu3 }
 0x214   : > { %v2066_v63 = vadd.f32 %v2065_v8, %v1977_v21  ;;  %v1889_v48 = vpop.f32.mrf.mxu0  ;;  %v1978_v38 = vpop.f32.mrf.mxu1 }
 0x215   : > { %10661 = vst [vmem:[#allocation53_spill] sm:$0xff] %v8956_v55  ;;  %v1979_v51 = vadd.f32 %v1978_v38, %v1889_v48 }
 0x216   : > { %v2155_v40 = vadd.f32 %v2154_v62, %v2066_v63 }
 0x218   : > { %v3093_v20 = vmul.f32 0.2, %v2155_v40  ;;  %vm2965_vm12 = vcmp.ge.f32.partialorder %v2155_v40, 0.0 }
 0x21a   : > { %v3221_v48 = vsel %vm2965_vm12, %v2155_v40, %v3093_v20  ;;  %v10666_v40 = vld [vmem:[#allocation4_spill] sm:$0xff] }
 0x21b   : > { %v2067_v61 = vpop.f32.mrf.mxu2  ;;  %v2156_v18 = vpop.f32.mrf.mxu3 }
 0x21c   : > { %v2068_v6 = vadd.f32 %v2067_v61, %v1979_v51  ;;  %v1892_v54 = vpop.f32.mrf.mxu0  ;;  %v1981_v50 = vpop.f32.mrf.mxu1 }
 0x21d   : > { %v1982_v7 = vadd.f32 %v1981_v50, %v1892_v54 }
 0x21e   : > { %v2157_v9 = vadd.f32 %v2156_v18, %v2068_v6  ;;  %2020 = vmatmul.bf16.gmra.mxu1 %v10663_v52 }
 0x21f   : > { %1931 = vmatmul.bf16.gmra.mxu0 %v10662_v23 }
 0x220   : > { %vm2969_vm13 = vcmp.ge.f32.partialorder %v2157_v9, 0.0  ;;  %v3097_v21 = vmul.f32 0.2, %v2157_v9  ;;  %2109 = vmatmul.bf16.gmra.mxu2 %v10664_v4  ;;  %2198 = vmatmul.bf16.gmra.mxu3 %v8667_v37 }
 0x222   : > { %v3225_v62 = vsel %vm2969_vm13, %v2157_v9, %v3097_v21  ;;  %v10667_v9 = vld [vmem:[#allocation5_spill] sm:$0xff] }
 0x223   : > { %v2070_v61 = vpop.f32.mrf.mxu2  ;;  %v8962_v51 = vpack.c.bf16 %v3225_v62, %v3221_v48  ;;  %v2159_v53 = vpop.f32.mrf.mxu3  ;;  %v6621_v21 = vld [vmem:[%s10451_s1 + $0xd8] sm:$0xf0]  ;;  %v7565_v48 = vld [vmem:[%s10451_s1 + $0x1cc] sm:$0xf] }
 0x224   : > { %v2071_v38 = vadd.f32 %v2070_v61, %v1982_v7  ;;  %v1894_v5 = vpop.f32.mrf.mxu0  ;;  %v1983_v50 = vpop.f32.mrf.mxu1  ;;  %v7533_v7 = vld [vmem:[%s10451_s1 + $0xcc] sm:$0xf]  ;;  %v6749_v61 = vld [vmem:[%s10451_s1 + $0x1d8] sm:$0xf0] }
 0x225   : > { %10665 = vst [vmem:[#allocation36_spill] sm:$0xff] %v8962_v51  ;;  %v1984_v17 = vadd.f32 %v1983_v50, %v1894_v5  ;;  %v6624_v62 = vor.u32 %v7533_v7, %v6621_v21  ;;  %v6752_v50 = vor.u32 %v7565_v48, %v6749_v61 }
 0x226   : > { %v2160_v54 = vadd.f32 %v2159_v53, %v2071_v38 }
 0x227   : > { %2561 = vmatpush.bf16.msrb.mxu0 %v6624_v62  ;;  %2650 = vmatpush.bf16.msrb.mxu1 %v6752_v50 }
 0x228   : > { %v3101_v18 = vmul.f32 0.2, %v2160_v54  ;;  %vm2973_vm14 = vcmp.ge.f32.partialorder %v2160_v54, 0.0 }
 0x22a   : > { %v3229_v38 = vsel %vm2973_vm14, %v2160_v54, %v3101_v18 }
 0x22b   : > { %v2072_v39 = vpop.f32.mrf.mxu2  ;;  %v2161_v36 = vpop.f32.mrf.mxu3 }
 0x22c   : > { %v2073_v8 = vadd.f32 %v2072_v39, %v1984_v17  ;;  %v1897_v63 = vpop.f32.mrf.mxu0  ;;  %v1986_v6 = vpop.f32.mrf.mxu1 }
 0x22d   : > { %v1987_v4 = vadd.f32 %v1986_v6, %v1897_v63 }
 0x22e   : > { %v2162_v55 = vadd.f32 %v2161_v36, %v2073_v8  ;;  %2301 = vmatmul.bf16.vlgmr.msra.gmra.mxu1 %v8158_v47 }
 0x22f   : > { %2212 = vmatmul.bf16.vlgmr.msra.gmra.mxu0 %v8154_v43 }
 0x230   : > { %vm2977_vm15 = vcmp.ge.f32.partialorder %v2162_v55, 0.0  ;;  %v3105_v20 = vmul.f32 0.2, %v2162_v55  ;;  %2390 = vmatmul.bf16.vlgmr.msra.gmra.mxu2 %v10666_v40  ;;  %2479 = vmatmul.bf16.vlgmr.msra.gmra.mxu3 %v10667_v9 }
 0x232   : > { %v3233_v53 = vsel %vm2977_vm15, %v2162_v55, %v3105_v20 }
 0x233   : > { %v2075_v5 = vpop.f32.mrf.mxu2  ;;  %v8980_v17 = vpack.c.bf16 %v3233_v53, %v3229_v38  ;;  %v2164_v8 = vpop.f32.mrf.mxu3 }
 0x234   : > { %v2076_v39 = vadd.f32 %v2075_v5, %v1987_v4  ;;  %v1899_v36 = vpop.f32.mrf.mxu0  ;;  %v1988_v63 = vpop.f32.mrf.mxu1 }
 0x235   : > { %10668 = vst [vmem:[#allocation37_spill] sm:$0xff] %v8980_v17  ;;  %v1989_v51 = vadd.f32 %v1988_v63, %v1899_v36 }
 0x236   : > { %v2165_v6 = vadd.f32 %v2164_v8, %v2076_v39 }
 0x238   : > { %v3109_v43 = vmul.f32 0.2, %v2165_v6  ;;  %vm2981_vm0 = vcmp.ge.f32.partialorder %v2165_v6, 0.0 }
 0x23a   : > { %v3237_v18 = vsel %vm2981_vm0, %v2165_v6, %v3109_v43  ;;  %v7529_v6 = vld [vmem:[%s10451_s1 + $0xac] sm:$0xf] }
 0x23b   : > { %v2077_v9 = vpop.f32.mrf.mxu2  ;;  %v2166_v21 = vpop.f32.mrf.mxu3 }
 0x23c   : > { %v2078_v7 = vadd.f32 %v2077_v9, %v1989_v51  ;;  %v1902_v40 = vpop.f32.mrf.mxu0  ;;  %v1991_v47 = vpop.f32.mrf.mxu1 }
 0x23d   : > { %v1992_v55 = vadd.f32 %v1991_v47, %v1902_v40 }
 0x23e   : > { %v2167_v54 = vadd.f32 %v2166_v21, %v2078_v7  ;;  %2306 = vmatmul.bf16.gmra.mxu1 %v8190_v1  ;;  %v6605_v21 = vld [vmem:[%s10451_s1 + $0xb8] sm:$0xf0] }
 0x23f   : > { %2217 = vmatmul.bf16.gmra.mxu0 %v8188_v0 }
 0x240   : > { %vm2985_vm1 = vcmp.ge.f32.partialorder %v2167_v54, 0.0  ;;  %v3113_v4 = vmul.f32 0.2, %v2167_v54  ;;  %2395 = vmatmul.bf16.gmra.mxu2 %v8192_v2  ;;  %2484 = vmatmul.bf16.gmra.mxu3 %v8194_v3 }
 0x242   : > { %v3241_v20 = vsel %vm2985_vm1, %v2167_v54, %v3113_v4  ;;  %v7561_v54 = vld [vmem:[%s10451_s1 + $0x1ac] sm:$0xf]  ;;  %v6733_v4 = vld [vmem:[%s10451_s1 + $0x1b8] sm:$0xf0] }
 0x243   : > { %v2080_v51 = vpop.f32.mrf.mxu2  ;;  %v8986_v9 = vpack.c.bf16 %v3241_v20, %v3237_v18  ;;  %v2169_v62 = vpop.f32.mrf.mxu3 }
 0x244   : > { %v2081_v48 = vadd.f32 %v2080_v51, %v1992_v55  ;;  %v1904_v61 = vpop.f32.mrf.mxu0  ;;  %v1993_v47 = vpop.f32.mrf.mxu1  ;;  %v6608_v55 = vor.u32 %v7529_v6, %v6605_v21 }
 0x245   : > { %10669 = vst [vmem:[#allocation54_spill] sm:$0xff] %v8986_v9  ;;  %v1994_v38 = vadd.f32 %v1993_v47, %v1904_v61 }
 0x246   : > { %v2170_v40 = vadd.f32 %v2169_v62, %v2081_v48  ;;  %v6736_v48 = vor.u32 %v7561_v54, %v6733_v4  ;;  %2562 = vmatpush.bf16.msrb.mxu0 %v6608_v55 }
 0x248   : > { %v3117_v36 = vmul.f32 0.2, %v2170_v40  ;;  %vm2989_vm2 = vcmp.ge.f32.partialorder %v2170_v40, 0.0  ;;  %2651 = vmatpush.bf16.msrb.mxu1 %v6736_v48 }
 0x24a   : > { %v3245_v18 = vsel %vm2989_vm2, %v2170_v40, %v3117_v36 }
 0x24b   : > { %v2082_v53 = vpop.f32.mrf.mxu2  ;;  %v2171_v50 = vpop.f32.mrf.mxu3 }
 0x24c   : > { %v2083_v5 = vadd.f32 %v2082_v53, %v1994_v38  ;;  %v1907_v39 = vpop.f32.mrf.mxu0  ;;  %v1996_v8 = vpop.f32.mrf.mxu1 }
 0x24d   : > { %v1997_v7 = vadd.f32 %v1996_v8, %v1907_v39 }
 0x24e   : > { %v2172_v63 = vadd.f32 %v2171_v50, %v2083_v5  ;;  %2311 = vmatmul.bf16.gmra.mxu1 %v8210_v13 }
 0x24f   : > { %2222 = vmatmul.bf16.gmra.mxu0 %v8208_v12 }
 0x250   : > { %vm2993_vm3 = vcmp.ge.f32.partialorder %v2172_v63, 0.0  ;;  %v3121_v43 = vmul.f32 0.2, %v2172_v63  ;;  %2400 = vmatmul.bf16.gmra.mxu2 %v8212_v14  ;;  %2489 = vmatmul.bf16.gmra.mxu3 %v8214_v15 }
 0x252   : > { %v3249_v20 = vsel %vm2993_vm3, %v2172_v63, %v3121_v43 }
 0x253   : > { %v2085_v51 = vpop.f32.mrf.mxu2  ;;  %v9004_v62 = vpack.c.bf16 %v3249_v20, %v3245_v18  ;;  %v2174_v47 = vpop.f32.mrf.mxu3 }
 0x254   : > { %v2086_v61 = vadd.f32 %v2085_v51, %v1997_v7  ;;  %v1909_v38 = vpop.f32.mrf.mxu0  ;;  %v1998_v53 = vpop.f32.mrf.mxu1 }
 0x255   : > { %10670 = vst [vmem:[#allocation55_spill] sm:$0xff] %v9004_v62  ;;  %v1999_v50 = vadd.f32 %v1998_v53, %v1909_v38 }
 0x256   : > { %v2175_v5 = vadd.f32 %v2174_v47, %v2086_v61 }
 0x258   : > { %v3125_v17 = vmul.f32 0.2, %v2175_v5  ;;  %vm2997_vm4 = vcmp.ge.f32.partialorder %v2175_v5, 0.0 }
 0x25a   : > { %v3253_v7 = vsel %vm2997_vm4, %v2175_v5, %v3125_v17  ;;  %v7525_v5 = vld [vmem:[%s10451_s1 + $0x8c] sm:$0xf] }
 0x25b   : > { %v2087_v39 = vpop.f32.mrf.mxu2  ;;  %v2176_v6 = vpop.f32.mrf.mxu3 }
 0x25c   : > { %v2088_v8 = vadd.f32 %v2087_v39, %v1999_v50  ;;  %v1912_v21 = vpop.f32.mrf.mxu0  ;;  %v2001_v9 = vpop.f32.mrf.mxu1 }
 0x25d   : > { %v2002_v36 = vadd.f32 %v2001_v9, %v1912_v21  ;;  %v6589_v21 = vld [vmem:[%s10451_s1 + $0x98] sm:$0xf0] }
 0x25e   : > { %v2177_v40 = vadd.f32 %v2176_v6, %v2088_v8  ;;  %2316 = vmatmul.bf16.gmra.mxu1 %v8242_v31 }
 0x25f   : > { %2227 = vmatmul.bf16.gmra.mxu0 %v8240_v30 }
 0x260   : > { %vm3001_vm5 = vcmp.ge.f32.partialorder %v2177_v40, 0.0  ;;  %v3129_v63 = vmul.f32 0.2, %v2177_v40  ;;  %2405 = vmatmul.bf16.gmra.mxu2 %v8244_v32  ;;  %2494 = vmatmul.bf16.gmra.mxu3 %v8246_v33 }
 0x262   : > { %v3257_v43 = vsel %vm3001_vm5, %v2177_v40, %v3129_v63  ;;  %v7557_v40 = vld [vmem:[%s10451_s1 + $0x18c] sm:$0xf]  ;;  %v6717_v63 = vld [vmem:[%s10451_s1 + $0x198] sm:$0xf0] }
 0x263   : > { %v2090_v54 = vpop.f32.mrf.mxu2  ;;  %v9010_v55 = vpack.c.bf16 %v3257_v43, %v3253_v7  ;;  %v2179_v18 = vpop.f32.mrf.mxu3 }
 0x264   : > { %v2091_v4 = vadd.f32 %v2090_v54, %v2002_v36  ;;  %v1914_v20 = vpop.f32.mrf.mxu0  ;;  %v2003_v9 = vpop.f32.mrf.mxu1  ;;  %v6592_v36 = vor.u32 %v7525_v5, %v6589_v21 }
 0x265   : > { %10671 = vst [vmem:[#allocation56_spill] sm:$0xff] %v9010_v55  ;;  %v2004_v48 = vadd.f32 %v2003_v9, %v1914_v20 }
 0x266   : > { %v2180_v51 = vadd.f32 %v2179_v18, %v2091_v4  ;;  %v6720_v4 = vor.u32 %v7557_v40, %v6717_v63  ;;  %2563 = vmatpush.bf16.msrb.mxu0 %v6592_v36  ;;  %v6893_v40 = vld [vmem:[%s10451_s1 + $0x2f8] sm:$0xf0] }
 0x267   : > { %v7021_v36 = vld [vmem:[%s10451_s1 + $0x3f8] sm:$0xf0] }
 0x268   : > { %v3133_v39 = vmul.f32 0.2, %v2180_v51  ;;  %vm3005_vm6 = vcmp.ge.f32.partialorder %v2180_v51, 0.0  ;;  %2652 = vmatpush.bf16.msrb.mxu1 %v6720_v4 }
 0x26a   : > { %v3261_v7 = vsel %vm3005_vm6, %v2180_v51, %v3133_v39 }
 0x26b   : > { %v2092_v61 = vpop.f32.mrf.mxu2  ;;  %v2181_v38 = vpop.f32.mrf.mxu3 }
 0x26c   : > { %v2093_v47 = vadd.f32 %v2092_v61, %v2004_v48  ;;  %v1917_v53 = vpop.f32.mrf.mxu0  ;;  %v2006_v50 = vpop.f32.mrf.mxu1 }
 0x26d   : > { %v2007_v6 = vadd.f32 %v2006_v50, %v1917_v53 }
 0x26e   : > { %v2182_v8 = vadd.f32 %v2181_v38, %v2093_v47  ;;  %2321 = vmatmul.bf16.gmra.mxu1 %v8262_v44 }
 0x26f   : > { %2232 = vmatmul.bf16.gmra.mxu0 %v8260_v42 }
 0x270   : > { %vm3009_vm7 = vcmp.ge.f32.partialorder %v2182_v8, 0.0  ;;  %v3137_v17 = vmul.f32 0.2, %v2182_v8  ;;  %2410 = vmatmul.bf16.gmra.mxu2 %v8264_v45  ;;  %2499 = vmatmul.bf16.gmra.mxu3 %v8266_v46 }
 0x272   : > { %v3265_v43 = vsel %vm3009_vm7, %v2182_v8, %v3137_v17  ;;  %v10673_v17 = vld [vmem:[#allocation7_spill] sm:$0xff] }
 0x273   : > { %v2095_v54 = vpop.f32.mrf.mxu2  ;;  %v9028_v18 = vpack.c.bf16 %v3265_v43, %v3261_v7  ;;  %v2184_v9 = vpop.f32.mrf.mxu3 }
 0x274   : > { %v2096_v20 = vadd.f32 %v2095_v54, %v2007_v6  ;;  %v1919_v48 = vpop.f32.mrf.mxu0  ;;  %v2008_v61 = vpop.f32.mrf.mxu1  ;;  %v7601_v6 = vld [vmem:[%s10451_s1 + $0x2ec] sm:$0xf] }
 0x275   : > { %10672 = vst [vmem:[#allocation57_spill] sm:$0xff] %v9028_v18  ;;  %v2009_v38 = vadd.f32 %v2008_v61, %v1919_v48  ;;  %v6896_v63 = vor.u32 %v7601_v6, %v6893_v40 }
 0x276   : > { %v2185_v47 = vadd.f32 %v2184_v9, %v2096_v20 }
 0x277   : > { %2738 = vmatpush.bf16.msrb.mxu2 %v6896_v63 }
 0x278   : > { %v3141_v62 = vmul.f32 0.2, %v2185_v47  ;;  %vm3013_vm8 = vcmp.ge.f32.partialorder %v2185_v47, 0.0 }
 0x27a   : > { %v3269_v43 = vsel %vm3013_vm8, %v2185_v47, %v3141_v62 }
 0x27b   : > { %v2097_v53 = vpop.f32.mrf.mxu2  ;;  %v2186_v5 = vpop.f32.mrf.mxu3 }
 0x27c   : > { %v2098_v50 = vadd.f32 %v2097_v53, %v2009_v38  ;;  %v1922_v21 = vpop.f32.mrf.mxu0  ;;  %v2011_v55 = vpop.f32.mrf.mxu1 }
 0x27d   : > { %v2012_v39 = vadd.f32 %v2011_v55, %v1922_v21  ;;  %v7633_v55 = vld [vmem:[%s10451_s1 + $0x3ec] sm:$0xf] }
 0x27e   : > { %v2187_v51 = vadd.f32 %v2186_v5, %v2098_v50  ;;  %2326 = vmatmul.bf16.gmra.mxu1 %v8306_v11  ;;  %v7024_v7 = vor.u32 %v7633_v55, %v7021_v36 }
 0x27f   : > { %2237 = vmatmul.bf16.gmra.mxu0 %v8304_v10 }
 0x280   : > { %vm3017_vm9 = vcmp.ge.f32.partialorder %v2187_v51, 0.0  ;;  %v3145_v8 = vmul.f32 0.2, %v2187_v51  ;;  %2415 = vmatmul.bf16.gmra.mxu2 %v8308_v16  ;;  %2504 = vmatmul.bf16.gmra.mxu3 %v10673_v17 }
 0x281   : > { %2827 = vmatpush.bf16.msrb.mxu3 %v7024_v7 }
 0x282   : > { %v3273_v54 = vsel %vm3017_vm9, %v2187_v51, %v3145_v8  ;;  %v7521_v51 = vld [vmem:[%s10451_s1 + $0x6c] sm:$0xf]  ;;  %v6701_v8 = vld [vmem:[%s10451_s1 + $0x178] sm:$0xf0] }
 0x283   : > { %v2100_v4 = vpop.f32.mrf.mxu2  ;;  %v9046_v20 = vpack.c.bf16 %v3273_v54, %v3269_v43  ;;  %v2189_v48 = vpop.f32.mrf.mxu3 }
 0x284   : > { %v2101_v9 = vadd.f32 %v2100_v4, %v2012_v39  ;;  %v1924_v61 = vpop.f32.mrf.mxu0  ;;  %v2013_v38 = vpop.f32.mrf.mxu1 }
 0x285   : > { %10674 = vst [vmem:[#allocation58_spill] sm:$0xff] %v9046_v20  ;;  %v2014_v50 = vadd.f32 %v2013_v38, %v1924_v61 }
 0x286   : > { %v2190_v53 = vadd.f32 %v2189_v48, %v2101_v9 }
 0x288   : > { %v3149_v6 = vmul.f32 0.2, %v2190_v53  ;;  %vm3021_vm10 = vcmp.ge.f32.partialorder %v2190_v53, 0.0 }
 0x28b   : > { %v2102_v5 = vpop.f32.mrf.mxu2  ;;  %v2191_v18 = vpop.f32.mrf.mxu3 }
 0x28c   : > { %v2103_v21 = vadd.f32 %v2102_v5, %v2014_v50  ;;  %v1927_v17 = vpop.f32.mrf.mxu0  ;;  %v2016_v16 = vpop.f32.mrf.mxu1 }
 0x28d   : > { %v2017_v62 = vadd.f32 %v2016_v16, %v1927_v17  ;;  %v7553_v16 = vld [vmem:[%s10451_s1 + $0x16c] sm:$0xf]  ;;  %v3277_v17 = vsel %vm3021_vm10, %v2190_v53, %v3149_v6 }
 0x28e   : > { %v2192_v40 = vadd.f32 %v2191_v18, %v2103_v21  ;;  %2331 = vmatmul.bf16.gmra.mxu1 %v8326_v27  ;;  %v6573_v18 = vld [vmem:[%s10451_s1 + $0x78] sm:$0xf0]  ;;  %v6704_v63 = vor.u32 %v7553_v16, %v6701_v8 }
 0x28f   : > { %2242 = vmatmul.bf16.gmra.mxu0 %v8324_v26  ;;  %v6576_v39 = vor.u32 %v7521_v51, %v6573_v18  ;;  %v6877_v8 = vld [vmem:[%s10451_s1 + $0x2d8] sm:$0xf0] }
 0x290   : > { %vm3025_vm11 = vcmp.ge.f32.partialorder %v2192_v40, 0.0  ;;  %v3153_v47 = vmul.f32 0.2, %v2192_v40  ;;  %2420 = vmatmul.bf16.gmra.mxu2 %v8328_v28  ;;  %2509 = vmatmul.bf16.gmra.mxu3 %v8330_v29 }
 0x291   : > { %2564 = vmatpush.bf16.msrb.mxu0 %v6576_v39  ;;  %2653 = vmatpush.bf16.msrb.mxu1 %v6704_v63  ;;  %v7597_v39 = vld [vmem:[%s10451_s1 + $0x2cc] sm:$0xf] }
 0x292   : > { %v3281_v55 = vsel %vm3025_vm11, %v2192_v40, %v3153_v47 }
 0x293   : > { %v2105_v36 = vpop.f32.mrf.mxu2  ;;  %v9064_v7 = vpack.c.bf16 %v3281_v55, %v3277_v17  ;;  %v2194_v54 = vpop.f32.mrf.mxu3  ;;  %v7629_v17 = vld [vmem:[%s10451_s1 + $0x3cc] sm:$0xf] }
 0x294   : > { %v2106_v43 = vadd.f32 %v2105_v36, %v2017_v62  ;;  %v1929_v4 = vpop.f32.mrf.mxu0  ;;  %v2018_v9 = vpop.f32.mrf.mxu1 }
 0x295   : > { %10675 = vst [vmem:[#allocation59_spill] sm:$0xff] %v9064_v7  ;;  %v2019_v61 = vadd.f32 %v2018_v9, %v1929_v4  ;;  %v7005_v4 = vld [vmem:[%s10451_s1 + $0x3d8] sm:$0xf0] }
 0x296   : > { %v2195_v48 = vadd.f32 %v2194_v54, %v2106_v43  ;;  %v6880_v54 = vor.u32 %v7597_v39, %v6877_v8  ;;  %v7549_v39 = vld [vmem:[%s10451_s1 + $0x14c] sm:$0xf] }
 0x298   : > { %v3157_v18 = vmul.f32 0.2, %v2195_v48  ;;  %vm3029_vm12 = vcmp.ge.f32.partialorder %v2195_v48, 0.0  ;;  %2739 = vmatpush.bf16.msrb.mxu2 %v6880_v54 }
 0x29a   : > { %v3285_v62 = vsel %vm3029_vm12, %v2195_v48, %v3157_v18  ;;  %v7008_v48 = vor.u32 %v7629_v17, %v7005_v4  ;;  %v6685_v17 = vld [vmem:[%s10451_s1 + $0x158] sm:$0xf0] }
 0x29b   : > { %v2107_v38 = vpop.f32.mrf.mxu2  ;;  %v2196_v5 = vpop.f32.mrf.mxu3  ;;  %v6688_v54 = vor.u32 %v7549_v39, %v6685_v17  ;;  %v10679_v39 = vld [vmem:[#allocation9_spill] sm:$0xff] }
 0x29c   : > { %v2108_v50 = vadd.f32 %v2107_v38, %v2019_v61  ;;  %v1932_v21 = vpop.f32.mrf.mxu0  ;;  %v2021_v51 = vpop.f32.mrf.mxu1  ;;  %2828 = vmatpush.bf16.msrb.mxu3 %v7008_v48  ;;  %v6989_v17 = vld [vmem:[%s10451_s1 + $0x3b8] sm:$0xf0] }
 0x29d   : > { %v2022_v6 = vadd.f32 %v2021_v51, %v1932_v21  ;;  %2654 = vmatpush.bf16.msrb.mxu1 %v6688_v54 }
 0x29e   : > { %v2197_v53 = vadd.f32 %v2196_v5, %v2108_v50  ;;  %2336 = vmatmul.bf16.gmra.mxu1 %v8358_v57 }
 0x29f   : > { %2247 = vmatmul.bf16.gmra.mxu0 %v8356_v56 }
 0x2a0   : > { %vm3033_vm13 = vcmp.ge.f32.partialorder %v2197_v53, 0.0  ;;  %v3161_v40 = vmul.f32 0.2, %v2197_v53  ;;  %2425 = vmatmul.bf16.gmra.mxu2 %v8360_v58  ;;  %2514 = vmatmul.bf16.gmra.mxu3 %v8362_v59 }
 0x2a2   : > { %v3289_v47 = vsel %vm3033_vm13, %v2197_v53, %v3161_v40 }
 0x2a3   : > { %v2110_v16 = vpop.f32.mrf.mxu2  ;;  %v9079_v55 = vpack.c.bf16 %v3289_v47, %v3285_v62  ;;  %v2199_v63 = vpop.f32.mrf.mxu3  ;;  %v7517_v47 = vld [vmem:[%s10451_s1 + $0x4c] sm:$0xf] }
 0x2a4   : > { %v2111_v36 = vadd.f32 %v2110_v16, %v2022_v6  ;;  %v1934_v43 = vpop.f32.mrf.mxu0  ;;  %v2023_v9 = vpop.f32.mrf.mxu1  ;;  %v6557_v16 = vld [vmem:[%s10451_s1 + $0x58] sm:$0xf0] }
 0x2a5   : > { %10676 = vst [vmem:[#allocation60_spill] sm:$0xff] %v9079_v55  ;;  %v2024_v38 = vadd.f32 %v2023_v9, %v1934_v43  ;;  %v6560_v8 = vor.u32 %v7517_v47, %v6557_v16 }
 0x2a6   : > { %v2200_v61 = vadd.f32 %v2199_v63, %v2111_v36 }
 0x2a7   : > { %2565 = vmatpush.bf16.msrb.mxu0 %v6560_v8  ;;  %v6861_v8 = vld [vmem:[%s10451_s1 + $0x2b8] sm:$0xf0] }
 0x2a8   : > { %v3165_v53 = vmul.f32 0.2, %v2200_v61  ;;  %vm3037_vm14 = vcmp.ge.f32.partialorder %v2200_v61, 0.0 }
 0x2aa   : > { %v3293_v36 = vsel %vm3037_vm14, %v2200_v61, %v3165_v53 }
 0x2ab   : > { %v2112_v50 = vpop.f32.mrf.mxu2  ;;  %v2201_v21 = vpop.f32.mrf.mxu3 }
 0x2ac   : > { %v2113_v5 = vadd.f32 %v2112_v50, %v2024_v38  ;;  %v2213_v51 = vpop.f32.mrf.mxu0  ;;  %v2302_v18 = vpop.f32.mrf.mxu1 }
 0x2ad   : > { %v2303_v40 = vadd.f32 %v2302_v18, %v2213_v51 }
 0x2ae   : > { %v2202_v6 = vadd.f32 %v2201_v21, %v2113_v5  ;;  %2341 = vmatmul.bf16.gmra.mxu1 %v8390_v24 }
 0x2af   : > { %2252 = vmatmul.bf16.gmra.mxu0 %v8388_v22 }
 0x2b0   : > { %vm3041_vm15 = vcmp.ge.f32.partialorder %v2202_v6, 0.0  ;;  %v3169_v62 = vmul.f32 0.2, %v2202_v6  ;;  %2430 = vmatmul.bf16.gmra.mxu2 %v8392_v25  ;;  %2519 = vmatmul.bf16.gmra.mxu3 %v8394_v35 }
 0x2b2   : > { %v3297_v63 = vsel %vm3041_vm15, %v2202_v6, %v3169_v62  ;;  %v7593_v62 = vld [vmem:[%s10451_s1 + $0x2ac] sm:$0xf] }
 0x2b3   : > { %v2391_v43 = vpop.f32.mrf.mxu2  ;;  %v9100_v4 = vpack.c.bf16 %v3297_v63, %v3293_v36  ;;  %v2480_v48 = vpop.f32.mrf.mxu3 }
 0x2b4   : > { %v2392_v9 = vadd.f32 %v2391_v43, %v2303_v40  ;;  %v2215_v38 = vpop.f32.mrf.mxu0  ;;  %v2304_v50 = vpop.f32.mrf.mxu1  ;;  %v10678_v40 = vld [vmem:[#allocation8_spill] sm:$0xff]  ;;  %v6864_v43 = vor.u32 %v7593_v62, %v6861_v8  ;;  %v10683_v8 = vld [vmem:[#allocation13_spill] sm:$0xff] }
 0x2b5   : > { %10677 = vst [vmem:[#allocation61_spill] sm:$0xff] %v9100_v4  ;;  %v2305_v21 = vadd.f32 %v2304_v50, %v2215_v38  ;;  %v10682_v62 = vld [vmem:[#allocation12_spill] sm:$0xff] }
 0x2b6   : > { %v2481_v5 = vadd.f32 %v2480_v48, %v2392_v9  ;;  %2740 = vmatpush.bf16.msrb.mxu2 %v6864_v43 }
 0x2b8   : > { %v3046_v7 = vmul.f32 0.2, %v2481_v5  ;;  %vm2918_vm0 = vcmp.ge.f32.partialorder %v2481_v5, 0.0 }
 0x2ba   : > { %v3174_v36 = vsel %vm2918_vm0, %v2481_v5, %v3046_v7 }
 0x2bb   : > { %v2393_v51 = vpop.f32.mrf.mxu2  ;;  %v2482_v47 = vpop.f32.mrf.mxu3 }
 0x2bc   : > { %v2394_v18 = vadd.f32 %v2393_v51, %v2305_v21  ;;  %v2218_v16 = vpop.f32.mrf.mxu0  ;;  %v2307_v55 = vpop.f32.mrf.mxu1 }
 0x2bd   : > { %v2308_v53 = vadd.f32 %v2307_v55, %v2218_v16  ;;  %v7625_v55 = vld [vmem:[%s10451_s1 + $0x3ac] sm:$0xf] }
 0x2be   : > { %v2483_v61 = vadd.f32 %v2482_v47, %v2394_v18  ;;  %2346 = vmatmul.bf16.gmra.mxu1 %v8422_v34  ;;  %v6992_v54 = vor.u32 %v7625_v55, %v6989_v17  ;;  %v10684_v55 = vld [vmem:[#allocation14_spill] sm:$0xff]  ;;  %v7513_v17 = vld [vmem:[%s10451_s1 + $0x2c] sm:$0xf] }
 0x2bf   : > { %2257 = vmatmul.bf16.gmra.mxu0 %v8420_v19 }
 0x2c0   : > { %vm2922_vm1 = vcmp.ge.f32.partialorder %v2483_v61, 0.0  ;;  %v3050_v6 = vmul.f32 0.2, %v2483_v61  ;;  %2435 = vmatmul.bf16.gmra.mxu2 %v10678_v40  ;;  %2524 = vmatmul.bf16.gmra.mxu3 %v10679_v39 }
 0x2c1   : > { %2829 = vmatpush.bf16.msrb.mxu3 %v6992_v54 }
 0x2c2   : > { %v3178_v63 = vsel %vm2922_vm1, %v2483_v61, %v3050_v6  ;;  %v10681_v6 = vld [vmem:[#allocation11_spill] sm:$0xff] }
 0x2c3   : > { %v9118_v9 = vpack.c.bf16 %v3178_v63, %v3174_v36  ;;  %v2396_v48 = vpop.f32.mrf.mxu2  ;;  %v2485_v50 = vpop.f32.mrf.mxu3 }
 0x2c4   : > { %v2397_v38 = vadd.f32 %v2396_v48, %v2308_v53  ;;  %v2220_v21 = vpop.f32.mrf.mxu0  ;;  %v2309_v51 = vpop.f32.mrf.mxu1 }
 0x2c5   : > { %10680 = vst [vmem:[#allocation62_spill] sm:$0xff] %v9118_v9  ;;  %v2310_v47 = vadd.f32 %v2309_v51, %v2220_v21 }
 0x2c6   : > { %v2486_v18 = vadd.f32 %v2485_v50, %v2397_v38 }
 0x2c8   : > { %v3054_v7 = vmul.f32 0.2, %v2486_v18  ;;  %vm2926_vm2 = vcmp.ge.f32.partialorder %v2486_v18, 0.0 }
 0x2ca   : > { %v3182_v36 = vsel %vm2926_vm2, %v2486_v18, %v3054_v7 }
 0x2cb   : > { %v2398_v16 = vpop.f32.mrf.mxu2  ;;  %v2487_v20 = vpop.f32.mrf.mxu3 }
 0x2cc   : > { %v2399_v4 = vadd.f32 %v2398_v16, %v2310_v47  ;;  %v2223_v39 = vpop.f32.mrf.mxu0  ;;  %v2312_v40 = vpop.f32.mrf.mxu1 }
 0x2cd   : > { %v2313_v61 = vadd.f32 %v2312_v40, %v2223_v39  ;;  %v6669_v39 = vld [vmem:[%s10451_s1 + $0x138] sm:$0xf0] }
 0x2ce   : > { %v2488_v5 = vadd.f32 %v2487_v20, %v2399_v4  ;;  %2351 = vmatmul.bf16.gmra.mxu1 %v10682_v62  ;;  %v6541_v20 = vld [vmem:[%s10451_s1 + $0x38] sm:$0xf0]  ;;  %v7545_v4 = vld [vmem:[%s10451_s1 + $0x12c] sm:$0xf] }
 0x2cf   : > { %2262 = vmatmul.bf16.gmra.mxu0 %v10681_v6  ;;  %v6544_v40 = vor.u32 %v7513_v17, %v6541_v20  ;;  %v6672_v54 = vor.u32 %v7545_v4, %v6669_v39  ;;  %v10688_v4 = vld [vmem:[#allocation18_spill] sm:$0xff]  ;;  %v6845_v39 = vld [vmem:[%s10451_s1 + $0x298] sm:$0xf0] }
 0x2d0   : > { %vm2930_vm3 = vcmp.ge.f32.partialorder %v2488_v5, 0.0  ;;  %v3058_v53 = vmul.f32 0.2, %v2488_v5  ;;  %2440 = vmatmul.bf16.gmra.mxu2 %v10683_v8  ;;  %2529 = vmatmul.bf16.gmra.mxu3 %v10684_v55 }
 0x2d1   : > { %2566 = vmatpush.bf16.msrb.mxu0 %v6544_v40  ;;  %2655 = vmatpush.bf16.msrb.mxu1 %v6672_v54  ;;  %v7589_v40 = vld [vmem:[%s10451_s1 + $0x28c] sm:$0xf] }
 0x2d2   : > { %v3186_v63 = vsel %vm2930_vm3, %v2488_v5, %v3058_v53  ;;  %v10686_v5 = vld [vmem:[#allocation16_spill] sm:$0xff]  ;;  %v10687_v53 = vld [vmem:[#allocation17_spill] sm:$0xff] }
 0x2d3   : > { %v2401_v43 = vpop.f32.mrf.mxu2  ;;  %v9136_v48 = vpack.c.bf16 %v3186_v63, %v3182_v36  ;;  %v2490_v50 = vpop.f32.mrf.mxu3  ;;  %v6848_v36 = vor.u32 %v7589_v40, %v6845_v39 }
 0x2d4   : > { %v2402_v38 = vadd.f32 %v2401_v43, %v2313_v61  ;;  %v2225_v21 = vpop.f32.mrf.mxu0  ;;  %v2314_v51 = vpop.f32.mrf.mxu1 }
 0x2d5   : > { %10685 = vst [vmem:[#allocation63_spill] sm:$0xff] %v9136_v48  ;;  %v2315_v16 = vadd.f32 %v2314_v51, %v2225_v21  ;;  %2741 = vmatpush.bf16.msrb.mxu2 %v6848_v36 }
 0x2d6   : > { %v2491_v47 = vadd.f32 %v2490_v50, %v2402_v38 }
 0x2d8   : > { %v3062_v62 = vmul.f32 0.2, %v2491_v47  ;;  %vm2934_vm4 = vcmp.ge.f32.partialorder %v2491_v47, 0.0 }
 0x2da   : > { %v3190_v43 = vsel %vm2934_vm4, %v2491_v47, %v3062_v62 }
 0x2db   : > { %v2403_v9 = vpop.f32.mrf.mxu2  ;;  %v2492_v20 = vpop.f32.mrf.mxu3 }
 0x2dc   : > { %v2404_v17 = vadd.f32 %v2403_v9, %v2315_v16  ;;  %v2228_v55 = vpop.f32.mrf.mxu0  ;;  %v2317_v8 = vpop.f32.mrf.mxu1  ;;  %v10689_v9 = vld [vmem:[#allocation19_spill] sm:$0xff] }
 0x2dd   : > { %v2318_v7 = vadd.f32 %v2317_v8, %v2228_v55  ;;  %v7621_v8 = vld [vmem:[%s10451_s1 + $0x38c] sm:$0xf]  ;;  %v6973_v55 = vld [vmem:[%s10451_s1 + $0x398] sm:$0xf0] }
 0x2de   : > { %v2493_v18 = vadd.f32 %v2492_v20, %v2404_v17  ;;  %2356 = vmatmul.bf16.gmra.mxu1 %v10687_v53  ;;  %v6976_v63 = vor.u32 %v7621_v8, %v6973_v55 }
 0x2df   : > { %2267 = vmatmul.bf16.gmra.mxu0 %v10686_v5 }
 0x2e0   : > { %vm2938_vm5 = vcmp.ge.f32.partialorder %v2493_v18, 0.0  ;;  %v3066_v61 = vmul.f32 0.2, %v2493_v18  ;;  %2445 = vmatmul.bf16.gmra.mxu2 %v10688_v4  ;;  %2534 = vmatmul.bf16.gmra.mxu3 %v10689_v9 }
 0x2e1   : > { %2830 = vmatpush.bf16.msrb.mxu3 %v6976_v63 }
 0x2e2   : > { %v3194_v54 = vsel %vm2938_vm5, %v2493_v18, %v3066_v61  ;;  %v10691_v18 = vld [vmem:[#allocation23_spill] sm:$0xff]  ;;  %v6525_v61 = vld [vmem:[%s10451_s1 + $0x18] sm:$0xf0] }
 0x2e3   : > { %v2406_v38 = vpop.f32.mrf.mxu2  ;;  %v9154_v50 = vpack.c.bf16 %v3194_v54, %v3190_v43  ;;  %v2495_v51 = vpop.f32.mrf.mxu3 }
 0x2e4   : > { %v2407_v21 = vadd.f32 %v2406_v38, %v2318_v7  ;;  %v2230_v16 = vpop.f32.mrf.mxu0  ;;  %v2319_v17 = vpop.f32.mrf.mxu1  ;;  %v10692_v7 = vld [vmem:[#allocation24_spill] sm:$0xff] }
 0x2e5   : > { %10690 = vst [vmem:[#allocation64_spill] sm:$0xff] %v9154_v50  ;;  %v2320_v48 = vadd.f32 %v2319_v17, %v2230_v16 }
 0x2e6   : > { %v2496_v20 = vadd.f32 %v2495_v51, %v2407_v21 }
 0x2e8   : > { %v3070_v40 = vmul.f32 0.2, %v2496_v20  ;;  %vm2942_vm6 = vcmp.ge.f32.partialorder %v2496_v20, 0.0 }
 0x2eb   : > { %v2408_v9 = vpop.f32.mrf.mxu2  ;;  %v2497_v53 = vpop.f32.mrf.mxu3 }
 0x2ec   : > { %v2409_v4 = vadd.f32 %v2408_v9, %v2320_v48  ;;  %v2233_v5 = vpop.f32.mrf.mxu0  ;;  %v2322_v6 = vpop.f32.mrf.mxu1  ;;  %v7509_v48 = vld [vmem:[%s10451_s1 + $0xc] sm:$0xf] }
 0x2ed   : > { %v2323_v62 = vadd.f32 %v2322_v6, %v2233_v5  ;;  %v7541_v6 = vld [vmem:[%s10451_s1 + $0x10c] sm:$0xf]  ;;  %v6528_v5 = vor.u32 %v7509_v48, %v6525_v61 }
 0x2ee   : > { %v2498_v39 = vadd.f32 %v2497_v53, %v2409_v4  ;;  %2361 = vmatmul.bf16.gmra.mxu1 %v10650_v41  ;;  %v6653_v53 = vld [vmem:[%s10451_s1 + $0x118] sm:$0xf0]  ;;  %v3198_v4 = vsel %vm2942_vm6, %v2496_v20, %v3070_v40 }
 0x2ef   : > { %2272 = vmatmul.bf16.gmra.mxu0 %v10649_v49  ;;  %v6656_v55 = vor.u32 %v7541_v6, %v6653_v53  ;;  %v7617_v6 = vld [vmem:[%s10451_s1 + $0x36c] sm:$0xf] }
 0x2f0   : > { %vm2946_vm7 = vcmp.ge.f32.partialorder %v2498_v39, 0.0  ;;  %v3074_v47 = vmul.f32 0.2, %v2498_v39  ;;  %2450 = vmatmul.bf16.gmra.mxu2 %v10691_v18  ;;  %2539 = vmatmul.bf16.gmra.mxu3 %v10692_v7  ;;  %v10694_v53 = vld [vmem:[#allocation27_spill] sm:$0xff] }
 0x2f1   : > { %2567 = vmatpush.bf16.msrb.mxu0 %v6528_v5  ;;  %2656 = vmatpush.bf16.msrb.mxu1 %v6656_v55 }
 0x2f2   : > { %v3202_v9 = vsel %vm2946_vm7, %v2498_v39, %v3074_v47  ;;  %v6829_v47 = vld [vmem:[%s10451_s1 + $0x278] sm:$0xf0] }
 0x2f3   : > { %v2411_v8 = vpop.f32.mrf.mxu2  ;;  %v9172_v36 = vpack.c.bf16 %v3202_v9, %v3198_v4  ;;  %v2500_v43 = vpop.f32.mrf.mxu3  ;;  %v10695_v4 = vld [vmem:[#allocation28_spill] sm:$0xff]  ;;  %v6957_v9 = vld [vmem:[%s10451_s1 + $0x378] sm:$0xf0] }
 0x2f4   : > { %v2412_v63 = vadd.f32 %v2411_v8, %v2323_v62  ;;  %v2235_v54 = vpop.f32.mrf.mxu0  ;;  %v2324_v38 = vpop.f32.mrf.mxu1  ;;  %v7585_v62 = vld [vmem:[%s10451_s1 + $0x26c] sm:$0xf]  ;;  %v10696_v8 = vld [vmem:[#allocation29_spill] sm:$0xff]  ;;  %v6960_v55 = vor.u32 %v7617_v6, %v6957_v9 }
 0x2f5   : > { %10693 = vst [vmem:[#allocation23_spill] sm:$0xff] %v9172_v36  ;;  %v2325_v51 = vadd.f32 %v2324_v38, %v2235_v54  ;;  %v7581_v38 = vld [vmem:[%s10451_s1 + $0x24c] sm:$0xf] }
 0x2f6   : > { %v2501_v21 = vadd.f32 %v2500_v43, %v2412_v63  ;;  %2831 = vmatpush.bf16.msrb.mxu3 %v6960_v55  ;;  %v7609_v9 = vld [vmem:[%s10451_s1 + $0x32c] sm:$0xf] }
 0x2f8   : > { %vm2950_vm8 = vcmp.ge.f32.partialorder %v2501_v21, 0.0  ;;  %v3078_v20 = vmul.f32 0.2, %v2501_v21 }
 0x2fa   : > { %v3206_v63 = vsel %vm2950_vm8, %v2501_v21, %v3078_v20 }
 0x2fb   : > { %v2413_v16 = vpop.f32.mrf.mxu2  ;;  %v2502_v48 = vpop.f32.mrf.mxu3 }
 0x2fc   : > { %v2414_v17 = vadd.f32 %v2413_v16, %v2325_v51  ;;  %v2238_v61 = vpop.f32.mrf.mxu0  ;;  %v2327_v50 = vpop.f32.mrf.mxu1  ;;  %v6813_v51 = vld [vmem:[%s10451_s1 + $0x258] sm:$0xf0]  ;;  %v7613_v16 = vld [vmem:[%s10451_s1 + $0x34c] sm:$0xf] }
 0x2fd   : > { %v2328_v39 = vadd.f32 %v2327_v50, %v2238_v61  ;;  %v6832_v50 = vor.u32 %v7585_v62, %v6829_v47  ;;  %v6816_v20 = vor.u32 %v7581_v38, %v6813_v51  ;;  %v7573_v38 = vld [vmem:[%s10451_s1 + $0x20c] sm:$0xf]  ;;  %v6781_v51 = vld [vmem:[%s10451_s1 + $0x218] sm:$0xf0] }
 0x2fe   : > { %v2503_v40 = vadd.f32 %v2502_v48, %v2414_v17  ;;  %2366 = vmatmul.bf16.gmra.mxu1 %v10694_v53 }
 0x2ff   : > { %2277 = vmatmul.bf16.gmra.mxu0 %v10654_v60  ;;  %2742 = vmatpush.bf16.msrb.mxu2 %v6832_v50  ;;  %v7577_v50 = vld [vmem:[%s10451_s1 + $0x22c] sm:$0xf] }
 0x300   : > { %vm2954_vm9 = vcmp.ge.f32.partialorder %v2503_v40, 0.0  ;;  %v3082_v5 = vmul.f32 0.2, %v2503_v40  ;;  %2455 = vmatmul.bf16.gmra.mxu2 %v10695_v4  ;;  %2544 = vmatmul.bf16.gmra.mxu3 %v10696_v8 }
 0x302   : > { %v3210_v43 = vsel %vm2954_vm9, %v2503_v40, %v3082_v5  ;;  %v6941_v40 = vld [vmem:[%s10451_s1 + $0x358] sm:$0xf0] }
 0x303   : > { %v2416_v54 = vpop.f32.mrf.mxu2  ;;  %v9200_v17 = vpack.c.bf16 %v3210_v43, %v3206_v63  ;;  %v2505_v61 = vpop.f32.mrf.mxu3  ;;  %v6944_v47 = vor.u32 %v7613_v16, %v6941_v40  ;;  %2743 = vmatpush.bf16.msrb.mxu2 %v6816_v20  ;;  %v6925_v63 = vld [vmem:[%s10451_s1 + $0x338] sm:$0xf0]  ;;  %v7605_v16 = vld [vmem:[%s10451_s1 + $0x30c] sm:$0xf]  ;;  %v6784_v20 = vor.u32 %v7573_v38, %v6781_v51  ;;  %v7083_v38 = vld [vmem:[%s10452_s2 + $0x70] sm:$0xf] }
 0x304   : > { %v2417_v48 = vadd.f32 %v2416_v54, %v2328_v39  ;;  %v2240_v21 = vpop.f32.mrf.mxu0  ;;  %v2329_v62 = vpop.f32.mrf.mxu1  ;;  %v6797_v39 = vld [vmem:[%s10451_s1 + $0x238] sm:$0xf0]  ;;  %v6928_v43 = vor.u32 %v7609_v9, %v6925_v63  ;;  %v7651_v51 = vld [vmem:[%s10452_s2 + $0x74] sm:$0xf0] }
 0x305   : > { %10697 = vst [vmem:[#allocation24_spill] sm:$0xff] %v9200_v17  ;;  %v2330_v5 = vadd.f32 %v2329_v62, %v2240_v21  ;;  %2832 = vmatpush.bf16.msrb.mxu3 %v6944_v47  ;;  %v6800_v55 = vor.u32 %v7577_v50, %v6797_v39  ;;  %v6909_v40 = vld [vmem:[%s10451_s1 + $0x318] sm:$0xf0] }
 0x306   : > { %v2506_v6 = vadd.f32 %v2505_v61, %v2417_v48  ;;  %v6912_v47 = vor.u32 %v7605_v16, %v6909_v40  ;;  %v7147_v16 = vld [vmem:[%s10452_s2 + $0xf0] sm:$0xf] }
 0x307   : > { %2744 = vmatpush.bf16.msrb.mxu2 %v6800_v55  ;;  %v10698_v55 = vld [vmem:[#allocation31_spill] sm:$0xff] }
 0x308   : > { %v3086_v50 = vmul.f32 0.2, %v2506_v6  ;;  %vm2958_vm10 = vcmp.ge.f32.partialorder %v2506_v6, 0.0 }
 0x309   : > { %2833 = vmatpush.bf16.msrb.mxu3 %v6928_v43  ;;  %v10700_v43 = vld [vmem:[#allocation33_spill] sm:$0xff] }
 0x30b   : > { %v2418_v54 = vpop.f32.mrf.mxu2  ;;  %v2507_v61 = vpop.f32.mrf.mxu3  ;;  %2745 = vmatpush.bf16.msrb.mxu2 %v6784_v20 }
 0x30c   : > { %v2419_v48 = vadd.f32 %v2418_v54, %v2330_v5  ;;  %v2243_v21 = vpop.f32.mrf.mxu0  ;;  %v2332_v62 = vpop.f32.mrf.mxu1  ;;  %v10699_v5 = vld [vmem:[#allocation32_spill] sm:$0xff]  ;;  %v10701_v54 = vld [vmem:[#allocation34_spill] sm:$0xff] }
 0x30d   : > { %v2333_v9 = vadd.f32 %v2332_v62, %v2243_v21  ;;  %2834 = vmatpush.bf16.msrb.mxu3 %v6912_v47  ;;  %v3214_v21 = vsel %vm2958_vm10, %v2506_v6, %v3086_v50 }
 0x30e   : > { %v2508_v39 = vadd.f32 %v2507_v61, %v2419_v48  ;;  %2371 = vmatmul.bf16.gmra.mxu1 %v10699_v5  ;;  %v7084_v48 = vor.u32 %v7651_v51, %v7083_v38  ;;  %v7667_v61 = vld [vmem:[%s10452_s2 + $0xf4] sm:$0xf0] }
 0x30f   : > { %2282 = vmatmul.bf16.gmra.mxu0 %v10698_v55  ;;  %v7148_v62 = vor.u32 %v7667_v61, %v7147_v16 }
 0x310   : > { %vm2962_vm11 = vcmp.ge.f32.partialorder %v2508_v39, 0.0  ;;  %v3090_v63 = vmul.f32 0.2, %v2508_v39  ;;  %2460 = vmatmul.bf16.gmra.mxu2 %v10700_v43  ;;  %2549 = vmatmul.bf16.gmra.mxu3 %v10701_v54 }
 0x311   : > { %3754 = vmatpush.bf16.msra.mxu0 %v7084_v48  ;;  %3843 = vmatpush.bf16.msra.mxu1 %v7148_v62 }
 0x312   : > { %v3218_v20 = vsel %vm2962_vm11, %v2508_v39, %v3090_v63 }
 0x313   : > { %v2421_v40 = vpop.f32.mrf.mxu2  ;;  %v9245_v47 = vpack.c.bf16 %v3218_v20, %v3214_v21  ;;  %v2510_v36 = vpop.f32.mrf.mxu3 }
 0x314   : > { %v2422_v17 = vadd.f32 %v2421_v40, %v2333_v9  ;;  %v2245_v54 = vpop.f32.mrf.mxu0  ;;  %v2334_v43 = vpop.f32.mrf.mxu1  ;;  %v10703_v9 = vld [vmem:[#allocation38_spill] sm:$0xff] }
 0x315   : > { %10702 = vst [vmem:[#allocation65_spill] sm:$0xff] %v9245_v47  ;;  %v2335_v55 = vadd.f32 %v2334_v43, %v2245_v54 }
 0x316   : > { %v2511_v5 = vadd.f32 %v2510_v36, %v2422_v17 }
 0x318   : > { %v3094_v60 = vmul.f32 0.2, %v2511_v5  ;;  %vm2966_vm12 = vcmp.ge.f32.partialorder %v2511_v5, 0.0 }
 0x31a   : > { %v3222_v36 = vsel %vm2966_vm12, %v2511_v5, %v3094_v60  ;;  %v10705_v60 = vld [vmem:[#allocation2_spill] sm:$0xff] }
 0x31b   : > { %v2423_v8 = vpop.f32.mrf.mxu2  ;;  %v2512_v51 = vpop.f32.mrf.mxu3 }
 0x31c   : > { %v2424_v38 = vadd.f32 %v2423_v8, %v2335_v55  ;;  %v2248_v4 = vpop.f32.mrf.mxu0  ;;  %v2337_v53 = vpop.f32.mrf.mxu1 }
 0x31d   : > { %v2338_v50 = vadd.f32 %v2337_v53, %v2248_v4 }
 0x31e   : > { %v2513_v6 = vadd.f32 %v2512_v51, %v2424_v38  ;;  %2376 = vmatmul.bf16.gmra.mxu1 %v10663_v52 }
 0x31f   : > { %2287 = vmatmul.bf16.gmra.mxu0 %v10662_v23 }
 0x320   : > { %vm2970_vm13 = vcmp.ge.f32.partialorder %v2513_v6, 0.0  ;;  %v3098_v39 = vmul.f32 0.2, %v2513_v6  ;;  %2465 = vmatmul.bf16.gmra.mxu2 %v10703_v9  ;;  %2554 = vmatmul.bf16.gmra.mxu3 %v8667_v37 }
 0x322   : > { %v3226_v17 = vsel %vm2970_vm13, %v2513_v6, %v3098_v39  ;;  %v10706_v6 = vld [vmem:[#allocation3_spill] sm:$0xff]  ;;  %v10708_v39 = vld [vmem:[#allocation5_spill] sm:$0xff] }
 0x323   : > { %v2426_v8 = vpop.f32.mrf.mxu2  ;;  %v9251_v55 = vpack.c.bf16 %v3226_v17, %v3222_v36  ;;  %v2515_v43 = vpop.f32.mrf.mxu3  ;;  %v7075_v36 = vld [vmem:[%s10452_s2 + $0x60] sm:$0xf]  ;;  %v7649_v17 = vld [vmem:[%s10452_s2 + $0x64] sm:$0xf0] }
 0x324   : > { %v2427_v63 = vadd.f32 %v2426_v8, %v2338_v50  ;;  %v2250_v54 = vpop.f32.mrf.mxu0  ;;  %v2339_v53 = vpop.f32.mrf.mxu1  ;;  %v10707_v50 = vld [vmem:[#allocation4_spill] sm:$0xff]  ;;  %v7139_v8 = vld [vmem:[%s10452_s2 + $0xe0] sm:$0xf] }
 0x325   : > { %10704 = vst [vmem:[#allocation38_spill] sm:$0xff] %v9251_v55  ;;  %v2340_v16 = vadd.f32 %v2339_v53, %v2250_v54 }
 0x326   : > { %v2516_v4 = vadd.f32 %v2515_v43, %v2427_v63  ;;  %v7076_v63 = vor.u32 %v7649_v17, %v7075_v36  ;;  %v7665_v43 = vld [vmem:[%s10452_s2 + $0xe4] sm:$0xf0] }
 0x328   : > { %v3102_v62 = vmul.f32 0.2, %v2516_v4  ;;  %vm2974_vm14 = vcmp.ge.f32.partialorder %v2516_v4, 0.0  ;;  %3755 = vmatpush.bf16.msra.mxu0 %v7076_v63 }
 0x32a   : > { %v3230_v54 = vsel %vm2974_vm14, %v2516_v4, %v3102_v62 }
 0x32b   : > { %v2428_v48 = vpop.f32.mrf.mxu2  ;;  %v2517_v21 = vpop.f32.mrf.mxu3 }
 0x32c   : > { %v2429_v61 = vadd.f32 %v2428_v48, %v2340_v16  ;;  %v2253_v20 = vpop.f32.mrf.mxu0  ;;  %v2342_v40 = vpop.f32.mrf.mxu1  ;;  %v7140_v48 = vor.u32 %v7665_v43, %v7139_v8 }
 0x32d   : > { %v2343_v51 = vadd.f32 %v2342_v40, %v2253_v20 }
 0x32e   : > { %v2518_v38 = vadd.f32 %v2517_v21, %v2429_v61  ;;  %2657 = vmatmul.bf16.vlgmr.msrb.gmra.mxu1 %v10706_v6 }
 0x32f   : > { %2568 = vmatmul.bf16.vlgmr.msrb.gmra.mxu0 %v10705_v60  ;;  %3844 = vmatpush.bf16.msra.mxu1 %v7140_v48 }
 0x330   : > { %vm2978_vm15 = vcmp.ge.f32.partialorder %v2518_v38, 0.0  ;;  %v3106_v5 = vmul.f32 0.2, %v2518_v38  ;;  %2746 = vmatmul.bf16.vlgmr.msrb.gmra.mxu2 %v10707_v50  ;;  %2835 = vmatmul.bf16.vlgmr.msrb.gmra.mxu3 %v10708_v39 }
 0x332   : > { %v3234_v53 = vsel %vm2978_vm15, %v2518_v38, %v3106_v5 }
 0x333   : > { %v2431_v16 = vpop.f32.mrf.mxu2  ;;  %v9269_v61 = vpack.c.bf16 %v3234_v53, %v3230_v54  ;;  %v2520_v20 = vpop.f32.mrf.mxu3 }
 0x334   : > { %v2432_v21 = vadd.f32 %v2431_v16, %v2343_v51  ;;  %v2255_v40 = vpop.f32.mrf.mxu0  ;;  %v2344_v60 = vpop.f32.mrf.mxu1 }
 0x335   : > { %10709 = vst [vmem:[#allocation2_spill] sm:$0xff] %v9269_v61  ;;  %v2345_v50 = vadd.f32 %v2344_v60, %v2255_v40 }
 0x336   : > { %v2521_v6 = vadd.f32 %v2520_v20, %v2432_v21 }
 0x338   : > { %v3110_v37 = vmul.f32 0.2, %v2521_v6  ;;  %vm2982_vm0 = vcmp.ge.f32.partialorder %v2521_v6, 0.0 }
 0x33a   : > { %v3238_v51 = vsel %vm2982_vm0, %v2521_v6, %v3110_v37  ;;  %v7067_v37 = vld [vmem:[%s10452_s2 + $0x50] sm:$0xf]  ;;  %v7647_v6 = vld [vmem:[%s10452_s2 + $0x54] sm:$0xf0] }
 0x33b   : > { %v2433_v39 = vpop.f32.mrf.mxu2  ;;  %v2522_v17 = vpop.f32.mrf.mxu3 }
 0x33c   : > { %v2434_v36 = vadd.f32 %v2433_v39, %v2345_v50  ;;  %v2258_v55 = vpop.f32.mrf.mxu0  ;;  %v2347_v47 = vpop.f32.mrf.mxu1  ;;  %v7068_v50 = vor.u32 %v7647_v6, %v7067_v37 }
 0x33d   : > { %v2348_v62 = vadd.f32 %v2347_v47, %v2258_v55 }
 0x33e   : > { %v2523_v4 = vadd.f32 %v2522_v17, %v2434_v36  ;;  %2662 = vmatmul.bf16.gmra.mxu1 %v8190_v1  ;;  %3756 = vmatpush.bf16.msra.mxu0 %v7068_v50 }
 0x33f   : > { %2573 = vmatmul.bf16.gmra.mxu0 %v8188_v0 }
 0x340   : > { %vm2986_vm1 = vcmp.ge.f32.partialorder %v2523_v4, 0.0  ;;  %v3114_v38 = vmul.f32 0.2, %v2523_v4  ;;  %2751 = vmatmul.bf16.gmra.mxu2 %v8192_v2  ;;  %2840 = vmatmul.bf16.gmra.mxu3 %v8194_v3 }
 0x342   : > { %v3242_v5 = vsel %vm2986_vm1, %v2523_v4, %v3114_v38 }
 0x343   : > { %v2436_v8 = vpop.f32.mrf.mxu2  ;;  %v9275_v63 = vpack.c.bf16 %v3242_v5, %v3238_v51  ;;  %v2525_v54 = vpop.f32.mrf.mxu3 }
 0x344   : > { %v2437_v43 = vadd.f32 %v2436_v8, %v2348_v62  ;;  %v2260_v53 = vpop.f32.mrf.mxu0  ;;  %v2349_v47 = vpop.f32.mrf.mxu1 }
 0x345   : > { %10710 = vst [vmem:[#allocation3_spill] sm:$0xff] %v9275_v63  ;;  %v2350_v16 = vadd.f32 %v2349_v47, %v2260_v53 }
 0x346   : > { %v2526_v55 = vadd.f32 %v2525_v54, %v2437_v43 }
 0x348   : > { %v3118_v40 = vmul.f32 0.2, %v2526_v55  ;;  %vm2990_vm2 = vcmp.ge.f32.partialorder %v2526_v55, 0.0 }
 0x34b   : > { %v2438_v0 = vpop.f32.mrf.mxu2  ;;  %v2527_v21 = vpop.f32.mrf.mxu3 }
 0x34c   : > { %v2439_v48 = vadd.f32 %v2438_v0, %v2350_v16  ;;  %v2263_v20 = vpop.f32.mrf.mxu0  ;;  %v2352_v1 = vpop.f32.mrf.mxu1 }
 0x34d   : > { %v2353_v60 = vadd.f32 %v2352_v1, %v2263_v20 }
 0x34e   : > { %v2528_v2 = vadd.f32 %v2527_v21, %v2439_v48  ;;  %2667 = vmatmul.bf16.gmra.mxu1 %v8210_v13  ;;  %v7663_v13 = vld [vmem:[%s10452_s2 + $0xd4] sm:$0xf0] }
 0x34f   : > { %2578 = vmatmul.bf16.gmra.mxu0 %v8208_v12  ;;  %v7131_v12 = vld [vmem:[%s10452_s2 + $0xd0] sm:$0xf] }
 0x350   : > { %vm2994_vm3 = vcmp.ge.f32.partialorder %v2528_v2, 0.0  ;;  %v3122_v3 = vmul.f32 0.2, %v2528_v2  ;;  %2756 = vmatmul.bf16.gmra.mxu2 %v8212_v14  ;;  %2845 = vmatmul.bf16.gmra.mxu3 %v8214_v15  ;;  %v3246_v14 = vsel %vm2990_vm2, %v2526_v55, %v3118_v40  ;;  %v7132_v36 = vor.u32 %v7663_v13, %v7131_v12 }
 0x352   : > { %v3250_v39 = vsel %vm2994_vm3, %v2528_v2, %v3122_v3  ;;  %3845 = vmatpush.bf16.msra.mxu1 %v7132_v36 }
 0x353   : > { %v2441_v15 = vpop.f32.mrf.mxu2  ;;  %v9293_v17 = vpack.c.bf16 %v3250_v39, %v3246_v14  ;;  %v2530_v62 = vpop.f32.mrf.mxu3 }
 0x354   : > { %v2442_v4 = vadd.f32 %v2441_v15, %v2353_v60  ;;  %v2265_v38 = vpop.f32.mrf.mxu0  ;;  %v2354_v51 = vpop.f32.mrf.mxu1 }
 0x355   : > { %v2355_v8 = vadd.f32 %v2354_v51, %v2265_v38 }
 0x356   : > { %v2531_v5 = vadd.f32 %v2530_v62, %v2442_v4  ;;  %v7059_v4 = vld [vmem:[%s10452_s2 + $0x40] sm:$0xf]  ;;  %v7645_v62 = vld [vmem:[%s10452_s2 + $0x44] sm:$0xf0] }
 0x357   : > { %v7060_v38 = vor.u32 %v7645_v62, %v7059_v4 }
 0x358   : > { %v3126_v0 = vmul.f32 0.2, %v2531_v5  ;;  %vm2998_vm4 = vcmp.ge.f32.partialorder %v2531_v5, 0.0 }
 0x359   : > { %3757 = vmatpush.bf16.msra.mxu0 %v7060_v38 }
 0x35a   : > { %v3254_v20 = vsel %vm2998_vm4, %v2531_v5, %v3126_v0 }
 0x35b   : > { %v2443_v43 = vpop.f32.mrf.mxu2  ;;  %v2532_v53 = vpop.f32.mrf.mxu3 }
 0x35c   : > { %v2444_v54 = vadd.f32 %v2443_v43, %v2355_v8  ;;  %v2268_v47 = vpop.f32.mrf.mxu0  ;;  %v2357_v16 = vpop.f32.mrf.mxu1 }
 0x35d   : > { %v2358_v48 = vadd.f32 %v2357_v16, %v2268_v47 }
 0x35e   : > { %v2533_v55 = vadd.f32 %v2532_v53, %v2444_v54  ;;  %2672 = vmatmul.bf16.gmra.mxu1 %v8242_v31 }
 0x35f   : > { %2583 = vmatmul.bf16.gmra.mxu0 %v8240_v30 }
 0x360   : > { %vm3002_vm5 = vcmp.ge.f32.partialorder %v2533_v55, 0.0  ;;  %v3130_v21 = vmul.f32 0.2, %v2533_v55  ;;  %2761 = vmatmul.bf16.gmra.mxu2 %v8244_v32  ;;  %2850 = vmatmul.bf16.gmra.mxu3 %v8246_v33 }
 0x362   : > { %v3258_v1 = vsel %vm3002_vm5, %v2533_v55, %v3130_v21 }
 0x363   : > { %v2446_v40 = vpop.f32.mrf.mxu2  ;;  %v9299_v2 = vpack.c.bf16 %v3258_v1, %v3254_v20  ;;  %v2535_v3 = vpop.f32.mrf.mxu3 }
 0x364   : > { %v2447_v60 = vadd.f32 %v2446_v40, %v2358_v48  ;;  %v2270_v37 = vpop.f32.mrf.mxu0  ;;  %v2359_v6 = vpop.f32.mrf.mxu1 }
 0x365   : > { %10711 = vst [vmem:[#allocation4_spill] sm:$0xff] %v9299_v2  ;;  %v2360_v50 = vadd.f32 %v2359_v6, %v2270_v37  ;;  %v10713_v6 = vld [vmem:[#allocation6_spill] sm:$0xff] }
 0x366   : > { %v2536_v12 = vadd.f32 %v2535_v3, %v2447_v60 }
 0x368   : > { %v3134_v15 = vmul.f32 0.2, %v2536_v12  ;;  %vm3006_vm6 = vcmp.ge.f32.partialorder %v2536_v12, 0.0 }
 0x36b   : > { %v2448_v30 = vpop.f32.mrf.mxu2  ;;  %v2537_v14 = vpop.f32.mrf.mxu3 }
 0x36c   : > { %v2449_v13 = vadd.f32 %v2448_v30, %v2360_v50  ;;  %v2273_v39 = vpop.f32.mrf.mxu0  ;;  %v2362_v31 = vpop.f32.mrf.mxu1  ;;  %v10714_v50 = vld [vmem:[#allocation7_spill] sm:$0xff]  ;;  %v7683_v30 = vld [vmem:[%s10452_s2 + $0x174] sm:$0xf0] }
 0x36d   : > { %v2363_v36 = vadd.f32 %v2362_v31, %v2273_v39 }
 0x36e   : > { %v2538_v32 = vadd.f32 %v2537_v14, %v2449_v13  ;;  %2677 = vmatmul.bf16.gmra.mxu1 %v8262_v44  ;;  %v7661_v44 = vld [vmem:[%s10452_s2 + $0xc4] sm:$0xf0] }
 0x36f   : > { %2588 = vmatmul.bf16.gmra.mxu0 %v8260_v42  ;;  %v7123_v42 = vld [vmem:[%s10452_s2 + $0xc0] sm:$0xf] }
 0x370   : > { %vm3010_vm7 = vcmp.ge.f32.partialorder %v2538_v32, 0.0  ;;  %v3138_v33 = vmul.f32 0.2, %v2538_v32  ;;  %2766 = vmatmul.bf16.gmra.mxu2 %v8264_v45  ;;  %2855 = vmatmul.bf16.gmra.mxu3 %v8266_v46  ;;  %v3262_v45 = vsel %vm3006_vm6, %v2536_v12, %v3134_v15  ;;  %v7124_v5 = vor.u32 %v7661_v44, %v7123_v42  ;;  %v7211_v12 = vld [vmem:[%s10452_s2 + $0x170] sm:$0xf] }
 0x371   : > { %v7212_v13 = vor.u32 %v7683_v30, %v7211_v12 }
 0x372   : > { %v3266_v51 = vsel %vm3010_vm7, %v2538_v32, %v3138_v33  ;;  %3846 = vmatpush.bf16.msra.mxu1 %v7124_v5 }
 0x373   : > { %v2451_v46 = vpop.f32.mrf.mxu2  ;;  %v9317_v8 = vpack.c.bf16 %v3266_v51, %v3262_v45  ;;  %v2540_v54 = vpop.f32.mrf.mxu3  ;;  %3932 = vmatpush.bf16.msra.mxu2 %v7212_v13 }
 0x374   : > { %v2452_v43 = vadd.f32 %v2451_v46, %v2363_v36  ;;  %v2275_v53 = vpop.f32.mrf.mxu0  ;;  %v2364_v47 = vpop.f32.mrf.mxu1 }
 0x375   : > { %10712 = vst [vmem:[#allocation5_spill] sm:$0xff] %v9317_v8  ;;  %v2365_v0 = vadd.f32 %v2364_v47, %v2275_v53 }
 0x376   : > { %v2541_v16 = vadd.f32 %v2540_v54, %v2452_v43 }
 0x378   : > { %v3142_v40 = vmul.f32 0.2, %v2541_v16  ;;  %vm3014_vm8 = vcmp.ge.f32.partialorder %v2541_v16, 0.0 }
 0x37a   : > { %v3270_v39 = vsel %vm3014_vm8, %v2541_v16, %v3142_v40  ;;  %v7051_v16 = vld [vmem:[%s10452_s2 + $0x30] sm:$0xf] }
 0x37b   : > { %v2453_v55 = vpop.f32.mrf.mxu2  ;;  %v2542_v21 = vpop.f32.mrf.mxu3 }
 0x37c   : > { %v2454_v48 = vadd.f32 %v2453_v55, %v2365_v0  ;;  %v2278_v20 = vpop.f32.mrf.mxu0  ;;  %v2367_v1 = vpop.f32.mrf.mxu1  ;;  %v7643_v0 = vld [vmem:[%s10452_s2 + $0x34] sm:$0xf0] }
 0x37d   : > { %v2368_v3 = vadd.f32 %v2367_v1, %v2278_v20  ;;  %v7052_v55 = vor.u32 %v7643_v0, %v7051_v16 }
 0x37e   : > { %v2543_v60 = vadd.f32 %v2542_v21, %v2454_v48  ;;  %2682 = vmatmul.bf16.gmra.mxu1 %v8306_v11  ;;  %v7699_v11 = vld [vmem:[%s10452_s2 + $0x1f4] sm:$0xf0] }
 0x37f   : > { %2593 = vmatmul.bf16.gmra.mxu0 %v8304_v10  ;;  %v7275_v10 = vld [vmem:[%s10452_s2 + $0x1f0] sm:$0xf] }
 0x380   : > { %vm3018_vm9 = vcmp.ge.f32.partialorder %v2543_v60, 0.0  ;;  %v3146_v37 = vmul.f32 0.2, %v2543_v60  ;;  %2771 = vmatmul.bf16.gmra.mxu2 %v10713_v6  ;;  %2860 = vmatmul.bf16.gmra.mxu3 %v10714_v50  ;;  %v7276_v14 = vor.u32 %v7699_v11, %v7275_v10 }
 0x381   : > { %3758 = vmatpush.bf16.msra.mxu0 %v7052_v55 }
 0x382   : > { %v3274_v31 = vsel %vm3018_vm9, %v2543_v60, %v3146_v37  ;;  %4021 = vmatpush.bf16.msra.mxu3 %v7276_v14 }
 0x383   : > { %v2456_v15 = vpop.f32.mrf.mxu2  ;;  %v9335_v32 = vpack.c.bf16 %v3274_v31, %v3270_v39  ;;  %v2545_v33 = vpop.f32.mrf.mxu3 }
 0x384   : > { %v2457_v36 = vadd.f32 %v2456_v15, %v2368_v3  ;;  %v2280_v4 = vpop.f32.mrf.mxu0  ;;  %v2369_v62 = vpop.f32.mrf.mxu1 }
 0x385   : > { %v2370_v38 = vadd.f32 %v2369_v62, %v2280_v4  ;;  %v7203_v4 = vld [vmem:[%s10452_s2 + $0x160] sm:$0xf]  ;;  %v7681_v62 = vld [vmem:[%s10452_s2 + $0x164] sm:$0xf0] }
 0x386   : > { %v2546_v42 = vadd.f32 %v2545_v33, %v2457_v36 }
 0x388   : > { %v3150_v43 = vmul.f32 0.2, %v2546_v42  ;;  %vm3022_vm10 = vcmp.ge.f32.partialorder %v2546_v42, 0.0 }
 0x38b   : > { %v2458_v44 = vpop.f32.mrf.mxu2  ;;  %v2547_v51 = vpop.f32.mrf.mxu3 }
 0x38c   : > { %v2459_v45 = vadd.f32 %v2458_v44, %v2370_v38  ;;  %v2283_v46 = vpop.f32.mrf.mxu0  ;;  %v2372_v5 = vpop.f32.mrf.mxu1  ;;  %v7204_v38 = vor.u32 %v7681_v62, %v7203_v4  ;;  %v7697_v44 = vld [vmem:[%s10452_s2 + $0x1e4] sm:$0xf0]  ;;  %v7195_v4 = vld [vmem:[%s10452_s2 + $0x150] sm:$0xf]  ;;  %v10718_v62 = vld [vmem:[#allocation9_spill] sm:$0xff] }
 0x38d   : > { %v2373_v53 = vadd.f32 %v2372_v5, %v2283_v46 }
 0x38e   : > { %v2548_v54 = vadd.f32 %v2547_v51, %v2459_v45  ;;  %2687 = vmatmul.bf16.gmra.mxu1 %v8326_v27  ;;  %v7659_v27 = vld [vmem:[%s10452_s2 + $0xb4] sm:$0xf0]  ;;  %3933 = vmatpush.bf16.msra.mxu2 %v7204_v38 }
 0x38f   : > { %2598 = vmatmul.bf16.gmra.mxu0 %v8324_v26  ;;  %v7115_v26 = vld [vmem:[%s10452_s2 + $0xb0] sm:$0xf] }
 0x390   : > { %vm3026_vm11 = vcmp.ge.f32.partialorder %v2548_v54, 0.0  ;;  %v3154_v47 = vmul.f32 0.2, %v2548_v54  ;;  %2776 = vmatmul.bf16.gmra.mxu2 %v8328_v28  ;;  %2865 = vmatmul.bf16.gmra.mxu3 %v8330_v29  ;;  %v3278_v28 = vsel %vm3022_vm10, %v2546_v42, %v3150_v43  ;;  %v7116_v21 = vor.u32 %v7659_v27, %v7115_v26 }
 0x392   : > { %v3282_v48 = vsel %vm3026_vm11, %v2548_v54, %v3154_v47  ;;  %3847 = vmatpush.bf16.msra.mxu1 %v7116_v21 }
 0x393   : > { %v2461_v29 = vpop.f32.mrf.mxu2  ;;  %v9353_v20 = vpack.c.bf16 %v3282_v48, %v3278_v28  ;;  %v2550_v40 = vpop.f32.mrf.mxu3  ;;  %v7043_v28 = vld [vmem:[%s10452_s2 + $0x20] sm:$0xf]  ;;  %v7641_v48 = vld [vmem:[%s10452_s2 + $0x24] sm:$0xf0] }
 0x394   : > { %v2462_v1 = vadd.f32 %v2461_v29, %v2373_v53  ;;  %v2285_v60 = vpop.f32.mrf.mxu0  ;;  %v2374_v3 = vpop.f32.mrf.mxu1  ;;  %v7044_v29 = vor.u32 %v7641_v48, %v7043_v28 }
 0x395   : > { %v2375_v6 = vadd.f32 %v2374_v3, %v2285_v60 }
 0x396   : > { %v2551_v37 = vadd.f32 %v2550_v40, %v2462_v1  ;;  %3759 = vmatpush.bf16.msra.mxu0 %v7044_v29 }
 0x398   : > { %v3158_v13 = vmul.f32 0.2, %v2551_v37  ;;  %vm3030_vm12 = vcmp.ge.f32.partialorder %v2551_v37, 0.0 }
 0x39a   : > { %v3286_v15 = vsel %vm3030_vm12, %v2551_v37, %v3158_v13 }
 0x39b   : > { %v2463_v12 = vpop.f32.mrf.mxu2  ;;  %v2552_v30 = vpop.f32.mrf.mxu3 }
 0x39c   : > { %v2464_v50 = vadd.f32 %v2463_v12, %v2375_v6  ;;  %v2288_v10 = vpop.f32.mrf.mxu0  ;;  %v2377_v11 = vpop.f32.mrf.mxu1 }
 0x39d   : > { %v2378_v39 = vadd.f32 %v2377_v11, %v2288_v10 }
 0x39e   : > { %v2553_v14 = vadd.f32 %v2552_v30, %v2464_v50  ;;  %2692 = vmatmul.bf16.gmra.mxu1 %v8358_v57 }
 0x39f   : > { %2603 = vmatmul.bf16.gmra.mxu0 %v8356_v56  ;;  %v7267_v56 = vld [vmem:[%s10452_s2 + $0x1e0] sm:$0xf] }
 0x3a0   : > { %vm3034_vm13 = vcmp.ge.f32.partialorder %v2553_v14, 0.0  ;;  %v3162_v31 = vmul.f32 0.2, %v2553_v14  ;;  %2781 = vmatmul.bf16.gmra.mxu2 %v8360_v58  ;;  %2870 = vmatmul.bf16.gmra.mxu3 %v8362_v59  ;;  %v7268_v51 = vor.u32 %v7697_v44, %v7267_v56  ;;  %v7679_v56 = vld [vmem:[%s10452_s2 + $0x154] sm:$0xf0] }
 0x3a2   : > { %v3290_v36 = vsel %vm3034_vm13, %v2553_v14, %v3162_v31  ;;  %4022 = vmatpush.bf16.msra.mxu3 %v7268_v51 }
 0x3a3   : > { %v2466_v33 = vpop.f32.mrf.mxu2  ;;  %v9368_v57 = vpack.c.bf16 %v3290_v36, %v3286_v15  ;;  %v2555_v42 = vpop.f32.mrf.mxu3 }
 0x3a4   : > { %v2467_v58 = vadd.f32 %v2466_v33, %v2378_v39  ;;  %v2290_v59 = vpop.f32.mrf.mxu0  ;;  %v2379_v45 = vpop.f32.mrf.mxu1  ;;  %v10717_v33 = vld [vmem:[#allocation8_spill] sm:$0xff] }
 0x3a5   : > { %10715 = vst [vmem:[#allocation6_spill] sm:$0xff] %v9368_v57  ;;  %v2380_v5 = vadd.f32 %v2379_v45, %v2290_v59  ;;  %v7196_v59 = vor.u32 %v7679_v56, %v7195_v4 }
 0x3a6   : > { %v2556_v46 = vadd.f32 %v2555_v42, %v2467_v58 }
 0x3a7   : > { %3934 = vmatpush.bf16.msra.mxu2 %v7196_v59 }
 0x3a8   : > { %v3166_v0 = vmul.f32 0.2, %v2556_v46  ;;  %vm3038_vm14 = vcmp.ge.f32.partialorder %v2556_v46, 0.0 }
 0x3ab   : > { %v2468_v43 = vpop.f32.mrf.mxu2  ;;  %v2557_v53 = vpop.f32.mrf.mxu3 }
 0x3ac   : > { %v2469_v54 = vadd.f32 %v2468_v43, %v2380_v5  ;;  %v2569_v47 = vpop.f32.mrf.mxu0  ;;  %v2658_v16 = vpop.f32.mrf.mxu1 }
 0x3ad   : > { %v2659_v55 = vadd.f32 %v2658_v16, %v2569_v47 }
 0x3ae   : > { %v2558_v26 = vadd.f32 %v2557_v53, %v2469_v54  ;;  %2697 = vmatmul.bf16.gmra.mxu1 %v8390_v24  ;;  %v7657_v24 = vld [vmem:[%s10452_s2 + $0xa4] sm:$0xf0] }
 0x3af   : > { %2608 = vmatmul.bf16.gmra.mxu0 %v8388_v22  ;;  %v7107_v22 = vld [vmem:[%s10452_s2 + $0xa0] sm:$0xf] }
 0x3b0   : > { %vm3042_vm15 = vcmp.ge.f32.partialorder %v2558_v26, 0.0  ;;  %v3170_v27 = vmul.f32 0.2, %v2558_v26  ;;  %2786 = vmatmul.bf16.gmra.mxu2 %v8392_v25  ;;  %2875 = vmatmul.bf16.gmra.mxu3 %v8394_v35  ;;  %v3294_v25 = vsel %vm3038_vm14, %v2556_v46, %v3166_v0  ;;  %v7108_v1 = vor.u32 %v7657_v24, %v7107_v22  ;;  %v10719_v22 = vld [vmem:[#allocation11_spill] sm:$0xff]  ;;  %v10720_v24 = vld [vmem:[#allocation12_spill] sm:$0xff] }
 0x3b2   : > { %v3298_v21 = vsel %vm3042_vm15, %v2558_v26, %v3170_v27  ;;  %3848 = vmatpush.bf16.msra.mxu1 %v7108_v1  ;;  %v7639_v1 = vld [vmem:[%s10452_s2 + $0x14] sm:$0xf0] }
 0x3b3   : > { %v2747_v35 = vpop.f32.mrf.mxu2  ;;  %v9389_v40 = vpack.c.bf16 %v3298_v21, %v3294_v25  ;;  %v2836_v3 = vpop.f32.mrf.mxu3  ;;  %v10721_v25 = vld [vmem:[#allocation13_spill] sm:$0xff]  ;;  %v10722_v21 = vld [vmem:[#allocation14_spill] sm:$0xff] }
 0x3b4   : > { %v2748_v60 = vadd.f32 %v2747_v35, %v2659_v55  ;;  %v2571_v37 = vpop.f32.mrf.mxu0  ;;  %v2660_v6 = vpop.f32.mrf.mxu1  ;;  %v7035_v35 = vld [vmem:[%s10452_s2 + $0x10] sm:$0xf] }
 0x3b5   : > { %10716 = vst [vmem:[#allocation7_spill] sm:$0xff] %v9389_v40  ;;  %v2661_v50 = vadd.f32 %v2660_v6, %v2571_v37  ;;  %v7655_v37 = vld [vmem:[%s10452_s2 + $0x94] sm:$0xf0] }
 0x3b6   : > { %v2837_v12 = vadd.f32 %v2836_v3, %v2748_v60  ;;  %v7099_v60 = vld [vmem:[%s10452_s2 + $0x90] sm:$0xf]  ;;  %v7036_v3 = vor.u32 %v7639_v1, %v7035_v35 }
 0x3b8   : > { %v3047_v39 = vmul.f32 0.2, %v2837_v12  ;;  %vm2919_vm0 = vcmp.ge.f32.partialorder %v2837_v12, 0.0  ;;  %3760 = vmatpush.bf16.msra.mxu0 %v7036_v3 }
 0x3ba   : > { %v3175_v58 = vsel %vm2919_vm0, %v2837_v12, %v3047_v39 }
 0x3bb   : > { %v2749_v30 = vpop.f32.mrf.mxu2  ;;  %v2838_v11 = vpop.f32.mrf.mxu3 }
 0x3bc   : > { %v2750_v10 = vadd.f32 %v2749_v30, %v2661_v50  ;;  %v2574_v13 = vpop.f32.mrf.mxu0  ;;  %v2663_v14 = vpop.f32.mrf.mxu1  ;;  %v7100_v30 = vor.u32 %v7655_v37, %v7099_v60 }
 0x3bd   : > { %v2664_v15 = vadd.f32 %v2663_v14, %v2574_v13 }
 0x3be   : > { %v2839_v31 = vadd.f32 %v2838_v11, %v2750_v10  ;;  %2702 = vmatmul.bf16.gmra.mxu1 %v8422_v34  ;;  %v7695_v34 = vld [vmem:[%s10452_s2 + $0x1d4] sm:$0xf0] }
 0x3bf   : > { %2613 = vmatmul.bf16.gmra.mxu0 %v8420_v19  ;;  %v7259_v19 = vld [vmem:[%s10452_s2 + $0x1d0] sm:$0xf]  ;;  %3849 = vmatpush.bf16.msra.mxu1 %v7100_v30  ;;  %v7637_v30 = vld [vmem:[%s10452_s2 + $0x4] sm:$0xf0] }
 0x3c0   : > { %vm2923_vm1 = vcmp.ge.f32.partialorder %v2839_v31, 0.0  ;;  %v3051_v36 = vmul.f32 0.2, %v2839_v31  ;;  %2791 = vmatmul.bf16.gmra.mxu2 %v10717_v33  ;;  %2880 = vmatmul.bf16.gmra.mxu3 %v10718_v62  ;;  %v7260_v38 = vor.u32 %v7695_v34, %v7259_v19 }
 0x3c2   : > { %v3179_v42 = vsel %vm2923_vm1, %v2839_v31, %v3051_v36  ;;  %4023 = vmatpush.bf16.msra.mxu3 %v7260_v38  ;;  %v10724_v38 = vld [vmem:[#allocation17_spill] sm:$0xff] }
 0x3c3   : > { %v9407_v44 = vpack.c.bf16 %v3179_v42, %v3175_v58  ;;  %v2752_v45 = vpop.f32.mrf.mxu2  ;;  %v2841_v46 = vpop.f32.mrf.mxu3  ;;  %v10723_v42 = vld [vmem:[#allocation16_spill] sm:$0xff] }
 0x3c4   : > { %v2753_v51 = vadd.f32 %v2752_v45, %v2664_v15  ;;  %v2576_v5 = vpop.f32.mrf.mxu0  ;;  %v2665_v43 = vpop.f32.mrf.mxu1  ;;  %v10725_v45 = vld [vmem:[#allocation18_spill] sm:$0xff] }
 0x3c5   : > { %v2666_v53 = vadd.f32 %v2665_v43, %v2576_v5  ;;  %v7677_v5 = vld [vmem:[%s10452_s2 + $0x144] sm:$0xf0]  ;;  %v7251_v43 = vld [vmem:[%s10452_s2 + $0x1c0] sm:$0xf] }
 0x3c6   : > { %v2842_v54 = vadd.f32 %v2841_v46, %v2753_v51  ;;  %v7187_v51 = vld [vmem:[%s10452_s2 + $0x140] sm:$0xf]  ;;  %v10726_v46 = vld [vmem:[#allocation19_spill] sm:$0xff] }
 0x3c8   : > { %v3055_v27 = vmul.f32 0.2, %v2842_v54  ;;  %vm2927_vm2 = vcmp.ge.f32.partialorder %v2842_v54, 0.0 }
 0x3ca   : > { %v3183_v6 = vsel %vm2927_vm2, %v2842_v54, %v3055_v27  ;;  %v7693_v54 = vld [vmem:[%s10452_s2 + $0x1c4] sm:$0xf0] }
 0x3cb   : > { %v2754_v47 = vpop.f32.mrf.mxu2  ;;  %v2843_v0 = vpop.f32.mrf.mxu3 }
 0x3cc   : > { %v2755_v16 = vadd.f32 %v2754_v47, %v2666_v53  ;;  %v2579_v26 = vpop.f32.mrf.mxu0  ;;  %v2668_v55 = vpop.f32.mrf.mxu1  ;;  %v7188_v53 = vor.u32 %v7677_v5, %v7187_v51  ;;  %v7252_v47 = vor.u32 %v7693_v54, %v7251_v43  ;;  %v10727_v51 = vld [vmem:[#allocation26_spill] sm:$0xff]  ;;  %v7675_v5 = vld [vmem:[%s10452_s2 + $0x134] sm:$0xf0]  ;;  %v7243_v43 = vld [vmem:[%s10452_s2 + $0x1b0] sm:$0xf] }
 0x3cd   : > { %v2669_v48 = vadd.f32 %v2668_v55, %v2579_v26 }
 0x3ce   : > { %v2844_v28 = vadd.f32 %v2843_v0, %v2755_v16  ;;  %2707 = vmatmul.bf16.gmra.mxu1 %v10720_v24  ;;  %3935 = vmatpush.bf16.msra.mxu2 %v7188_v53  ;;  %v10728_v53 = vld [vmem:[#allocation27_spill] sm:$0xff] }
 0x3cf   : > { %2618 = vmatmul.bf16.gmra.mxu0 %v10719_v22  ;;  %4024 = vmatpush.bf16.msra.mxu3 %v7252_v47  ;;  %v10729_v47 = vld [vmem:[#allocation28_spill] sm:$0xff] }
 0x3d0   : > { %vm2931_vm3 = vcmp.ge.f32.partialorder %v2844_v28, 0.0  ;;  %v3059_v29 = vmul.f32 0.2, %v2844_v28  ;;  %2796 = vmatmul.bf16.gmra.mxu2 %v10721_v25  ;;  %2885 = vmatmul.bf16.gmra.mxu3 %v10722_v21 }
 0x3d2   : > { %v3187_v12 = vsel %vm2931_vm3, %v2844_v28, %v3059_v29 }
 0x3d3   : > { %v2757_v50 = vpop.f32.mrf.mxu2  ;;  %v9425_v10 = vpack.c.bf16 %v3187_v12, %v3183_v6  ;;  %v2846_v13 = vpop.f32.mrf.mxu3 }
 0x3d4   : > { %v2758_v11 = vadd.f32 %v2757_v50, %v2669_v48  ;;  %v2581_v14 = vpop.f32.mrf.mxu0  ;;  %v2670_v39 = vpop.f32.mrf.mxu1  ;;  %v7027_v50 = vld [vmem:[%s10452_s2] sm:$0xf] }
 0x3d5   : > { %v2671_v15 = vadd.f32 %v2670_v39, %v2581_v14 }
 0x3d6   : > { %v2847_v31 = vadd.f32 %v2846_v13, %v2758_v11  ;;  %v7028_v11 = vor.u32 %v7637_v30, %v7027_v50 }
 0x3d8   : > { %v3063_v19 = vmul.f32 0.2, %v2847_v31  ;;  %vm2935_vm4 = vcmp.ge.f32.partialorder %v2847_v31, 0.0  ;;  %3761 = vmatpush.bf16.msra.mxu0 %v7028_v11  ;;  %v7671_v11 = vld [vmem:[%s10452_s2 + $0x114] sm:$0xf0] }
 0x3da   : > { %v3191_v16 = vsel %vm2935_vm4, %v2847_v31, %v3063_v19 }
 0x3db   : > { %v2759_v36 = vpop.f32.mrf.mxu2  ;;  %v2848_v4 = vpop.f32.mrf.mxu3 }
 0x3dc   : > { %v2760_v33 = vadd.f32 %v2759_v36, %v2671_v15  ;;  %v2584_v62 = vpop.f32.mrf.mxu0  ;;  %v2673_v56 = vpop.f32.mrf.mxu1 }
 0x3dd   : > { %v2674_v58 = vadd.f32 %v2673_v56, %v2584_v62 }
 0x3de   : > { %v2849_v34 = vadd.f32 %v2848_v4, %v2760_v33  ;;  %2712 = vmatmul.bf16.gmra.mxu1 %v10724_v38 }
 0x3df   : > { %2623 = vmatmul.bf16.gmra.mxu0 %v10723_v42 }
 0x3e0   : > { %vm2939_vm5 = vcmp.ge.f32.partialorder %v2849_v34, 0.0  ;;  %v3067_v59 = vmul.f32 0.2, %v2849_v34  ;;  %2801 = vmatmul.bf16.gmra.mxu2 %v10725_v45  ;;  %2890 = vmatmul.bf16.gmra.mxu3 %v10726_v46  ;;  %v7179_v46 = vld [vmem:[%s10452_s2 + $0x130] sm:$0xf] }
 0x3e2   : > { %v3195_v0 = vsel %vm2939_vm5, %v2849_v34, %v3067_v59 }
 0x3e3   : > { %v2762_v26 = vpop.f32.mrf.mxu2  ;;  %v9443_v55 = vpack.c.bf16 %v3195_v0, %v3191_v16  ;;  %v2851_v28 = vpop.f32.mrf.mxu3  ;;  %v7180_v16 = vor.u32 %v7675_v5, %v7179_v46  ;;  %v7691_v0 = vld [vmem:[%s10452_s2 + $0x1b4] sm:$0xf0]  ;;  %v10732_v46 = vld [vmem:[#allocation32_spill] sm:$0xff] }
 0x3e4   : > { %v2763_v27 = vadd.f32 %v2762_v26, %v2674_v58  ;;  %v2586_v48 = vpop.f32.mrf.mxu0  ;;  %v2675_v22 = vpop.f32.mrf.mxu1  ;;  %v10730_v26 = vld [vmem:[#allocation29_spill] sm:$0xff] }
 0x3e5   : > { %v2676_v24 = vadd.f32 %v2675_v22, %v2586_v48  ;;  %3936 = vmatpush.bf16.msra.mxu2 %v7180_v16  ;;  %v10733_v5 = vld [vmem:[#allocation33_spill] sm:$0xff] }
 0x3e6   : > { %v2852_v29 = vadd.f32 %v2851_v28, %v2763_v27  ;;  %v7244_v27 = vor.u32 %v7691_v0, %v7243_v43  ;;  %v10734_v43 = vld [vmem:[#allocation34_spill] sm:$0xff]  ;;  %v7149_v0 = vld [vmem:[%s10452_s2 + $0xf8] sm:$0xf0] }
 0x3e8   : > { %v3071_v3 = vmul.f32 0.2, %v2852_v29  ;;  %vm2943_vm6 = vcmp.ge.f32.partialorder %v2852_v29, 0.0  ;;  %4025 = vmatpush.bf16.msra.mxu3 %v7244_v27 }
 0x3eb   : > { %v2764_v25 = vpop.f32.mrf.mxu2  ;;  %v2853_v35 = vpop.f32.mrf.mxu3 }
 0x3ec   : > { %v2765_v21 = vadd.f32 %v2764_v25, %v2676_v24  ;;  %v2589_v1 = vpop.f32.mrf.mxu0  ;;  %v2678_v60 = vpop.f32.mrf.mxu1  ;;  %v7673_v24 = vld [vmem:[%s10452_s2 + $0x124] sm:$0xf0]  ;;  %v7235_v25 = vld [vmem:[%s10452_s2 + $0x1a0] sm:$0xf] }
 0x3ed   : > { %v2679_v6 = vadd.f32 %v2678_v60, %v2589_v1 }
 0x3ee   : > { %v2854_v37 = vadd.f32 %v2853_v35, %v2765_v21  ;;  %2717 = vmatmul.bf16.gmra.mxu1 %v10650_v41  ;;  %v7653_v41 = vld [vmem:[%s10452_s2 + $0x84] sm:$0xf0] }
 0x3ef   : > { %2628 = vmatmul.bf16.gmra.mxu0 %v10649_v49  ;;  %v7091_v49 = vld [vmem:[%s10452_s2 + $0x80] sm:$0xf] }
 0x3f0   : > { %vm2947_vm7 = vcmp.ge.f32.partialorder %v2854_v37, 0.0  ;;  %v3075_v12 = vmul.f32 0.2, %v2854_v37  ;;  %2806 = vmatmul.bf16.gmra.mxu2 %v10691_v18  ;;  %2895 = vmatmul.bf16.gmra.mxu3 %v10692_v7  ;;  %v3199_v18 = vsel %vm2943_vm6, %v2852_v29, %v3071_v3  ;;  %v7092_v14 = vor.u32 %v7653_v41, %v7091_v49  ;;  %v7171_v29 = vld [vmem:[%s10452_s2 + $0x120] sm:$0xf] }
 0x3f1   : > { %v7172_v3 = vor.u32 %v7673_v24, %v7171_v29  ;;  %v7163_v49 = vld [vmem:[%s10452_s2 + $0x110] sm:$0xf] }
 0x3f2   : > { %v3203_v13 = vsel %vm2947_vm7, %v2854_v37, %v3075_v12  ;;  %3850 = vmatpush.bf16.msra.mxu1 %v7092_v14  ;;  %v7689_v37 = vld [vmem:[%s10452_s2 + $0x1a4] sm:$0xf0]  ;;  %v7227_v41 = vld [vmem:[%s10452_s2 + $0x190] sm:$0xf] }
 0x3f3   : > { %v2767_v7 = vpop.f32.mrf.mxu2  ;;  %v9461_v39 = vpack.c.bf16 %v3203_v13, %v3199_v18  ;;  %v2856_v15 = vpop.f32.mrf.mxu3  ;;  %v7236_v12 = vor.u32 %v7689_v37, %v7235_v25  ;;  %3937 = vmatpush.bf16.msra.mxu2 %v7172_v3  ;;  %v7164_v18 = vor.u32 %v7671_v11, %v7163_v49  ;;  %v7687_v13 = vld [vmem:[%s10452_s2 + $0x194] sm:$0xf0] }
 0x3f4   : > { %v2768_v31 = vadd.f32 %v2767_v7, %v2679_v6  ;;  %v2591_v36 = vpop.f32.mrf.mxu0  ;;  %v2680_v33 = vpop.f32.mrf.mxu1  ;;  %v7228_v7 = vor.u32 %v7687_v13, %v7227_v41 }
 0x3f5   : > { %v2681_v62 = vadd.f32 %v2680_v33, %v2591_v36  ;;  %4026 = vmatpush.bf16.msra.mxu3 %v7236_v12  ;;  %v7219_v36 = vld [vmem:[%s10452_s2 + $0x180] sm:$0xf] }
 0x3f6   : > { %v2857_v4 = vadd.f32 %v2856_v15, %v2768_v31  ;;  %v7155_v31 = vld [vmem:[%s10452_s2 + $0x100] sm:$0xf]  ;;  %v7669_v15 = vld [vmem:[%s10452_s2 + $0x104] sm:$0xf0] }
 0x3f7   : > { %3938 = vmatpush.bf16.msra.mxu2 %v7164_v18  ;;  %v10736_v18 = vld [vmem:[#allocation39_spill] sm:$0xff] }
 0x3f8   : > { %vm2951_vm8 = vcmp.ge.f32.partialorder %v2857_v4, 0.0  ;;  %v3079_v59 = vmul.f32 0.2, %v2857_v4 }
 0x3f9   : > { %4027 = vmatpush.bf16.msra.mxu3 %v7228_v7 }
 0x3fa   : > { %v3207_v28 = vsel %vm2951_vm8, %v2857_v4, %v3079_v59 }
 0x3fb   : > { %v2769_v56 = vpop.f32.mrf.mxu2  ;;  %v2858_v34 = vpop.f32.mrf.mxu3 }
 0x3fc   : > { %v2770_v19 = vadd.f32 %v2769_v56, %v2681_v62  ;;  %v2594_v58 = vpop.f32.mrf.mxu0  ;;  %v2683_v42 = vpop.f32.mrf.mxu1  ;;  %v7156_v56 = vor.u32 %v7669_v15, %v7155_v31 }
 0x3fd   : > { %v2684_v45 = vadd.f32 %v2683_v42, %v2594_v58 }
 0x3fe   : > { %v2859_v38 = vadd.f32 %v2858_v34, %v2770_v19  ;;  %2722 = vmatmul.bf16.gmra.mxu1 %v10728_v53  ;;  %v7685_v19 = vld [vmem:[%s10452_s2 + $0x184] sm:$0xf0]  ;;  %3939 = vmatpush.bf16.msra.mxu2 %v7156_v56  ;;  %v7085_v53 = vld [vmem:[%s10452_s2 + $0x78] sm:$0xf0] }
 0x3ff   : > { %2633 = vmatmul.bf16.gmra.mxu0 %v10727_v51  ;;  %v7220_v58 = vor.u32 %v7685_v19, %v7219_v36 }
 0x400   : > { %vm2955_vm9 = vcmp.ge.f32.partialorder %v2859_v38, 0.0  ;;  %v3083_v54 = vmul.f32 0.2, %v2859_v38  ;;  %2811 = vmatmul.bf16.gmra.mxu2 %v10729_v47  ;;  %2900 = vmatmul.bf16.gmra.mxu3 %v10730_v26  ;;  %v7666_v47 = vld [vmem:[%s10452_s2 + $0xf4] sm:$0xf] }
 0x401   : > { %4028 = vmatpush.bf16.msra.mxu3 %v7220_v58 }
 0x402   : > { %v3211_v48 = vsel %vm2955_vm9, %v2859_v38, %v3083_v54  ;;  %v7650_v54 = vld [vmem:[%s10452_s2 + $0x74] sm:$0xf] }
 0x403   : > { %v2772_v22 = vpop.f32.mrf.mxu2  ;;  %v9489_v21 = vpack.c.bf16 %v3211_v48, %v3207_v28  ;;  %v2861_v1 = vpop.f32.mrf.mxu3  ;;  %v7088_v16 = vor.u32 %v7650_v54, %v7085_v53  ;;  %v7152_v48 = vor.u32 %v7666_v47, %v7149_v0  ;;  %v7664_v54 = vld [vmem:[%s10452_s2 + $0xe4] sm:$0xf]  ;;  %v7141_v47 = vld [vmem:[%s10452_s2 + $0xe8] sm:$0xf0] }
 0x404   : > { %v2773_v35 = vadd.f32 %v2772_v22, %v2684_v45  ;;  %v2596_v60 = vpop.f32.mrf.mxu0  ;;  %v2685_v6 = vpop.f32.mrf.mxu1  ;;  %v10731_v45 = vld [vmem:[#allocation31_spill] sm:$0xff] }
 0x405   : > { %v2686_v30 = vadd.f32 %v2685_v6, %v2596_v60  ;;  %4110 = vmatpush.bf16.msrb.mxu0 %v7088_v16  ;;  %4199 = vmatpush.bf16.msrb.mxu1 %v7152_v48 }
 0x406   : > { %v2862_v50 = vadd.f32 %v2861_v1, %v2773_v35 }
 0x408   : > { %v3087_v42 = vmul.f32 0.2, %v2862_v50  ;;  %vm2959_vm10 = vcmp.ge.f32.partialorder %v2862_v50, 0.0 }
 0x40a   : > { %v3215_v26 = vsel %vm2959_vm10, %v2862_v50, %v3087_v42 }
 0x40b   : > { %v2774_v14 = vpop.f32.mrf.mxu2  ;;  %v2863_v4 = vpop.f32.mrf.mxu3 }
 0x40c   : > { %v2775_v33 = vadd.f32 %v2774_v14, %v2686_v30  ;;  %v2599_v62 = vpop.f32.mrf.mxu0  ;;  %v2688_v34 = vpop.f32.mrf.mxu1 }
 0x40d   : > { %v2689_v38 = vadd.f32 %v2688_v34, %v2599_v62 }
 0x40e   : > { %v2864_v59 = vadd.f32 %v2863_v4, %v2775_v33  ;;  %2727 = vmatmul.bf16.gmra.mxu1 %v10732_v46  ;;  %v10740_v46 = vld [vmem:[#allocation62_spill] sm:$0xff] }
 0x40f   : > { %2638 = vmatmul.bf16.gmra.mxu0 %v10731_v45 }
 0x410   : > { %vm2963_vm11 = vcmp.ge.f32.partialorder %v2864_v59, 0.0  ;;  %v3091_v51 = vmul.f32 0.2, %v2864_v59  ;;  %2816 = vmatmul.bf16.gmra.mxu2 %v10733_v5  ;;  %2905 = vmatmul.bf16.gmra.mxu3 %v10734_v43  ;;  %v7648_v5 = vld [vmem:[%s10452_s2 + $0x64] sm:$0xf] }
 0x411   : > { %v7077_v43 = vld [vmem:[%s10452_s2 + $0x68] sm:$0xf0] }
 0x412   : > { %v3219_v27 = vsel %vm2963_vm11, %v2864_v59, %v3091_v51  ;;  %v10739_v51 = vld [vmem:[#allocation50_spill] sm:$0xff]  ;;  %v7080_v53 = vor.u32 %v7648_v5, %v7077_v43  ;;  %v10746_v43 = vld [vmem:[#allocation20_spill] sm:$0xff] }
 0x413   : > { %v2777_v28 = vpop.f32.mrf.mxu2  ;;  %v9534_v22 = vpack.c.bf16 %v3219_v27, %v3215_v26  ;;  %v2866_v24 = vpop.f32.mrf.mxu3  ;;  %v7144_v27 = vor.u32 %v7664_v54, %v7141_v47  ;;  %v10748_v47 = vld [vmem:[#allocation64_spill] sm:$0xff] }
 0x414   : > { %v2778_v29 = vadd.f32 %v2777_v28, %v2689_v38  ;;  %v2601_v25 = vpop.f32.mrf.mxu0  ;;  %v2690_v35 = vpop.f32.mrf.mxu1  ;;  %v10738_v38 = vld [vmem:[#allocation10_spill] sm:$0xff]  ;;  %4111 = vmatpush.bf16.msrb.mxu0 %v7080_v53  ;;  %v10747_v53 = vld [vmem:[#allocation52_spill] sm:$0xff] }
 0x415   : > { %10735 = vst [vmem:[#allocation8_spill] sm:$0xff] %v9534_v22  ;;  %v2691_v60 = vadd.f32 %v2690_v35, %v2601_v25  ;;  %4200 = vmatpush.bf16.msrb.mxu1 %v7144_v27 }
 0x416   : > { %v2867_v1 = vadd.f32 %v2866_v24, %v2778_v29 }
 0x418   : > { %v3095_v49 = vmul.f32 0.2, %v2867_v1  ;;  %vm2967_vm12 = vcmp.ge.f32.partialorder %v2867_v1, 0.0 }
 0x41a   : > { %v3223_v13 = vsel %vm2967_vm12, %v2867_v1, %v3095_v49 }
 0x41b   : > { %v2779_v3 = vpop.f32.mrf.mxu2  ;;  %v2868_v6 = vpop.f32.mrf.mxu3 }
 0x41c   : > { %v2780_v37 = vadd.f32 %v2779_v3, %v2691_v60  ;;  %v2604_v12 = vpop.f32.mrf.mxu0  ;;  %v2693_v30 = vpop.f32.mrf.mxu1 }
 0x41d   : > { %v2694_v11 = vadd.f32 %v2693_v30, %v2604_v12 }
 0x41e   : > { %v2869_v50 = vadd.f32 %v2868_v6, %v2780_v37  ;;  %2732 = vmatmul.bf16.gmra.mxu1 %v10663_v52 }
 0x41f   : > { %2643 = vmatmul.bf16.gmra.mxu0 %v10662_v23 }
 0x420   : > { %vm2971_vm13 = vcmp.ge.f32.partialorder %v2869_v50, 0.0  ;;  %v3099_v41 = vmul.f32 0.2, %v2869_v50  ;;  %2821 = vmatmul.bf16.gmra.mxu2 %v10703_v9  ;;  %2910 = vmatmul.bf16.gmra.mxu3 %v10736_v18  ;;  %v10743_v18 = vld [vmem:[#allocation51_spill] sm:$0xff] }
 0x422   : > { %v3227_v7 = vsel %vm2971_vm13, %v2869_v50, %v3099_v41 }
 0x423   : > { %v2782_v14 = vpop.f32.mrf.mxu2  ;;  %v9540_v31 = vpack.c.bf16 %v3227_v7, %v3223_v13  ;;  %v2871_v36 = vpop.f32.mrf.mxu3  ;;  %v10744_v13 = vld [vmem:[#allocation63_spill] sm:$0xff] }
 0x424   : > { %v2783_v15 = vadd.f32 %v2782_v14, %v2694_v11  ;;  %v2606_v33 = vpop.f32.mrf.mxu0  ;;  %v2695_v4 = vpop.f32.mrf.mxu1  ;;  %v10742_v11 = vld [vmem:[#allocation15_spill] sm:$0xff] }
 0x425   : > { %10737 = vst [vmem:[#allocation9_spill] sm:$0xff] %v9540_v31  ;;  %v2696_v56 = vadd.f32 %v2695_v4, %v2606_v33 }
 0x426   : > { %v2872_v62 = vadd.f32 %v2871_v36, %v2783_v15 }
 0x428   : > { %v3103_v42 = vmul.f32 0.2, %v2872_v62  ;;  %vm2975_vm14 = vcmp.ge.f32.partialorder %v2872_v62, 0.0 }
 0x42a   : > { %v3231_v16 = vsel %vm2975_vm14, %v2872_v62, %v3103_v42 }
 0x42b   : > { %v2784_v23 = vpop.f32.mrf.mxu2  ;;  %v2873_v34 = vpop.f32.mrf.mxu3 }
 0x42c   : > { %v2785_v19 = vadd.f32 %v2784_v23, %v2696_v56  ;;  %v2609_v58 = vpop.f32.mrf.mxu0  ;;  %v2698_v52 = vpop.f32.mrf.mxu1 }
 0x42d   : > { %v2699_v59 = vadd.f32 %v2698_v52, %v2609_v58 }
 0x42e   : > { %v2874_v9 = vadd.f32 %v2873_v34, %v2785_v19  ;;  %3851 = vmatmul.bf16.vlgmr.msra.gmra.mxu1 %v10739_v51 }
 0x42f   : > { %3762 = vmatmul.bf16.vlgmr.msra.gmra.mxu0 %v10738_v38 }
 0x430   : > { %vm2979_vm15 = vcmp.ge.f32.partialorder %v2874_v9, 0.0  ;;  %v3107_v45 = vmul.f32 0.2, %v2874_v9  ;;  %3940 = vmatmul.bf16.vlgmr.msra.gmra.mxu2 %v10740_v46  ;;  %4029 = vmatmul.bf16.vlgmr.msra.gmra.mxu3 %v9407_v44 }
 0x432   : > { %v3235_v0 = vsel %vm2979_vm15, %v2874_v9, %v3107_v45 }
 0x433   : > { %v2787_v26 = vpop.f32.mrf.mxu2  ;;  %v9558_v28 = vpack.c.bf16 %v3235_v0, %v3231_v16  ;;  %v2876_v29 = vpop.f32.mrf.mxu3  ;;  %v7646_v16 = vld [vmem:[%s10452_s2 + $0x54] sm:$0xf]  ;;  %v7069_v0 = vld [vmem:[%s10452_s2 + $0x58] sm:$0xf0] }
 0x434   : > { %v2788_v48 = vadd.f32 %v2787_v26, %v2699_v59  ;;  %v2611_v24 = vpop.f32.mrf.mxu0  ;;  %v2700_v25 = vpop.f32.mrf.mxu1  ;;  %v7662_v26 = vld [vmem:[%s10452_s2 + $0xd4] sm:$0xf]  ;;  %v7072_v27 = vor.u32 %v7646_v16, %v7069_v0 }
 0x435   : > { %10741 = vst [vmem:[#allocation11_spill] sm:$0xff] %v9558_v28  ;;  %v2701_v1 = vadd.f32 %v2700_v25, %v2611_v24 }
 0x436   : > { %v2877_v35 = vadd.f32 %v2876_v29, %v2788_v48  ;;  %v7133_v48 = vld [vmem:[%s10452_s2 + $0xd8] sm:$0xf0]  ;;  %4112 = vmatpush.bf16.msrb.mxu0 %v7072_v27 }
 0x438   : > { %v3111_v30 = vmul.f32 0.2, %v2877_v35  ;;  %vm2983_vm0 = vcmp.ge.f32.partialorder %v2877_v35, 0.0 }
 0x43a   : > { %v3239_v7 = vsel %vm2983_vm0, %v2877_v35, %v3111_v30  ;;  %v7136_v35 = vor.u32 %v7662_v26, %v7133_v48 }
 0x43b   : > { %v2789_v60 = vpop.f32.mrf.mxu2  ;;  %v2878_v37 = vpop.f32.mrf.mxu3 }
 0x43c   : > { %v2790_v3 = vadd.f32 %v2789_v60, %v2701_v1  ;;  %v2614_v6 = vpop.f32.mrf.mxu0  ;;  %v2703_v12 = vpop.f32.mrf.mxu1  ;;  %4201 = vmatpush.bf16.msrb.mxu1 %v7136_v35 }
 0x43d   : > { %v2704_v50 = vadd.f32 %v2703_v12, %v2614_v6 }
 0x43e   : > { %v2879_v49 = vadd.f32 %v2878_v37, %v2790_v3  ;;  %3856 = vmatmul.bf16.gmra.mxu1 %v10743_v18 }
 0x43f   : > { %3767 = vmatmul.bf16.gmra.mxu0 %v10742_v11 }
 0x440   : > { %vm2987_vm1 = vcmp.ge.f32.partialorder %v2879_v49, 0.0  ;;  %v3115_v41 = vmul.f32 0.2, %v2879_v49  ;;  %3945 = vmatmul.bf16.gmra.mxu2 %v10744_v13  ;;  %4034 = vmatmul.bf16.gmra.mxu3 %v9425_v10 }
 0x442   : > { %v3243_v14 = vsel %vm2987_vm1, %v2879_v49, %v3115_v41 }
 0x443   : > { %v2792_v15 = vpop.f32.mrf.mxu2  ;;  %v9564_v36 = vpack.c.bf16 %v3243_v14, %v3239_v7  ;;  %v2881_v4 = vpop.f32.mrf.mxu3 }
 0x444   : > { %v2793_v33 = vadd.f32 %v2792_v15, %v2704_v50  ;;  %v2616_v62 = vpop.f32.mrf.mxu0  ;;  %v2705_v56 = vpop.f32.mrf.mxu1 }
 0x445   : > { %10745 = vst [vmem:[#allocation12_spill] sm:$0xff] %v9564_v36  ;;  %v2706_v19 = vadd.f32 %v2705_v56, %v2616_v62  ;;  %v10750_v62 = vld [vmem:[#allocation25_spill] sm:$0xff] }
 0x446   : > { %v2882_v23 = vadd.f32 %v2881_v4, %v2793_v33 }
 0x448   : > { %v3119_v59 = vmul.f32 0.2, %v2882_v23  ;;  %vm2991_vm2 = vcmp.ge.f32.partialorder %v2882_v23, 0.0 }
 0x44a   : > { %v3247_v29 = vsel %vm2991_vm2, %v2882_v23, %v3119_v59  ;;  %v10751_v23 = vld [vmem:[#allocation21_spill] sm:$0xff] }
 0x44b   : > { %v2794_v34 = vpop.f32.mrf.mxu2  ;;  %v2883_v52 = vpop.f32.mrf.mxu3 }
 0x44c   : > { %v2795_v58 = vadd.f32 %v2794_v34, %v2706_v19  ;;  %v2619_v42 = vpop.f32.mrf.mxu0  ;;  %v2708_v9 = vpop.f32.mrf.mxu1  ;;  %v10752_v19 = vld [vmem:[#allocation23_spill] sm:$0xff] }
 0x44d   : > { %v2709_v5 = vadd.f32 %v2708_v9, %v2619_v42 }
 0x44e   : > { %v2884_v45 = vadd.f32 %v2883_v52, %v2795_v58  ;;  %3861 = vmatmul.bf16.gmra.mxu1 %v10747_v53 }
 0x44f   : > { %3772 = vmatmul.bf16.gmra.mxu0 %v10746_v43 }
 0x450   : > { %vm2995_vm3 = vcmp.ge.f32.partialorder %v2884_v45, 0.0  ;;  %v3123_v54 = vmul.f32 0.2, %v2884_v45  ;;  %3950 = vmatmul.bf16.gmra.mxu2 %v10748_v47  ;;  %4039 = vmatmul.bf16.gmra.mxu3 %v9443_v55 }
 0x452   : > { %v3251_v24 = vsel %vm2995_vm3, %v2884_v45, %v3123_v54 }
 0x453   : > { %v2797_v25 = vpop.f32.mrf.mxu2  ;;  %v9582_v1 = vpack.c.bf16 %v3251_v24, %v3247_v29  ;;  %v2886_v3 = vpop.f32.mrf.mxu3 }
 0x454   : > { %v2798_v60 = vadd.f32 %v2797_v25, %v2709_v5  ;;  %v2621_v37 = vpop.f32.mrf.mxu0  ;;  %v2710_v6 = vpop.f32.mrf.mxu1 }
 0x455   : > { %10749 = vst [vmem:[#allocation13_spill] sm:$0xff] %v9582_v1  ;;  %v2711_v30 = vadd.f32 %v2710_v6, %v2621_v37  ;;  %v10755_v37 = vld [vmem:[#allocation22_spill] sm:$0xff]  ;;  %v10756_v6 = vld [vmem:[#allocation24_spill] sm:$0xff] }
 0x456   : > { %v2887_v12 = vadd.f32 %v2886_v3, %v2798_v60  ;;  %v10754_v60 = vld [vmem:[#allocation30_spill] sm:$0xff] }
 0x458   : > { %v3127_v15 = vmul.f32 0.2, %v2887_v12  ;;  %vm2999_vm4 = vcmp.ge.f32.partialorder %v2887_v12, 0.0 }
 0x45a   : > { %v3255_v34 = vsel %vm2999_vm4, %v2887_v12, %v3127_v15  ;;  %v7644_v12 = vld [vmem:[%s10452_s2 + $0x44] sm:$0xf] }
 0x45b   : > { %v2799_v49 = vpop.f32.mrf.mxu2  ;;  %v2888_v41 = vpop.f32.mrf.mxu3 }
 0x45c   : > { %v2800_v50 = vadd.f32 %v2799_v49, %v2711_v30  ;;  %v2624_v7 = vpop.f32.mrf.mxu0  ;;  %v2713_v14 = vpop.f32.mrf.mxu1  ;;  %v7061_v30 = vld [vmem:[%s10452_s2 + $0x48] sm:$0xf0]  ;;  %v7660_v49 = vld [vmem:[%s10452_s2 + $0xc4] sm:$0xf] }
 0x45d   : > { %v2714_v4 = vadd.f32 %v2713_v14, %v2624_v7 }
 0x45e   : > { %v2889_v33 = vadd.f32 %v2888_v41, %v2800_v50  ;;  %3866 = vmatmul.bf16.gmra.mxu1 %v10751_v23  ;;  %v7064_v50 = vor.u32 %v7644_v12, %v7061_v30  ;;  %v7125_v41 = vld [vmem:[%s10452_s2 + $0xc8] sm:$0xf0]  ;;  %v7213_v12 = vld [vmem:[%s10452_s2 + $0x178] sm:$0xf0]  ;;  %v7698_v30 = vld [vmem:[%s10452_s2 + $0x1f4] sm:$0xf] }
 0x45f   : > { %3777 = vmatmul.bf16.gmra.mxu0 %v10750_v62 }
 0x460   : > { %vm3003_vm5 = vcmp.ge.f32.partialorder %v2889_v33, 0.0  ;;  %v3131_v56 = vmul.f32 0.2, %v2889_v33  ;;  %3955 = vmatmul.bf16.gmra.mxu2 %v10752_v19  ;;  %4044 = vmatmul.bf16.gmra.mxu3 %v9461_v39 }
 0x461   : > { %4113 = vmatpush.bf16.msrb.mxu0 %v7064_v50 }
 0x462   : > { %v3259_v58 = vsel %vm3003_vm5, %v2889_v33, %v3131_v56  ;;  %v7128_v33 = vor.u32 %v7660_v49, %v7125_v41  ;;  %v7277_v49 = vld [vmem:[%s10452_s2 + $0x1f8] sm:$0xf0] }
 0x463   : > { %v2802_v52 = vpop.f32.mrf.mxu2  ;;  %v9588_v42 = vpack.c.bf16 %v3259_v58, %v3255_v34  ;;  %v2891_v59 = vpop.f32.mrf.mxu3  ;;  %v7280_v41 = vor.u32 %v7698_v30, %v7277_v49  ;;  %v7642_v30 = vld [vmem:[%s10452_s2 + $0x34] sm:$0xf]  ;;  %v7053_v49 = vld [vmem:[%s10452_s2 + $0x38] sm:$0xf0] }
 0x464   : > { %v2803_v9 = vadd.f32 %v2802_v52, %v2714_v4  ;;  %v2626_v45 = vpop.f32.mrf.mxu0  ;;  %v2715_v5 = vpop.f32.mrf.mxu1  ;;  %4202 = vmatpush.bf16.msrb.mxu1 %v7128_v33 }
 0x465   : > { %10753 = vst [vmem:[#allocation14_spill] sm:$0xff] %v9588_v42  ;;  %v2716_v16 = vadd.f32 %v2715_v5, %v2626_v45  ;;  %4377 = vmatpush.bf16.msrb.mxu3 %v7280_v41  ;;  %v7117_v41 = vld [vmem:[%s10452_s2 + $0xb8] sm:$0xf0] }
 0x466   : > { %v2892_v54 = vadd.f32 %v2891_v59, %v2803_v9 }
 0x468   : > { %v3135_v24 = vmul.f32 0.2, %v2892_v54  ;;  %vm3007_vm6 = vcmp.ge.f32.partialorder %v2892_v54, 0.0 }
 0x46a   : > { %v3263_v7 = vsel %vm3007_vm6, %v2892_v54, %v3135_v24 }
 0x46b   : > { %v2804_v0 = vpop.f32.mrf.mxu2  ;;  %v2893_v27 = vpop.f32.mrf.mxu3 }
 0x46c   : > { %v2805_v26 = vadd.f32 %v2804_v0, %v2716_v16  ;;  %v2629_v48 = vpop.f32.mrf.mxu0  ;;  %v2718_v29 = vpop.f32.mrf.mxu1 }
 0x46d   : > { %v2719_v35 = vadd.f32 %v2718_v29, %v2629_v48  ;;  %v10758_v29 = vld [vmem:[#allocation35_spill] sm:$0xff] }
 0x46e   : > { %v2894_v25 = vadd.f32 %v2893_v27, %v2805_v26  ;;  %3871 = vmatmul.bf16.gmra.mxu1 %v10755_v37 }
 0x46f   : > { %3782 = vmatmul.bf16.gmra.mxu0 %v10754_v60 }
 0x470   : > { %vm3011_vm7 = vcmp.ge.f32.partialorder %v2894_v25, 0.0  ;;  %v3139_v3 = vmul.f32 0.2, %v2894_v25  ;;  %3960 = vmatmul.bf16.gmra.mxu2 %v10756_v6  ;;  %4049 = vmatmul.bf16.gmra.mxu3 %v9489_v21 }
 0x472   : > { %v3267_v14 = vsel %vm3011_vm7, %v2894_v25, %v3139_v3  ;;  %v10759_v25 = vld [vmem:[#allocation53_spill] sm:$0xff]  ;;  %v7682_v3 = vld [vmem:[%s10452_s2 + $0x174] sm:$0xf] }
 0x473   : > { %v2807_v15 = vpop.f32.mrf.mxu2  ;;  %v9606_v4 = vpack.c.bf16 %v3267_v14, %v3263_v7  ;;  %v2896_v34 = vpop.f32.mrf.mxu3  ;;  %v7216_v50 = vor.u32 %v7682_v3, %v7213_v12 }
 0x474   : > { %v2808_v56 = vadd.f32 %v2807_v15, %v2719_v35  ;;  %v2631_v58 = vpop.f32.mrf.mxu0  ;;  %v2720_v52 = vpop.f32.mrf.mxu1  ;;  %v10760_v35 = vld [vmem:[#allocation65_spill] sm:$0xff] }
 0x475   : > { %10757 = vst [vmem:[#allocation16_spill] sm:$0xff] %v9606_v4  ;;  %v2721_v59 = vadd.f32 %v2720_v52, %v2631_v58  ;;  %4288 = vmatpush.bf16.msrb.mxu2 %v7216_v50  ;;  %v7056_v50 = vor.u32 %v7642_v30, %v7053_v49 }
 0x476   : > { %v2897_v9 = vadd.f32 %v2896_v34, %v2808_v56 }
 0x477   : > { %4114 = vmatpush.bf16.msrb.mxu0 %v7056_v50 }
 0x478   : > { %v3143_v27 = vmul.f32 0.2, %v2897_v9  ;;  %vm3015_vm8 = vcmp.ge.f32.partialorder %v2897_v9, 0.0 }
 0x47a   : > { %v3271_v7 = vsel %vm3015_vm8, %v2897_v9, %v3143_v27  ;;  %v10762_v27 = vld [vmem:[#allocation40_spill] sm:$0xff] }
 0x47b   : > { %v2809_v45 = vpop.f32.mrf.mxu2  ;;  %v2898_v16 = vpop.f32.mrf.mxu3 }
 0x47c   : > { %v2810_v5 = vadd.f32 %v2809_v45, %v2721_v59  ;;  %v2634_v0 = vpop.f32.mrf.mxu0  ;;  %v2723_v26 = vpop.f32.mrf.mxu1 }
 0x47d   : > { %v2724_v48 = vadd.f32 %v2723_v26, %v2634_v0 }
 0x47e   : > { %v2899_v54 = vadd.f32 %v2898_v16, %v2810_v5  ;;  %3876 = vmatmul.bf16.gmra.mxu1 %v10759_v25 }
 0x47f   : > { %3787 = vmatmul.bf16.gmra.mxu0 %v10758_v29 }
 0x480   : > { %vm3019_vm9 = vcmp.ge.f32.partialorder %v2899_v54, 0.0  ;;  %v3147_v24 = vmul.f32 0.2, %v2899_v54  ;;  %3965 = vmatmul.bf16.gmra.mxu2 %v10760_v35  ;;  %4054 = vmatmul.bf16.gmra.mxu3 %v9534_v22 }
 0x482   : > { %v3275_v14 = vsel %vm3019_vm9, %v2899_v54, %v3147_v24  ;;  %v10764_v24 = vld [vmem:[#allocation38_spill] sm:$0xff] }
 0x483   : > { %v2812_v15 = vpop.f32.mrf.mxu2  ;;  %v9624_v33 = vpack.c.bf16 %v3275_v14, %v3271_v7  ;;  %v2901_v34 = vpop.f32.mrf.mxu3 }
 0x484   : > { %v2813_v56 = vadd.f32 %v2812_v15, %v2724_v48  ;;  %v2636_v58 = vpop.f32.mrf.mxu0  ;;  %v2725_v52 = vpop.f32.mrf.mxu1  ;;  %v10763_v48 = vld [vmem:[#allocation36_spill] sm:$0xff] }
 0x485   : > { %10761 = vst [vmem:[#allocation17_spill] sm:$0xff] %v9624_v33  ;;  %v2726_v45 = vadd.f32 %v2725_v52, %v2636_v58 }
 0x486   : > { %v2902_v59 = vadd.f32 %v2901_v34, %v2813_v56 }
 0x488   : > { %v3151_v3 = vmul.f32 0.2, %v2902_v59  ;;  %vm3023_vm10 = vcmp.ge.f32.partialorder %v2902_v59, 0.0 }
 0x48a   : > { %v3279_v7 = vsel %vm3023_vm10, %v2902_v59, %v3151_v3 }
 0x48b   : > { %v2814_v5 = vpop.f32.mrf.mxu2  ;;  %v2903_v0 = vpop.f32.mrf.mxu3 }
 0x48c   : > { %v2815_v16 = vadd.f32 %v2814_v5, %v2726_v45  ;;  %v2639_v26 = vpop.f32.mrf.mxu0  ;;  %v2728_v22 = vpop.f32.mrf.mxu1 }
 0x48d   : > { %v2729_v9 = vadd.f32 %v2728_v22, %v2639_v26  ;;  %v7658_v22 = vld [vmem:[%s10452_s2 + $0xb4] sm:$0xf] }
 0x48e   : > { %v2904_v12 = vadd.f32 %v2903_v0, %v2815_v16  ;;  %3881 = vmatmul.bf16.gmra.mxu1 %v10763_v48  ;;  %v7120_v56 = vor.u32 %v7658_v22, %v7117_v41 }
 0x48f   : > { %3792 = vmatmul.bf16.gmra.mxu0 %v10762_v27 }
 0x490   : > { %vm3027_vm11 = vcmp.ge.f32.partialorder %v2904_v12, 0.0  ;;  %v3155_v54 = vmul.f32 0.2, %v2904_v12  ;;  %3970 = vmatmul.bf16.gmra.mxu2 %v10764_v24  ;;  %4059 = vmatmul.bf16.gmra.mxu3 %v9540_v31 }
 0x491   : > { %4203 = vmatpush.bf16.msrb.mxu1 %v7120_v56 }
 0x492   : > { %v3283_v14 = vsel %vm3027_vm11, %v2904_v12, %v3155_v54  ;;  %v10765_v12 = vld [vmem:[#allocation41_spill] sm:$0xff] }
 0x493   : > { %v2817_v15 = vpop.f32.mrf.mxu2  ;;  %v9642_v34 = vpack.c.bf16 %v3283_v14, %v3279_v7  ;;  %v2906_v52 = vpop.f32.mrf.mxu3  ;;  %v10766_v54 = vld [vmem:[#allocation37_spill] sm:$0xff]  ;;  %v7680_v7 = vld [vmem:[%s10452_s2 + $0x164] sm:$0xf] }
 0x494   : > { %v2818_v58 = vadd.f32 %v2817_v15, %v2729_v9  ;;  %v2641_v45 = vpop.f32.mrf.mxu0  ;;  %v2730_v5 = vpop.f32.mrf.mxu1 }
 0x495   : > { %v2731_v0 = vadd.f32 %v2730_v5, %v2641_v45 }
 0x496   : > { %v2907_v16 = vadd.f32 %v2906_v52, %v2818_v58  ;;  %v7269_v52 = vld [vmem:[%s10452_s2 + $0x1e8] sm:$0xf0] }
 0x498   : > { %v3159_v48 = vmul.f32 0.2, %v2907_v16  ;;  %vm3031_vm12 = vcmp.ge.f32.partialorder %v2907_v16, 0.0 }
 0x49a   : > { %v3287_v22 = vsel %vm3031_vm12, %v2907_v16, %v3159_v48 }
 0x49b   : > { %v2819_v26 = vpop.f32.mrf.mxu2  ;;  %v2908_v49 = vpop.f32.mrf.mxu3 }
 0x49c   : > { %v2820_v30 = vadd.f32 %v2819_v26, %v2731_v0  ;;  %v2644_v31 = vpop.f32.mrf.mxu0  ;;  %v2733_v24 = vpop.f32.mrf.mxu1  ;;  %v3428_v26 = vld [vmem:[%s10453_s3] sm:$0x3] }
 0x49d   : > { %v2734_v3 = vadd.f32 %v2733_v24, %v2644_v31  ;;  %v7205_v31 = vld [vmem:[%s10452_s2 + $0x168] sm:$0xf0]  ;;  %v7696_v24 = vld [vmem:[%s10452_s2 + $0x1e4] sm:$0xf] }
 0x49e   : > { %v2909_v59 = vadd.f32 %v2908_v49, %v2820_v30  ;;  %3886 = vmatmul.bf16.gmra.mxu1 %v10766_v54  ;;  %v7208_v48 = vor.u32 %v7680_v7, %v7205_v31  ;;  %v7272_v5 = vor.u32 %v7696_v24, %v7269_v52  ;;  %v9665_v30 = vperm.slane %v3428_v26, 0  ;;  %v10768_v24 = vld [vmem:[#allocation42_spill] sm:$0xff] }
 0x49f   : > { %3797 = vmatmul.bf16.gmra.mxu0 %v10765_v12  ;;  %v7656_v52 = vld [vmem:[%s10452_s2 + $0xa4] sm:$0xf] }
 0x4a0   : > { %vm3035_vm13 = vcmp.ge.f32.partialorder %v2909_v59, 0.0  ;;  %v3163_v9 = vmul.f32 0.2, %v2909_v59  ;;  %3975 = vmatmul.bf16.gmra.mxu2 %v9269_v61  ;;  %4064 = vmatmul.bf16.gmra.mxu3 %v9558_v28 }
 0x4a1   : > { %4289 = vmatpush.bf16.msrb.mxu2 %v7208_v48  ;;  %4378 = vmatpush.bf16.msrb.mxu3 %v7272_v5  ;;  %v7045_v48 = vld [vmem:[%s10452_s2 + $0x28] sm:$0xf0] }
 0x4a2   : > { %v3291_v50 = vsel %vm3035_vm13, %v2909_v59, %v3163_v9  ;;  %v7109_v5 = vld [vmem:[%s10452_s2 + $0xa8] sm:$0xf0] }
 0x4a3   : > { %v2822_v41 = vpop.f32.mrf.mxu2  ;;  %v9657_v14 = vpack.c.bf16 %v3291_v50, %v3287_v22  ;;  %v2911_v56 = vpop.f32.mrf.mxu3 }
 0x4a4   : > { %v2823_v15 = vadd.f32 %v2822_v41, %v2734_v3  ;;  %v2646_v58 = vpop.f32.mrf.mxu0  ;;  %v2735_v45 = vpop.f32.mrf.mxu1 }
 0x4a5   : > { %10767 = vst [vmem:[#allocation18_spill] sm:$0xff] %v9657_v14  ;;  %v2736_v0 = vadd.f32 %v2735_v45, %v2646_v58  ;;  %v7640_v58 = vld [vmem:[%s10452_s2 + $0x24] sm:$0xf] }
 0x4a6   : > { %v2912_v16 = vadd.f32 %v2911_v56, %v2823_v15  ;;  %v10769_v56 = vld [vmem:[#allocation54_spill] sm:$0xff]  ;;  %v7048_v45 = vor.u32 %v7640_v58, %v7045_v48 }
 0x4a8   : > { %v3167_v41 = vmul.f32 0.2, %v2912_v16  ;;  %vm3039_vm14 = vcmp.ge.f32.partialorder %v2912_v16, 0.0  ;;  %4115 = vmatpush.bf16.msrb.mxu0 %v7048_v45 }
 0x4ab   : > { %v2824_v49 = vpop.f32.mrf.mxu2  ;;  %v2913_v3 = vpop.f32.mrf.mxu3 }
 0x4ac   : > { %v2825_v59 = vadd.f32 %v2824_v49, %v2736_v0  ;;  %v3763_v9 = vpop.f32.mrf.mxu0  ;;  %v3852_v50 = vpop.f32.mrf.mxu1  ;;  %v3295_v0 = vsel %vm3039_vm14, %v2912_v16, %v3167_v41 }
 0x4ad   : > { %v3764_v22 = vadd.f32 %v3763_v9, %v9665_v30 }
 0x4ae   : > { %v2914_v7 = vadd.f32 %v2913_v3, %v2825_v59  ;;  %3891 = vmatmul.bf16.gmra.mxu1 %v10769_v56  ;;  %v7112_v59 = vor.u32 %v7656_v52, %v7109_v5  ;;  %v10771_v52 = vld [vmem:[#allocation43_spill] sm:$0xff] }
 0x4af   : > { %v3853_v31 = vadd.f32 %v3852_v50, %v3764_v22  ;;  %3802 = vmatmul.bf16.gmra.mxu0 %v10768_v24  ;;  %v10772_v5 = vld [vmem:[#allocation55_spill] sm:$0xff] }
 0x4b0   : > { %vm3043_vm15 = vcmp.ge.f32.partialorder %v2914_v7, 0.0  ;;  %v3171_v15 = vmul.f32 0.2, %v2914_v7  ;;  %3980 = vmatmul.bf16.gmra.mxu2 %v9275_v63  ;;  %4069 = vmatmul.bf16.gmra.mxu3 %v9564_v36 }
 0x4b1   : > { %4204 = vmatpush.bf16.msrb.mxu1 %v7112_v59 }
 0x4b2   : > { %v3299_v26 = vsel %vm3043_vm15, %v2914_v7, %v3171_v15 }
 0x4b3   : > { %v3941_v49 = vpop.f32.mrf.mxu2  ;;  %v9684_v3 = vpack.c.bf16 %v3299_v26, %v3295_v0  ;;  %v4030_v22 = vpop.f32.mrf.mxu3 }
 0x4b4   : > { %v3942_v9 = vadd.f32 %v3941_v49, %v3853_v31  ;;  %v3765_v50 = vpop.f32.mrf.mxu0  ;;  %v3854_v63 = vpop.f32.mrf.mxu1 }
 0x4b5   : > { %10770 = vst [vmem:[#allocation19_spill] sm:$0xff] %v9684_v3  ;;  %v3766_v36 = vadd.f32 %v3765_v50, %v9665_v30 }
 0x4b6   : > { %v4031_v56 = vadd.f32 %v4030_v22, %v3942_v9 }
 0x4b7   : > { %v3855_v58 = vadd.f32 %v3854_v63, %v3766_v36  ;;  %v7678_v63 = vld [vmem:[%s10452_s2 + $0x154] sm:$0xf]  ;;  %v7261_v36 = vld [vmem:[%s10452_s2 + $0x1d8] sm:$0xf0] }
 0x4b8   : > { %v4530_v7 = vmul.f32 0.2, %v4031_v56  ;;  %vm4466_vm0 = vcmp.ge.f32.partialorder %v4031_v56, 0.0 }
 0x4bb   : > { %v3943_v48 = vpop.f32.mrf.mxu2  ;;  %v4032_v28 = vpop.f32.mrf.mxu3 }
 0x4bc   : > { %v3944_v24 = vadd.f32 %v3943_v48, %v3855_v58  ;;  %v3768_v61 = vpop.f32.mrf.mxu0  ;;  %v3857_v41 = vpop.f32.mrf.mxu1 }
 0x4bd   : > { %v3769_v16 = vadd.f32 %v3768_v61, %v9665_v30  ;;  %v7197_v61 = vld [vmem:[%s10452_s2 + $0x158] sm:$0xf0] }
 0x4be   : > { %v4033_v15 = vadd.f32 %v4032_v28, %v3944_v24  ;;  %3896 = vmatmul.bf16.gmra.mxu1 %v10772_v5  ;;  %v7694_v28 = vld [vmem:[%s10452_s2 + $0x1d4] sm:$0xf]  ;;  %v9704_v24 = vsel %vm4466_vm0, %v4031_v56, %v4530_v7  ;;  %v7200_v26 = vor.u32 %v7678_v63, %v7197_v61 }
 0x4bf   : > { %v3858_v31 = vadd.f32 %v3857_v41, %v3769_v16  ;;  %3807 = vmatmul.bf16.gmra.mxu0 %v10771_v52  ;;  %10773 = vst [vmem:[#allocation26_spill] sm:$0xff] %v9704_v24  ;;  %v7264_v49 = vor.u32 %v7694_v28, %v7261_v36 }
 0x4c0   : > { %vm4468_vm1 = vcmp.ge.f32.partialorder %v4033_v15, 0.0  ;;  %v4532_v45 = vmul.f32 0.2, %v4033_v15  ;;  %3985 = vmatmul.bf16.gmra.mxu2 %v9293_v17  ;;  %4074 = vmatmul.bf16.gmra.mxu3 %v9582_v1 }
 0x4c1   : > { %4290 = vmatpush.bf16.msrb.mxu2 %v7200_v26  ;;  %4379 = vmatpush.bf16.msrb.mxu3 %v7264_v49  ;;  %v10776_v49 = vld [vmem:[#allocation56_spill] sm:$0xff] }
 0x4c2   : > { %v9706_v0 = vsel %vm4468_vm1, %v4033_v15, %v4532_v45 }
 0x4c3   : > { %10774 = vst [vmem:[#allocation27_spill] sm:$0xff] %v9706_v0  ;;  %v3946_v9 = vpop.f32.mrf.mxu2  ;;  %v4035_v50 = vpop.f32.mrf.mxu3 }
 0x4c4   : > { %v3947_v22 = vadd.f32 %v3946_v9, %v3858_v31  ;;  %v3770_v58 = vpop.f32.mrf.mxu0  ;;  %v3859_v16 = vpop.f32.mrf.mxu1  ;;  %v10775_v9 = vld [vmem:[#allocation44_spill] sm:$0xff] }
 0x4c5   : > { %v3771_v48 = vadd.f32 %v3770_v58, %v9665_v30 }
 0x4c6   : > { %v4036_v41 = vadd.f32 %v4035_v50, %v3947_v22  ;;  %v7037_v22 = vld [vmem:[%s10452_s2 + $0x18] sm:$0xf0]  ;;  %v7654_v50 = vld [vmem:[%s10452_s2 + $0x94] sm:$0xf] }
 0x4c7   : > { %v3860_v1 = vadd.f32 %v3859_v16, %v3771_v48  ;;  %v7101_v48 = vld [vmem:[%s10452_s2 + $0x98] sm:$0xf0] }
 0x4c8   : > { %v4534_v28 = vmul.f32 0.2, %v4036_v41  ;;  %vm4470_vm2 = vcmp.ge.f32.partialorder %v4036_v41, 0.0 }
 0x4ca   : > { %v9728_v16 = vsel %vm4470_vm2, %v4036_v41, %v4534_v28 }
 0x4cb   : > { %v3948_v56 = vpop.f32.mrf.mxu2  ;;  %v4037_v15 = vpop.f32.mrf.mxu3  ;;  %10777 = vst [vmem:[#allocation28_spill] sm:$0xff] %v9728_v16 }
 0x4cc   : > { %v3949_v7 = vadd.f32 %v3948_v56, %v3860_v1  ;;  %v3773_v45 = vpop.f32.mrf.mxu0  ;;  %v3862_v61 = vpop.f32.mrf.mxu1  ;;  %v7638_v1 = vld [vmem:[%s10452_s2 + $0x14] sm:$0xf] }
 0x4cd   : > { %v3774_v63 = vadd.f32 %v3773_v45, %v9665_v30  ;;  %v7040_v58 = vor.u32 %v7638_v1, %v7037_v22 }
 0x4ce   : > { %v4038_v36 = vadd.f32 %v4037_v15, %v3949_v7  ;;  %3901 = vmatmul.bf16.gmra.mxu1 %v10776_v49  ;;  %v7104_v15 = vor.u32 %v7654_v50, %v7101_v48 }
 0x4cf   : > { %v3863_v31 = vadd.f32 %v3862_v61, %v3774_v63  ;;  %3812 = vmatmul.bf16.gmra.mxu0 %v10775_v9 }
 0x4d0   : > { %vm4472_vm3 = vcmp.ge.f32.partialorder %v4038_v36, 0.0  ;;  %v4536_v26 = vmul.f32 0.2, %v4038_v36  ;;  %3990 = vmatmul.bf16.gmra.mxu2 %v9299_v2  ;;  %4079 = vmatmul.bf16.gmra.mxu3 %v9588_v42 }
 0x4d1   : > { %4116 = vmatpush.bf16.msrb.mxu0 %v7040_v58  ;;  %4205 = vmatpush.bf16.msrb.mxu1 %v7104_v15  ;;  %v7253_v15 = vld [vmem:[%s10452_s2 + $0x1c8] sm:$0xf0] }
 0x4d2   : > { %v9730_v56 = vsel %vm4472_vm3, %v4038_v36, %v4536_v26 }
 0x4d3   : > { %10778 = vst [vmem:[#allocation29_spill] sm:$0xff] %v9730_v56  ;;  %v3951_v7 = vpop.f32.mrf.mxu2  ;;  %v4040_v61 = vpop.f32.mrf.mxu3 }
 0x4d4   : > { %v3952_v63 = vadd.f32 %v3951_v7, %v3863_v31  ;;  %v3775_v59 = vpop.f32.mrf.mxu0  ;;  %v3864_v1 = vpop.f32.mrf.mxu1  ;;  %v10779_v7 = vld [vmem:[#allocation45_spill] sm:$0xff] }
 0x4d5   : > { %v3776_v24 = vadd.f32 %v3775_v59, %v9665_v30  ;;  %v10780_v59 = vld [vmem:[#allocation57_spill] sm:$0xff] }
 0x4d6   : > { %v4041_v22 = vadd.f32 %v4040_v61, %v3952_v63 }
 0x4d7   : > { %v3865_v0 = vadd.f32 %v3864_v1, %v3776_v24  ;;  %v7189_v24 = vld [vmem:[%s10452_s2 + $0x148] sm:$0xf0] }
 0x4d8   : > { %v4538_v48 = vmul.f32 0.2, %v4041_v22  ;;  %vm4474_vm4 = vcmp.ge.f32.partialorder %v4041_v22, 0.0 }
 0x4da   : > { %v9752_v1 = vsel %vm4474_vm4, %v4041_v22, %v4538_v48 }
 0x4db   : > { %v3953_v42 = vpop.f32.mrf.mxu2  ;;  %v4042_v28 = vpop.f32.mrf.mxu3  ;;  %10781 = vst [vmem:[#allocation31_spill] sm:$0xff] %v9752_v1 }
 0x4dc   : > { %v3954_v41 = vadd.f32 %v3953_v42, %v3865_v0  ;;  %v3778_v36 = vpop.f32.mrf.mxu0  ;;  %v3867_v50 = vpop.f32.mrf.mxu1  ;;  %v7676_v42 = vld [vmem:[%s10452_s2 + $0x144] sm:$0xf] }
 0x4dd   : > { %v3779_v26 = vadd.f32 %v3778_v36, %v9665_v30  ;;  %v7692_v0 = vld [vmem:[%s10452_s2 + $0x1c4] sm:$0xf]  ;;  %v7192_v63 = vor.u32 %v7676_v42, %v7189_v24 }
 0x4de   : > { %v4043_v2 = vadd.f32 %v4042_v28, %v3954_v41  ;;  %3906 = vmatmul.bf16.gmra.mxu1 %v10780_v59  ;;  %v7256_v61 = vor.u32 %v7692_v0, %v7253_v15 }
 0x4df   : > { %v3868_v31 = vadd.f32 %v3867_v50, %v3779_v26  ;;  %3817 = vmatmul.bf16.gmra.mxu0 %v10779_v7  ;;  %4291 = vmatpush.bf16.msrb.mxu2 %v7192_v63 }
 0x4e0   : > { %vm4476_vm5 = vcmp.ge.f32.partialorder %v4043_v2, 0.0  ;;  %v4540_v58 = vmul.f32 0.2, %v4043_v2  ;;  %3995 = vmatmul.bf16.gmra.mxu2 %v9317_v8  ;;  %4084 = vmatmul.bf16.gmra.mxu3 %v9606_v4 }
 0x4e1   : > { %4380 = vmatpush.bf16.msrb.mxu3 %v7256_v61  ;;  %v10784_v61 = vld [vmem:[#allocation58_spill] sm:$0xff] }
 0x4e2   : > { %v9754_v41 = vsel %vm4476_vm5, %v4043_v2, %v4540_v58 }
 0x4e3   : > { %10782 = vst [vmem:[#allocation32_spill] sm:$0xff] %v9754_v41  ;;  %v3956_v28 = vpop.f32.mrf.mxu2  ;;  %v4045_v50 = vpop.f32.mrf.mxu3 }
 0x4e4   : > { %v3957_v26 = vadd.f32 %v3956_v28, %v3868_v31  ;;  %v3780_v45 = vpop.f32.mrf.mxu0  ;;  %v3869_v56 = vpop.f32.mrf.mxu1  ;;  %v10783_v28 = vld [vmem:[#allocation46_spill] sm:$0xff] }
 0x4e5   : > { %v3781_v16 = vadd.f32 %v3780_v45, %v9665_v30 }
 0x4e6   : > { %v4046_v4 = vadd.f32 %v4045_v50, %v3957_v26  ;;  %v7093_v26 = vld [vmem:[%s10452_s2 + $0x88] sm:$0xf0] }
 0x4e7   : > { %v3870_v8 = vadd.f32 %v3869_v56, %v3781_v16  ;;  %v7029_v16 = vld [vmem:[%s10452_s2 + $0x8] sm:$0xf0]  ;;  %v7652_v56 = vld [vmem:[%s10452_s2 + $0x84] sm:$0xf] }
 0x4e8   : > { %v4542_v0 = vmul.f32 0.2, %v4046_v4  ;;  %vm4478_vm6 = vcmp.ge.f32.partialorder %v4046_v4, 0.0 }
 0x4ea   : > { %v9776_v50 = vsel %vm4478_vm6, %v4046_v4, %v4542_v0 }
 0x4eb   : > { %v3958_v42 = vpop.f32.mrf.mxu2  ;;  %v4047_v22 = vpop.f32.mrf.mxu3  ;;  %10785 = vst [vmem:[#allocation33_spill] sm:$0xff] %v9776_v50 }
 0x4ec   : > { %v3959_v24 = vadd.f32 %v3958_v42, %v3870_v8  ;;  %v3783_v48 = vpop.f32.mrf.mxu0  ;;  %v3872_v58 = vpop.f32.mrf.mxu1  ;;  %v7636_v8 = vld [vmem:[%s10452_s2 + $0x4] sm:$0xf] }
 0x4ed   : > { %v3784_v2 = vadd.f32 %v3783_v48, %v9665_v30  ;;  %v7032_v45 = vor.u32 %v7636_v8, %v7029_v16 }
 0x4ee   : > { %v4048_v15 = vadd.f32 %v4047_v22, %v3959_v24  ;;  %3911 = vmatmul.bf16.gmra.mxu1 %v10784_v61  ;;  %v7096_v22 = vor.u32 %v7652_v56, %v7093_v26 }
 0x4ef   : > { %v3873_v31 = vadd.f32 %v3872_v58, %v3784_v2  ;;  %3822 = vmatmul.bf16.gmra.mxu0 %v10783_v28 }
 0x4f0   : > { %vm4480_vm7 = vcmp.ge.f32.partialorder %v4048_v15, 0.0  ;;  %v4544_v63 = vmul.f32 0.2, %v4048_v15  ;;  %4000 = vmatmul.bf16.gmra.mxu2 %v9335_v32  ;;  %4089 = vmatmul.bf16.gmra.mxu3 %v9624_v33 }
 0x4f1   : > { %4117 = vmatpush.bf16.msrb.mxu0 %v7032_v45  ;;  %4206 = vmatpush.bf16.msrb.mxu1 %v7096_v22  ;;  %v10788_v45 = vld [vmem:[#allocation59_spill] sm:$0xff] }
 0x4f2   : > { %v9778_v42 = vsel %vm4480_vm7, %v4048_v15, %v4544_v63 }
 0x4f3   : > { %10786 = vst [vmem:[#allocation34_spill] sm:$0xff] %v9778_v42  ;;  %v3961_v24 = vpop.f32.mrf.mxu2  ;;  %v4050_v58 = vpop.f32.mrf.mxu3 }
 0x4f4   : > { %v3962_v2 = vadd.f32 %v3961_v24, %v3873_v31  ;;  %v3785_v36 = vpop.f32.mrf.mxu0  ;;  %v3874_v8 = vpop.f32.mrf.mxu1  ;;  %v10787_v24 = vld [vmem:[#allocation47_spill] sm:$0xff] }
 0x4f5   : > { %v3786_v1 = vadd.f32 %v3785_v36, %v9665_v30  ;;  %v7674_v36 = vld [vmem:[%s10452_s2 + $0x134] sm:$0xf] }
 0x4f6   : > { %v4051_v16 = vadd.f32 %v4050_v58, %v3962_v2  ;;  %v7245_v2 = vld [vmem:[%s10452_s2 + $0x1b8] sm:$0xf0] }
 0x4f7   : > { %v3875_v41 = vadd.f32 %v3874_v8, %v3786_v1  ;;  %v7181_v1 = vld [vmem:[%s10452_s2 + $0x138] sm:$0xf0] }
 0x4f8   : > { %vm4482_vm8 = vcmp.ge.f32.partialorder %v4051_v16, 0.0  ;;  %v4546_v26 = vmul.f32 0.2, %v4051_v16  ;;  %v7184_v22 = vor.u32 %v7674_v36, %v7181_v1 }
 0x4fa   : > { %4292 = vmatpush.bf16.msrb.mxu2 %v7184_v22  ;;  %v9801_v8 = vsel %vm4482_vm8, %v4051_v16, %v4546_v26  ;;  %v7670_v16 = vld [vmem:[%s10452_s2 + $0x114] sm:$0xf] }
 0x4fb   : > { %v3963_v33 = vpop.f32.mrf.mxu2  ;;  %v4052_v0 = vpop.f32.mrf.mxu3  ;;  %10789 = vst [vmem:[#allocation39_spill] sm:$0xff] %v9801_v8 }
 0x4fc   : > { %v3964_v4 = vadd.f32 %v3963_v33, %v3875_v41  ;;  %v3788_v15 = vpop.f32.mrf.mxu0  ;;  %v3877_v56 = vpop.f32.mrf.mxu1  ;;  %v7690_v33 = vld [vmem:[%s10452_s2 + $0x1b4] sm:$0xf] }
 0x4fd   : > { %v3789_v63 = vadd.f32 %v3788_v15, %v9665_v30  ;;  %v7248_v58 = vor.u32 %v7690_v33, %v7245_v2  ;;  %v7672_v15 = vld [vmem:[%s10452_s2 + $0x124] sm:$0xf]  ;;  %v7237_v33 = vld [vmem:[%s10452_s2 + $0x1a8] sm:$0xf0] }
 0x4fe   : > { %v4053_v48 = vadd.f32 %v4052_v0, %v3964_v4  ;;  %3916 = vmatmul.bf16.gmra.mxu1 %v10788_v45 }
 0x4ff   : > { %v3878_v31 = vadd.f32 %v3877_v56, %v3789_v63  ;;  %3827 = vmatmul.bf16.gmra.mxu0 %v10787_v24  ;;  %4381 = vmatpush.bf16.msrb.mxu3 %v7248_v58  ;;  %v7173_v63 = vld [vmem:[%s10452_s2 + $0x128] sm:$0xf0]  ;;  %v7688_v56 = vld [vmem:[%s10452_s2 + $0x1a4] sm:$0xf] }
 0x500   : > { %vm4484_vm9 = vcmp.ge.f32.partialorder %v4053_v48, 0.0  ;;  %v4548_v41 = vmul.f32 0.2, %v4053_v48  ;;  %4005 = vmatmul.bf16.gmra.mxu2 %v9353_v20  ;;  %4094 = vmatmul.bf16.gmra.mxu3 %v9642_v34  ;;  %v7176_v1 = vor.u32 %v7672_v15, %v7173_v63  ;;  %v7240_v2 = vor.u32 %v7688_v56, %v7237_v33  ;;  %v7229_v63 = vld [vmem:[%s10452_s2 + $0x198] sm:$0xf0] }
 0x502   : > { %v9803_v4 = vsel %vm4484_vm9, %v4053_v48, %v4548_v41  ;;  %4293 = vmatpush.bf16.msrb.mxu2 %v7176_v1 }
 0x503   : > { %10790 = vst [vmem:[#allocation10_spill] sm:$0xff] %v9803_v4  ;;  %v3966_v0 = vpop.f32.mrf.mxu2  ;;  %v4055_v48 = vpop.f32.mrf.mxu3  ;;  %4382 = vmatpush.bf16.msrb.mxu3 %v7240_v2  ;;  %v7221_v2 = vld [vmem:[%s10452_s2 + $0x188] sm:$0xf0]  ;;  %v10791_v4 = vld [vmem:[#allocation48_spill] sm:$0xff] }
 0x504   : > { %v3967_v26 = vadd.f32 %v3966_v0, %v3878_v31  ;;  %v3790_v36 = vpop.f32.mrf.mxu0  ;;  %v3879_v22 = vpop.f32.mrf.mxu1  ;;  %v7165_v31 = vld [vmem:[%s10452_s2 + $0x118] sm:$0xf0]  ;;  %v7686_v0 = vld [vmem:[%s10452_s2 + $0x194] sm:$0xf] }
 0x505   : > { %v3791_v41 = vadd.f32 %v3790_v36, %v9665_v30  ;;  %v7168_v15 = vor.u32 %v7670_v16, %v7165_v31  ;;  %v7232_v56 = vor.u32 %v7686_v0, %v7229_v63  ;;  %v7157_v36 = vld [vmem:[%s10452_s2 + $0x108] sm:$0xf0]  ;;  %v7684_v16 = vld [vmem:[%s10452_s2 + $0x184] sm:$0xf] }
 0x506   : > { %v4056_v58 = vadd.f32 %v4055_v48, %v3967_v26  ;;  %v7668_v48 = vld [vmem:[%s10452_s2 + $0x104] sm:$0xf] }
 0x507   : > { %v3880_v50 = vadd.f32 %v3879_v22, %v3791_v41  ;;  %4294 = vmatpush.bf16.msrb.mxu2 %v7168_v15  ;;  %4383 = vmatpush.bf16.msrb.mxu3 %v7232_v56  ;;  %v7160_v22 = vor.u32 %v7668_v48, %v7157_v36  ;;  %v7224_v15 = vor.u32 %v7684_v16, %v7221_v2  ;;  %v7707_v48 = vld [vmem:[%s10454_s4 + $0x38] sm:$0xff] }
 0x508   : > { %v4550_v63 = vmul.f32 0.2, %v4056_v58  ;;  %vm4486_vm10 = vcmp.ge.f32.partialorder %v4056_v58, 0.0  ;;  %v7715_v36 = vld [vmem:[%s10454_s4 + $0x78] sm:$0xff]  ;;  %4822 = vmatpush.bf16.msra.mxu0 %v7707_v48 }
 0x509   : > { %4911 = vmatpush.bf16.msra.mxu1 %v7715_v36 }
 0x50a   : > { %v9855_v16 = vsel %vm4486_vm10, %v4056_v58, %v4550_v63 }
 0x50b   : > { %v3968_v26 = vpop.f32.mrf.mxu2  ;;  %v4057_v33 = vpop.f32.mrf.mxu3  ;;  %4295 = vmatpush.bf16.msrb.mxu2 %v7160_v22  ;;  %4384 = vmatpush.bf16.msrb.mxu3 %v7224_v15  ;;  %10793 = vst [vmem:[#allocation50_spill] sm:$0xff] %v9855_v16 }
 0x50c   : > { %v3969_v1 = vadd.f32 %v3968_v26, %v3880_v50  ;;  %v3793_v41 = vpop.f32.mrf.mxu0  ;;  %v3882_v0 = vpop.f32.mrf.mxu1  ;;  %v10792_v26 = vld [vmem:[#allocation60_spill] sm:$0xff] }
 0x50d   : > { %v3794_v31 = vadd.f32 %v3793_v41, %v9665_v30  ;;  %v10795_v41 = vld [vmem:[#allocation49_spill] sm:$0xff] }
 0x50e   : > { %v4058_v56 = vadd.f32 %v4057_v33, %v3969_v1  ;;  %3921 = vmatmul.bf16.gmra.mxu1 %v10792_v26 }
 0x50f   : > { %v3883_v8 = vadd.f32 %v3882_v0, %v3794_v31  ;;  %3832 = vmatmul.bf16.gmra.mxu0 %v10791_v4 }
 0x510   : > { %vm4488_vm11 = vcmp.ge.f32.partialorder %v4058_v56, 0.0  ;;  %v4552_v50 = vmul.f32 0.2, %v4058_v56  ;;  %4010 = vmatmul.bf16.gmra.mxu2 %v9368_v57  ;;  %4099 = vmatmul.bf16.gmra.mxu3 %v9657_v14 }
 0x512   : > { %v9857_v1 = vsel %vm4488_vm11, %v4058_v56, %v4552_v50 }
 0x513   : > { %10794 = vst [vmem:[#allocation62_spill] sm:$0xff] %v9857_v1  ;;  %v3971_v33 = vpop.f32.mrf.mxu2  ;;  %v4060_v2 = vpop.f32.mrf.mxu3 }
 0x514   : > { %v3972_v22 = vadd.f32 %v3971_v33, %v3883_v8  ;;  %v3795_v31 = vpop.f32.mrf.mxu0  ;;  %v3884_v15 = vpop.f32.mrf.mxu1  ;;  %v10796_v33 = vld [vmem:[#allocation61_spill] sm:$0xff] }
 0x515   : > { %v3796_v0 = vadd.f32 %v3795_v31, %v9665_v30 }
 0x516   : > { %v4061_v42 = vadd.f32 %v4060_v2, %v3972_v22 }
 0x517   : > { %v3885_v14 = vadd.f32 %v3884_v15, %v3796_v0 }
 0x518   : > { %v4554_v48 = vmul.f32 0.2, %v4061_v42  ;;  %vm4490_vm12 = vcmp.ge.f32.partialorder %v4061_v42, 0.0 }
 0x51b   : > { %v3973_v57 = vpop.f32.mrf.mxu2  ;;  %v4062_v58 = vpop.f32.mrf.mxu3 }
 0x51c   : > { %v3974_v26 = vadd.f32 %v3973_v57, %v3885_v14  ;;  %v3798_v63 = vpop.f32.mrf.mxu0  ;;  %v3887_v50 = vpop.f32.mrf.mxu1  ;;  %v9867_v57 = vsel %vm4490_vm12, %v4061_v42, %v4554_v48 }
 0x51d   : > { %v3799_v56 = vadd.f32 %v3798_v63, %v9665_v30 }
 0x51e   : > { %v4063_v36 = vadd.f32 %v4062_v58, %v3974_v26  ;;  %3926 = vmatmul.bf16.gmra.mxu1 %v10796_v33 }
 0x51f   : > { %v3888_v4 = vadd.f32 %v3887_v50, %v3799_v56  ;;  %3837 = vmatmul.bf16.gmra.mxu0 %v10795_v41 }
 0x520   : > { %vm4492_vm13 = vcmp.ge.f32.partialorder %v4063_v36, 0.0  ;;  %v4556_v8 = vmul.f32 0.2, %v4063_v36  ;;  %4015 = vmatmul.bf16.gmra.mxu2 %v9389_v40  ;;  %4104 = vmatmul.bf16.gmra.mxu3 %v9684_v3 }
 0x522   : > { %v9869_v14 = vsel %vm4492_vm13, %v4063_v36, %v4556_v8 }
 0x523   : > { %v3976_v22 = vpop.f32.mrf.mxu2  ;;  %v4670_v26 = vpack.c.bf16 %v9869_v14, %v9867_v57  ;;  %v4065_v31 = vpop.f32.mrf.mxu3 }
 0x524   : > { %v3977_v2 = vadd.f32 %v3976_v22, %v3888_v4  ;;  %v3800_v0 = vpop.f32.mrf.mxu0  ;;  %v3889_v58 = vpop.f32.mrf.mxu1  ;;  %v7706_v22 = vld [vmem:[%s10454_s4 + $0x30] sm:$0xff] }
 0x525   : > { %v3801_v15 = vadd.f32 %v3800_v0, %v9665_v30  ;;  %4823 = vmatpush.bf16.msra.mxu0 %v7706_v22 }
 0x526   : > { %v4066_v63 = vadd.f32 %v4065_v31, %v3977_v2 }
 0x527   : > { %v3890_v56 = vadd.f32 %v3889_v58, %v3801_v15 }
 0x528   : > { %v4558_v36 = vmul.f32 0.2, %v4066_v63  ;;  %vm4494_vm14 = vcmp.ge.f32.partialorder %v4066_v63, 0.0 }
 0x52b   : > { %v3978_v50 = vpop.f32.mrf.mxu2  ;;  %v4067_v1 = vpop.f32.mrf.mxu3 }
 0x52c   : > { %v3979_v16 = vadd.f32 %v3978_v50, %v3890_v56  ;;  %v3803_v3 = vpop.f32.mrf.mxu0  ;;  %v3892_v48 = vpop.f32.mrf.mxu1 }
 0x52d   : > { %v3804_v42 = vadd.f32 %v3803_v3, %v9665_v30  ;;  %v7714_v3 = vld [vmem:[%s10454_s4 + $0x70] sm:$0xff] }
 0x52e   : > { %v4068_v8 = vadd.f32 %v4067_v1, %v3979_v16  ;;  %4207 = vmatmul.bf16.vlgmr.msrb.gmra.mxu1 %v10739_v51  ;;  %v9885_v16 = vsel %vm4494_vm14, %v4066_v63, %v4558_v36 }
 0x52f   : > { %v3893_v40 = vadd.f32 %v3892_v48, %v3804_v42  ;;  %4118 = vmatmul.bf16.vlgmr.msrb.gmra.mxu0 %v10738_v38  ;;  %4912 = vmatpush.bf16.msra.mxu1 %v7714_v3 }
 0x530   : > { %vm4496_vm15 = vcmp.ge.f32.partialorder %v4068_v8, 0.0  ;;  %v4560_v4 = vmul.f32 0.2, %v4068_v8  ;;  %4296 = vmatmul.bf16.vlgmr.msrb.gmra.mxu2 %v10740_v46  ;;  %4385 = vmatmul.bf16.vlgmr.msrb.gmra.mxu3 %v9407_v44 }
 0x532   : > { %v9887_v1 = vsel %vm4496_vm15, %v4068_v8, %v4560_v4 }
 0x533   : > { %v3981_v38 = vpop.f32.mrf.mxu2  ;;  %v4070_v44 = vpop.f32.mrf.mxu3 }
 0x534   : > { %v3982_v46 = vadd.f32 %v3981_v38, %v3893_v40  ;;  %v3805_v2 = vpop.f32.mrf.mxu0  ;;  %v3894_v0 = vpop.f32.mrf.mxu1 }
 0x535   : > { %v3806_v31 = vadd.f32 %v3805_v2, %v9665_v30 }
 0x536   : > { %v4071_v15 = vadd.f32 %v4070_v44, %v3982_v46  ;;  %v10820_v44 = vld [vmem:[#allocation26_spill] sm:$0xff] }
 0x537   : > { %v3895_v58 = vadd.f32 %v3894_v0, %v3806_v31 }
 0x538   : > { %v4562_v8 = vmul.f32 0.2, %v4071_v15  ;;  %vm4498_vm0 = vcmp.ge.f32.partialorder %v4071_v15, 0.0 }
 0x53a   : > { %v9897_v3 = vsel %vm4498_vm0, %v4071_v15, %v4562_v8 }
 0x53b   : > { %v3983_v56 = vpop.f32.mrf.mxu2  ;;  %v4072_v63 = vpop.f32.mrf.mxu3 }
 0x53c   : > { %v3984_v50 = vadd.f32 %v3983_v56, %v3895_v58  ;;  %v3808_v42 = vpop.f32.mrf.mxu0  ;;  %v3897_v36 = vpop.f32.mrf.mxu1 }
 0x53d   : > { %v3809_v48 = vadd.f32 %v3808_v42, %v9665_v30 }
 0x53e   : > { %v4073_v4 = vadd.f32 %v4072_v63, %v3984_v50  ;;  %4212 = vmatmul.bf16.gmra.mxu1 %v10743_v18 }
 0x53f   : > { %v3898_v22 = vadd.f32 %v3897_v36, %v3809_v48  ;;  %4123 = vmatmul.bf16.gmra.mxu0 %v10742_v11 }
 0x540   : > { %vm4500_vm1 = vcmp.ge.f32.partialorder %v4073_v4, 0.0  ;;  %v4564_v40 = vmul.f32 0.2, %v4073_v4  ;;  %4301 = vmatmul.bf16.gmra.mxu2 %v10744_v13  ;;  %4390 = vmatmul.bf16.gmra.mxu3 %v9425_v10 }
 0x542   : > { %v9899_v38 = vsel %vm4500_vm1, %v4073_v4, %v4564_v40  ;;  %v7713_v40 = vld [vmem:[%s10454_s4 + $0x68] sm:$0xff] }
 0x543   : > { %v3986_v46 = vpop.f32.mrf.mxu2  ;;  %v4075_v31 = vpop.f32.mrf.mxu3  ;;  %4913 = vmatpush.bf16.msra.mxu1 %v7713_v40 }
 0x544   : > { %v3987_v2 = vadd.f32 %v3986_v46, %v3898_v22  ;;  %v3810_v0 = vpop.f32.mrf.mxu0  ;;  %v3899_v58 = vpop.f32.mrf.mxu1  ;;  %v7705_v22 = vld [vmem:[%s10454_s4 + $0x28] sm:$0xff] }
 0x545   : > { %v3811_v11 = vadd.f32 %v3810_v0, %v9665_v30  ;;  %4824 = vmatpush.bf16.msra.mxu0 %v7705_v22 }
 0x546   : > { %v4076_v56 = vadd.f32 %v4075_v31, %v3987_v2 }
 0x547   : > { %v3900_v18 = vadd.f32 %v3899_v58, %v3811_v11 }
 0x548   : > { %v4566_v48 = vmul.f32 0.2, %v4076_v56  ;;  %vm4502_vm2 = vcmp.ge.f32.partialorder %v4076_v56, 0.0 }
 0x54a   : > { %v9915_v46 = vsel %vm4502_vm2, %v4076_v56, %v4566_v48 }
 0x54b   : > { %v3988_v50 = vpop.f32.mrf.mxu2  ;;  %v4077_v63 = vpop.f32.mrf.mxu3 }
 0x54c   : > { %v3989_v13 = vadd.f32 %v3988_v50, %v3900_v18  ;;  %v3813_v10 = vpop.f32.mrf.mxu0  ;;  %v3902_v42 = vpop.f32.mrf.mxu1 }
 0x54d   : > { %v3814_v15 = vadd.f32 %v3813_v10, %v9665_v30 }
 0x54e   : > { %v4078_v36 = vadd.f32 %v4077_v63, %v3989_v13  ;;  %4217 = vmatmul.bf16.gmra.mxu1 %v10747_v53  ;;  %v10819_v53 = vld [vmem:[#allocation27_spill] sm:$0xff] }
 0x54f   : > { %v3903_v8 = vadd.f32 %v3902_v42, %v3814_v15  ;;  %4128 = vmatmul.bf16.gmra.mxu0 %v10746_v43  ;;  %v10821_v51 = vpack.c.bf16 %v10819_v53, %v10820_v44 }
 0x550   : > { %vm4504_vm3 = vcmp.ge.f32.partialorder %v4078_v36, 0.0  ;;  %v4568_v4 = vmul.f32 0.2, %v4078_v36  ;;  %4306 = vmatmul.bf16.gmra.mxu2 %v10748_v47  ;;  %4395 = vmatmul.bf16.gmra.mxu3 %v9443_v55 }
 0x552   : > { %v9917_v2 = vsel %vm4504_vm3, %v4078_v36, %v4568_v4 }
 0x553   : > { %v3991_v43 = vpop.f32.mrf.mxu2  ;;  %v4080_v55 = vpop.f32.mrf.mxu3 }
 0x554   : > { %v3992_v47 = vadd.f32 %v3991_v43, %v3903_v8  ;;  %v3815_v31 = vpop.f32.mrf.mxu0  ;;  %v3904_v11 = vpop.f32.mrf.mxu1 }
 0x555   : > { %v3816_v0 = vadd.f32 %v3815_v31, %v9665_v30 }
 0x556   : > { %v4081_v58 = vadd.f32 %v4080_v55, %v3992_v47 }
 0x557   : > { %v3905_v18 = vadd.f32 %v3904_v11, %v3816_v0 }
 0x558   : > { %v4570_v42 = vmul.f32 0.2, %v4081_v58  ;;  %vm4506_vm4 = vcmp.ge.f32.partialorder %v4081_v58, 0.0 }
 0x55a   : > { %v9927_v4 = vsel %vm4506_vm4, %v4081_v58, %v4570_v42  ;;  %v7704_v42 = vld [vmem:[%s10454_s4 + $0x20] sm:$0xff] }
 0x55b   : > { %v3993_v50 = vpop.f32.mrf.mxu2  ;;  %v4082_v56 = vpop.f32.mrf.mxu3  ;;  %4825 = vmatpush.bf16.msra.mxu0 %v7704_v42 }
 0x55c   : > { %v3994_v13 = vadd.f32 %v3993_v50, %v3905_v18  ;;  %v3818_v63 = vpop.f32.mrf.mxu0  ;;  %v3907_v15 = vpop.f32.mrf.mxu1 }
 0x55d   : > { %v3819_v10 = vadd.f32 %v3818_v63, %v9665_v30 }
 0x55e   : > { %v4083_v48 = vadd.f32 %v4082_v56, %v3994_v13  ;;  %4222 = vmatmul.bf16.gmra.mxu1 %v10751_v23 }
 0x55f   : > { %v3908_v36 = vadd.f32 %v3907_v15, %v3819_v10  ;;  %4133 = vmatmul.bf16.gmra.mxu0 %v10750_v62 }
 0x560   : > { %vm4508_vm5 = vcmp.ge.f32.partialorder %v4083_v48, 0.0  ;;  %v4572_v8 = vmul.f32 0.2, %v4083_v48  ;;  %4311 = vmatmul.bf16.gmra.mxu2 %v10752_v19  ;;  %4400 = vmatmul.bf16.gmra.mxu3 %v9461_v39 }
 0x562   : > { %v9929_v22 = vsel %vm4508_vm5, %v4083_v48, %v4572_v8  ;;  %v7712_v48 = vld [vmem:[%s10454_s4 + $0x60] sm:$0xff] }
 0x563   : > { %v3996_v40 = vpop.f32.mrf.mxu2  ;;  %v4085_v55 = vpop.f32.mrf.mxu3  ;;  %4914 = vmatpush.bf16.msra.mxu1 %v7712_v48 }
 0x564   : > { %v3997_v47 = vadd.f32 %v3996_v40, %v3908_v36  ;;  %v3820_v31 = vpop.f32.mrf.mxu0  ;;  %v3909_v0 = vpop.f32.mrf.mxu1 }
 0x565   : > { %v3821_v62 = vadd.f32 %v3820_v31, %v9665_v30 }
 0x566   : > { %v4086_v11 = vadd.f32 %v4085_v55, %v3997_v47 }
 0x567   : > { %v3910_v23 = vadd.f32 %v3909_v0, %v3821_v62 }
 0x568   : > { %v4574_v56 = vmul.f32 0.2, %v4086_v11  ;;  %vm4510_vm6 = vcmp.ge.f32.partialorder %v4086_v11, 0.0 }
 0x56a   : > { %v9945_v36 = vsel %vm4510_vm6, %v4086_v11, %v4574_v56 }
 0x56b   : > { %v3998_v18 = vpop.f32.mrf.mxu2  ;;  %v4087_v50 = vpop.f32.mrf.mxu3 }
 0x56c   : > { %v3999_v19 = vadd.f32 %v3998_v18, %v3910_v23  ;;  %v3823_v39 = vpop.f32.mrf.mxu0  ;;  %v3912_v13 = vpop.f32.mrf.mxu1 }
 0x56d   : > { %v3824_v58 = vadd.f32 %v3823_v39, %v9665_v30 }
 0x56e   : > { %v4088_v63 = vadd.f32 %v4087_v50, %v3999_v19  ;;  %4227 = vmatmul.bf16.gmra.mxu1 %v10755_v37 }
 0x56f   : > { %v3913_v10 = vadd.f32 %v3912_v13, %v3824_v58  ;;  %4138 = vmatmul.bf16.gmra.mxu0 %v10754_v60 }
 0x570   : > { %vm4512_vm7 = vcmp.ge.f32.partialorder %v4088_v63, 0.0  ;;  %v4576_v15 = vmul.f32 0.2, %v4088_v63  ;;  %4316 = vmatmul.bf16.gmra.mxu2 %v10756_v6  ;;  %4405 = vmatmul.bf16.gmra.mxu3 %v9489_v21 }
 0x572   : > { %v9947_v8 = vsel %vm4512_vm7, %v4088_v63, %v4576_v15  ;;  %v10797_v63 = vld [vmem:[#allocation8_spill] sm:$0xff] }
 0x573   : > { %v4001_v60 = vpop.f32.mrf.mxu2  ;;  %v4090_v21 = vpop.f32.mrf.mxu3 }
 0x574   : > { %v4002_v6 = vadd.f32 %v4001_v60, %v3913_v10  ;;  %v3825_v40 = vpop.f32.mrf.mxu0  ;;  %v3914_v55 = vpop.f32.mrf.mxu1 }
 0x575   : > { %v3826_v47 = vadd.f32 %v3825_v40, %v9665_v30 }
 0x576   : > { %v4091_v31 = vadd.f32 %v4090_v21, %v4002_v6 }
 0x577   : > { %v3915_v62 = vadd.f32 %v3914_v55, %v3826_v47 }
 0x578   : > { %v4578_v39 = vmul.f32 0.2, %v4091_v31  ;;  %vm4514_vm8 = vcmp.ge.f32.partialorder %v4091_v31, 0.0 }
 0x57a   : > { %v9957_v10 = vsel %vm4514_vm8, %v4091_v31, %v4578_v39  ;;  %v10798_v39 = vld [vmem:[#allocation36_spill] sm:$0xff] }
 0x57b   : > { %v4003_v0 = vpop.f32.mrf.mxu2  ;;  %v4092_v11 = vpop.f32.mrf.mxu3 }
 0x57c   : > { %v4004_v23 = vadd.f32 %v4003_v0, %v3915_v62  ;;  %v3828_v18 = vpop.f32.mrf.mxu0  ;;  %v3917_v50 = vpop.f32.mrf.mxu1 }
 0x57d   : > { %v3829_v19 = vadd.f32 %v3828_v18, %v9665_v30 }
 0x57e   : > { %v4093_v58 = vadd.f32 %v4092_v11, %v4004_v23  ;;  %4232 = vmatmul.bf16.gmra.mxu1 %v10759_v25 }
 0x57f   : > { %v3918_v13 = vadd.f32 %v3917_v50, %v3829_v19  ;;  %4143 = vmatmul.bf16.gmra.mxu0 %v10758_v29 }
 0x580   : > { %vm4516_vm9 = vcmp.ge.f32.partialorder %v4093_v58, 0.0  ;;  %v4580_v56 = vmul.f32 0.2, %v4093_v58  ;;  %4321 = vmatmul.bf16.gmra.mxu2 %v10760_v35  ;;  %4410 = vmatmul.bf16.gmra.mxu3 %v10797_v63  ;;  %v7711_v63 = vld [vmem:[%s10454_s4 + $0x58] sm:$0xff] }
 0x581   : > { %4915 = vmatpush.bf16.msra.mxu1 %v7711_v63 }
 0x582   : > { %v9959_v15 = vsel %vm4516_vm9, %v4093_v58, %v4580_v56  ;;  %v10799_v58 = vld [vmem:[#allocation38_spill] sm:$0xff]  ;;  %v7703_v56 = vld [vmem:[%s10454_s4 + $0x18] sm:$0xff] }
 0x583   : > { %v4006_v42 = vpop.f32.mrf.mxu2  ;;  %v4095_v6 = vpop.f32.mrf.mxu3  ;;  %4826 = vmatpush.bf16.msra.mxu0 %v7703_v56  ;;  %v10802_v56 = vld [vmem:[#allocation11_spill] sm:$0xff] }
 0x584   : > { %v4007_v60 = vadd.f32 %v4006_v42, %v3918_v13  ;;  %v3830_v21 = vpop.f32.mrf.mxu0  ;;  %v3919_v40 = vpop.f32.mrf.mxu1  ;;  %v10800_v13 = vld [vmem:[#allocation9_spill] sm:$0xff] }
 0x585   : > { %v3831_v29 = vadd.f32 %v3830_v21, %v9665_v30 }
 0x586   : > { %v4096_v47 = vadd.f32 %v4095_v6, %v4007_v60 }
 0x587   : > { %v3920_v25 = vadd.f32 %v3919_v40, %v3831_v29 }
 0x588   : > { %v4582_v11 = vmul.f32 0.2, %v4096_v47  ;;  %vm4518_vm10 = vcmp.ge.f32.partialorder %v4096_v47, 0.0 }
 0x58a   : > { %v9975_v42 = vsel %vm4518_vm10, %v4096_v47, %v4582_v11 }
 0x58b   : > { %v4008_v55 = vpop.f32.mrf.mxu2  ;;  %v4097_v62 = vpop.f32.mrf.mxu3 }
 0x58c   : > { %v4009_v35 = vadd.f32 %v4008_v55, %v3920_v25  ;;  %v3833_v0 = vpop.f32.mrf.mxu0  ;;  %v3922_v23 = vpop.f32.mrf.mxu1 }
 0x58d   : > { %v3834_v31 = vadd.f32 %v3833_v0, %v9665_v30 }
 0x58e   : > { %v4098_v18 = vadd.f32 %v4097_v62, %v4009_v35  ;;  %4237 = vmatmul.bf16.gmra.mxu1 %v10798_v39 }
 0x58f   : > { %v3923_v19 = vadd.f32 %v3922_v23, %v3834_v31  ;;  %4148 = vmatmul.bf16.gmra.mxu0 %v10762_v27 }
 0x590   : > { %vm4520_vm11 = vcmp.ge.f32.partialorder %v4098_v18, 0.0  ;;  %v4584_v50 = vmul.f32 0.2, %v4098_v18  ;;  %4326 = vmatmul.bf16.gmra.mxu2 %v10799_v58  ;;  %4415 = vmatmul.bf16.gmra.mxu3 %v10800_v13  ;;  %v10801_v13 = vld [vmem:[#allocation2_spill] sm:$0xff] }
 0x592   : > { %v9977_v60 = vsel %vm4520_vm11, %v4098_v18, %v4584_v50 }
 0x593   : > { %v4011_v27 = vpop.f32.mrf.mxu2  ;;  %v4100_v29 = vpop.f32.mrf.mxu3 }
 0x594   : > { %v4012_v21 = vadd.f32 %v4011_v27, %v3923_v19  ;;  %v3835_v40 = vpop.f32.mrf.mxu0  ;;  %v3924_v55 = vpop.f32.mrf.mxu1 }
 0x595   : > { %v3836_v25 = vadd.f32 %v3835_v40, %v9665_v30 }
 0x596   : > { %v4101_v35 = vadd.f32 %v4100_v29, %v4012_v21  ;;  %v7723_v29 = vld [vmem:[%s10456_s6 + $0x38] sm:$0xff] }
 0x597   : > { %v3925_v62 = vadd.f32 %v3924_v55, %v3836_v25  ;;  %5180 = vmatpush.bf16.msra.mxu2 %v7723_v29  ;;  %v10804_v29 = vld [vmem:[#allocation54_spill] sm:$0xff] }
 0x598   : > { %v4586_v50 = vmul.f32 0.2, %v4101_v35  ;;  %vm4522_vm12 = vcmp.ge.f32.partialorder %v4101_v35, 0.0 }
 0x59a   : > { %v9987_v63 = vsel %vm4522_vm12, %v4101_v35, %v4586_v50 }
 0x59b   : > { %v4013_v0 = vpop.f32.mrf.mxu2  ;;  %v4102_v47 = vpop.f32.mrf.mxu3 }
 0x59c   : > { %v4014_v31 = vadd.f32 %v4013_v0, %v3925_v62  ;;  %v3838_v23 = vpop.f32.mrf.mxu0  ;;  %v3927_v18 = vpop.f32.mrf.mxu1 }
 0x59d   : > { %v3839_v11 = vadd.f32 %v3838_v23, %v9665_v30 }
 0x59e   : > { %v4103_v39 = vadd.f32 %v4102_v47, %v4014_v31  ;;  %4242 = vmatmul.bf16.gmra.mxu1 %v10766_v54  ;;  %v7866_v31 = vld [vmem:[%s10453_s3] sm:$0x3] }
 0x59f   : > { %v3928_v58 = vadd.f32 %v3927_v18, %v3839_v11  ;;  %4153 = vmatmul.bf16.gmra.mxu0 %v10765_v12  ;;  %v10000_v47 = vperm.slane %v7866_v31, 1 }
 0x5a0   : > { %vm4524_vm13 = vcmp.ge.f32.partialorder %v4103_v39, 0.0  ;;  %v4588_v19 = vmul.f32 0.2, %v4103_v39  ;;  %4331 = vmatmul.bf16.gmra.mxu2 %v10801_v13  ;;  %4420 = vmatmul.bf16.gmra.mxu3 %v10802_v56  ;;  %v10803_v56 = vld [vmem:[#allocation42_spill] sm:$0xff] }
 0x5a2   : > { %v9989_v27 = vsel %vm4524_vm13, %v4103_v39, %v4588_v19 }
 0x5a3   : > { %v4016_v21 = vpop.f32.mrf.mxu2  ;;  %v4105_v25 = vpop.f32.mrf.mxu3 }
 0x5a4   : > { %v4017_v40 = vadd.f32 %v4016_v21, %v3928_v58  ;;  %v3840_v55 = vpop.f32.mrf.mxu0  ;;  %v3929_v62 = vpop.f32.mrf.mxu1 }
 0x5a5   : > { %v3841_v54 = vadd.f32 %v3840_v55, %v9665_v30  ;;  %v7702_v55 = vld [vmem:[%s10454_s4 + $0x10] sm:$0xff] }
 0x5a6   : > { %v4106_v0 = vadd.f32 %v4105_v25, %v4017_v40  ;;  %v10805_v40 = vld [vmem:[#allocation3_spill] sm:$0xff]  ;;  %v10806_v25 = vld [vmem:[#allocation12_spill] sm:$0xff]  ;;  %4827 = vmatpush.bf16.msra.mxu0 %v7702_v55 }
 0x5a7   : > { %v3930_v35 = vadd.f32 %v3929_v62, %v3841_v54  ;;  %v7710_v54 = vld [vmem:[%s10454_s4 + $0x50] sm:$0xff] }
 0x5a8   : > { %v4590_v19 = vmul.f32 0.2, %v4106_v0  ;;  %vm4526_vm14 = vcmp.ge.f32.partialorder %v4106_v0, 0.0  ;;  %4916 = vmatpush.bf16.msra.mxu1 %v7710_v54 }
 0x5aa   : > { %v10013_v62 = vsel %vm4526_vm14, %v4106_v0, %v4590_v19 }
 0x5ab   : > { %v4018_v23 = vpop.f32.mrf.mxu2  ;;  %v4107_v18 = vpop.f32.mrf.mxu3 }
 0x5ac   : > { %v4019_v11 = vadd.f32 %v4018_v23, %v3930_v35  ;;  %v4119_v50 = vpop.f32.mrf.mxu0  ;;  %v4208_v58 = vpop.f32.mrf.mxu1 }
 0x5ad   : > { %v4120_v39 = vadd.f32 %v4119_v50, %v10000_v47 }
 0x5ae   : > { %v4108_v13 = vadd.f32 %v4107_v18, %v4019_v11  ;;  %4247 = vmatmul.bf16.gmra.mxu1 %v10804_v29 }
 0x5af   : > { %v4209_v30 = vadd.f32 %v4208_v58, %v4120_v39  ;;  %4158 = vmatmul.bf16.gmra.mxu0 %v10803_v56 }
 0x5b0   : > { %vm4528_vm15 = vcmp.ge.f32.partialorder %v4108_v13, 0.0  ;;  %v4592_v21 = vmul.f32 0.2, %v4108_v13  ;;  %4336 = vmatmul.bf16.gmra.mxu2 %v10805_v40  ;;  %4425 = vmatmul.bf16.gmra.mxu3 %v10806_v25 }
 0x5b2   : > { %v10015_v35 = vsel %vm4528_vm15, %v4108_v13, %v4592_v21 }
 0x5b3   : > { %v4297_v31 = vpop.f32.mrf.mxu2  ;;  %v4386_v11 = vpop.f32.mrf.mxu3 }
 0x5b4   : > { %v4121_v18 = vpop.f32.mrf.mxu0  ;;  %v4210_v39 = vpop.f32.mrf.mxu1  ;;  %v4298_v58 = vadd.f32 %v4297_v31, %v4209_v30  ;;  %v7722_v30 = vld [vmem:[%s10456_s6 + $0x30] sm:$0xff]  ;;  %v10807_v31 = vld [vmem:[#allocation13_spill] sm:$0xff] }
 0x5b5   : > { %v4122_v50 = vadd.f32 %v4121_v18, %v10000_v47  ;;  %5181 = vmatpush.bf16.msra.mxu2 %v7722_v30 }
 0x5b6   : > { %v4387_v29 = vadd.f32 %v4386_v11, %v4298_v58 }
 0x5b7   : > { %v4211_v56 = vadd.f32 %v4210_v39, %v4122_v50 }
 0x5b8   : > { %v4531_v55 = vmul.f32 0.2, %v4387_v29  ;;  %vm4467_vm0 = vcmp.ge.f32.partialorder %v4387_v29, 0.0 }
 0x5ba   : > { %v10028_v11 = vsel %vm4467_vm0, %v4387_v29, %v4531_v55 }
 0x5bb   : > { %v4299_v40 = vpop.f32.mrf.mxu2  ;;  %v4388_v0 = vpop.f32.mrf.mxu3 }
 0x5bc   : > { %v4300_v25 = vadd.f32 %v4299_v40, %v4211_v56  ;;  %v4124_v19 = vpop.f32.mrf.mxu0  ;;  %v4213_v21 = vpop.f32.mrf.mxu1 }
 0x5bd   : > { %v4125_v13 = vadd.f32 %v4124_v19, %v10000_v47 }
 0x5be   : > { %v4389_v54 = vadd.f32 %v4388_v0, %v4300_v25  ;;  %4252 = vmatmul.bf16.gmra.mxu1 %v10772_v5 }
 0x5bf   : > { %v4214_v12 = vadd.f32 %v4213_v21, %v4125_v13  ;;  %4163 = vmatmul.bf16.gmra.mxu0 %v10771_v52 }
 0x5c0   : > { %vm4469_vm1 = vcmp.ge.f32.partialorder %v4389_v54, 0.0  ;;  %v4533_v23 = vmul.f32 0.2, %v4389_v54  ;;  %4341 = vmatmul.bf16.gmra.mxu2 %v9293_v17  ;;  %4430 = vmatmul.bf16.gmra.mxu3 %v10807_v31 }
 0x5c2   : > { %v10030_v18 = vsel %vm4469_vm1, %v4389_v54, %v4533_v23 }
 0x5c3   : > { %v4659_v52 = vpack.c.bf16 %v10030_v18, %v10028_v11  ;;  %v4302_v50 = vpop.f32.mrf.mxu2  ;;  %v4391_v39 = vpop.f32.mrf.mxu3 }
 0x5c4   : > { %v4126_v58 = vpop.f32.mrf.mxu0  ;;  %v4215_v17 = vpop.f32.mrf.mxu1  ;;  %v4303_v56 = vadd.f32 %v4302_v50, %v4214_v12  ;;  %v10808_v12 = vld [vmem:[#allocation4_spill] sm:$0xff]  ;;  %v10809_v50 = vld [vmem:[#allocation14_spill] sm:$0xff] }
 0x5c5   : > { %v4127_v5 = vadd.f32 %v4126_v58, %v10000_v47  ;;  %v7709_v58 = vld [vmem:[%s10454_s4 + $0x48] sm:$0xff] }
 0x5c6   : > { %v4392_v25 = vadd.f32 %v4391_v39, %v4303_v56  ;;  %v7701_v39 = vld [vmem:[%s10454_s4 + $0x8] sm:$0xff]  ;;  %4917 = vmatpush.bf16.msra.mxu1 %v7709_v58 }
 0x5c7   : > { %v4216_v40 = vadd.f32 %v4215_v17, %v4127_v5  ;;  %4828 = vmatpush.bf16.msra.mxu0 %v7701_v39 }
 0x5c8   : > { %v4535_v55 = vmul.f32 0.2, %v4392_v25  ;;  %vm4471_vm2 = vcmp.ge.f32.partialorder %v4392_v25, 0.0 }
 0x5ca   : > { %v10046_v5 = vsel %vm4471_vm2, %v4392_v25, %v4535_v55 }
 0x5cb   : > { %v4304_v0 = vpop.f32.mrf.mxu2  ;;  %v4393_v13 = vpop.f32.mrf.mxu3 }
 0x5cc   : > { %v4305_v19 = vadd.f32 %v4304_v0, %v4216_v40  ;;  %v4129_v29 = vpop.f32.mrf.mxu0  ;;  %v4218_v21 = vpop.f32.mrf.mxu1 }
 0x5cd   : > { %v4130_v23 = vadd.f32 %v4129_v29, %v10000_v47 }
 0x5ce   : > { %v4394_v54 = vadd.f32 %v4393_v13, %v4305_v19  ;;  %4257 = vmatmul.bf16.gmra.mxu1 %v10776_v49 }
 0x5cf   : > { %v4219_v30 = vadd.f32 %v4218_v21, %v4130_v23  ;;  %4168 = vmatmul.bf16.gmra.mxu0 %v10775_v9 }
 0x5d0   : > { %vm4473_vm3 = vcmp.ge.f32.partialorder %v4394_v54, 0.0  ;;  %v4537_v31 = vmul.f32 0.2, %v4394_v54  ;;  %4346 = vmatmul.bf16.gmra.mxu2 %v10808_v12  ;;  %4435 = vmatmul.bf16.gmra.mxu3 %v10809_v50 }
 0x5d2   : > { %v10048_v17 = vsel %vm4473_vm3, %v4394_v54, %v4537_v31 }
 0x5d3   : > { %v4307_v9 = vpop.f32.mrf.mxu2  ;;  %v4661_v49 = vpack.c.bf16 %v10048_v17, %v10046_v5  ;;  %v4396_v56 = vpop.f32.mrf.mxu3 }
 0x5d4   : > { %v4131_v40 = vpop.f32.mrf.mxu0  ;;  %v4220_v19 = vpop.f32.mrf.mxu1  ;;  %v4308_v13 = vadd.f32 %v4307_v9, %v4219_v30  ;;  %v10810_v30 = vld [vmem:[#allocation5_spill] sm:$0xff]  ;;  %v7721_v9 = vld [vmem:[%s10456_s6 + $0x28] sm:$0xff] }
 0x5d5   : > { %v4132_v0 = vadd.f32 %v4131_v40, %v10000_v47  ;;  %5182 = vmatpush.bf16.msra.mxu2 %v7721_v9 }
 0x5d6   : > { %v4397_v23 = vadd.f32 %v4396_v56, %v4308_v13  ;;  %v10811_v56 = vld [vmem:[#allocation16_spill] sm:$0xff] }
 0x5d7   : > { %v4221_v29 = vadd.f32 %v4220_v19, %v4132_v0 }
 0x5d8   : > { %v4539_v50 = vmul.f32 0.2, %v4397_v23  ;;  %vm4475_vm4 = vcmp.ge.f32.partialorder %v4397_v23, 0.0 }
 0x5da   : > { %v10061_v40 = vsel %vm4475_vm4, %v4397_v23, %v4539_v50 }
 0x5db   : > { %v4309_v21 = vpop.f32.mrf.mxu2  ;;  %v4398_v25 = vpop.f32.mrf.mxu3 }
 0x5dc   : > { %v4310_v12 = vadd.f32 %v4309_v21, %v4221_v29  ;;  %v4134_v55 = vpop.f32.mrf.mxu0  ;;  %v4223_v31 = vpop.f32.mrf.mxu1 }
 0x5dd   : > { %v4135_v54 = vadd.f32 %v4134_v55, %v10000_v47 }
 0x5de   : > { %v4399_v39 = vadd.f32 %v4398_v25, %v4310_v12  ;;  %4262 = vmatmul.bf16.gmra.mxu1 %v10780_v59 }
 0x5df   : > { %v4224_v58 = vadd.f32 %v4223_v31, %v4135_v54  ;;  %4173 = vmatmul.bf16.gmra.mxu0 %v10779_v7 }
 0x5e0   : > { %vm4477_vm5 = vcmp.ge.f32.partialorder %v4399_v39, 0.0  ;;  %v4541_v6 = vmul.f32 0.2, %v4399_v39  ;;  %4351 = vmatmul.bf16.gmra.mxu2 %v10810_v30  ;;  %4440 = vmatmul.bf16.gmra.mxu3 %v10811_v56 }
 0x5e2   : > { %v10063_v0 = vsel %vm4477_vm5, %v4399_v39, %v4541_v6 }
 0x5e3   : > { %v4312_v19 = vpop.f32.mrf.mxu2  ;;  %v4663_v7 = vpack.c.bf16 %v10063_v0, %v10061_v40  ;;  %v4401_v13 = vpop.f32.mrf.mxu3 }
 0x5e4   : > { %v4136_v29 = vpop.f32.mrf.mxu0  ;;  %v4225_v21 = vpop.f32.mrf.mxu1  ;;  %v4313_v12 = vadd.f32 %v4312_v19, %v4224_v58  ;;  %v10812_v58 = vld [vmem:[#allocation17_spill] sm:$0xff]  ;;  %v7700_v19 = vld [vmem:[%s10454_s4] sm:$0xff] }
 0x5e5   : > { %v4137_v59 = vadd.f32 %v4136_v29, %v10000_v47  ;;  %4829 = vmatpush.bf16.msra.mxu0 %v7700_v19 }
 0x5e6   : > { %v4402_v55 = vadd.f32 %v4401_v13, %v4313_v12  ;;  %v7708_v13 = vld [vmem:[%s10454_s4 + $0x40] sm:$0xff] }
 0x5e7   : > { %v4226_v25 = vadd.f32 %v4225_v21, %v4137_v59  ;;  %4918 = vmatpush.bf16.msra.mxu1 %v7708_v13 }
 0x5e8   : > { %v4543_v50 = vmul.f32 0.2, %v4402_v55  ;;  %vm4479_vm6 = vcmp.ge.f32.partialorder %v4402_v55, 0.0 }
 0x5ea   : > { %v10079_v29 = vsel %vm4479_vm6, %v4402_v55, %v4543_v50 }
 0x5eb   : > { %v4314_v54 = vpop.f32.mrf.mxu2  ;;  %v4403_v30 = vpop.f32.mrf.mxu3 }
 0x5ec   : > { %v4315_v31 = vadd.f32 %v4314_v54, %v4226_v25  ;;  %v4139_v9 = vpop.f32.mrf.mxu0  ;;  %v4228_v6 = vpop.f32.mrf.mxu1 }
 0x5ed   : > { %v4140_v23 = vadd.f32 %v4139_v9, %v10000_v47 }
 0x5ee   : > { %v4404_v39 = vadd.f32 %v4403_v30, %v4315_v31  ;;  %4267 = vmatmul.bf16.gmra.mxu1 %v10784_v61 }
 0x5ef   : > { %v4229_v56 = vadd.f32 %v4228_v6, %v4140_v23  ;;  %4178 = vmatmul.bf16.gmra.mxu0 %v10783_v28 }
 0x5f0   : > { %vm4481_vm7 = vcmp.ge.f32.partialorder %v4404_v39, 0.0  ;;  %v4545_v48 = vmul.f32 0.2, %v4404_v39  ;;  %4356 = vmatmul.bf16.gmra.mxu2 %v9335_v32  ;;  %4445 = vmatmul.bf16.gmra.mxu3 %v10812_v58 }
 0x5f2   : > { %v10081_v59 = vsel %vm4481_vm7, %v4404_v39, %v4545_v48 }
 0x5f3   : > { %v4317_v28 = vpop.f32.mrf.mxu2  ;;  %v4665_v32 = vpack.c.bf16 %v10081_v59, %v10079_v29  ;;  %v4406_v61 = vpop.f32.mrf.mxu3 }
 0x5f4   : > { %v4141_v21 = vpop.f32.mrf.mxu0  ;;  %v4230_v25 = vpop.f32.mrf.mxu1  ;;  %v4318_v54 = vadd.f32 %v4317_v28, %v4229_v56  ;;  %v7720_v56 = vld [vmem:[%s10456_s6 + $0x20] sm:$0xff] }
 0x5f5   : > { %v4142_v12 = vadd.f32 %v4141_v21, %v10000_v47  ;;  %5183 = vmatpush.bf16.msra.mxu2 %v7720_v56 }
 0x5f6   : > { %v4407_v30 = vadd.f32 %v4406_v61, %v4318_v54 }
 0x5f7   : > { %v4231_v31 = vadd.f32 %v4230_v25, %v4142_v12 }
 0x5f8   : > { %v4547_v39 = vmul.f32 0.2, %v4407_v30  ;;  %vm4483_vm8 = vcmp.ge.f32.partialorder %v4407_v30, 0.0 }
 0x5fa   : > { %v10094_v28 = vsel %vm4483_vm8, %v4407_v30, %v4547_v39 }
 0x5fb   : > { %v4319_v9 = vpop.f32.mrf.mxu2  ;;  %v4408_v55 = vpop.f32.mrf.mxu3 }
 0x5fc   : > { %v4320_v23 = vadd.f32 %v4319_v9, %v4231_v31  ;;  %v4144_v6 = vpop.f32.mrf.mxu0  ;;  %v4233_v50 = vpop.f32.mrf.mxu1 }
 0x5fd   : > { %v4145_v48 = vadd.f32 %v4144_v6, %v10000_v47 }
 0x5fe   : > { %v4409_v58 = vadd.f32 %v4408_v55, %v4320_v23  ;;  %4272 = vmatmul.bf16.gmra.mxu1 %v10788_v45 }
 0x5ff   : > { %v4234_v19 = vadd.f32 %v4233_v50, %v4145_v48  ;;  %4183 = vmatmul.bf16.gmra.mxu0 %v10787_v24 }
 0x600   : > { %vm4485_vm9 = vcmp.ge.f32.partialorder %v4409_v58, 0.0  ;;  %v4549_v13 = vmul.f32 0.2, %v4409_v58  ;;  %4361 = vmatmul.bf16.gmra.mxu2 %v9353_v20  ;;  %4450 = vmatmul.bf16.gmra.mxu3 %v9642_v34 }
 0x602   : > { %v10096_v61 = vsel %vm4485_vm9, %v4409_v58, %v4549_v13  ;;  %v10813_v13 = vld [vmem:[#allocation48_spill] sm:$0xff] }
 0x603   : > { %v4322_v21 = vpop.f32.mrf.mxu2  ;;  %v4667_v24 = vpack.c.bf16 %v10096_v61, %v10094_v28  ;;  %v4411_v12 = vpop.f32.mrf.mxu3 }
 0x604   : > { %v4146_v25 = vpop.f32.mrf.mxu0  ;;  %v4235_v20 = vpop.f32.mrf.mxu1  ;;  %v4323_v54 = vadd.f32 %v4322_v21, %v4234_v19  ;;  %v10815_v19 = vld [vmem:[#allocation6_spill] sm:$0xff] }
 0x605   : > { %v4147_v45 = vadd.f32 %v4146_v25, %v10000_v47  ;;  %v10814_v25 = vld [vmem:[#allocation60_spill] sm:$0xff]  ;;  %v10816_v21 = vld [vmem:[#allocation18_spill] sm:$0xff] }
 0x606   : > { %v4412_v9 = vadd.f32 %v4411_v12, %v4323_v54 }
 0x607   : > { %v4236_v31 = vadd.f32 %v4235_v20, %v4147_v45 }
 0x608   : > { %v4551_v50 = vmul.f32 0.2, %v4412_v9  ;;  %vm4487_vm10 = vcmp.ge.f32.partialorder %v4412_v9, 0.0 }
 0x60a   : > { %v10106_v12 = vsel %vm4487_vm10, %v4412_v9, %v4551_v50 }
 0x60b   : > { %v4324_v23 = vpop.f32.mrf.mxu2  ;;  %v4413_v34 = vpop.f32.mrf.mxu3 }
 0x60c   : > { %v4325_v55 = vadd.f32 %v4324_v23, %v4236_v31  ;;  %v4149_v6 = vpop.f32.mrf.mxu0  ;;  %v4238_v48 = vpop.f32.mrf.mxu1 }
 0x60d   : > { %v4150_v30 = vadd.f32 %v4149_v6, %v10000_v47 }
 0x60e   : > { %v4414_v39 = vadd.f32 %v4413_v34, %v4325_v55  ;;  %4277 = vmatmul.bf16.gmra.mxu1 %v10814_v25 }
 0x60f   : > { %v4239_v58 = vadd.f32 %v4238_v48, %v4150_v30  ;;  %4188 = vmatmul.bf16.gmra.mxu0 %v10813_v13 }
 0x610   : > { %vm4489_vm11 = vcmp.ge.f32.partialorder %v4414_v39, 0.0  ;;  %v4553_v56 = vmul.f32 0.2, %v4414_v39  ;;  %4366 = vmatmul.bf16.gmra.mxu2 %v10815_v19  ;;  %4455 = vmatmul.bf16.gmra.mxu3 %v10816_v21 }
 0x612   : > { %v10108_v45 = vsel %vm4489_vm11, %v4414_v39, %v4553_v56 }
 0x613   : > { %v4327_v20 = vpop.f32.mrf.mxu2  ;;  %v4669_v54 = vpack.c.bf16 %v10108_v45, %v10106_v12  ;;  %v4416_v31 = vpop.f32.mrf.mxu3 }
 0x614   : > { %v4151_v23 = vpop.f32.mrf.mxu0  ;;  %v4240_v34 = vpop.f32.mrf.mxu1  ;;  %v4328_v6 = vadd.f32 %v4327_v20, %v4239_v58  ;;  %v10817_v58 = vld [vmem:[#allocation7_spill] sm:$0xff]  ;;  %v7719_v20 = vld [vmem:[%s10456_s6 + $0x18] sm:$0xff] }
 0x615   : > { %v4152_v55 = vadd.f32 %v4151_v23, %v10000_v47  ;;  %5184 = vmatpush.bf16.msra.mxu2 %v7719_v20 }
 0x616   : > { %v4417_v48 = vadd.f32 %v4416_v31, %v4328_v6  ;;  %v10818_v31 = vld [vmem:[#allocation19_spill] sm:$0xff] }
 0x617   : > { %v4241_v30 = vadd.f32 %v4240_v34, %v4152_v55 }
 0x618   : > { %v4555_v39 = vmul.f32 0.2, %v4417_v48  ;;  %vm4491_vm12 = vcmp.ge.f32.partialorder %v4417_v48, 0.0 }
 0x61a   : > { %v10121_v23 = vsel %vm4491_vm12, %v4417_v48, %v4555_v39 }
 0x61b   : > { %v4329_v13 = vpop.f32.mrf.mxu2  ;;  %v4418_v19 = vpop.f32.mrf.mxu3 }
 0x61c   : > { %v4330_v25 = vadd.f32 %v4329_v13, %v4241_v30  ;;  %v4154_v21 = vpop.f32.mrf.mxu0  ;;  %v4243_v50 = vpop.f32.mrf.mxu1 }
 0x61d   : > { %v4155_v9 = vadd.f32 %v4154_v21, %v10000_v47 }
 0x61e   : > { %v4419_v56 = vadd.f32 %v4418_v19, %v4330_v25  ;;  %4282 = vmatmul.bf16.gmra.mxu1 %v10796_v33 }
 0x61f   : > { %v4244_v37 = vadd.f32 %v4243_v50, %v4155_v9  ;;  %4193 = vmatmul.bf16.gmra.mxu0 %v10795_v41 }
 0x620   : > { %vm4493_vm13 = vcmp.ge.f32.partialorder %v4419_v56, 0.0  ;;  %v4557_v43 = vmul.f32 0.2, %v4419_v56  ;;  %4371 = vmatmul.bf16.gmra.mxu2 %v10817_v58  ;;  %4460 = vmatmul.bf16.gmra.mxu3 %v10818_v31 }
 0x622   : > { %v10123_v55 = vsel %vm4493_vm13, %v4419_v56, %v4557_v43 }
 0x623   : > { %v4332_v34 = vpop.f32.mrf.mxu2  ;;  %v4671_v41 = vpack.c.bf16 %v10123_v55, %v10121_v23  ;;  %v4421_v6 = vpop.f32.mrf.mxu3 }
 0x624   : > { %v4156_v30 = vpop.f32.mrf.mxu0  ;;  %v4245_v13 = vpop.f32.mrf.mxu1  ;;  %v4333_v25 = vadd.f32 %v4332_v34, %v4244_v37  ;;  %v7727_v37 = vld [vmem:[%s10458_s8 + $0x18] sm:$0xff] }
 0x625   : > { %v4157_v33 = vadd.f32 %v4156_v30, %v10000_v47  ;;  %5466 = vmatpush.bf16.msra.mxu3 %v7727_v37 }
 0x626   : > { %v4422_v21 = vadd.f32 %v4421_v6, %v4333_v25 }
 0x627   : > { %v4246_v19 = vadd.f32 %v4245_v13, %v4157_v33 }
 0x628   : > { %v4559_v39 = vmul.f32 0.2, %v4422_v21  ;;  %vm4495_vm14 = vcmp.ge.f32.partialorder %v4422_v21, 0.0 }
 0x62a   : > { %v10138_v34 = vsel %vm4495_vm14, %v4422_v21, %v4559_v39 }
 0x62b   : > { %v4334_v9 = vpop.f32.mrf.mxu2  ;;  %v4423_v58 = vpop.f32.mrf.mxu3 }
 0x62c   : > { %v4335_v50 = vadd.f32 %v4334_v9, %v4246_v19  ;;  %v4159_v20 = vpop.f32.mrf.mxu0  ;;  %v4248_v43 = vpop.f32.mrf.mxu1 }
 0x62d   : > { %v4160_v48 = vadd.f32 %v4159_v20, %v10000_v47 }
 0x62e   : > { %v4424_v56 = vadd.f32 %v4423_v58, %v4335_v50  ;;  %4919 = vmatmul.bf16.vlgmr.msra.gmra.mxu1 %v4659_v52 }
 0x62f   : > { %v4249_v31 = vadd.f32 %v4248_v43, %v4160_v48  ;;  %4830 = vmatmul.bf16.vlgmr.msra.gmra.mxu0 %v10821_v51 }
 0x630   : > { %vm4497_vm15 = vcmp.ge.f32.partialorder %v4424_v56, 0.0  ;;  %v4561_v30 = vmul.f32 0.2, %v4424_v56 }
 0x632   : > { %v10140_v6 = vsel %vm4497_vm15, %v4424_v56, %v4561_v30  ;;  %v10822_v56 = vld [vmem:[#allocation29_spill] sm:$0xff]  ;;  %v10823_v30 = vld [vmem:[#allocation28_spill] sm:$0xff] }
 0x633   : > { %v4337_v33 = vpop.f32.mrf.mxu2  ;;  %v4673_v44 = vpack.c.bf16 %v10140_v6, %v10138_v34  ;;  %v4426_v51 = vpop.f32.mrf.mxu3  ;;  %v10824_v37 = vpack.c.bf16 %v10822_v56, %v10823_v30  ;;  %v10258_v34 = vld [vmem:[%s10455_s5] ss:$0 sm:$0xff] }
 0x634   : > { %v4161_v53 = vpop.f32.mrf.mxu0  ;;  %v4250_v25 = vpop.f32.mrf.mxu1  ;;  %v4338_v11 = vadd.f32 %v4337_v33, %v4249_v31  ;;  %v7718_v31 = vld [vmem:[%s10456_s6 + $0x10] sm:$0xff] }
 0x635   : > { %v4162_v13 = vadd.f32 %v4161_v53, %v10000_v47  ;;  %5185 = vmatpush.bf16.msra.mxu2 %v7718_v31 }
 0x636   : > { %v4427_v52 = vadd.f32 %v4426_v51, %v4338_v11 }
 0x637   : > { %v4251_v18 = vadd.f32 %v4250_v25, %v4162_v13 }
 0x638   : > { %v4563_v48 = vmul.f32 0.2, %v4427_v52  ;;  %vm4499_vm0 = vcmp.ge.f32.partialorder %v4427_v52, 0.0 }
 0x63a   : > { %v10155_v33 = vsel %vm4499_vm0, %v4427_v52, %v4563_v48 }
 0x63b   : > { %v4339_v19 = vpop.f32.mrf.mxu2  ;;  %v4428_v50 = vpop.f32.mrf.mxu3 }
 0x63c   : > { %v4340_v9 = vadd.f32 %v4339_v19, %v4251_v18  ;;  %v4164_v58 = vpop.f32.mrf.mxu0  ;;  %v4253_v20 = vpop.f32.mrf.mxu1 }
 0x63d   : > { %v4165_v21 = vadd.f32 %v4164_v58, %v10000_v47 }
 0x63e   : > { %v4429_v43 = vadd.f32 %v4428_v50, %v4340_v9  ;;  %4924 = vmatmul.bf16.gmra.mxu1 %v4661_v49 }
 0x63f   : > { %v4254_v39 = vadd.f32 %v4253_v20, %v4165_v21  ;;  %4835 = vmatmul.bf16.gmra.mxu0 %v10824_v37  ;;  %v10825_v37 = vld [vmem:[#allocation32_spill] sm:$0xff] }
 0x640   : > { %vm4501_vm1 = vcmp.ge.f32.partialorder %v4429_v43, 0.0  ;;  %v4565_v53 = vmul.f32 0.2, %v4429_v43 }
 0x642   : > { %v10157_v51 = vsel %vm4501_vm1, %v4429_v43, %v4565_v53  ;;  %v10826_v53 = vld [vmem:[#allocation31_spill] sm:$0xff] }
 0x643   : > { %v4342_v13 = vpop.f32.mrf.mxu2  ;;  %v4675_v25 = vpack.c.bf16 %v10157_v51, %v10155_v33  ;;  %v4431_v11 = vpop.f32.mrf.mxu3  ;;  %v10827_v31 = vpack.c.bf16 %v10825_v37, %v10826_v53  ;;  %v10828_v53 = vld [vmem:[#allocation34_spill] sm:$0xff] }
 0x644   : > { %v4166_v18 = vpop.f32.mrf.mxu0  ;;  %v4255_v9 = vpop.f32.mrf.mxu1  ;;  %v4343_v5 = vadd.f32 %v4342_v13, %v4254_v39 }
 0x645   : > { %v4167_v19 = vadd.f32 %v4166_v18, %v10000_v47 }
 0x646   : > { %v4432_v49 = vadd.f32 %v4431_v11, %v4343_v5 }
 0x647   : > { %v4256_v17 = vadd.f32 %v4255_v9, %v4167_v19 }
 0x648   : > { %v4567_v43 = vmul.f32 0.2, %v4432_v49  ;;  %vm4503_vm2 = vcmp.ge.f32.partialorder %v4432_v49, 0.0 }
 0x64a   : > { %v10169_v39 = vsel %vm4503_vm2, %v4432_v49, %v4567_v43 }
 0x64b   : > { %v4344_v50 = vpop.f32.mrf.mxu2  ;;  %v4433_v21 = vpop.f32.mrf.mxu3 }
 0x64c   : > { %v4345_v58 = vadd.f32 %v4344_v50, %v4256_v17  ;;  %v4169_v20 = vpop.f32.mrf.mxu0  ;;  %v4258_v48 = vpop.f32.mrf.mxu1 }
 0x64d   : > { %v4170_v52 = vadd.f32 %v4169_v20, %v10000_v47 }
 0x64e   : > { %v4434_v56 = vadd.f32 %v4433_v21, %v4345_v58  ;;  %4929 = vmatmul.bf16.gmra.mxu1 %v4663_v7 }
 0x64f   : > { %v4259_v30 = vadd.f32 %v4258_v48, %v4170_v52  ;;  %4840 = vmatmul.bf16.gmra.mxu0 %v10827_v31  ;;  %v10829_v31 = vld [vmem:[#allocation33_spill] sm:$0xff] }
 0x650   : > { %vm4505_vm3 = vcmp.ge.f32.partialorder %v4434_v56, 0.0  ;;  %v4569_v18 = vmul.f32 0.2, %v4434_v56 }
 0x652   : > { %v10171_v13 = vsel %vm4505_vm3, %v4434_v56, %v4569_v18  ;;  %v10830_v18 = vpack.c.bf16 %v10828_v53, %v10829_v31 }
 0x653   : > { %v4347_v11 = vpop.f32.mrf.mxu2  ;;  %v4677_v19 = vpack.c.bf16 %v10171_v13, %v10169_v39  ;;  %v4436_v9 = vpop.f32.mrf.mxu3  ;;  %v10840_v39 = vpack.c.bf16 %v9929_v22, %v9927_v4 }
 0x654   : > { %v4171_v5 = vpop.f32.mrf.mxu0  ;;  %v4260_v50 = vpop.f32.mrf.mxu1  ;;  %v4348_v58 = vadd.f32 %v4347_v11, %v4259_v30  ;;  %v7717_v30 = vld [vmem:[%s10456_s6 + $0x8] sm:$0xff] }
 0x655   : > { %v4172_v17 = vadd.f32 %v4171_v5, %v10000_v47  ;;  %5186 = vmatpush.bf16.msra.mxu2 %v7717_v30 }
 0x656   : > { %v4437_v20 = vadd.f32 %v4436_v9, %v4348_v58 }
 0x657   : > { %v4261_v21 = vadd.f32 %v4260_v50, %v4172_v17 }
 0x658   : > { %v4571_v43 = vmul.f32 0.2, %v4437_v20  ;;  %vm4507_vm4 = vcmp.ge.f32.partialorder %v4437_v20, 0.0 }
 0x65a   : > { %v10186_v11 = vsel %vm4507_vm4, %v4437_v20, %v4571_v43 }
 0x65b   : > { %v4349_v52 = vpop.f32.mrf.mxu2  ;;  %v4438_v40 = vpop.f32.mrf.mxu3 }
 0x65c   : > { %v4350_v48 = vadd.f32 %v4349_v52, %v4261_v21  ;;  %v4174_v0 = vpop.f32.mrf.mxu0  ;;  %v4263_v49 = vpop.f32.mrf.mxu1 }
 0x65d   : > { %v4175_v7 = vadd.f32 %v4174_v0, %v10000_v47 }
 0x65e   : > { %v4439_v56 = vadd.f32 %v4438_v40, %v4350_v48  ;;  %4934 = vmatmul.bf16.gmra.mxu1 %v4665_v32 }
 0x65f   : > { %v4264_v37 = vadd.f32 %v4263_v49, %v4175_v7  ;;  %4845 = vmatmul.bf16.gmra.mxu0 %v10830_v18  ;;  %v10831_v18 = vld [vmem:[#allocation10_spill] sm:$0xff] }
 0x660   : > { %vm4509_vm5 = vcmp.ge.f32.partialorder %v4439_v56, 0.0  ;;  %v4573_v5 = vmul.f32 0.2, %v4439_v56 }
 0x662   : > { %v10188_v9 = vsel %vm4509_vm5, %v4439_v56, %v4573_v5  ;;  %v10832_v5 = vld [vmem:[#allocation39_spill] sm:$0xff] }
 0x663   : > { %v4352_v17 = vpop.f32.mrf.mxu2  ;;  %v4679_v50 = vpack.c.bf16 %v10188_v9, %v10186_v11  ;;  %v4441_v58 = vpop.f32.mrf.mxu3  ;;  %v10833_v30 = vpack.c.bf16 %v10831_v18, %v10832_v5  ;;  %v10841_v11 = vpack.c.bf16 %v9947_v8, %v9945_v36 }
 0x664   : > { %v4176_v21 = vpop.f32.mrf.mxu0  ;;  %v4265_v48 = vpop.f32.mrf.mxu1  ;;  %v4353_v29 = vadd.f32 %v4352_v17, %v4264_v37  ;;  %v7726_v37 = vld [vmem:[%s10458_s8 + $0x10] sm:$0xff] }
 0x665   : > { %v4177_v52 = vadd.f32 %v4176_v21, %v10000_v47  ;;  %5467 = vmatpush.bf16.msra.mxu3 %v7726_v37 }
 0x666   : > { %v4442_v32 = vadd.f32 %v4441_v58, %v4353_v29 }
 0x667   : > { %v4266_v59 = vadd.f32 %v4265_v48, %v4177_v52 }
 0x668   : > { %v4575_v56 = vmul.f32 0.2, %v4442_v32  ;;  %vm4511_vm6 = vcmp.ge.f32.partialorder %v4442_v32, 0.0 }
 0x66a   : > { %v10203_v17 = vsel %vm4511_vm6, %v4442_v32, %v4575_v56 }
 0x66b   : > { %v4354_v40 = vpop.f32.mrf.mxu2  ;;  %v4443_v7 = vpop.f32.mrf.mxu3 }
 0x66c   : > { %v4355_v0 = vadd.f32 %v4354_v40, %v4266_v59  ;;  %v4179_v49 = vpop.f32.mrf.mxu0  ;;  %v4268_v43 = vpop.f32.mrf.mxu1 }
 0x66d   : > { %v4180_v20 = vadd.f32 %v4179_v49, %v10000_v47 }
 0x66e   : > { %v4444_v53 = vadd.f32 %v4443_v7, %v4355_v0  ;;  %4939 = vmatmul.bf16.gmra.mxu1 %v4667_v24 }
 0x66f   : > { %v4269_v31 = vadd.f32 %v4268_v43, %v4180_v20  ;;  %4850 = vmatmul.bf16.gmra.mxu0 %v10833_v30  ;;  %v10834_v30 = vld [vmem:[#allocation62_spill] sm:$0xff] }
 0x670   : > { %vm4513_vm7 = vcmp.ge.f32.partialorder %v4444_v53, 0.0  ;;  %v4577_v21 = vmul.f32 0.2, %v4444_v53 }
 0x672   : > { %v10205_v58 = vsel %vm4513_vm7, %v4444_v53, %v4577_v21  ;;  %v10835_v21 = vld [vmem:[#allocation50_spill] sm:$0xff] }
 0x673   : > { %v4357_v52 = vpop.f32.mrf.mxu2  ;;  %v4681_v48 = vpack.c.bf16 %v10205_v58, %v10203_v17  ;;  %v4446_v29 = vpop.f32.mrf.mxu3  ;;  %v10836_v37 = vpack.c.bf16 %v10834_v30, %v10835_v21  ;;  %v10842_v17 = vpack.c.bf16 %v9959_v15, %v9957_v10  ;;  %v7724_v58 = vld [vmem:[%s10458_s8] sm:$0xff] }
 0x674   : > { %v4181_v59 = vpop.f32.mrf.mxu0  ;;  %v4270_v0 = vpop.f32.mrf.mxu1  ;;  %v4358_v28 = vadd.f32 %v4357_v52, %v4269_v31  ;;  %v7716_v31 = vld [vmem:[%s10456_s6] sm:$0xff] }
 0x675   : > { %v4182_v40 = vadd.f32 %v4181_v59, %v10000_v47  ;;  %5187 = vmatpush.bf16.msra.mxu2 %v7716_v31 }
 0x676   : > { %v4447_v24 = vadd.f32 %v4446_v29, %v4358_v28 }
 0x677   : > { %v4271_v61 = vadd.f32 %v4270_v0, %v4182_v40 }
 0x678   : > { %v4579_v53 = vmul.f32 0.2, %v4447_v24  ;;  %vm4515_vm8 = vcmp.ge.f32.partialorder %v4447_v24, 0.0 }
 0x67a   : > { %v10220_v52 = vsel %vm4515_vm8, %v4447_v24, %v4579_v53 }
 0x67b   : > { %v4359_v7 = vpop.f32.mrf.mxu2  ;;  %v4448_v20 = vpop.f32.mrf.mxu3 }
 0x67c   : > { %v4360_v49 = vadd.f32 %v4359_v7, %v4271_v61  ;;  %v4184_v43 = vpop.f32.mrf.mxu0  ;;  %v4273_v56 = vpop.f32.mrf.mxu1 }
 0x67d   : > { %v4185_v32 = vadd.f32 %v4184_v43, %v10000_v47 }
 0x67e   : > { %v4449_v18 = vadd.f32 %v4448_v20, %v4360_v49  ;;  %4944 = vmatmul.bf16.gmra.mxu1 %v4669_v54 }
 0x67f   : > { %v4274_v5 = vadd.f32 %v4273_v56, %v4185_v32  ;;  %4855 = vmatmul.bf16.gmra.mxu0 %v10836_v37 }
 0x680   : > { %vm4517_vm9 = vcmp.ge.f32.partialorder %v4449_v18, 0.0  ;;  %v4581_v59 = vmul.f32 0.2, %v4449_v18 }
 0x682   : > { %v10222_v29 = vsel %vm4517_vm9, %v4449_v18, %v4581_v59 }
 0x683   : > { %v4362_v40 = vpop.f32.mrf.mxu2  ;;  %v4683_v0 = vpack.c.bf16 %v10222_v29, %v10220_v52  ;;  %v4451_v28 = vpop.f32.mrf.mxu3 }
 0x684   : > { %v4186_v61 = vpop.f32.mrf.mxu0  ;;  %v4275_v49 = vpop.f32.mrf.mxu1  ;;  %v4363_v12 = vadd.f32 %v4362_v40, %v4274_v5 }
 0x685   : > { %v4187_v7 = vadd.f32 %v4186_v61, %v10000_v47 }
 0x686   : > { %v4452_v54 = vadd.f32 %v4451_v28, %v4363_v12 }
 0x687   : > { %v4276_v45 = vadd.f32 %v4275_v49, %v4187_v7 }
 0x688   : > { %v4583_v18 = vmul.f32 0.2, %v4452_v54  ;;  %vm4519_vm10 = vcmp.ge.f32.partialorder %v4452_v54, 0.0 }
 0x68a   : > { %v10234_v5 = vsel %vm4519_vm10, %v4452_v54, %v4583_v18 }
 0x68b   : > { %v4364_v20 = vpop.f32.mrf.mxu2  ;;  %v4453_v32 = vpop.f32.mrf.mxu3 }
 0x68c   : > { %v4365_v43 = vadd.f32 %v4364_v20, %v4276_v45  ;;  %v4189_v56 = vpop.f32.mrf.mxu0  ;;  %v4278_v53 = vpop.f32.mrf.mxu1 }
 0x68d   : > { %v4190_v24 = vadd.f32 %v4189_v56, %v10000_v47  ;;  %v10837_v56 = vpack.c.bf16 %v9887_v1, %v9885_v16 }
 0x68e   : > { %v4454_v30 = vadd.f32 %v4453_v32, %v4365_v43  ;;  %4949 = vmatmul.bf16.gmra.mxu1 %v4671_v41 }
 0x68f   : > { %v4279_v21 = vadd.f32 %v4278_v53, %v4190_v24  ;;  %4860 = vmatmul.bf16.gmra.mxu0 %v4670_v26 }
 0x690   : > { %vm4521_vm11 = vcmp.ge.f32.partialorder %v4454_v30, 0.0  ;;  %v4585_v37 = vmul.f32 0.2, %v4454_v30 }
 0x692   : > { %v10236_v59 = vsel %vm4521_vm11, %v4454_v30, %v4585_v37 }
 0x693   : > { %v4367_v31 = vpop.f32.mrf.mxu2  ;;  %v4685_v40 = vpack.c.bf16 %v10236_v59, %v10234_v5  ;;  %v4456_v28 = vpop.f32.mrf.mxu3  ;;  %v10844_v5 = vpack.c.bf16 %v9989_v27, %v9987_v63 }
 0x694   : > { %v4191_v61 = vpop.f32.mrf.mxu0  ;;  %v4280_v57 = vpop.f32.mrf.mxu1  ;;  %v4368_v14 = vadd.f32 %v4367_v31, %v4279_v21 }
 0x695   : > { %v4192_v7 = vadd.f32 %v4191_v61, %v10000_v47 }
 0x696   : > { %v4457_v49 = vadd.f32 %v4456_v28, %v4368_v14 }
 0x697   : > { %v4281_v26 = vadd.f32 %v4280_v57, %v4192_v7 }
 0x698   : > { %v4587_v20 = vmul.f32 0.2, %v4457_v49  ;;  %vm4523_vm12 = vcmp.ge.f32.partialorder %v4457_v49, 0.0 }
 0x69a   : > { %v10248_v53 = vsel %vm4523_vm12, %v4457_v49, %v4587_v20 }
 0x69b   : > { %v4369_v12 = vpop.f32.mrf.mxu2  ;;  %v4458_v23 = vpop.f32.mrf.mxu3 }
 0x69c   : > { %v4370_v45 = vadd.f32 %v4369_v12, %v4281_v26  ;;  %v4194_v55 = vpop.f32.mrf.mxu0  ;;  %v4283_v54 = vpop.f32.mrf.mxu1 }
 0x69d   : > { %v4195_v41 = vadd.f32 %v4194_v55, %v10000_v47  ;;  %v7725_v55 = vld [vmem:[%s10458_s8 + $0x8] sm:$0xff] }
 0x69e   : > { %v4459_v43 = vadd.f32 %v4458_v23, %v4370_v45  ;;  %4954 = vmatmul.bf16.gmra.mxu1 %v4673_v44  ;;  %5468 = vmatpush.bf16.msra.mxu3 %v7725_v55 }
 0x69f   : > { %v4284_v32 = vadd.f32 %v4283_v54, %v4195_v41  ;;  %4865 = vmatmul.bf16.gmra.mxu0 %v10837_v56 }
 0x6a0   : > { %vm4525_vm13 = vcmp.ge.f32.partialorder %v4459_v43, 0.0  ;;  %v4589_v24 = vmul.f32 0.2, %v4459_v43 }
 0x6a2   : > { %v10250_v18 = vsel %vm4525_vm13, %v4459_v43, %v4589_v24  ;;  %5469 = vmatpush.bf16.msra.mxu3 %v7724_v58 }
 0x6a3   : > { %v4372_v30 = vpop.f32.mrf.mxu2  ;;  %v4687_v21 = vpack.c.bf16 %v10250_v18, %v10248_v53  ;;  %v4461_v37 = vpop.f32.mrf.mxu3  ;;  %v10845_v53 = vpack.c.bf16 %v10015_v35, %v10013_v62 }
 0x6a4   : > { %v4196_v31 = vpop.f32.mrf.mxu0  ;;  %v4285_v16 = vpop.f32.mrf.mxu1  ;;  %v4373_v1 = vadd.f32 %v4372_v30, %v4284_v32 }
 0x6a5   : > { %v4197_v28 = vadd.f32 %v4196_v31, %v10000_v47  ;;  %v10838_v47 = vpack.c.bf16 %v9899_v38, %v9897_v3 }
 0x6a6   : > { %v4462_v7 = vadd.f32 %v4461_v37, %v4373_v1 }
 0x6a7   : > { %v4286_v61 = vadd.f32 %v4285_v16, %v4197_v28  ;;  %v10839_v16 = vpack.c.bf16 %v9917_v2, %v9915_v46 }
 0x6a8   : > { %v4591_v49 = vmul.f32 0.2, %v4462_v7  ;;  %vm4527_vm14 = vcmp.ge.f32.partialorder %v4462_v7, 0.0 }
 0x6aa   : > { %v10270_v41 = vsel %vm4527_vm14, %v4462_v7, %v4591_v49 }
 0x6ab   : > { %v4374_v57 = vpop.f32.mrf.mxu2  ;;  %v4463_v14 = vpop.f32.mrf.mxu3 }
 0x6ac   : > { %v4375_v6 = vadd.f32 %v4374_v57, %v4286_v61  ;;  %v4831_v44 = vpop.f32.mrf.mxu0  ;;  %v4920_v26 = vpop.f32.mrf.mxu1 }
 0x6ad   : > { %v4832_v45 = vadd.f32 %v10258_v34, %v4831_v44 }
 0x6ae   : > { %v4464_v12 = vadd.f32 %v4463_v14, %v4375_v6  ;;  %4959 = vmatmul.bf16.gmra.mxu1 %v4675_v25 }
 0x6af   : > { %4870 = vmatmul.bf16.gmra.mxu0 %v10838_v47  ;;  %v4921_v20 = vadd.f32 %v4920_v26, %v4832_v45 }
 0x6b0   : > { %vm4529_vm15 = vcmp.ge.f32.partialorder %v4464_v12, 0.0  ;;  %v4593_v23 = vmul.f32 0.2, %v4464_v12 }
 0x6b1   : > { %v5032_v56 = vmul.f32 0.2, %v4921_v20  ;;  %vm5000_vm0 = vcmp.ge.f32.partialorder %v4921_v20, 0.0 }
 0x6b2   : > { %v10272_v54 = vsel %vm4529_vm15, %v4464_v12, %v4593_v23 }
 0x6b3   : > { %v4689_v3 = vpack.c.bf16 %v10272_v54, %v10270_v41  ;;  %v5064_v25 = vsel %vm5000_vm0, %v4921_v20, %v5032_v56 }
 0x6b4   : > { %v4833_v38 = vpop.f32.mrf.mxu0  ;;  %v4922_v32 = vpop.f32.mrf.mxu1 }
 0x6b5   : > { %v4834_v43 = vadd.f32 %v10258_v34, %v4833_v38 }
 0x6b7   : > { %v4923_v33 = vadd.f32 %v4922_v32, %v4834_v43 }
 0x6b9   : > { %vm5001_vm1 = vcmp.ge.f32.partialorder %v4923_v33, 0.0  ;;  %v5033_v51 = vmul.f32 0.2, %v4923_v33 }
 0x6bb   : > { %v5065_v24 = vsel %vm5001_vm1, %v4923_v33, %v5033_v51 }
 0x6bc   : > { %v5096_v30 = vpack.c.bf16 %v5065_v24, %v5064_v25  ;;  %v4836_v37 = vpop.f32.mrf.mxu0  ;;  %v4925_v31 = vpop.f32.mrf.mxu1 }
 0x6bd   : > { %v4837_v28 = vadd.f32 %v10258_v34, %v4836_v37 }
 0x6be   : > { %5188 = vmatmul.bf16.vlgmr.msra.gmra.mxu2 %v5096_v30  ;;  %4964 = vmatmul.bf16.gmra.mxu1 %v4677_v19 }
 0x6bf   : > { %4875 = vmatmul.bf16.gmra.mxu0 %v10839_v16  ;;  %v4926_v1 = vadd.f32 %v4925_v31, %v4837_v28 }
 0x6c1   : > { %v5034_v6 = vmul.f32 0.2, %v4926_v1  ;;  %vm5002_vm2 = vcmp.ge.f32.partialorder %v4926_v1, 0.0 }
 0x6c3   : > { %v5066_v26 = vsel %vm5002_vm2, %v4926_v1, %v5034_v6 }
 0x6c4   : > { %v4838_v61 = vpop.f32.mrf.mxu0  ;;  %v4927_v57 = vpop.f32.mrf.mxu1 }
 0x6c5   : > { %v4839_v7 = vadd.f32 %v10258_v34, %v4838_v61 }
 0x6c7   : > { %v4928_v44 = vadd.f32 %v4927_v57, %v4839_v7 }
 0x6c9   : > { %vm5003_vm3 = vcmp.ge.f32.partialorder %v4928_v44, 0.0  ;;  %v5035_v14 = vmul.f32 0.2, %v4928_v44 }
 0x6cb   : > { %v5067_v49 = vsel %vm5003_vm3, %v4928_v44, %v5035_v14 }
 0x6cc   : > { %v4841_v12 = vpop.f32.mrf.mxu0  ;;  %v5097_v45 = vpack.c.bf16 %v5067_v49, %v5066_v26  ;;  %v4930_v46 = vpop.f32.mrf.mxu1  ;;  %v10843_v49 = vpack.c.bf16 %v9977_v60, %v9975_v42 }
 0x6cd   : > { %v4842_v2 = vadd.f32 %v10258_v34, %v4841_v12 }
 0x6ce   : > { %5193 = vmatmul.bf16.gmra.mxu2 %v5097_v45  ;;  %4969 = vmatmul.bf16.gmra.mxu1 %v4679_v50 }
 0x6cf   : > { %4880 = vmatmul.bf16.gmra.mxu0 %v10840_v39  ;;  %v4931_v13 = vadd.f32 %v4930_v46, %v4842_v2 }
 0x6d1   : > { %v5036_v55 = vmul.f32 0.2, %v4931_v13  ;;  %vm5004_vm4 = vcmp.ge.f32.partialorder %v4931_v13, 0.0 }
 0x6d3   : > { %v5068_v43 = vsel %vm5004_vm4, %v4931_v13, %v5036_v55 }
 0x6d4   : > { %v4843_v19 = vpop.f32.mrf.mxu0  ;;  %v4932_v23 = vpop.f32.mrf.mxu1 }
 0x6d5   : > { %v4844_v47 = vadd.f32 %v10258_v34, %v4843_v19 }
 0x6d7   : > { %v4933_v20 = vadd.f32 %v4932_v23, %v4844_v47 }
 0x6d9   : > { %vm5005_vm5 = vcmp.ge.f32.partialorder %v4933_v20, 0.0  ;;  %v5037_v38 = vmul.f32 0.2, %v4933_v20 }
 0x6db   : > { %v5069_v32 = vsel %vm5005_vm5, %v4933_v20, %v5037_v38 }
 0x6dc   : > { %v4846_v56 = vpop.f32.mrf.mxu0  ;;  %v5098_v33 = vpack.c.bf16 %v5069_v32, %v5068_v43  ;;  %v4935_v4 = vpop.f32.mrf.mxu1 }
 0x6dd   : > { %v4847_v22 = vadd.f32 %v10258_v34, %v4846_v56 }
 0x6de   : > { %5198 = vmatmul.bf16.gmra.mxu2 %v5098_v33  ;;  %4974 = vmatmul.bf16.gmra.mxu1 %v4681_v48 }
 0x6df   : > { %4885 = vmatmul.bf16.gmra.mxu0 %v10841_v11  ;;  %v4936_v9 = vadd.f32 %v4935_v4, %v4847_v22 }
 0x6e1   : > { %v5038_v24 = vmul.f32 0.2, %v4936_v9  ;;  %vm5006_vm6 = vcmp.ge.f32.partialorder %v4936_v9, 0.0 }
 0x6e3   : > { %v5070_v31 = vsel %vm5006_vm6, %v4936_v9, %v5038_v24  ;;  %vm5413_vm6 = vcmask 523264  }
 0x6e4   : > { %v4848_v50 = vpop.f32.mrf.mxu0  ;;  %v4937_v25 = vpop.f32.mrf.mxu1 }
 0x6e5   : > { %v4849_v51 = vadd.f32 %v10258_v34, %v4848_v50 }
 0x6e7   : > { %v4938_v30 = vadd.f32 %v4937_v25, %v4849_v51 }
 0x6e9   : > { %vm5007_vm7 = vcmp.ge.f32.partialorder %v4938_v30, 0.0  ;;  %v5039_v37 = vmul.f32 0.2, %v4938_v30 }
 0x6eb   : > { %v5071_v28 = vsel %vm5007_vm7, %v4938_v30, %v5039_v37 }
 0x6ec   : > { %v4851_v16 = vpop.f32.mrf.mxu0  ;;  %v5099_v1 = vpack.c.bf16 %v5071_v28, %v5070_v31  ;;  %v4940_v36 = vpop.f32.mrf.mxu1 }
 0x6ed   : > { %v4852_v8 = vadd.f32 %v10258_v34, %v4851_v16 }
 0x6ee   : > { %5203 = vmatmul.bf16.gmra.mxu2 %v5099_v1  ;;  %4979 = vmatmul.bf16.gmra.mxu1 %v4683_v0 }
 0x6ef   : > { %4890 = vmatmul.bf16.gmra.mxu0 %v10842_v17  ;;  %v4941_v48 = vadd.f32 %v4940_v36, %v4852_v8 }
 0x6f1   : > { %v5040_v6 = vmul.f32 0.2, %v4941_v48  ;;  %vm5008_vm8 = vcmp.ge.f32.partialorder %v4941_v48, 0.0 }
 0x6f3   : > { %v5072_v15 = vsel %vm5008_vm8, %v4941_v48, %v5040_v6 }
 0x6f4   : > { %v4853_v61 = vpop.f32.mrf.mxu0  ;;  %v4942_v57 = vpop.f32.mrf.mxu1 }
 0x6f5   : > { %v4854_v7 = vadd.f32 %v10258_v34, %v4853_v61 }
 0x6f7   : > { %v4943_v44 = vadd.f32 %v4942_v57, %v4854_v7 }
 0x6f9   : > { %vm5009_vm9 = vcmp.ge.f32.partialorder %v4943_v44, 0.0  ;;  %v5041_v10 = vmul.f32 0.2, %v4943_v44 }
 0x6fb   : > { %v5073_v14 = vsel %vm5009_vm9, %v4943_v44, %v5041_v10  ;;  %v10342_v10 = vld [vmem:[%s10457_s7] ss:$0 sm:$0xff] }
 0x6fc   : > { %v4856_v26 = vpop.f32.mrf.mxu0  ;;  %v5100_v52 = vpack.c.bf16 %v5073_v14, %v5072_v15  ;;  %v4945_v29 = vpop.f32.mrf.mxu1 }
 0x6fd   : > { %v4857_v0 = vadd.f32 %v10258_v34, %v4856_v26 }
 0x6fe   : > { %5208 = vmatmul.bf16.gmra.mxu2 %v5100_v52  ;;  %4984 = vmatmul.bf16.gmra.mxu1 %v4685_v40 }
 0x6ff   : > { %4895 = vmatmul.bf16.gmra.mxu0 %v10843_v49  ;;  %v4946_v12 = vadd.f32 %v4945_v29, %v4857_v0 }
 0x701   : > { %v5042_v39 = vmul.f32 0.2, %v4946_v12  ;;  %vm5010_vm10 = vcmp.ge.f32.partialorder %v4946_v12, 0.0 }
 0x703   : > { %v5074_v47 = vsel %vm5010_vm10, %v4946_v12, %v5042_v39 }
 0x704   : > { %v4858_v45 = vpop.f32.mrf.mxu0  ;;  %v4947_v2 = vpop.f32.mrf.mxu1 }
 0x705   : > { %v4859_v46 = vadd.f32 %v10258_v34, %v4858_v45 }
 0x707   : > { %v4948_v13 = vadd.f32 %v4947_v2, %v4859_v46 }
 0x709   : > { %vm5011_vm11 = vcmp.ge.f32.partialorder %v4948_v13, 0.0  ;;  %v5043_v19 = vmul.f32 0.2, %v4948_v13 }
 0x70b   : > { %v5075_v23 = vsel %vm5011_vm11, %v4948_v13, %v5043_v19 }
 0x70c   : > { %v4861_v55 = vpop.f32.mrf.mxu0  ;;  %v5101_v20 = vpack.c.bf16 %v5075_v23, %v5074_v47  ;;  %v4950_v42 = vpop.f32.mrf.mxu1 }
 0x70d   : > { %v4862_v60 = vadd.f32 %v10258_v34, %v4861_v55 }
 0x70e   : > { %5213 = vmatmul.bf16.gmra.mxu2 %v5101_v20  ;;  %4989 = vmatmul.bf16.gmra.mxu1 %v4687_v21 }
 0x70f   : > { %4900 = vmatmul.bf16.gmra.mxu0 %v10844_v5  ;;  %v4951_v59 = vadd.f32 %v4950_v42, %v4862_v60 }
 0x711   : > { %v5044_v32 = vmul.f32 0.2, %v4951_v59  ;;  %vm5012_vm12 = vcmp.ge.f32.partialorder %v4951_v59, 0.0 }
 0x713   : > { %v5076_v4 = vsel %vm5012_vm12, %v4951_v59, %v5044_v32 }
 0x714   : > { %v4863_v40 = vpop.f32.mrf.mxu0  ;;  %v4952_v43 = vpop.f32.mrf.mxu1 }
 0x715   : > { %v4864_v38 = vadd.f32 %v10258_v34, %v4863_v40 }
 0x717   : > { %v4953_v56 = vadd.f32 %v4952_v43, %v4864_v38 }
 0x719   : > { %vm5013_vm13 = vcmp.ge.f32.partialorder %v4953_v56, 0.0  ;;  %v5045_v33 = vmul.f32 0.2, %v4953_v56 }
 0x71b   : > { %v5077_v22 = vsel %vm5013_vm13, %v4953_v56, %v5045_v33 }
 0x71c   : > { %v4866_v11 = vpop.f32.mrf.mxu0  ;;  %v5102_v9 = vpack.c.bf16 %v5077_v22, %v5076_v4  ;;  %v4955_v63 = vpop.f32.mrf.mxu1 }
 0x71d   : > { %v4867_v27 = vadd.f32 %v10258_v34, %v4866_v11 }
 0x71e   : > { %5218 = vmatmul.bf16.gmra.mxu2 %v5102_v9  ;;  %4994 = vmatmul.bf16.gmra.mxu1 %v4689_v3 }
 0x71f   : > { %4905 = vmatmul.bf16.gmra.mxu0 %v10845_v53  ;;  %v4956_v18 = vadd.f32 %v4955_v63, %v4867_v27 }
 0x721   : > { %v5046_v25 = vmul.f32 0.2, %v4956_v18  ;;  %vm5014_vm14 = vcmp.ge.f32.partialorder %v4956_v18, 0.0 }
 0x723   : > { %v5078_v37 = vsel %vm5014_vm14, %v4956_v18, %v5046_v25 }
 0x724   : > { %v4868_v21 = vpop.f32.mrf.mxu0  ;;  %v4957_v51 = vpop.f32.mrf.mxu1 }
 0x725   : > { %v4869_v50 = vadd.f32 %v10258_v34, %v4868_v21 }
 0x727   : > { %v4958_v24 = vadd.f32 %v4957_v51, %v4869_v50 }
 0x729   : > { %vm5015_vm15 = vcmp.ge.f32.partialorder %v4958_v24, 0.0  ;;  %v5047_v30 = vmul.f32 0.2, %v4958_v24 }
 0x72b   : > { %v5079_v31 = vsel %vm5015_vm15, %v4958_v24, %v5047_v30 }
 0x72c   : > { %v4871_v28 = vpop.f32.mrf.mxu0  ;;  %v5103_v16 = vpack.c.bf16 %v5079_v31, %v5078_v37  ;;  %v4960_v62 = vpop.f32.mrf.mxu1 }
 0x72d   : > { %v4872_v35 = vadd.f32 %v10258_v34, %v4871_v28 }
 0x72e   : > { %5223 = vmatmul.bf16.gmra.mxu2 %v5103_v16 }
 0x72f   : > { %v4961_v41 = vadd.f32 %v4960_v62, %v4872_v35 }
 0x731   : > { %v5048_v36 = vmul.f32 0.2, %v4961_v41  ;;  %vm5016_vm0 = vcmp.ge.f32.partialorder %v4961_v41, 0.0 }
 0x733   : > { %v5080_v58 = vsel %vm5016_vm0, %v4961_v41, %v5048_v36 }
 0x734   : > { %v4873_v54 = vpop.f32.mrf.mxu0  ;;  %v4962_v1 = vpop.f32.mrf.mxu1 }
 0x735   : > { %v4874_v3 = vadd.f32 %v10258_v34, %v4873_v54 }
 0x737   : > { %v4963_v8 = vadd.f32 %v4962_v1, %v4874_v3 }
 0x739   : > { %vm5017_vm1 = vcmp.ge.f32.partialorder %v4963_v8, 0.0  ;;  %v5049_v17 = vmul.f32 0.2, %v4963_v8 }
 0x73b   : > { %v5081_v48 = vsel %vm5017_vm1, %v4963_v8, %v5049_v17 }
 0x73c   : > { %v4876_v61 = vpop.f32.mrf.mxu0  ;;  %v5104_v7 = vpack.c.bf16 %v5081_v48, %v5080_v58  ;;  %v4965_v57 = vpop.f32.mrf.mxu1 }
 0x73d   : > { %v4877_v6 = vadd.f32 %v10258_v34, %v4876_v61 }
 0x73e   : > { %5228 = vmatmul.bf16.gmra.mxu2 %v5104_v7 }
 0x73f   : > { %v4966_v15 = vadd.f32 %v4965_v57, %v4877_v6 }
 0x741   : > { %v5189_v44 = vpop.f32.mrf.mxu2  ;;  %v5050_v0 = vmul.f32 0.2, %v4966_v15  ;;  %vm5018_vm2 = vcmp.ge.f32.partialorder %v4966_v15, 0.0 }
 0x742   : > { %v5190_v29 = vadd.f32 %v10342_v10, %v5189_v44 }
 0x743   : > { %v5082_v39 = vsel %vm5018_vm2, %v4966_v15, %v5050_v0 }
 0x744   : > { %v4878_v14 = vpop.f32.mrf.mxu0  ;;  %v4967_v52 = vpop.f32.mrf.mxu1  ;;  %v5301_v46 = vmul.f32 0.2, %v5190_v29  ;;  %vm5269_vm4 = vcmp.ge.f32.partialorder %v5190_v29, 0.0 }
 0x745   : > { %v4879_v26 = vadd.f32 %v10258_v34, %v4878_v14 }
 0x746   : > { %v5333_v20 = vsel %vm5269_vm4, %v5190_v29, %v5301_v46 }
 0x747   : > { %v4968_v49 = vadd.f32 %v4967_v52, %v4879_v26 }
 0x749   : > { %vm5019_vm3 = vcmp.ge.f32.partialorder %v4968_v49, 0.0  ;;  %v5051_v12 = vmul.f32 0.2, %v4968_v49  ;;  %v5191_v45 = vpop.f32.mrf.mxu2 }
 0x74a   : > { %v5192_v2 = vadd.f32 %v10342_v10, %v5191_v45 }
 0x74b   : > { %v5083_v13 = vsel %vm5019_vm3, %v4968_v49, %v5051_v12 }
 0x74c   : > { %vm5270_vm5 = vcmp.ge.f32.partialorder %v5192_v2, 0.0  ;;  %v5302_v19 = vmul.f32 0.2, %v5192_v2  ;;  %v4881_v47 = vpop.f32.mrf.mxu0  ;;  %v5105_v23 = vpack.c.bf16 %v5083_v13, %v5082_v39  ;;  %v4970_v55 = vpop.f32.mrf.mxu1 }
 0x74d   : > { %v4882_v5 = vadd.f32 %v10258_v34, %v4881_v47 }
 0x74e   : > { %v5334_v42 = vsel %vm5270_vm5, %v5192_v2, %v5302_v19  ;;  %5233 = vmatmul.bf16.gmra.mxu2 %v5105_v23 }
 0x74f   : > { %v5365_v60 = vpack.c.bf16 %v5334_v42, %v5333_v20  ;;  %v4971_v40 = vadd.f32 %v4970_v55, %v4882_v5 }
 0x751   : > { %v5194_v59 = vpop.f32.mrf.mxu2  ;;  %7393 = vmatmul.msk.bf16.vlgmr.msra.gmra.mxu3 %vm5413_vm6, %v5365_v60  ;;  %v5052_v33 = vmul.f32 0.2, %v4971_v40  ;;  %vm5020_vm7 = vcmp.ge.f32.partialorder %v4971_v40, 0.0 }
 0x752   : > { %v5195_v56 = vadd.f32 %v10342_v10, %v5194_v59 }
 0x753   : > { %v5084_v27 = vsel %vm5020_vm7, %v4971_v40, %v5052_v33 }
 0x754   : > { %v4883_v38 = vpop.f32.mrf.mxu0  ;;  %v4972_v32 = vpop.f32.mrf.mxu1  ;;  %v5303_v9 = vmul.f32 0.2, %v5195_v56  ;;  %vm5271_vm9 = vcmp.ge.f32.partialorder %v5195_v56, 0.0 }
 0x755   : > { %v4884_v43 = vadd.f32 %v10258_v34, %v4883_v38 }
 0x756   : > { %v5335_v25 = vsel %vm5271_vm9, %v5195_v56, %v5303_v9 }
 0x757   : > { %v4973_v4 = vadd.f32 %v4972_v32, %v4884_v43 }
 0x759   : > { %vm5021_vm8 = vcmp.ge.f32.partialorder %v4973_v4, 0.0  ;;  %v5053_v22 = vmul.f32 0.2, %v4973_v4  ;;  %v5196_v11 = vpop.f32.mrf.mxu2 }
 0x75a   : > { %v5197_v63 = vadd.f32 %v10342_v10, %v5196_v11 }
 0x75b   : > { %v5085_v53 = vsel %vm5021_vm8, %v4973_v4, %v5053_v22 }
 0x75c   : > { %vm5272_vm10 = vcmp.ge.f32.partialorder %v5197_v63, 0.0  ;;  %v5304_v18 = vmul.f32 0.2, %v5197_v63  ;;  %v4886_v21 = vpop.f32.mrf.mxu0  ;;  %v5106_v50 = vpack.c.bf16 %v5085_v53, %v5084_v27  ;;  %v4975_v51 = vpop.f32.mrf.mxu1 }
 0x75d   : > { %v4887_v37 = vadd.f32 %v10258_v34, %v4886_v21 }
 0x75e   : > { %v5336_v24 = vsel %vm5272_vm10, %v5197_v63, %v5304_v18  ;;  %5238 = vmatmul.bf16.gmra.mxu2 %v5106_v50 }
 0x75f   : > { %v5366_v30 = vpack.c.bf16 %v5336_v24, %v5335_v25  ;;  %v4976_v28 = vadd.f32 %v4975_v51, %v4887_v37 }
 0x761   : > { %v5199_v31 = vpop.f32.mrf.mxu2  ;;  %7394 = vmatmul.msk.bf16.gmra.mxu3 %vm5413_vm6, %v5366_v30  ;;  %v5054_v54 = vmul.f32 0.2, %v4976_v28  ;;  %vm5022_vm11 = vcmp.ge.f32.partialorder %v4976_v28, 0.0 }
 0x762   : > { %v5200_v41 = vadd.f32 %v10342_v10, %v5199_v31 }
 0x763   : > { %v5086_v58 = vsel %vm5022_vm11, %v4976_v28, %v5054_v54 }
 0x764   : > { %v4888_v16 = vpop.f32.mrf.mxu0  ;;  %v4977_v35 = vpop.f32.mrf.mxu1  ;;  %v5305_v8 = vmul.f32 0.2, %v5200_v41  ;;  %vm5273_vm13 = vcmp.ge.f32.partialorder %v5200_v41, 0.0 }
 0x765   : > { %v4889_v62 = vadd.f32 %v10258_v34, %v4888_v16 }
 0x766   : > { %v5337_v44 = vsel %vm5273_vm13, %v5200_v41, %v5305_v8 }
 0x767   : > { %v4978_v3 = vadd.f32 %v4977_v35, %v4889_v62 }
 0x769   : > { %vm5023_vm12 = vcmp.ge.f32.partialorder %v4978_v3, 0.0  ;;  %v5055_v1 = vmul.f32 0.2, %v4978_v3  ;;  %v5201_v36 = vpop.f32.mrf.mxu2 }
 0x76a   : > { %v5202_v17 = vadd.f32 %v10342_v10, %v5201_v36 }
 0x76b   : > { %v5087_v48 = vsel %vm5023_vm12, %v4978_v3, %v5055_v1 }
 0x76c   : > { %vm5274_vm14 = vcmp.ge.f32.partialorder %v5202_v17, 0.0  ;;  %v5306_v61 = vmul.f32 0.2, %v5202_v17  ;;  %v4891_v7 = vpop.f32.mrf.mxu0  ;;  %v5107_v57 = vpack.c.bf16 %v5087_v48, %v5086_v58  ;;  %v4980_v6 = vpop.f32.mrf.mxu1 }
 0x76d   : > { %v4892_v26 = vadd.f32 %v10258_v34, %v4891_v7 }
 0x76e   : > { %v5338_v15 = vsel %vm5274_vm14, %v5202_v17, %v5306_v61  ;;  %5243 = vmatmul.bf16.gmra.mxu2 %v5107_v57 }
 0x76f   : > { %v5367_v14 = vpack.c.bf16 %v5338_v15, %v5337_v44  ;;  %v4981_v29 = vadd.f32 %v4980_v6, %v4892_v26 }
 0x771   : > { %v5204_v52 = vpop.f32.mrf.mxu2  ;;  %7395 = vmatmul.msk.bf16.gmra.mxu3 %vm5413_vm6, %v5367_v14  ;;  %v5056_v46 = vmul.f32 0.2, %v4981_v29  ;;  %vm5024_vm15 = vcmp.ge.f32.partialorder %v4981_v29, 0.0 }
 0x772   : > { %v5205_v45 = vadd.f32 %v10342_v10, %v5204_v52 }
 0x773   : > { %v5088_v23 = vsel %vm5024_vm15, %v4981_v29, %v5056_v46 }
 0x774   : > { %v4893_v0 = vpop.f32.mrf.mxu0  ;;  %v4982_v12 = vpop.f32.mrf.mxu1  ;;  %v5307_v19 = vmul.f32 0.2, %v5205_v45  ;;  %vm5275_vm1 = vcmp.ge.f32.partialorder %v5205_v45, 0.0 }
 0x775   : > { %v4894_v49 = vadd.f32 %v10258_v34, %v4893_v0 }
 0x776   : > { %v5339_v59 = vsel %vm5275_vm1, %v5205_v45, %v5307_v19 }
 0x777   : > { %v4983_v2 = vadd.f32 %v4982_v12, %v4894_v49 }
 0x779   : > { %vm5025_vm0 = vcmp.ge.f32.partialorder %v4983_v2, 0.0  ;;  %v5057_v39 = vmul.f32 0.2, %v4983_v2  ;;  %v5206_v13 = vpop.f32.mrf.mxu2 }
 0x77a   : > { %v5207_v47 = vadd.f32 %v10342_v10, %v5206_v13 }
 0x77b   : > { %v5089_v55 = vsel %vm5025_vm0, %v4983_v2, %v5057_v39 }
 0x77c   : > { %vm5276_vm2 = vcmp.ge.f32.partialorder %v5207_v47, 0.0  ;;  %v5308_v20 = vmul.f32 0.2, %v5207_v47  ;;  %v4896_v42 = vpop.f32.mrf.mxu0  ;;  %v5108_v60 = vpack.c.bf16 %v5089_v55, %v5088_v23  ;;  %v4985_v5 = vpop.f32.mrf.mxu1 }
 0x77d   : > { %v4897_v43 = vadd.f32 %v10258_v34, %v4896_v42 }
 0x77e   : > { %v5340_v40 = vsel %vm5276_vm2, %v5207_v47, %v5308_v20  ;;  %5248 = vmatmul.bf16.gmra.mxu2 %v5108_v60 }
 0x77f   : > { %v5368_v38 = vpack.c.bf16 %v5340_v40, %v5339_v59  ;;  %v4986_v56 = vadd.f32 %v4985_v5, %v4897_v43 }
 0x781   : > { %v5209_v32 = vpop.f32.mrf.mxu2  ;;  %7396 = vmatmul.msk.bf16.gmra.mxu3 %vm5413_vm6, %v5368_v38  ;;  %v5058_v9 = vmul.f32 0.2, %v4986_v56  ;;  %vm5026_vm3 = vcmp.ge.f32.partialorder %v4986_v56, 0.0 }
 0x782   : > { %v5210_v11 = vadd.f32 %v10342_v10, %v5209_v32 }
 0x783   : > { %v5090_v50 = vsel %vm5026_vm3, %v4986_v56, %v5058_v9 }
 0x784   : > { %v4898_v33 = vpop.f32.mrf.mxu0  ;;  %v4987_v22 = vpop.f32.mrf.mxu1  ;;  %v5309_v18 = vmul.f32 0.2, %v5210_v11  ;;  %vm5277_vm5 = vcmp.ge.f32.partialorder %v5210_v11, 0.0 }
 0x785   : > { %v4899_v4 = vadd.f32 %v10258_v34, %v4898_v33 }
 0x786   : > { %v5341_v31 = vsel %vm5277_vm5, %v5210_v11, %v5309_v18 }
 0x787   : > { %v4988_v63 = vadd.f32 %v4987_v22, %v4899_v4 }
 0x789   : > { %vm5027_vm4 = vcmp.ge.f32.partialorder %v4988_v63, 0.0  ;;  %v5059_v27 = vmul.f32 0.2, %v4988_v63  ;;  %v5211_v53 = vpop.f32.mrf.mxu2 }
 0x78a   : > { %v5212_v21 = vadd.f32 %v10342_v10, %v5211_v53 }
 0x78b   : > { %v5091_v51 = vsel %vm5027_vm4, %v4988_v63, %v5059_v27 }
 0x78c   : > { %vm5278_vm7 = vcmp.ge.f32.partialorder %v5212_v21, 0.0  ;;  %v5310_v25 = vmul.f32 0.2, %v5212_v21  ;;  %v4901_v24 = vpop.f32.mrf.mxu0  ;;  %v5109_v30 = vpack.c.bf16 %v5091_v51, %v5090_v50  ;;  %v4990_v37 = vpop.f32.mrf.mxu1 }
 0x78d   : > { %v4902_v62 = vadd.f32 %v10258_v34, %v4901_v24 }
 0x78e   : > { %v5342_v28 = vsel %vm5278_vm7, %v5212_v21, %v5310_v25  ;;  %5253 = vmatmul.bf16.gmra.mxu2 %v5109_v30 }
 0x78f   : > { %v5369_v16 = vpack.c.bf16 %v5342_v28, %v5341_v31  ;;  %v4991_v41 = vadd.f32 %v4990_v37, %v4902_v62 }
 0x791   : > { %v5214_v35 = vpop.f32.mrf.mxu2  ;;  %7397 = vmatmul.msk.bf16.gmra.mxu3 %vm5413_vm6, %v5369_v16  ;;  %v5060_v8 = vmul.f32 0.2, %v4991_v41  ;;  %vm5028_vm8 = vcmp.ge.f32.partialorder %v4991_v41, 0.0 }
 0x792   : > { %v5215_v36 = vadd.f32 %v10342_v10, %v5214_v35 }
 0x793   : > { %v5092_v57 = vsel %vm5028_vm8, %v4991_v41, %v5060_v8 }
 0x794   : > { %v4903_v54 = vpop.f32.mrf.mxu0  ;;  %v4992_v1 = vpop.f32.mrf.mxu1  ;;  %v5311_v61 = vmul.f32 0.2, %v5215_v36  ;;  %vm5279_vm10 = vcmp.ge.f32.partialorder %v5215_v36, 0.0 }
 0x795   : > { %v4904_v3 = vadd.f32 %v10258_v34, %v4903_v54 }
 0x796   : > { %v5343_v52 = vsel %vm5279_vm10, %v5215_v36, %v5311_v61 }
 0x797   : > { %v4993_v17 = vadd.f32 %v4992_v1, %v4904_v3 }
 0x799   : > { %vm5029_vm9 = vcmp.ge.f32.partialorder %v4993_v17, 0.0  ;;  %v5061_v58 = vmul.f32 0.2, %v4993_v17  ;;  %v5216_v48 = vpop.f32.mrf.mxu2 }
 0x79a   : > { %v5217_v7 = vadd.f32 %v10342_v10, %v5216_v48 }
 0x79b   : > { %v5093_v6 = vsel %vm5029_vm9, %v4993_v17, %v5061_v58 }
 0x79c   : > { %vm5280_vm11 = vcmp.ge.f32.partialorder %v5217_v7, 0.0  ;;  %v5312_v44 = vmul.f32 0.2, %v5217_v7  ;;  %v4906_v15 = vpop.f32.mrf.mxu0  ;;  %v5110_v14 = vpack.c.bf16 %v5093_v6, %v5092_v57  ;;  %v4995_v26 = vpop.f32.mrf.mxu1 }
 0x79d   : > { %v4907_v49 = vadd.f32 %v10258_v34, %v4906_v15 }
 0x79e   : > { %v5344_v29 = vsel %vm5280_vm11, %v5217_v7, %v5312_v44  ;;  %5258 = vmatmul.bf16.gmra.mxu2 %v5110_v14 }
 0x79f   : > { %v5370_v0 = vpack.c.bf16 %v5344_v29, %v5343_v52  ;;  %v4996_v45 = vadd.f32 %v4995_v26, %v4907_v49 }
 0x7a1   : > { %v5219_v12 = vpop.f32.mrf.mxu2  ;;  %7398 = vmatmul.msk.bf16.gmra.mxu3 %vm5413_vm6, %v5370_v0  ;;  %v5062_v19 = vmul.f32 0.2, %v4996_v45  ;;  %vm5030_vm12 = vcmp.ge.f32.partialorder %v4996_v45, 0.0 }
 0x7a2   : > { %v5220_v39 = vadd.f32 %v10342_v10, %v5219_v12 }
 0x7a3   : > { %v5094_v60 = vsel %vm5030_vm12, %v4996_v45, %v5062_v19 }
 0x7a4   : > { %v4908_v46 = vpop.f32.mrf.mxu0  ;;  %v4997_v13 = vpop.f32.mrf.mxu1  ;;  %v5313_v20 = vmul.f32 0.2, %v5220_v39  ;;  %vm5281_vm14 = vcmp.ge.f32.partialorder %v5220_v39, 0.0 }
 0x7a5   : > { %v4909_v2 = vadd.f32 %v10258_v34, %v4908_v46 }
 0x7a6   : > { %v5345_v38 = vsel %vm5281_vm14, %v5220_v39, %v5313_v20 }
 0x7a7   : > { %v4998_v47 = vadd.f32 %v4997_v13, %v4909_v2 }
 0x7a9   : > { %vm5031_vm13 = vcmp.ge.f32.partialorder %v4998_v47, 0.0  ;;  %v5063_v23 = vmul.f32 0.2, %v4998_v47  ;;  %v5221_v55 = vpop.f32.mrf.mxu2 }
 0x7aa   : > { %v5222_v42 = vadd.f32 %v10342_v10, %v5221_v55 }
 0x7ab   : > { %v5095_v5 = vsel %vm5031_vm13, %v4998_v47, %v5063_v23 }
 0x7ac   : > { %vm5282_vm15 = vcmp.ge.f32.partialorder %v5222_v42, 0.0  ;;  %v5314_v59 = vmul.f32 0.2, %v5222_v42  ;;  %v5111_v40 = vpack.c.bf16 %v5095_v5, %v5094_v60 }
 0x7ae   : > { %v5346_v34 = vsel %vm5282_vm15, %v5222_v42, %v5314_v59  ;;  %5263 = vmatmul.bf16.gmra.mxu2 %v5111_v40 }
 0x7af   : > { %v5371_v43 = vpack.c.bf16 %v5346_v34, %v5345_v38 }
 0x7b1   : > { %v5224_v32 = vpop.f32.mrf.mxu2  ;;  %7399 = vmatmul.msk.bf16.gmra.mxu3 %vm5413_vm6, %v5371_v43 }
 0x7b2   : > { %v5225_v56 = vadd.f32 %v10342_v10, %v5224_v32 }
 0x7b4   : > { %v5315_v4 = vmul.f32 0.2, %v5225_v56  ;;  %vm5283_vm0 = vcmp.ge.f32.partialorder %v5225_v56, 0.0 }
 0x7b6   : > { %v5347_v9 = vsel %vm5283_vm0, %v5225_v56, %v5315_v4 }
 0x7b9   : > { %v5226_v33 = vpop.f32.mrf.mxu2 }
 0x7ba   : > { %v5227_v22 = vadd.f32 %v10342_v10, %v5226_v33 }
 0x7bc   : > { %vm5284_vm1 = vcmp.ge.f32.partialorder %v5227_v22, 0.0  ;;  %v5316_v11 = vmul.f32 0.2, %v5227_v22 }
 0x7be   : > { %v5348_v63 = vsel %vm5284_vm1, %v5227_v22, %v5316_v11 }
 0x7bf   : > { %v5372_v27 = vpack.c.bf16 %v5348_v63, %v5347_v9 }
 0x7c1   : > { %v5229_v53 = vpop.f32.mrf.mxu2  ;;  %7400 = vmatmul.msk.bf16.gmra.mxu3 %vm5413_vm6, %v5372_v27 }
 0x7c2   : > { %v5230_v18 = vadd.f32 %v10342_v10, %v5229_v53 }
 0x7c4   : > { %v5317_v50 = vmul.f32 0.2, %v5230_v18  ;;  %vm5285_vm2 = vcmp.ge.f32.partialorder %v5230_v18, 0.0 }
 0x7c6   : > { %v5349_v24 = vsel %vm5285_vm2, %v5230_v18, %v5317_v50 }
 0x7c9   : > { %v5231_v21 = vpop.f32.mrf.mxu2 }
 0x7ca   : > { %v5232_v51 = vadd.f32 %v10342_v10, %v5231_v21 }
 0x7cc   : > { %vm5286_vm3 = vcmp.ge.f32.partialorder %v5232_v51, 0.0  ;;  %v5318_v25 = vmul.f32 0.2, %v5232_v51 }
 0x7ce   : > { %v5350_v30 = vsel %vm5286_vm3, %v5232_v51, %v5318_v25 }
 0x7cf   : > { %v5373_v37 = vpack.c.bf16 %v5350_v30, %v5349_v24 }
 0x7d1   : > { %v5234_v31 = vpop.f32.mrf.mxu2  ;;  %7401 = vmatmul.msk.bf16.gmra.mxu3 %vm5413_vm6, %v5373_v37 }
 0x7d2   : > { %v5235_v62 = vadd.f32 %v10342_v10, %v5234_v31 }
 0x7d4   : > { %v5471_v28 = vpop.f32.mrf.mxu3  ;;  %v5319_v41 = vmul.f32 0.2, %v5235_v62  ;;  %vm5287_vm4 = vcmp.ge.f32.partialorder %v5235_v62, 0.0 }
 0x7d5   : > { %v7409_v16 = vmul.f32 -1.442695, %v5471_v28 }
 0x7d6   : > { %v5351_v17 = vsel %vm5287_vm4, %v5235_v62, %v5319_v41 }
 0x7d7   : > { %7738 = vpow2.f32 %v7409_v16 }
 0x7d9   : > { %v5236_v35 = vpop.f32.mrf.mxu2 }
 0x7da   : > { %v5237_v54 = vadd.f32 %v10342_v10, %v5236_v35 }
 0x7dc   : > { %vm5288_vm5 = vcmp.ge.f32.partialorder %v5237_v54, 0.0  ;;  %v5320_v3 = vmul.f32 0.2, %v5237_v54  ;;  %v5473_v1 = vpop.f32.mrf.mxu3 }
 0x7dd   : > { %v7739_v36 = vpop.eup %7738  ;;  %v7410_v8 = vmul.f32 -1.442695, %v5473_v1 }
 0x7de   : > { %v5647_v58 = vadd.f32 1.0, %v7739_v36  ;;  %v5352_v48 = vsel %vm5288_vm5, %v5237_v54, %v5320_v3 }
 0x7df   : > { %v5374_v61 = vpack.c.bf16 %v5352_v48, %v5351_v17  ;;  %7740 = vpow2.f32 %v7410_v8 }
 0x7e0   : > { %7742 = vrcp.f32 %v5647_v58  ;;  %v5690_v49 = vand.u32 2147483648, %v5647_v58  ;;  %v5688_v2 = vand.u32 2147483647, %v5647_v58  ;;  %vm5684_vm10 = vweird.f32 %v5647_v58 }
 0x7e1   : > { %v5239_v7 = vpop.f32.mrf.mxu2  ;;  %7402 = vmatmul.msk.bf16.gmra.mxu3 %vm5413_vm6, %v5374_v61 }
 0x7e2   : > { %v5240_v26 = vadd.f32 %v10342_v10, %v5239_v7  ;;  %v5691_v20 = vor.u32 1.1754944e-38, %v5690_v49  ;;  %vm5689_vm12 = vcmp.eq.f32.partialorder %v5688_v2, 8.507059e+37 }
 0x7e4   : > { %v5476_v57 = vpop.f32.mrf.mxu3  ;;  %v5321_v12 = vmul.f32 0.2, %v5240_v26  ;;  %vm5289_vm8 = vcmp.ge.f32.partialorder %v5240_v26, 0.0 }
 0x7e5   : > { %v7741_v6 = vpop.eup %7740  ;;  %v7411_v44 = vmul.f32 -1.442695, %v5476_v57 }
 0x7e6   : > { %v7743_v15 = vpop.eup %7742  ;;  %v5648_v14 = vadd.f32 1.0, %v7741_v6  ;;  %v5353_v42 = vsel %vm5289_vm8, %v5240_v26, %v5321_v12 }
 0x7e7   : > { %v5680_v52 = vmul.f32 %v7743_v15, %v5647_v58  ;;  %7744 = vpow2.f32 %v7411_v44  ;;  %vm5685_vm7 = vweird.f32 %v7743_v15 }
 0x7e8   : > { %7746 = vrcp.f32 %v5648_v14  ;;  %vm5686_vm11 = vmor %vm5684_vm10, %vm5685_vm7  ;;  %v5705_v56 = vand.u32 2147483648, %v5648_v14  ;;  %v5703_v4 = vand.u32 2147483647, %v5648_v14  ;;  %vm5699_vm14 = vweird.f32 %v5648_v14 }
 0x7e9   : > { %v5681_v29 = vsub.f32 1.0, %v5680_v52  ;;  %v5241_v0 = vpop.f32.mrf.mxu2 }
 0x7ea   : > { %v5242_v45 = vadd.f32 %v10342_v10, %v5241_v0  ;;  %v5706_v27 = vor.u32 1.1754944e-38, %v5705_v56  ;;  %vm5704_vm0 = vcmp.eq.f32.partialorder %v5703_v4, 8.507059e+37 }
 0x7eb   : > { %v5682_v46 = vmul.f32 %v7743_v15, %v5681_v29 }
 0x7ec   : > { %vm5290_vm9 = vcmp.ge.f32.partialorder %v5242_v45, 0.0  ;;  %v5322_v39 = vmul.f32 0.2, %v5242_v45  ;;  %v5478_v13 = vpop.f32.mrf.mxu3 }
 0x7ed   : > { %v7745_v19 = vpop.eup %7744  ;;  %v5683_v47 = vadd.f32 %v7743_v15, %v5682_v46  ;;  %v7412_v23 = vmul.f32 -1.442695, %v5478_v13 }
 0x7ee   : > { %v7747_v55 = vpop.eup %7746  ;;  %v5649_v60 = vadd.f32 1.0, %v7745_v19  ;;  %v5354_v5 = vsel %vm5290_vm9, %v5242_v45, %v5322_v39 }
 0x7ef   : > { %v5687_v59 = vsel %vm5686_vm11, %v7743_v15, %v5683_v47  ;;  %v5695_v40 = vmul.f32 %v7747_v55, %v5648_v14  ;;  %v5375_v38 = vpack.c.bf16 %v5354_v5, %v5353_v42  ;;  %vm5700_vm13 = vweird.f32 %v7747_v55 }
 0x7f0   : > { %v5692_v34 = vsel %vm5689_vm12, %v5691_v20, %v5687_v59  ;;  %7748 = vrcp.f32 %v5649_v60  ;;  %vm5701_vm15 = vmor %vm5699_vm14, %vm5700_vm13  ;;  %v5720_v37 = vand.u32 2147483648, %v5649_v60  ;;  %v5718_v28 = vand.u32 2147483647, %v5649_v60 }
 0x7f1   : > { %6159 = vst [vmem:[%s10393_s20] sm:$0xff] %v5692_v34  ;;  %v5696_v43 = vsub.f32 1.0, %v5695_v40  ;;  %7750 = vpow2.f32 %v7412_v23  ;;  %v5244_v32 = vpop.f32.mrf.mxu2  ;;  %7403 = vmatmul.msk.bf16.gmra.mxu3 %vm5413_vm6, %v5375_v38  ;;  %vm5714_vm2 = vweird.f32 %v5649_v60 }
 0x7f2   : > { %v5245_v25 = vadd.f32 %v10342_v10, %v5244_v32  ;;  %v5721_v36 = vor.u32 1.1754944e-38, %v5720_v37  ;;  %vm5719_vm7 = vcmp.eq.f32.partialorder %v5718_v28, 8.507059e+37 }
 0x7f3   : > { %v5697_v33 = vmul.f32 %v7747_v55, %v5696_v43 }
 0x7f4   : > { %v5481_v22 = vpop.f32.mrf.mxu3  ;;  %vm5291_vm3 = vcmp.ge.f32.partialorder %v5245_v25, 0.0  ;;  %v5323_v62 = vmul.f32 0.2, %v5245_v25 }
 0x7f5   : > { %v5698_v11 = vadd.f32 %v7747_v55, %v5697_v33  ;;  %v7413_v9 = vmul.f32 -1.442695, %v5481_v22 }
 0x7f6   : > { %v7749_v63 = vpop.eup %7748  ;;  %v5355_v7 = vsel %vm5291_vm3, %v5245_v25, %v5323_v62 }
 0x7f7   : > { %v7751_v53 = vpop.eup %7750  ;;  %v5702_v18 = vsel %vm5701_vm15, %v7747_v55, %v5698_v11  ;;  %v5710_v21 = vmul.f32 %v7749_v63, %v5649_v60  ;;  %7752 = vpow2.f32 %v7413_v9  ;;  %vm5715_vm1 = vweird.f32 %v7749_v63 }
 0x7f8   : > { %v5707_v50 = vsel %vm5704_vm0, %v5706_v27, %v5702_v18  ;;  %v5650_v51 = vadd.f32 1.0, %v7751_v53  ;;  %vm5716_vm5 = vmor %vm5714_vm2, %vm5715_vm1 }
 0x7f9   : > { %6160 = vst [vmem:[%s10393_s20 + $0x8] sm:$0xff] %v5707_v50  ;;  %v5711_v24 = vsub.f32 1.0, %v5710_v21  ;;  %v5246_v30 = vpop.f32.mrf.mxu2 }
 0x7fa   : > { %7754 = vrcp.f32 %v5650_v51  ;;  %v5247_v16 = vadd.f32 %v10342_v10, %v5246_v30  ;;  %v5735_v14 = vand.u32 2147483648, %v5650_v51  ;;  %v5733_v0 = vand.u32 2147483647, %v5650_v51 }
 0x7fb   : > { %v5712_v31 = vmul.f32 %v7749_v63, %v5711_v24  ;;  %vm5729_vm9 = vweird.f32 %v5650_v51 }
 0x7fc   : > { %v5483_v35 = vpop.f32.mrf.mxu3  ;;  %vm5292_vm4 = vcmp.ge.f32.partialorder %v5247_v16, 0.0  ;;  %v5324_v3 = vmul.f32 0.2, %v5247_v16  ;;  %v5736_v13 = vor.u32 1.1754944e-38, %v5735_v14  ;;  %vm5734_vm11 = vcmp.eq.f32.partialorder %v5733_v0, 8.507059e+37 }
 0x7fd   : > { %v7753_v41 = vpop.eup %7752  ;;  %v5713_v54 = vadd.f32 %v7749_v63, %v5712_v31  ;;  %v7414_v1 = vmul.f32 -1.442695, %v5483_v35 }
 0x7fe   : > { %v5651_v8 = vadd.f32 1.0, %v7753_v41  ;;  %v5356_v58 = vsel %vm5292_vm4, %v5247_v16, %v5324_v3 }
 0x7ff   : > { %v5717_v17 = vsel %vm5716_vm5, %v7749_v63, %v5713_v54  ;;  %7756 = vpow2.f32 %v7414_v1  ;;  %v5376_v6 = vpack.c.bf16 %v5356_v58, %v5355_v7 }
 0x800   : > { %v7755_v48 = vpop.eup %7754  ;;  %v5722_v61 = vsel %vm5719_vm7, %v5721_v36, %v5717_v17  ;;  %7758 = vrcp.f32 %v5651_v8  ;;  %v5750_v20 = vand.u32 2147483648, %v5651_v8  ;;  %v5748_v59 = vand.u32 2147483647, %v5651_v8 }
 0x801   : > { %6161 = vst [vmem:[%s10393_s20 + $0x10] sm:$0xff] %v5722_v61  ;;  %v5725_v57 = vmul.f32 %v7755_v48, %v5650_v51  ;;  %v5249_v44 = vpop.f32.mrf.mxu2  ;;  %7404 = vmatmul.msk.bf16.gmra.mxu3 %vm5413_vm6, %v5376_v6  ;;  %vm5730_vm8 = vweird.f32 %v7755_v48  ;;  %vm5744_vm15 = vweird.f32 %v5651_v8 }
 0x802   : > { %v5250_v46 = vadd.f32 %v10342_v10, %v5249_v44  ;;  %vm5731_vm10 = vmor %vm5729_vm9, %vm5730_vm8  ;;  %v5751_v33 = vor.u32 1.1754944e-38, %v5750_v20  ;;  %vm5749_vm1 = vcmp.eq.f32.partialorder %v5748_v59, 8.507059e+37 }
 0x803   : > { %v5726_v15 = vsub.f32 1.0, %v5725_v57 }
 0x804   : > { %v5486_v26 = vpop.f32.mrf.mxu3  ;;  %v5325_v42 = vmul.f32 0.2, %v5250_v46  ;;  %vm5293_vm13 = vcmp.ge.f32.partialorder %v5250_v46, 0.0 }
 0x805   : > { %v7757_v52 = vpop.eup %7756  ;;  %v5727_v29 = vmul.f32 %v7755_v48, %v5726_v15  ;;  %v7415_v49 = vmul.f32 -1.442695, %v5486_v26 }
 0x806   : > { %v7759_v12 = vpop.eup %7758  ;;  %v5652_v45 = vadd.f32 1.0, %v7757_v52  ;;  %v5357_v4 = vsel %vm5293_vm13, %v5250_v46, %v5325_v42 }
 0x807   : > { %v5728_v2 = vadd.f32 %v7755_v48, %v5727_v29  ;;  %v5740_v39 = vmul.f32 %v7759_v12, %v5651_v8  ;;  %7760 = vpow2.f32 %v7415_v49  ;;  %vm5745_vm12 = vweird.f32 %v7759_v12 }
 0x808   : > { %7762 = vrcp.f32 %v5652_v45  ;;  %vm5746_vm0 = vmor %vm5744_vm15, %vm5745_vm12  ;;  %v5765_v50 = vand.u32 2147483648, %v5652_v45  ;;  %v5763_v25 = vand.u32 2147483647, %v5652_v45  ;;  %vm5759_vm3 = vweird.f32 %v5652_v45 }
 0x809   : > { %v5732_v19 = vsel %vm5731_vm10, %v7755_v48, %v5728_v2  ;;  %v5741_v47 = vsub.f32 1.0, %v5740_v39  ;;  %v5251_v23 = vpop.f32.mrf.mxu2 }
 0x80a   : > { %v5737_v55 = vsel %vm5734_vm11, %v5736_v13, %v5732_v19  ;;  %v5252_v60 = vadd.f32 %v10342_v10, %v5251_v23  ;;  %v5766_v28 = vor.u32 1.1754944e-38, %v5765_v50  ;;  %vm5764_vm5 = vcmp.eq.f32.partialorder %v5763_v25, 8.507059e+37 }
 0x80b   : > { %6162 = vst [vmem:[%s10393_s20 + $0x18] sm:$0xff] %v5737_v55  ;;  %v5742_v5 = vmul.f32 %v7759_v12, %v5741_v47 }
 0x80c   : > { %vm5294_vm14 = vcmp.ge.f32.partialorder %v5252_v60, 0.0  ;;  %v5326_v40 = vmul.f32 0.2, %v5252_v60  ;;  %v5488_v38 = vpop.f32.mrf.mxu3 }
 0x80d   : > { %v7761_v34 = vpop.eup %7760  ;;  %v5743_v43 = vadd.f32 %v7759_v12, %v5742_v5  ;;  %v7416_v32 = vmul.f32 -1.442695, %v5488_v38 }
 0x80e   : > { %v7763_v56 = vpop.eup %7762  ;;  %v5653_v22 = vadd.f32 1.0, %v7761_v34  ;;  %v5358_v11 = vsel %vm5294_vm14, %v5252_v60, %v5326_v40 }
 0x80f   : > { %v5747_v9 = vsel %vm5746_vm0, %v7759_v12, %v5743_v43  ;;  %v5755_v63 = vmul.f32 %v7763_v56, %v5652_v45  ;;  %v5377_v27 = vpack.c.bf16 %v5358_v11, %v5357_v4  ;;  %vm5760_vm2 = vweird.f32 %v7763_v56 }
 0x810   : > { %v5752_v53 = vsel %vm5749_vm1, %v5751_v33, %v5747_v9  ;;  %7764 = vrcp.f32 %v5653_v22  ;;  %vm5761_vm4 = vmor %vm5759_vm3, %vm5760_vm2  ;;  %v5780_v8 = vand.u32 2147483648, %v5653_v22  ;;  %v5778_v58 = vand.u32 2147483647, %v5653_v22 }
 0x811   : > { %6163 = vst [vmem:[%s10393_s20 + $0x20] sm:$0xff] %v5752_v53  ;;  %v5756_v18 = vsub.f32 1.0, %v5755_v63  ;;  %7766 = vpow2.f32 %v7416_v32  ;;  %v5254_v21 = vpop.f32.mrf.mxu2  ;;  %7405 = vmatmul.msk.bf16.gmra.mxu3 %vm5413_vm6, %v5377_v27  ;;  %vm5774_vm8 = vweird.f32 %v5653_v22 }
 0x812   : > { %v5255_v3 = vadd.f32 %v10342_v10, %v5254_v21  ;;  %v5781_v14 = vor.u32 1.1754944e-38, %v5780_v8  ;;  %vm5779_vm12 = vcmp.eq.f32.partialorder %v5778_v58, 8.507059e+37 }
 0x813   : > { %v5757_v51 = vmul.f32 %v7763_v56, %v5756_v18 }
 0x814   : > { %v5491_v24 = vpop.f32.mrf.mxu3  ;;  %vm5295_vm9 = vcmp.ge.f32.partialorder %v5255_v3, 0.0  ;;  %v5327_v61 = vmul.f32 0.2, %v5255_v3 }
 0x815   : > { %v5758_v30 = vadd.f32 %v7763_v56, %v5757_v51  ;;  %v7417_v37 = vmul.f32 -1.442695, %v5491_v24 }
 0x816   : > { %v7765_v31 = vpop.eup %7764  ;;  %v5359_v12 = vsel %vm5295_vm9, %v5255_v3, %v5327_v61 }
 0x817   : > { %v7767_v16 = vpop.eup %7766  ;;  %v5762_v62 = vsel %vm5761_vm4, %v7763_v56, %v5758_v30  ;;  %v5770_v35 = vmul.f32 %v7765_v31, %v5653_v22  ;;  %7768 = vpow2.f32 %v7417_v37  ;;  %vm5775_vm7 = vweird.f32 %v7765_v31 }
 0x818   : > { %v5767_v41 = vsel %vm5764_vm5, %v5766_v28, %v5762_v62  ;;  %v5654_v54 = vadd.f32 1.0, %v7767_v16  ;;  %vm5776_vm11 = vmor %vm5774_vm8, %vm5775_vm7 }
 0x819   : > { %6164 = vst [vmem:[%s10393_s20 + $0x28] sm:$0xff] %v5767_v41  ;;  %v5771_v1 = vsub.f32 1.0, %v5770_v35  ;;  %v5256_v36 = vpop.f32.mrf.mxu2 }
 0x81a   : > { %7770 = vrcp.f32 %v5654_v54  ;;  %v5257_v48 = vadd.f32 %v10342_v10, %v5256_v36  ;;  %v5795_v13 = vand.u32 2147483648, %v5654_v54  ;;  %v5793_v55 = vand.u32 2147483647, %v5654_v54 }
 0x81b   : > { %v5772_v17 = vmul.f32 %v7765_v31, %v5771_v1  ;;  %vm5789_vm14 = vweird.f32 %v5654_v54 }
 0x81c   : > { %v5493_v7 = vpop.f32.mrf.mxu3  ;;  %vm5296_vm10 = vcmp.ge.f32.partialorder %v5257_v48, 0.0  ;;  %v5328_v44 = vmul.f32 0.2, %v5257_v48  ;;  %v5796_v38 = vor.u32 1.1754944e-38, %v5795_v13  ;;  %vm5794_vm0 = vcmp.eq.f32.partialorder %v5793_v55, 8.507059e+37 }
 0x81d   : > { %v7769_v57 = vpop.eup %7768  ;;  %v5773_v6 = vadd.f32 %v7765_v31, %v5772_v17  ;;  %v7418_v15 = vmul.f32 -1.442695, %v5493_v7 }
 0x81e   : > { %v5655_v26 = vadd.f32 1.0, %v7769_v57  ;;  %v5360_v29 = vsel %vm5296_vm10, %v5257_v48, %v5328_v44 }
 0x81f   : > { %v5777_v52 = vsel %vm5776_vm11, %v7765_v31, %v5773_v6  ;;  %7772 = vpow2.f32 %v7418_v15  ;;  %v5378_v46 = vpack.c.bf16 %v5360_v29, %v5359_v12  ;;  %v7867_v6 = vld [vmem:[%s10457_s7] ss:$0 sm:$0xff] }
 0x820   : > { %v7771_v0 = vpop.eup %7770  ;;  %v5782_v49 = vsel %vm5779_vm12, %v5781_v14, %v5777_v52  ;;  %7774 = vrcp.f32 %v5655_v26  ;;  %v5810_v33 = vand.u32 2147483648, %v5655_v26  ;;  %v5808_v9 = vand.u32 2147483647, %v5655_v26 }
 0x821   : > { %6165 = vst [vmem:[%s10393_s20 + $0x30] sm:$0xff] %v5782_v49  ;;  %v5785_v45 = vmul.f32 %v7771_v0, %v5654_v54  ;;  %v5259_v2 = vpop.f32.mrf.mxu2  ;;  %7406 = vmatmul.msk.bf16.gmra.mxu3 %vm5413_vm6, %v5378_v46  ;;  %vm5790_vm13 = vweird.f32 %v7771_v0  ;;  %vm5804_vm4 = vweird.f32 %v5655_v26 }
 0x822   : > { %v5260_v5 = vadd.f32 %v10342_v10, %v5259_v2  ;;  %vm5791_vm15 = vmor %vm5789_vm14, %vm5790_vm13  ;;  %v5811_v51 = vor.u32 1.1754944e-38, %v5810_v33  ;;  %vm5809_vm7 = vcmp.eq.f32.partialorder %v5808_v9, 8.507059e+37 }
 0x823   : > { %v5786_v39 = vsub.f32 1.0, %v5785_v45 }
 0x824   : > { %v5496_v19 = vpop.f32.mrf.mxu3  ;;  %v5329_v4 = vmul.f32 0.2, %v5260_v5  ;;  %vm5297_vm2 = vcmp.ge.f32.partialorder %v5260_v5, 0.0 }
 0x825   : > { %v7773_v47 = vpop.eup %7772  ;;  %v5787_v23 = vmul.f32 %v7771_v0, %v5786_v39  ;;  %v7419_v20 = vmul.f32 -1.442695, %v5496_v19 }
 0x826   : > { %v7775_v42 = vpop.eup %7774  ;;  %v5656_v60 = vadd.f32 1.0, %v7773_v47  ;;  %v5361_v25 = vsel %vm5297_vm2, %v5260_v5, %v5329_v4 }
 0x827   : > { %v5788_v59 = vadd.f32 %v7771_v0, %v5787_v23  ;;  %v5800_v40 = vmul.f32 %v7775_v42, %v5655_v26  ;;  %7776 = vpow2.f32 %v7419_v20  ;;  %vm5805_vm1 = vweird.f32 %v7775_v42 }
 0x828   : > { %7778 = vrcp.f32 %v5656_v60  ;;  %vm5806_vm5 = vmor %vm5804_vm4, %vm5805_vm1  ;;  %v5825_v35 = vand.u32 2147483648, %v5656_v60  ;;  %v5823_v54 = vand.u32 2147483647, %v5656_v60  ;;  %vm5819_vm9 = vweird.f32 %v5656_v60 }
 0x829   : > { %v5792_v34 = vsel %vm5791_vm15, %v7771_v0, %v5788_v59  ;;  %v5801_v43 = vsub.f32 1.0, %v5800_v40  ;;  %v5261_v32 = vpop.f32.mrf.mxu2 }
 0x82a   : > { %v5797_v56 = vsel %vm5794_vm0, %v5796_v38, %v5792_v34  ;;  %v5262_v22 = vadd.f32 %v10342_v10, %v5261_v32  ;;  %v5826_v17 = vor.u32 1.1754944e-38, %v5825_v35  ;;  %vm5824_vm11 = vcmp.eq.f32.partialorder %v5823_v54, 8.507059e+37 }
 0x82b   : > { %6166 = vst [vmem:[%s10393_s20 + $0x38] sm:$0xff] %v5797_v56  ;;  %v5802_v11 = vmul.f32 %v7775_v42, %v5801_v43 }
 0x82c   : > { %vm5298_vm3 = vcmp.ge.f32.partialorder %v5262_v22, 0.0  ;;  %v5330_v63 = vmul.f32 0.2, %v5262_v22  ;;  %v5498_v27 = vpop.f32.mrf.mxu3 }
 0x82d   : > { %v7777_v53 = vpop.eup %7776  ;;  %v5803_v18 = vadd.f32 %v7775_v42, %v5802_v11  ;;  %v7420_v21 = vmul.f32 -1.442695, %v5498_v27 }
 0x82e   : > { %v7779_v50 = vpop.eup %7778  ;;  %v5657_v24 = vadd.f32 1.0, %v7777_v53  ;;  %v5362_v30 = vsel %vm5298_vm3, %v5262_v22, %v5330_v63 }
 0x82f   : > { %v5807_v10 = vsel %vm5806_vm5, %v7775_v42, %v5803_v18  ;;  %v5815_v37 = vmul.f32 %v7779_v50, %v5656_v60  ;;  %v5379_v31 = vpack.c.bf16 %v5362_v30, %v5361_v25  ;;  %vm5820_vm8 = vweird.f32 %v7779_v50 }
 0x830   : > { %v5812_v28 = vsel %vm5809_vm7, %v5811_v51, %v5807_v10  ;;  %7780 = vrcp.f32 %v5657_v24  ;;  %vm5821_vm10 = vmor %vm5819_vm9, %vm5820_vm8  ;;  %v5840_v26 = vand.u32 2147483648, %v5657_v24  ;;  %v5838_v29 = vand.u32 2147483647, %v5657_v24 }
 0x831   : > { %6167 = vst [vmem:[%s10393_s20 + $0x40] sm:$0xff] %v5812_v28  ;;  %v5816_v16 = vsub.f32 1.0, %v5815_v37  ;;  %7782 = vpow2.f32 %v7420_v21  ;;  %v5264_v62 = vpop.f32.mrf.mxu2  ;;  %7407 = vmatmul.msk.bf16.gmra.mxu3 %vm5413_vm6, %v5379_v31  ;;  %vm5834_vm13 = vweird.f32 %v5657_v24 }
 0x832   : > { %v5265_v44 = vadd.f32 %v7867_v6, %v5264_v62  ;;  %v5841_v13 = vor.u32 1.1754944e-38, %v5840_v26  ;;  %vm5839_vm1 = vcmp.eq.f32.partialorder %v5838_v29, 8.507059e+37 }
 0x833   : > { %v5817_v41 = vmul.f32 %v7779_v50, %v5816_v16 }
 0x834   : > { %v5501_v3 = vpop.f32.mrf.mxu3  ;;  %vm5299_vm14 = vcmp.ge.f32.partialorder %v5265_v44, 0.0  ;;  %v5331_v49 = vmul.f32 0.2, %v5265_v44 }
 0x835   : > { %v5818_v1 = vadd.f32 %v7779_v50, %v5817_v41  ;;  %v7421_v36 = vmul.f32 -1.442695, %v5501_v3 }
 0x836   : > { %v7781_v8 = vpop.eup %7780  ;;  %v5363_v42 = vsel %vm5299_vm14, %v5265_v44, %v5331_v49 }
 0x837   : > { %v7783_v58 = vpop.eup %7782  ;;  %v5822_v48 = vsel %vm5821_vm10, %v7779_v50, %v5818_v1  ;;  %v5830_v61 = vmul.f32 %v7781_v8, %v5657_v24  ;;  %7784 = vpow2.f32 %v7421_v36  ;;  %vm5835_vm12 = vweird.f32 %v7781_v8 }
 0x838   : > { %v5827_v7 = vsel %vm5824_vm11, %v5826_v17, %v5822_v48  ;;  %v5658_v57 = vadd.f32 1.0, %v7783_v58  ;;  %vm5836_vm0 = vmor %vm5834_vm13, %vm5835_vm12 }
 0x839   : > { %6168 = vst [vmem:[%s10393_s20 + $0x48] sm:$0xff] %v5827_v7  ;;  %v5831_v15 = vsub.f32 1.0, %v5830_v61  ;;  %v5266_v14 = vpop.f32.mrf.mxu2 }
 0x83a   : > { %7786 = vrcp.f32 %v5658_v57  ;;  %v5267_v0 = vadd.f32 %v7867_v6, %v5266_v14  ;;  %v5855_v40 = vand.u32 2147483648, %v5658_v57  ;;  %v5853_v32 = vand.u32 2147483647, %v5658_v57 }
 0x83b   : > { %v5832_v52 = vmul.f32 %v7781_v8, %v5831_v15  ;;  %vm5849_vm3 = vweird.f32 %v5658_v57 }
 0x83c   : > { %v5503_v12 = vpop.f32.mrf.mxu3  ;;  %vm5300_vm15 = vcmp.ge.f32.partialorder %v5267_v0, 0.0  ;;  %v5332_v2 = vmul.f32 0.2, %v5267_v0  ;;  %v5856_v9 = vor.u32 1.1754944e-38, %v5855_v40  ;;  %vm5854_vm5 = vcmp.eq.f32.partialorder %v5853_v32, 8.507059e+37 }
 0x83d   : > { %v7785_v45 = vpop.eup %7784  ;;  %v5833_v46 = vadd.f32 %v7781_v8, %v5832_v52  ;;  %v7422_v39 = vmul.f32 -1.442695, %v5503_v12 }
 0x83e   : > { %v5659_v19 = vadd.f32 1.0, %v7785_v45  ;;  %v5364_v23 = vsel %vm5300_vm15, %v5267_v0, %v5332_v2 }
 0x83f   : > { %v5837_v47 = vsel %vm5836_vm0, %v7781_v8, %v5833_v46  ;;  %7788 = vpow2.f32 %v7422_v39  ;;  %v5380_v5 = vpack.c.bf16 %v5364_v23, %v5363_v42 }
 0x840   : > { %v7787_v55 = vpop.eup %7786  ;;  %v5842_v20 = vsel %vm5839_vm1, %v5841_v13, %v5837_v47  ;;  %7790 = vrcp.f32 %v5659_v19  ;;  %v5870_v18 = vand.u32 2147483648, %v5659_v19  ;;  %v5868_v50 = vand.u32 2147483647, %v5659_v19 }
 0x841   : > { %6169 = vst [vmem:[%s10393_s20 + $0x50] sm:$0xff] %v5842_v20  ;;  %v5845_v60 = vmul.f32 %v7787_v55, %v5658_v57  ;;  %7408 = vmatmul.msk.bf16.gmra.mxu3 %vm5413_vm6, %v5380_v5  ;;  %vm5850_vm2 = vweird.f32 %v7787_v55  ;;  %vm5864_vm7 = vweird.f32 %v5659_v19 }
 0x842   : > { %vm5851_vm4 = vmor %vm5849_vm3, %vm5850_vm2  ;;  %v5871_v37 = vor.u32 1.1754944e-38, %v5870_v18  ;;  %vm5869_vm9 = vcmp.eq.f32.partialorder %v5868_v50, 8.507059e+37 }
 0x843   : > { %v5846_v59 = vsub.f32 1.0, %v5845_v60 }
 0x844   : > { %v5506_v38 = vpop.f32.mrf.mxu3 }
 0x845   : > { %v7789_v34 = vpop.eup %7788  ;;  %v5847_v43 = vmul.f32 %v7787_v55, %v5846_v59  ;;  %v7423_v56 = vmul.f32 -1.442695, %v5506_v38 }
 0x846   : > { %v7791_v33 = vpop.eup %7790  ;;  %v5660_v4 = vadd.f32 1.0, %v7789_v34 }
 0x847   : > { %v5848_v22 = vadd.f32 %v7787_v55, %v5847_v43  ;;  %v5860_v11 = vmul.f32 %v7791_v33, %v5659_v19  ;;  %7792 = vpow2.f32 %v7423_v56  ;;  %vm5865_vm6 = vweird.f32 %v7791_v33 }
 0x848   : > { %7794 = vrcp.f32 %v5660_v4  ;;  %vm5866_vm8 = vmor %vm5864_vm7, %vm5865_vm6  ;;  %v5885_v41 = vand.u32 2147483648, %v5660_v4  ;;  %v5883_v3 = vand.u32 2147483647, %v5660_v4  ;;  %vm5879_vm11 = vweird.f32 %v5660_v4 }
 0x849   : > { %v5852_v63 = vsel %vm5851_vm4, %v7787_v55, %v5848_v22  ;;  %v5861_v27 = vsub.f32 1.0, %v5860_v11 }
 0x84a   : > { %v5857_v53 = vsel %vm5854_vm5, %v5856_v9, %v5852_v63  ;;  %v5886_v48 = vor.u32 1.1754944e-38, %v5885_v41  ;;  %vm5884_vm13 = vcmp.eq.f32.partialorder %v5883_v3, 8.507059e+37 }
 0x84b   : > { %6170 = vst [vmem:[%s10393_s20 + $0x58] sm:$0xff] %v5857_v53  ;;  %v5862_v21 = vmul.f32 %v7791_v33, %v5861_v27 }
 0x84c   : > { %v5508_v51 = vpop.f32.mrf.mxu3 }
 0x84d   : > { %v7793_v25 = vpop.eup %7792  ;;  %v5863_v24 = vadd.f32 %v7791_v33, %v5862_v21  ;;  %v7424_v30 = vmul.f32 -1.442695, %v5508_v51 }
 0x84e   : > { %v7795_v10 = vpop.eup %7794  ;;  %v5661_v31 = vadd.f32 1.0, %v7793_v25 }
 0x84f   : > { %v5867_v28 = vsel %vm5866_vm8, %v7791_v33, %v5863_v24  ;;  %v5875_v16 = vmul.f32 %v7795_v10, %v5660_v4  ;;  %7796 = vpow2.f32 %v7424_v30  ;;  %vm5880_vm10 = vweird.f32 %v7795_v10 }
 0x850   : > { %v5872_v62 = vsel %vm5869_vm9, %v5871_v37, %v5867_v28  ;;  %7798 = vrcp.f32 %v5661_v31  ;;  %vm5881_vm12 = vmor %vm5879_vm11, %vm5880_vm10  ;;  %v5900_v15 = vand.u32 2147483648, %v5661_v31  ;;  %v5898_v26 = vand.u32 2147483647, %v5661_v31 }
 0x851   : > { %6171 = vst [vmem:[%s10393_s20 + $0x60] sm:$0xff] %v5872_v62  ;;  %v5876_v35 = vsub.f32 1.0, %v5875_v16  ;;  %vm5894_vm15 = vweird.f32 %v5661_v31 }
 0x852   : > { %v5901_v45 = vor.u32 1.1754944e-38, %v5900_v15  ;;  %vm5899_vm1 = vcmp.eq.f32.partialorder %v5898_v26, 8.507059e+37 }
 0x853   : > { %v5877_v54 = vmul.f32 %v7795_v10, %v5876_v35 }
 0x854   : > { %v5511_v1 = vpop.f32.mrf.mxu3 }
 0x855   : > { %v7797_v36 = vpop.eup %7796  ;;  %v5878_v8 = vadd.f32 %v7795_v10, %v5877_v54  ;;  %v7425_v17 = vmul.f32 -1.442695, %v5511_v1 }
 0x856   : > { %v7799_v58 = vpop.eup %7798  ;;  %v5662_v61 = vadd.f32 1.0, %v7797_v36 }
 0x857   : > { %v5882_v7 = vsel %vm5881_vm12, %v7795_v10, %v5878_v8  ;;  %v5890_v57 = vmul.f32 %v7799_v58, %v5661_v31  ;;  %7800 = vpow2.f32 %v7425_v17  ;;  %vm5895_vm14 = vweird.f32 %v7799_v58 }
 0x858   : > { %v5887_v6 = vsel %vm5884_vm13, %v5886_v48, %v5882_v7  ;;  %7802 = vrcp.f32 %v5662_v61  ;;  %vm5896_vm0 = vmor %vm5894_vm15, %vm5895_vm14  ;;  %v5915_v47 = vand.u32 2147483648, %v5662_v61  ;;  %v5913_v55 = vand.u32 2147483647, %v5662_v61 }
 0x859   : > { %6172 = vst [vmem:[%s10393_s20 + $0x68] sm:$0xff] %v5887_v6  ;;  %v5891_v44 = vsub.f32 1.0, %v5890_v57  ;;  %vm5909_vm3 = vweird.f32 %v5662_v61 }
 0x85a   : > { %v5916_v40 = vor.u32 1.1754944e-38, %v5915_v47  ;;  %vm5914_vm5 = vcmp.eq.f32.partialorder %v5913_v55, 8.507059e+37 }
 0x85b   : > { %v5892_v14 = vmul.f32 %v7799_v58, %v5891_v44 }
 0x85c   : > { %v5513_v52 = vpop.f32.mrf.mxu3 }
 0x85d   : > { %v7801_v29 = vpop.eup %7800  ;;  %v5893_v0 = vadd.f32 %v7799_v58, %v5892_v14  ;;  %v7426_v49 = vmul.f32 -1.442695, %v5513_v52 }
 0x85e   : > { %v7803_v12 = vpop.eup %7802  ;;  %v5663_v46 = vadd.f32 1.0, %v7801_v29 }
 0x85f   : > { %v5897_v2 = vsel %vm5896_vm0, %v7799_v58, %v5893_v0  ;;  %v5905_v39 = vmul.f32 %v7803_v12, %v5662_v61  ;;  %7804 = vpow2.f32 %v7426_v49  ;;  %vm5910_vm2 = vweird.f32 %v7803_v12 }
 0x860   : > { %v5902_v13 = vsel %vm5899_vm1, %v5901_v45, %v5897_v2  ;;  %7806 = vrcp.f32 %v5663_v46  ;;  %vm5911_vm4 = vmor %vm5909_vm3, %vm5910_vm2  ;;  %v5930_v33 = vand.u32 2147483648, %v5663_v46  ;;  %v5928_v22 = vand.u32 2147483647, %v5663_v46 }
 0x861   : > { %6173 = vst [vmem:[%s10393_s20 + $0x70] sm:$0xff] %v5902_v13  ;;  %v5906_v19 = vsub.f32 1.0, %v5905_v39  ;;  %vm5924_vm7 = vweird.f32 %v5663_v46 }
 0x862   : > { %v5931_v18 = vor.u32 1.1754944e-38, %v5930_v33  ;;  %vm5929_vm9 = vcmp.eq.f32.partialorder %v5928_v22, 8.507059e+37 }
 0x863   : > { %v5907_v23 = vmul.f32 %v7803_v12, %v5906_v19 }
 0x864   : > { %v5516_v20 = vpop.f32.mrf.mxu3 }
 0x865   : > { %v7805_v42 = vpop.eup %7804  ;;  %v5908_v60 = vadd.f32 %v7803_v12, %v5907_v23  ;;  %v7427_v5 = vmul.f32 -1.442695, %v5516_v20 }
 0x866   : > { %v7807_v59 = vpop.eup %7806  ;;  %v5664_v38 = vadd.f32 1.0, %v7805_v42 }
 0x867   : > { %v5912_v34 = vsel %vm5911_vm4, %v7803_v12, %v5908_v60  ;;  %v5920_v43 = vmul.f32 %v7807_v59, %v5663_v46  ;;  %7808 = vpow2.f32 %v7427_v5  ;;  %vm5925_vm6 = vweird.f32 %v7807_v59 }
 0x868   : > { %v5917_v32 = vsel %vm5914_vm5, %v5916_v40, %v5912_v34  ;;  %7810 = vrcp.f32 %v5664_v38  ;;  %vm5926_vm8 = vmor %vm5924_vm7, %vm5925_vm6  ;;  %v5945_v30 = vand.u32 2147483648, %v5664_v38  ;;  %v5943_v37 = vand.u32 2147483647, %v5664_v38 }
 0x869   : > { %6174 = vst [vmem:[%s10393_s20 + $0x78] sm:$0xff] %v5917_v32  ;;  %v5921_v56 = vsub.f32 1.0, %v5920_v43  ;;  %vm5939_vm11 = vweird.f32 %v5664_v38 }
 0x86a   : > { %v5946_v41 = vor.u32 1.1754944e-38, %v5945_v30  ;;  %vm5944_vm13 = vcmp.eq.f32.partialorder %v5943_v37, 8.507059e+37 }
 0x86b   : > { %v5922_v4 = vmul.f32 %v7807_v59, %v5921_v56 }
 0x86c   : > { %v5518_v11 = vpop.f32.mrf.mxu3 }
 0x86d   : > { %v7809_v9 = vpop.eup %7808  ;;  %v5923_v63 = vadd.f32 %v7807_v59, %v5922_v4  ;;  %v7428_v27 = vmul.f32 -1.442695, %v5518_v11 }
 0x86e   : > { %v7811_v53 = vpop.eup %7810  ;;  %v5665_v21 = vadd.f32 1.0, %v7809_v9 }
 0x86f   : > { %v5927_v50 = vsel %vm5926_vm8, %v7807_v59, %v5923_v63  ;;  %v5935_v51 = vmul.f32 %v7811_v53, %v5664_v38  ;;  %7812 = vpow2.f32 %v7428_v27  ;;  %vm5940_vm10 = vweird.f32 %v7811_v53 }
 0x870   : > { %v5932_v25 = vsel %vm5929_vm9, %v5931_v18, %v5927_v50  ;;  %7814 = vrcp.f32 %v5665_v21  ;;  %vm5941_vm12 = vmor %vm5939_vm11, %vm5940_vm10  ;;  %v5960_v17 = vand.u32 2147483648, %v5665_v21  ;;  %v5958_v48 = vand.u32 2147483647, %v5665_v21 }
 0x871   : > { %6175 = vst [vmem:[%s10393_s20 + $0x80] sm:$0xff] %v5932_v25  ;;  %v5936_v24 = vsub.f32 1.0, %v5935_v51  ;;  %vm5954_vm15 = vweird.f32 %v5665_v21 }
 0x872   : > { %v5961_v15 = vor.u32 1.1754944e-38, %v5960_v17  ;;  %vm5959_vm1 = vcmp.eq.f32.partialorder %v5958_v48, 8.507059e+37 }
 0x873   : > { %v5937_v10 = vmul.f32 %v7811_v53, %v5936_v24 }
 0x874   : > { %v5521_v31 = vpop.f32.mrf.mxu3 }
 0x875   : > { %v7813_v28 = vpop.eup %7812  ;;  %v5938_v16 = vadd.f32 %v7811_v53, %v5937_v10  ;;  %v7429_v62 = vmul.f32 -1.442695, %v5521_v31 }
 0x876   : > { %v7815_v35 = vpop.eup %7814  ;;  %v5666_v54 = vadd.f32 1.0, %v7813_v28 }
 0x877   : > { %v5942_v3 = vsel %vm5941_vm12, %v7811_v53, %v5938_v16  ;;  %v5950_v1 = vmul.f32 %v7815_v35, %v5665_v21  ;;  %7816 = vpow2.f32 %v7429_v62  ;;  %vm5955_vm14 = vweird.f32 %v7815_v35 }
 0x878   : > { %v5947_v36 = vsel %vm5944_vm13, %v5946_v41, %v5942_v3  ;;  %7818 = vrcp.f32 %v5666_v54  ;;  %vm5956_vm0 = vmor %vm5954_vm15, %vm5955_vm14  ;;  %v5975_v49 = vand.u32 2147483648, %v5666_v54  ;;  %v5973_v45 = vand.u32 2147483647, %v5666_v54 }
 0x879   : > { %6176 = vst [vmem:[%s10393_s20 + $0x88] sm:$0xff] %v5947_v36  ;;  %v5951_v8 = vsub.f32 1.0, %v5950_v1  ;;  %vm5969_vm3 = vweird.f32 %v5666_v54 }
 0x87a   : > { %v5976_v13 = vor.u32 1.1754944e-38, %v5975_v49  ;;  %vm5974_vm5 = vcmp.eq.f32.partialorder %v5973_v45, 8.507059e+37 }
 0x87b   : > { %v5952_v58 = vmul.f32 %v7815_v35, %v5951_v8 }
 0x87c   : > { %v5523_v61 = vpop.f32.mrf.mxu3 }
 0x87d   : > { %v7817_v7 = vpop.eup %7816  ;;  %v5953_v57 = vadd.f32 %v7815_v35, %v5952_v58  ;;  %v7430_v6 = vmul.f32 -1.442695, %v5523_v61 }
 0x87e   : > { %v7819_v44 = vpop.eup %7818  ;;  %v5667_v14 = vadd.f32 1.0, %v7817_v7 }
 0x87f   : > { %v5957_v26 = vsel %vm5956_vm0, %v7815_v35, %v5953_v57  ;;  %v5965_v52 = vmul.f32 %v7819_v44, %v5666_v54  ;;  %7820 = vpow2.f32 %v7430_v6  ;;  %vm5970_vm2 = vweird.f32 %v7819_v44 }
 0x880   : > { %v5962_v29 = vsel %vm5959_vm1, %v5961_v15, %v5957_v26  ;;  %7822 = vrcp.f32 %v5667_v14  ;;  %vm5971_vm4 = vmor %vm5969_vm3, %vm5970_vm2  ;;  %v5990_v5 = vand.u32 2147483648, %v5667_v14  ;;  %v5988_v40 = vand.u32 2147483647, %v5667_v14 }
 0x881   : > { %6177 = vst [vmem:[%s10393_s20 + $0x90] sm:$0xff] %v5962_v29  ;;  %v5966_v0 = vsub.f32 1.0, %v5965_v52  ;;  %vm5984_vm7 = vweird.f32 %v5667_v14 }
 0x882   : > { %v5991_v43 = vor.u32 1.1754944e-38, %v5990_v5  ;;  %vm5989_vm9 = vcmp.eq.f32.partialorder %v5988_v40, 8.507059e+37 }
 0x883   : > { %v5967_v12 = vmul.f32 %v7819_v44, %v5966_v0 }
 0x884   : > { %v5526_v47 = vpop.f32.mrf.mxu3 }
 0x885   : > { %v7821_v46 = vpop.eup %7820  ;;  %v5968_v2 = vadd.f32 %v7819_v44, %v5967_v12  ;;  %v7431_v20 = vmul.f32 -1.442695, %v5526_v47 }
 0x886   : > { %v7823_v39 = vpop.eup %7822  ;;  %v5668_v19 = vadd.f32 1.0, %v7821_v46 }
 0x887   : > { %v5972_v23 = vsel %vm5971_vm4, %v7819_v44, %v5968_v2  ;;  %v5980_v55 = vmul.f32 %v7823_v39, %v5667_v14  ;;  %vm5985_vm6 = vweird.f32 %v7823_v39 }
 0x888   : > { %v5977_v42 = vsel %vm5974_vm5, %v5976_v13, %v5972_v23  ;;  %7824 = vrcp.f32 %v5668_v19  ;;  %vm5986_vm8 = vmor %vm5984_vm7, %vm5985_vm6  ;;  %v6005_v27 = vand.u32 2147483648, %v5668_v19  ;;  %v6003_v18 = vand.u32 2147483647, %v5668_v19 }
 0x889   : > { %6178 = vst [vmem:[%s10393_s20 + $0x98] sm:$0xff] %v5977_v42  ;;  %v5981_v60 = vsub.f32 1.0, %v5980_v55  ;;  %7826 = vpow2.f32 %v7431_v20  ;;  %vm5999_vm11 = vweird.f32 %v5668_v19 }
 0x88a   : > { %v6006_v50 = vor.u32 1.1754944e-38, %v6005_v27  ;;  %vm6004_vm13 = vcmp.eq.f32.partialorder %v6003_v18, 8.507059e+37 }
 0x88b   : > { %v5982_v59 = vmul.f32 %v7823_v39, %v5981_v60 }
 0x88c   : > { %v5528_v32 = vpop.f32.mrf.mxu3 }
 0x88d   : > { %v5983_v38 = vadd.f32 %v7823_v39, %v5982_v59  ;;  %v7432_v22 = vmul.f32 -1.442695, %v5528_v32 }
 0x88e   : > { %v7825_v34 = vpop.eup %7824 }
 0x88f   : > { %v7827_v56 = vpop.eup %7826  ;;  %v5987_v33 = vsel %vm5986_vm8, %v7823_v39, %v5983_v38  ;;  %v5995_v4 = vmul.f32 %v7825_v34, %v5668_v19  ;;  %7828 = vpow2.f32 %v7432_v22  ;;  %vm6000_vm10 = vweird.f32 %v7825_v34 }
 0x890   : > { %v5992_v11 = vsel %vm5989_vm9, %v5991_v43, %v5987_v33  ;;  %v5669_v9 = vadd.f32 1.0, %v7827_v56  ;;  %vm6001_vm12 = vmor %vm5999_vm11, %vm6000_vm10 }
 0x891   : > { %6179 = vst [vmem:[%s10393_s20 + $0xa0] sm:$0xff] %v5992_v11  ;;  %v5996_v63 = vsub.f32 1.0, %v5995_v4 }
 0x892   : > { %7830 = vrcp.f32 %v5669_v9  ;;  %v6020_v62 = vand.u32 2147483648, %v5669_v9  ;;  %v6018_v41 = vand.u32 2147483647, %v5669_v9  ;;  %vm6014_vm15 = vweird.f32 %v5669_v9 }
 0x893   : > { %v5997_v53 = vmul.f32 %v7825_v34, %v5996_v63 }
 0x894   : > { %v5531_v51 = vpop.f32.mrf.mxu3  ;;  %v6021_v17 = vor.u32 1.1754944e-38, %v6020_v62  ;;  %vm6019_vm1 = vcmp.eq.f32.partialorder %v6018_v41, 8.507059e+37 }
 0x895   : > { %v5998_v21 = vadd.f32 %v7825_v34, %v5997_v53  ;;  %v7829_v25 = vpop.eup %7828  ;;  %v7433_v30 = vmul.f32 -1.442695, %v5531_v51 }
 0x896   : > { %v5670_v31 = vadd.f32 1.0, %v7829_v25 }
 0x897   : > { %v6002_v24 = vsel %vm6001_vm12, %v7825_v34, %v5998_v21  ;;  %7832 = vpow2.f32 %v7433_v30 }
 0x898   : > { %v7831_v10 = vpop.eup %7830  ;;  %v6007_v37 = vsel %vm6004_vm13, %v6006_v50, %v6002_v24  ;;  %7834 = vrcp.f32 %v5670_v31  ;;  %v6035_v6 = vand.u32 2147483648, %v5670_v31  ;;  %v6033_v15 = vand.u32 2147483647, %v5670_v31 }
 0x899   : > { %6180 = vst [vmem:[%s10393_s20 + $0xa8] sm:$0xff] %v6007_v37  ;;  %v6010_v28 = vmul.f32 %v7831_v10, %v5669_v9  ;;  %vm6015_vm14 = vweird.f32 %v7831_v10  ;;  %vm6029_vm3 = vweird.f32 %v5670_v31 }
 0x89a   : > { %vm6016_vm0 = vmor %vm6014_vm15, %vm6015_vm14  ;;  %v6036_v49 = vor.u32 1.1754944e-38, %v6035_v6  ;;  %vm6034_vm5 = vcmp.eq.f32.partialorder %v6033_v15, 8.507059e+37 }
 0x89b   : > { %v6011_v16 = vsub.f32 1.0, %v6010_v28 }
 0x89c   : > { %v5533_v54 = vpop.f32.mrf.mxu3 }
 0x89d   : > { %v6012_v35 = vmul.f32 %v7831_v10, %v6011_v16  ;;  %v7833_v3 = vpop.eup %7832  ;;  %v7434_v36 = vmul.f32 -1.442695, %v5533_v54 }
 0x89e   : > { %v7835_v8 = vpop.eup %7834  ;;  %v5671_v58 = vadd.f32 1.0, %v7833_v3 }
 0x89f   : > { %v6013_v1 = vadd.f32 %v7831_v10, %v6012_v35  ;;  %v6025_v61 = vmul.f32 %v7835_v8, %v5670_v31  ;;  %7836 = vpow2.f32 %v7434_v36  ;;  %vm6030_vm2 = vweird.f32 %v7835_v8 }
 0x8a0   : > { %7838 = vrcp.f32 %v5671_v58  ;;  %vm6031_vm4 = vmor %vm6029_vm3, %vm6030_vm2  ;;  %v6050_v13 = vand.u32 2147483648, %v5671_v58  ;;  %v6048_v47 = vand.u32 2147483647, %v5671_v58  ;;  %vm6044_vm7 = vweird.f32 %v5671_v58 }
 0x8a1   : > { %v6017_v48 = vsel %vm6016_vm0, %v7831_v10, %v6013_v1  ;;  %v6026_v57 = vsub.f32 1.0, %v6025_v61 }
 0x8a2   : > { %v6022_v7 = vsel %vm6019_vm1, %v6021_v17, %v6017_v48  ;;  %v6051_v5 = vor.u32 1.1754944e-38, %v6050_v13  ;;  %vm6049_vm9 = vcmp.eq.f32.partialorder %v6048_v47, 8.507059e+37 }
 0x8a3   : > { %6181 = vst [vmem:[%s10393_s20 + $0xb0] sm:$0xff] %v6022_v7  ;;  %v6027_v44 = vmul.f32 %v7835_v8, %v6026_v57 }
 0x8a4   : > { %v5536_v14 = vpop.f32.mrf.mxu3 }
 0x8a5   : > { %v7837_v26 = vpop.eup %7836  ;;  %v6028_v52 = vadd.f32 %v7835_v8, %v6027_v44  ;;  %v7435_v29 = vmul.f32 -1.442695, %v5536_v14 }
 0x8a6   : > { %v7839_v0 = vpop.eup %7838  ;;  %v5672_v12 = vadd.f32 1.0, %v7837_v26 }
 0x8a7   : > { %v6032_v45 = vsel %vm6031_vm4, %v7835_v8, %v6028_v52  ;;  %v6040_v46 = vmul.f32 %v7839_v0, %v5671_v58  ;;  %7840 = vpow2.f32 %v7435_v29  ;;  %vm6045_vm6 = vweird.f32 %v7839_v0 }
 0x8a8   : > { %v6037_v2 = vsel %vm6034_vm5, %v6036_v49, %v6032_v45  ;;  %7842 = vrcp.f32 %v5672_v12  ;;  %vm6046_vm8 = vmor %vm6044_vm7, %vm6045_vm6  ;;  %v6065_v32 = vand.u32 2147483648, %v5672_v12  ;;  %v6063_v33 = vand.u32 2147483647, %v5672_v12 }
 0x8a9   : > { %6182 = vst [vmem:[%s10393_s20 + $0xb8] sm:$0xff] %v6037_v2  ;;  %v6041_v39 = vsub.f32 1.0, %v6040_v46  ;;  %vm6059_vm11 = vweird.f32 %v5672_v12 }
 0x8aa   : > { %v6066_v27 = vor.u32 1.1754944e-38, %v6065_v32  ;;  %vm6064_vm13 = vcmp.eq.f32.partialorder %v6063_v33, 8.507059e+37 }
 0x8ab   : > { %v6042_v19 = vmul.f32 %v7839_v0, %v6041_v39 }
 0x8ac   : > { %v5538_v23 = vpop.f32.mrf.mxu3 }
 0x8ad   : > { %v7841_v55 = vpop.eup %7840  ;;  %v6043_v20 = vadd.f32 %v7839_v0, %v6042_v19  ;;  %v7436_v42 = vmul.f32 -1.442695, %v5538_v23 }
 0x8ae   : > { %v7843_v60 = vpop.eup %7842  ;;  %v5673_v59 = vadd.f32 1.0, %v7841_v55 }
 0x8af   : > { %v6047_v40 = vsel %vm6046_vm8, %v7839_v0, %v6043_v20  ;;  %v6055_v38 = vmul.f32 %v7843_v60, %v5672_v12  ;;  %7844 = vpow2.f32 %v7436_v42  ;;  %vm6060_vm10 = vweird.f32 %v7843_v60 }
 0x8b0   : > { %v6052_v34 = vsel %vm6049_vm9, %v6051_v5, %v6047_v40  ;;  %7846 = vrcp.f32 %v5673_v59  ;;  %vm6061_vm12 = vmor %vm6059_vm11, %vm6060_vm10  ;;  %v6080_v25 = vand.u32 2147483648, %v5673_v59  ;;  %v6078_v30 = vand.u32 2147483647, %v5673_v59 }
 0x8b1   : > { %6183 = vst [vmem:[%s10393_s20 + $0xc0] sm:$0xff] %v6052_v34  ;;  %v6056_v43 = vsub.f32 1.0, %v6055_v38  ;;  %vm6074_vm15 = vweird.f32 %v5673_v59 }
 0x8b2   : > { %v6081_v62 = vor.u32 1.1754944e-38, %v6080_v25  ;;  %vm6079_vm1 = vcmp.eq.f32.partialorder %v6078_v30, 8.507059e+37 }
 0x8b3   : > { %v6057_v56 = vmul.f32 %v7843_v60, %v6056_v43 }
 0x8b4   : > { %v5541_v4 = vpop.f32.mrf.mxu3 }
 0x8b5   : > { %v7845_v22 = vpop.eup %7844  ;;  %v6058_v11 = vadd.f32 %v7843_v60, %v6057_v56  ;;  %v7437_v9 = vmul.f32 -1.442695, %v5541_v4 }
 0x8b6   : > { %v7847_v63 = vpop.eup %7846  ;;  %v5674_v53 = vadd.f32 1.0, %v7845_v22 }
 0x8b7   : > { %v6062_v18 = vsel %vm6061_vm12, %v7843_v60, %v6058_v11  ;;  %v6070_v21 = vmul.f32 %v7847_v63, %v5673_v59  ;;  %7848 = vpow2.f32 %v7437_v9  ;;  %vm6075_vm14 = vweird.f32 %v7847_v63 }
 0x8b8   : > { %v6067_v50 = vsel %vm6064_vm13, %v6066_v27, %v6062_v18  ;;  %7850 = vrcp.f32 %v5674_v53  ;;  %vm6076_vm0 = vmor %vm6074_vm15, %vm6075_vm14  ;;  %v6095_v36 = vand.u32 2147483648, %v5674_v53  ;;  %v6093_v17 = vand.u32 2147483647, %v5674_v53 }
 0x8b9   : > { %6184 = vst [vmem:[%s10393_s20 + $0xc8] sm:$0xff] %v6067_v50  ;;  %v6071_v51 = vsub.f32 1.0, %v6070_v21  ;;  %vm6089_vm3 = vweird.f32 %v5674_v53 }
 0x8ba   : > { %v6096_v6 = vor.u32 1.1754944e-38, %v6095_v36  ;;  %vm6094_vm5 = vcmp.eq.f32.partialorder %v6093_v17, 8.507059e+37 }
 0x8bb   : > { %v6072_v24 = vmul.f32 %v7847_v63, %v6071_v51 }
 0x8bc   : > { %v5543_v10 = vpop.f32.mrf.mxu3 }
 0x8bd   : > { %v7849_v37 = vpop.eup %7848  ;;  %v6073_v31 = vadd.f32 %v7847_v63, %v6072_v24  ;;  %v7438_v28 = vmul.f32 -1.442695, %v5543_v10 }
 0x8be   : > { %v7851_v16 = vpop.eup %7850  ;;  %v5675_v35 = vadd.f32 1.0, %v7849_v37 }
 0x8bf   : > { %v6077_v41 = vsel %vm6076_vm0, %v7847_v63, %v6073_v31  ;;  %v6085_v54 = vmul.f32 %v7851_v16, %v5674_v53  ;;  %7852 = vpow2.f32 %v7438_v28  ;;  %vm6090_vm2 = vweird.f32 %v7851_v16 }
 0x8c0   : > { %v6082_v3 = vsel %vm6079_vm1, %v6081_v62, %v6077_v41  ;;  %7854 = vrcp.f32 %v5675_v35  ;;  %vm6091_vm4 = vmor %vm6089_vm3, %vm6090_vm2  ;;  %v6110_v29 = vand.u32 2147483648, %v5675_v35  ;;  %v6108_v49 = vand.u32 2147483647, %v5675_v35 }
 0x8c1   : > { %6185 = vst [vmem:[%s10393_s20 + $0xd0] sm:$0xff] %v6082_v3  ;;  %v6086_v1 = vsub.f32 1.0, %v6085_v54  ;;  %vm6104_vm7 = vweird.f32 %v5675_v35 }
 0x8c2   : > { %v6111_v13 = vor.u32 1.1754944e-38, %v6110_v29  ;;  %vm6109_vm9 = vcmp.eq.f32.partialorder %v6108_v49, 8.507059e+37 }
 0x8c3   : > { %v6087_v8 = vmul.f32 %v7851_v16, %v6086_v1 }
 0x8c4   : > { %v5546_v58 = vpop.f32.mrf.mxu3 }
 0x8c5   : > { %v7853_v48 = vpop.eup %7852  ;;  %v6088_v61 = vadd.f32 %v7851_v16, %v6087_v8  ;;  %v7439_v7 = vmul.f32 -1.442695, %v5546_v58 }
 0x8c6   : > { %v7855_v57 = vpop.eup %7854  ;;  %v5676_v44 = vadd.f32 1.0, %v7853_v48 }
 0x8c7   : > { %v6092_v15 = vsel %vm6091_vm4, %v7851_v16, %v6088_v61  ;;  %v6100_v14 = vmul.f32 %v7855_v57, %v5675_v35  ;;  %7856 = vpow2.f32 %v7439_v7  ;;  %vm6105_vm6 = vweird.f32 %v7855_v57 }
 0x8c8   : > { %v6097_v26 = vsel %vm6094_vm5, %v6096_v6, %v6092_v15  ;;  %7858 = vrcp.f32 %v5676_v44  ;;  %vm6106_vm8 = vmor %vm6104_vm7, %vm6105_vm6  ;;  %v6125_v42 = vand.u32 2147483648, %v5676_v44  ;;  %v6123_v5 = vand.u32 2147483647, %v5676_v44 }
 0x8c9   : > { %6186 = vst [vmem:[%s10393_s20 + $0xd8] sm:$0xff] %v6097_v26  ;;  %v6101_v52 = vsub.f32 1.0, %v6100_v14  ;;  %vm6119_vm11 = vweird.f32 %v5676_v44 }
 0x8ca   : > { %v6126_v34 = vor.u32 1.1754944e-38, %v6125_v42  ;;  %vm6124_vm13 = vcmp.eq.f32.partialorder %v6123_v5, 8.507059e+37 }
 0x8cb   : > { %v6102_v0 = vmul.f32 %v7855_v57, %v6101_v52 }
 0x8cc   : > { %v5548_v12 = vpop.f32.mrf.mxu3 }
 0x8cd   : > { %v7857_v45 = vpop.eup %7856  ;;  %v6103_v46 = vadd.f32 %v7855_v57, %v6102_v0  ;;  %v7440_v2 = vmul.f32 -1.442695, %v5548_v12 }
 0x8ce   : > { %v7859_v39 = vpop.eup %7858  ;;  %v5677_v19 = vadd.f32 1.0, %v7857_v45 }
 0x8cf   : > { %v6107_v47 = vsel %vm6106_vm8, %v7855_v57, %v6103_v46  ;;  %v6115_v23 = vmul.f32 %v7859_v39, %v5676_v44  ;;  %7860 = vpow2.f32 %v7440_v2  ;;  %vm6120_vm10 = vweird.f32 %v7859_v39 }
 0x8d0   : > { %v6112_v55 = vsel %vm6109_vm9, %v6111_v13, %v6107_v47  ;;  %7862 = vrcp.f32 %v5677_v19  ;;  %vm6121_vm12 = vmor %vm6119_vm11, %vm6120_vm10  ;;  %v6140_v22 = vand.u32 2147483648, %v5677_v19  ;;  %v6138_v9 = vand.u32 2147483647, %v5677_v19 }
 0x8d1   : > { %6187 = vst [vmem:[%s10393_s20 + $0xe0] sm:$0xff] %v6112_v55  ;;  %v6116_v20 = vsub.f32 1.0, %v6115_v23  ;;  %vm6134_vm15 = vweird.f32 %v5677_v19 }
 0x8d2   : > { %v6141_v53 = vor.u32 1.1754944e-38, %v6140_v22  ;;  %vm6139_vm1 = vcmp.eq.f32.partialorder %v6138_v9, 8.507059e+37 }
 0x8d3   : > { %v6117_v60 = vmul.f32 %v7859_v39, %v6116_v20 }
 0x8d5   : > { %v7861_v59 = vpop.eup %7860  ;;  %v6118_v40 = vadd.f32 %v7859_v39, %v6117_v60 }
 0x8d6   : > { %v7863_v38 = vpop.eup %7862  ;;  %v5678_v43 = vadd.f32 1.0, %v7861_v59 }
 0x8d7   : > { %v6122_v32 = vsel %vm6121_vm12, %v7859_v39, %v6118_v40  ;;  %v6130_v56 = vmul.f32 %v7863_v38, %v5677_v19  ;;  %vm6135_vm14 = vweird.f32 %v7863_v38 }
 0x8d8   : > { %v6127_v33 = vsel %vm6124_vm13, %v6126_v34, %v6122_v32  ;;  %7864 = vrcp.f32 %v5678_v43  ;;  %vm6136_vm0 = vmor %vm6134_vm15, %vm6135_vm14  ;;  %v6155_v25 = vand.u32 2147483648, %v5678_v43  ;;  %v6153_v30 = vand.u32 2147483647, %v5678_v43 }
 0x8d9   : > { %6188 = vst [vmem:[%s10393_s20 + $0xe8] sm:$0xff] %v6127_v33  ;;  %v6131_v4 = vsub.f32 1.0, %v6130_v56  ;;  %vm6149_vm3 = vweird.f32 %v5678_v43 }
 0x8da   : > { %v6156_v37 = vor.u32 1.1754944e-38, %v6155_v25  ;;  %vm6154_vm5 = vcmp.eq.f32.partialorder %v6153_v30, 8.507059e+37 }
 0x8db   : > { %v6132_v11 = vmul.f32 %v7863_v38, %v6131_v4 }
 0x8dd   : > { %v6133_v63 = vadd.f32 %v7863_v38, %v6132_v11 }
 0x8de   : > { %v7865_v27 = vpop.eup %7864 }
 0x8df   : > { %v6137_v18 = vsel %vm6136_vm0, %v7863_v38, %v6133_v63  ;;  %v6145_v21 = vmul.f32 %v7865_v27, %v5678_v43  ;;  %vm6150_vm2 = vweird.f32 %v7865_v27 }
 0x8e0   : > { %v6142_v50 = vsel %vm6139_vm1, %v6141_v53, %v6137_v18  ;;  %vm6151_vm4 = vmor %vm6149_vm3, %vm6150_vm2 }
 0x8e1   : > { %6189 = vst [vmem:[%s10393_s20 + $0xf0] sm:$0xff] %v6142_v50  ;;  %v6146_v51 = vsub.f32 1.0, %v6145_v21 }
 0x8e3   : > { %v6147_v24 = vmul.f32 %v7865_v27, %v6146_v51 }
 0x8e5   : > { %v6148_v10 = vadd.f32 %v7865_v27, %v6147_v24 }
 0x8e7   : > { %v6152_v31 = vsel %vm6151_vm4, %v7865_v27, %v6148_v10 }
 0x8e8   : > { %v6157_v28 = vsel %vm6154_vm5, %v6156_v37, %v6152_v31 }
 0x8e9   : > { %6190 = vst [vmem:[%s10393_s20 + $0xf8] sm:$0xff] %v6157_v28 }
 0x8ea PF: > { %s19_s30 = sadd.s32 1, %s7874_s30  }
 0x8eb   : > { %p16_p4 = scmp.ge.s32.totalorder %s19_s30, 4  }
 0x8ed   :  { %18 = sbr.rel (!%p16_p4) target bundleno = 1 (0x1), region = 86 }

</bundles_post_ra>
